<compile_context>
chip_gen: v5e
topology: v5e:2x2
jax: 0.10.0
libtpu: 0.0.40
codegen_flags: <defaults>
</compile_context>

<pallas_src>
import functools

import jax
import jax.numpy as jnp
import numpy as np
from jax.experimental import pallas as pl
from jax.experimental.pallas import tpu as pltpu

EPS = 1e-5
MATMUL_DTYPE = jnp.float32   # flip to jnp.bfloat16 for production (BN math stays f32)


# ----------------------------------------------------------------------------
# small helpers
# ----------------------------------------------------------------------------
def _pick_rows(total, target):
    """Largest divisor of `total` that is <= target, preferring multiples of 8."""
    target = max(1, min(total, target))
    best, best8 = 1, 0
    for d in range(1, target + 1):
        if total % d == 0:
            best = d
            if d % 8 == 0:
                best8 = d
    return best8 if best8 else best


def _pick_row_block(H, W, target_rows=1024):
    """Rows-per-tile for the deconv kernel: a divisor of H, <= target_rows/W, and
    (when possible) < H so the halo path is exercised and the grid pipelines."""
    cap = max(1, min(H, target_rows // max(W, 1)))
    if H >= 2:
        cap = min(cap, max(1, H // 2))
    best = 1
    for d in range(1, cap + 1):
        if H % d == 0:
            best = d
    return best


def _cparams(grid_rank, est_bytes):
    # Explicit scoped-VMEM budget: ~2x the live-buffer estimate (double buffering),
    # clamped so it stays inside every generation's physical VMEM (64 MiB on v7x).
    limit = int(min(max(2 * est_bytes, 32 * 2**20), 48 * 2**20))
    return pltpu.CompilerParams(
        dimension_semantics=("parallel",) * grid_rank,
        vmem_limit_bytes=limit)


def _bn_affine(stats, count, gamma, beta):
    """Finalize per-tile [sum, sumsq] partials into BN scale/shift (f32)."""
    tot = jnp.sum(stats.astype(jnp.float32), axis=0)          # (2, C)
    mean = tot[0] / count
    var = jnp.maximum(tot[1] / count - mean * mean, 0.0)      # biased variance
    s = gamma.astype(jnp.float32) * jax.lax.rsqrt(var + EPS)
    t = beta.astype(jnp.float32) - mean * s
    return s.reshape(1, -1), t.reshape(1, -1)


# ----------------------------------------------------------------------------
# kernels
# ----------------------------------------------------------------------------
def _conv1_stats_kernel(x_ref, w1_ref, st_ref):
    """Pass 1: per-tile sum / sum-of-squares of x @ W1 (BN1 batch statistics)."""
    h = jnp.dot(x_ref[...], w1_ref[...], preferred_element_type=jnp.float32)
    st_ref[0, :, :] = jnp.concatenate(
        [jnp.sum(h, axis=0, keepdims=True),
         jnp.sum(h * h, axis=0, keepdims=True)], axis=0)


def _deconv_kernel(x_ref, xh_ref, w1_ref, s1_ref, t1_ref,
                   wf_ref, wd_ref, wr_ref, wx_ref,
                   z_ref, st_ref, hbuf, *, W, RB, TPB, PADW):
    """Pass 2 (per image row-block): recompute conv1, apply folded BN1+ReLU, run the
    stride-2 transposed conv as 4 parity sub-grids (fused wide RHS), write the
    parity-planar result and the per-tile BN2 partial statistics."""
    RBW = RB * W
    C = x_ref.shape[1]
    md = w1_ref.dtype

    # stage 1 (recomputed; cheaper than storing/re-reading it via HBM) + BN1 + ReLU
    h = jnp.dot(x_ref[...].astype(md), w1_ref[...], preferred_element_type=jnp.float32)
    h = jnp.maximum(h * s1_ref[...] + t1_ref[...], 0.0)

    # halo row (first row of the next row-block of the same image); zero at the
    # bottom edge of the image.
    hh = jnp.dot(xh_ref[...].astype(md), w1_ref[...], preferred_element_type=jnp.float32)
    hh = jnp.maximum(hh * s1_ref[...] + t1_ref[...], 0.0)
    halo_ok = pl.program_id(1) < TPB - 1
    hh = jnp.where(halo_ok, hh, 0.0)

    # one zero-padded staging buffer -> shifted views without concat copies
    hbuf[0:RBW, :] = h.astype(hbuf.dtype)
    hbuf[RBW:RBW + W, :] = hh.astype(hbuf.dtype)
    hbuf[RBW + W:, :] = jnp.zeros((PADW - W, C), hbuf.dtype)

    rows = jax.lax.broadcasted_iota(jnp.int32, (RBW, 1), 0)
    col_ok = (rows % W) != (W - 1)                     # right-shift falls off the edge

    hf = hbuf[0:RBW, :]                                # h[i,   j]
    hd = hbuf[W:W + RBW, :]                            # h[i+1, j]   (zero past halo)
    hr = jnp.where(col_ok, hbuf[1:1 + RBW, :], 0.0)    # h[i,   j+1]
    hdr = jnp.where(col_ok, hbuf[W + 1:W + 1 + RBW, :], 0.0)   # h[i+1, j+1]

    # fused-RHS matmuls (taps grouped by shared LHS)
    F = jnp.dot(hf, wf_ref[...], preferred_element_type=jnp.float32)               # (RBW, 4C)
    D = jnp.dot(hd, wd_ref[...], preferred_element_type=jnp.float32)               # (RBW, 2C)
    R = jnp.dot(hr.astype(md), wr_ref[...], preferred_element_type=jnp.float32)    # (RBW, 2C)
    X = jnp.dot(hdr.astype(md), wx_ref[...], preferred_element_type=jnp.float32)   # (RBW, C)

    ee = F[:, 0 * C:1 * C]                                  # (even row, even col)
    eo = F[:, 1 * C:2 * C] + R[:, 0 * C:1 * C]              # (even row, odd  col)
    oe = F[:, 2 * C:3 * C] + D[:, 0 * C:1 * C]              # (odd  row, even col)
    oo = F[:, 3 * C:4 * C] + D[:, 1 * C:2 * C] + R[:, 1 * C:2 * C] + X

    z_ref[0 * RBW:1 * RBW, :] = ee
    z_ref[1 * RBW:2 * RBW, :] = eo
    z_ref[2 * RBW:3 * RBW, :] = oe
    z_ref[3 * RBW:4 * RBW, :] = oo

    s = (jnp.sum(ee, axis=0, keepdims=True) + jnp.sum(eo, axis=0, keepdims=True)
         + jnp.sum(oe, axis=0, keepdims=True) + jnp.sum(oo, axis=0, keepdims=True))
    sq = (jnp.sum(ee * ee, axis=0, keepdims=True) + jnp.sum(eo * eo, axis=0, keepdims=True)
          + jnp.sum(oe * oe, axis=0, keepdims=True) + jnp.sum(oo * oo, axis=0, keepdims=True))
    st_ref[0, :, :] = jnp.concatenate([s, sq], axis=0)


def _bn_conv3_stats_kernel(z_ref, s2_ref, t2_ref, w3_ref, u_ref, st_ref):
    """Pass 3: BN2+ReLU -> 1x1 conv (all parities as plain rows, one dot per tile),
    plus per-tile BN3 partial statistics."""
    a = jnp.maximum(z_ref[...] * s2_ref[...] + t2_ref[...], 0.0)
    u = jnp.dot(a.astype(w3_ref.dtype), w3_ref[...], preferred_element_type=jnp.float32)
    u_ref[...] = u
    st_ref[0, :, :] = jnp.concatenate(
        [jnp.sum(u, axis=0, keepdims=True),
         jnp.sum(u * u, axis=0, keepdims=True)], axis=0)


def _bn_relu_kernel(u_ref, s3_ref, t3_ref, y_ref):
    """Pass 4: BN3 + ReLU."""
    y_ref[...] = jnp.maximum(u_ref[...] * s3_ref[...] + t3_ref[...], 0.0)


# ----------------------------------------------------------------------------
# wrapper
# ----------------------------------------------------------------------------
def trans_block_forward(x_nchw, params):
    (W1, b1, g1, be1, W2, b2, g2, be2, W3, b3, g3, be3) = params
    del b1, b2, b3   # exactly cancelled by training-mode BatchNorm (mean subtraction)

    N, Cin, H, W = x_nchw.shape
    Cout = W3.shape[1]
    HW = H * W
    M1 = N * HW          # stage-1 pixel count
    M2 = 4 * M1          # stage-2/3 pixel count (2H x 2W)
    f32 = jnp.float32
    md = MATMUL_DTYPE

    # layout plumbing wrapper-side: NCHW -> channels-last 2-D
    x2d = jnp.transpose(x_nchw, (0, 2, 3, 1)).reshape(M1, Cin).astype(md)

    W1m = W1.astype(md)
    # fused stage-2 (3x3 stride-2 transposed conv) weights, grouped by shared LHS
    Wf = jnp.concatenate([W2[1, 1], W2[1, 2], W2[2, 1], W2[2, 2]], axis=1).astype(md)
    Wd = jnp.concatenate([W2[0, 1], W2[0, 2]], axis=1).astype(md)
    Wr = jnp.concatenate([W2[1, 0], W2[2, 0]], axis=1).astype(md)
    Wx = W2[0, 0].astype(md)
    W3m = W3.astype(md)

    # ---------------- pass 1: BN1 statistics of x @ W1 ----------------------
    tm1 = _pick_rows(M1, 1024)
    g1n = M1 // tm1
    stats1 = pl.pallas_call(
        _conv1_stats_kernel,
        grid=(g1n,),
        in_specs=[pl.BlockSpec((tm1, Cin), lambda i: (i, 0)),
                  pl.BlockSpec((Cin, Cin), lambda i: (0, 0))],
        out_specs=pl.BlockSpec((1, 2, Cin), lambda i: (i, 0, 0)),
        out_shape=jax.ShapeDtypeStruct((g1n, 2, Cin), f32),
        compiler_params=_cparams(1, 4 * (2 * tm1 * Cin + Cin * Cin)),
    )(x2d, W1m)
    s1, t1 = _bn_affine(stats1, float(M1), g1, be1)

    # -------- pass 2: conv1+BN1+ReLU -> ConvTranspose2d, BN2 partial stats --
    RB = _pick_row_block(H, W, 1024)     # rows of the input image per tile
    TPB = H // RB                        # tiles per image
    RBW = RB * W
    PADW = ((W + 1 + 7) // 8) * 8        # halo row + zero tail, sublane aligned

    deconv = functools.partial(_deconv_kernel, W=W, RB=RB, TPB=TPB, PADW=PADW)
    z, stats2 = pl.pallas_call(
        deconv,
        grid=(N, TPB),
        in_specs=[
            pl.BlockSpec((RBW, Cin), lambda n, r: (n * TPB + r, 0)),          # tile rows
            pl.BlockSpec((W, Cin),                                            # 1-row halo
                         lambda n, r: (jnp.minimum(n * H + (r + 1) * RB, N * H - 1), 0)),
            pl.BlockSpec((Cin, Cin), lambda n, r: (0, 0)),                    # W1
            pl.BlockSpec((1, Cin), lambda n, r: (0, 0)),                      # s1
            pl.BlockSpec((1, Cin), lambda n, r: (0, 0)),                      # t1
            pl.BlockSpec((Cin, 4 * Cin), lambda n, r: (0, 0)),                # Wf
            pl.BlockSpec((Cin, 2 * Cin), lambda n, r: (0, 0)),                # Wd
            pl.BlockSpec((Cin, 2 * Cin), lambda n, r: (0, 0)),                # Wr
            pl.BlockSpec((Cin, Cin), lambda n, r: (0, 0)),                    # Wx
        ],
        out_specs=(pl.BlockSpec((4 * RBW, Cin), lambda n, r: (n * TPB + r, 0)),
                   pl.BlockSpec((1, 2, Cin), lambda n, r: (n * TPB + r, 0, 0))),
        out_shape=(jax.ShapeDtypeStruct((M2, Cin), f32),
                   jax.ShapeDtypeStruct((N * TPB, 2, Cin), f32)),
        scratch_shapes=[pltpu.VMEM((RBW + PADW, Cin), md)],
        compiler_params=_cparams(2, 4 * (24 * RBW * Cin + 12 * Cin * Cin)),
    )(x2d, x2d, W1m, s1, t1, Wf, Wd, Wr, Wx)
    s2, t2 = _bn_affine(stats2, float(M2), g2, be2)

    # ---------------- pass 3: BN2+ReLU -> conv3, BN3 partial stats ----------
    tm3 = _pick_rows(M2, 1024)
    g3n = M2 // tm3
    u, stats3 = pl.pallas_call(
        _bn_conv3_stats_kernel,
        grid=(g3n,),
        in_specs=[pl.BlockSpec((tm3, Cin), lambda i: (i, 0)),
                  pl.BlockSpec((1, Cin), lambda i: (0, 0)),
                  pl.BlockSpec((1, Cin), lambda i: (0, 0)),
                  pl.BlockSpec((Cin, Cout), lambda i: (0, 0))],
        out_specs=(pl.BlockSpec((tm3, Cout), lambda i: (i, 0)),
                   pl.BlockSpec((1, 2, Cout), lambda i: (i, 0, 0))),
        out_shape=(jax.ShapeDtypeStruct((M2, Cout), f32),
                   jax.ShapeDtypeStruct((g3n, 2, Cout), f32)),
        compiler_params=_cparams(1, 4 * (2 * tm3 * (Cin + Cout) + Cin * Cout)),
    )(z, s2, t2, W3m)
    s3, t3 = _bn_affine(stats3, float(M2), g3, be3)

    # ---------------- pass 4: BN3 + ReLU ------------------------------------
    tm4 = _pick_rows(M2, 1024)
    g4n = M2 // tm4
    y = pl.pallas_call(
        _bn_relu_kernel,
        grid=(g4n,),
        in_specs=[pl.BlockSpec((tm4, Cout), lambda i: (i, 0)),
                  pl.BlockSpec((1, Cout), lambda i: (0, 0)),
                  pl.BlockSpec((1, Cout), lambda i: (0, 0))],
        out_specs=pl.BlockSpec((tm4, Cout), lambda i: (i, 0)),
        out_shape=jax.ShapeDtypeStruct((M2, Cout), f32),
        compiler_params=_cparams(1, 4 * (4 * tm4 * Cout)),
    )(u, s3, t3)

    # parity-planar -> interleaved NCHW: a single XLA transpose (inherent to the
    # NCHW interface; replaces the previous stack/stack/stack/reshape passes).
    # row order of y: (n, row-block, row-parity a, col-parity b, row-in-block, col).
    y7 = y.reshape(N, TPB, 2, 2, RB, W, Cout)
    out = jnp.transpose(y7, (0, 6, 1, 4, 2, 5, 3)).reshape(N, Cout, 2 * H, 2 * W)
    return out


# ------------------------- pure-JAX reference (for verification) ------------
def trans_block_reference(x_nchw, params):
    (W1, b1, g1, be1, W2, b2, g2, be2, W3, b3, g3, be3) = params

    def bn(y, g, b):
        m = jnp.mean(y, axis=(0, 2, 3), keepdims=True)
        v = jnp.mean((y - m) ** 2, axis=(0, 2, 3), keepdims=True)
        return (y - m) / jnp.sqrt(v + EPS) * g.reshape(1, -1, 1, 1) + b.reshape(1, -1, 1, 1)

    y = jnp.einsum('nchw,cd->ndhw', x_nchw, W1) + b1.reshape(1, -1, 1, 1)
    y = jax.nn.relu(bn(y, g1, be1))
    # transposed conv = lhs-dilated conv with flipped kernel, pad (k-1-p, k-1-p+op) = (1, 2)
    rhs = jnp.transpose(W2[::-1, ::-1, :, :], (3, 2, 0, 1))   # OIHW
    y = jax.lax.conv_general_dilated(
        y, rhs, window_strides=(1, 1), padding=[(1, 2), (1, 2)],
        lhs_dilation=(2, 2), dimension_numbers=('NCHW', 'OIHW', 'NCHW'))
    y = y + b2.reshape(1, -1, 1, 1)
    y = jax.nn.relu(bn(y, g2, be2))
    y = jnp.einsum('nchw,cd->ndhw', y, W3) + b3.reshape(1, -1, 1, 1)
    y = jax.nn.relu(bn(y, g3, be3))
    return y


def init_params(key, cin, cout):
    ks = jax.random.split(key, 6)
    W1 = 0.2 * jax.random.normal(ks[0], (cin, cin), jnp.float32)
    b1 = 0.1 * jax.random.normal(ks[1], (cin,), jnp.float32)
    W2 = 0.2 * jax.random.normal(ks[2], (3, 3, cin, cin), jnp.float32)  # [kh,kw,ci,co]
    b2 = 0.1 * jax.random.normal(ks[3], (cin,), jnp.float32)
    W3 = 0.2 * jax.random.normal(ks[4], (cin, cout), jnp.float32)
    b3 = 0.1 * jax.random.normal(ks[5], (cout,), jnp.float32)
    g1 = jnp.linspace(0.8, 1.2, cin).astype(jnp.float32)
    be1 = jnp.linspace(-0.1, 0.1, cin).astype(jnp.float32)
    g2 = jnp.linspace(0.9, 1.1, cin).astype(jnp.float32)
    be2 = jnp.linspace(-0.05, 0.05, cin).astype(jnp.float32)
    g3 = jnp.linspace(0.7, 1.3, cout).astype(jnp.float32)
    be3 = jnp.linspace(-0.2, 0.2, cout).astype(jnp.float32)
    return (W1, b1, g1, be1, W2, b2, g2, be2, W3, b3, g3, be3)


if __name__ == "__main__":
    key = jax.random.PRNGKey(0)
    k_x, k_p = jax.random.split(key)

    N, Cin, Cout, H, W = 2, 4, 8, 16, 16        # output: (2, 8, 32, 32)
    x = jax.random.normal(k_x, (N, Cin, H, W), jnp.float32)
    params = init_params(k_p, Cin, Cout)

    fwd = jax.jit(trans_block_forward)
    out = jax.block_until_ready(fwd(x, params))
    assert out.shape == (N, Cout, 2 * H, 2 * W), out.shape

    ref = jax.block_until_ready(trans_block_reference(x, params))
    np.testing.assert_allclose(np.asarray(out), np.asarray(ref), atol=1e-3, rtol=1e-3)

    print("KERNEL_OK")
</pallas_src>

<mosaic_0001>
module attributes {stable_mosaic.version = 11 : i64} {
  func.func @_conv1_stats_kernel(%arg0: i32, %arg1: memref<512x4xf32, #tpu.memory_space<vmem>>, %arg2: memref<4x4xf32, #tpu.memory_space<vmem>>, %arg3: memref<1x2x4xf32, #tpu.memory_space<vmem>>) attributes {dimension_semantics = [#tpu.dimension_semantics<parallel>], iteration_bounds = array<i64: 1>, scalar_prefetch = 0 : i64, scratch_operands = 0 : i64, tpu.core_type = #tpu.core_type<tc>, window_params = [{transform_indices = @transform_0, window_bounds = array<i64: 512, 4>}, {pipeline_mode = #tpu.pipeline_mode<synchronous>, transform_indices = @transform_1, window_bounds = array<i64: 4, 4>}, {transform_indices = @transform_2, window_bounds = array<i64: 1, 2, 4>}]} {
    %c0 = arith.constant 0 : index
    %c0_0 = arith.constant 0 : index
    %0 = vector.load %arg1[%c0, %c0_0] : memref<512x4xf32, #tpu.memory_space<vmem>>, vector<512x4xf32>
    %c0_1 = arith.constant 0 : index
    %c0_2 = arith.constant 0 : index
    %1 = vector.load %arg2[%c0_1, %c0_2] : memref<4x4xf32, #tpu.memory_space<vmem>>, vector<4x4xf32>
    %cst = arith.constant dense<0.000000e+00> : vector<512x4xf32>
    %2 = tpu.matmul %0, %1, %cst {dimension_numbers = #tpu.dot_dimension_numbers<[1], [0], [0], [1], [0, 0, 1, 1], [], []>} : vector<512x4xf32>, vector<4x4xf32>, vector<512x4xf32> -> vector<512x4xf32>
    %cst_3 = arith.constant dense<0.000000e+00> : vector<4xf32>
    %3 = vector.multi_reduction <add>, %2, %cst_3 [0] : vector<512x4xf32> to vector<4xf32>
    %4 = vector.shape_cast %3 : vector<4xf32> to vector<1x4xf32>
    %5 = arith.mulf %2, %2 : vector<512x4xf32>
    %cst_4 = arith.constant dense<0.000000e+00> : vector<4xf32>
    %6 = vector.multi_reduction <add>, %5, %cst_4 [0] : vector<512x4xf32> to vector<4xf32>
    %7 = vector.shape_cast %6 : vector<4xf32> to vector<1x4xf32>
    %8 = tpu.concatenate %4, %7 in 0 : vector<1x4xf32>, vector<1x4xf32> -> vector<2x4xf32>
    %c0_5 = arith.constant 0 : index
    %c0_6 = arith.constant 0 : index
    %c0_7 = arith.constant 0 : index
    %9 = vector.load %arg3[%c0_5, %c0_6, %c0_7] : memref<1x2x4xf32, #tpu.memory_space<vmem>>, vector<1x2x4xf32>
    %10 = vector.shape_cast %9 : vector<1x2x4xf32> to vector<2x4xf32>
    %11 = vector.shape_cast %8 : vector<2x4xf32> to vector<1x2x4xf32>
    tpu.vector_store %arg3[%c0_5, %c0_6, %c0_7], %11 {strides = array<i32>} : memref<1x2x4xf32, #tpu.memory_space<vmem>>, vector<1x2x4xf32>,
    return
  }
  func.func @transform_0(%arg0: i32) -> (i32, i32) {
    %c0_i32 = arith.constant 0 : i32
    %c0_i32_0 = arith.constant 0 : i32
    return %arg0, %c0_i32 : i32, i32
  }
  func.func @transform_1(%arg0: i32) -> (i32, i32) {
    %c0_i32 = arith.constant 0 : i32
    %c0_i32_0 = arith.constant 0 : i32
    %c0_i32_1 = arith.constant 0 : i32
    return %c0_i32, %c0_i32_0 : i32, i32
  }
  func.func @transform_2(%arg0: i32) -> (i32, i32, i32) {
    %c0_i32 = arith.constant 0 : i32
    %c0_i32_0 = arith.constant 0 : i32
    %c0_i32_1 = arith.constant 0 : i32
    return %arg0, %c0_i32, %c0_i32_0 : i32, i32, i32
  }
}

module attributes {stable_mosaic.version = 11 : i64} {
  func.func @_deconv_kernel(%arg0: i32, %arg1: i32, %arg2: memref<128x4xf32, #tpu.memory_space<vmem>>, %arg3: memref<16x4xf32, #tpu.memory_space<vmem>>, %arg4: memref<4x4xf32, #tpu.memory_space<vmem>>, %arg5: memref<1x4xf32, #tpu.memory_space<vmem>>, %arg6: memref<1x4xf32, #tpu.memory_space<vmem>>, %arg7: memref<4x16xf32, #tpu.memory_space<vmem>>, %arg8: memref<4x8xf32, #tpu.memory_space<vmem>>, %arg9: memref<4x8xf32, #tpu.memory_space<vmem>>, %arg10: memref<4x4xf32, #tpu.memory_space<vmem>>, %arg11: memref<512x4xf32, #tpu.memory_space<vmem>>, %arg12: memref<1x2x4xf32, #tpu.memory_space<vmem>>, %arg13: memref<152x4xf32, #tpu.memory_space<vmem>>) attributes {dimension_semantics = [#tpu.dimension_semantics<parallel>, #tpu.dimension_semantics<parallel>], iteration_bounds = array<i64: 2, 2>, scalar_prefetch = 0 : i64, scratch_operands = 1 : i64, tpu.core_type = #tpu.core_type<tc>, window_params = [{transform_indices = @transform_0, window_bounds = array<i64: 128, 4>}, {transform_indices = @transform_1, window_bounds = array<i64: 16, 4>}, {pipeline_mode = #tpu.pipeline_mode<synchronous>, transform_indices = @transform_2, window_bounds = array<i64: 4, 4>}, {pipeline_mode = #tpu.pipeline_mode<synchronous>, transform_indices = @transform_3, window_bounds = array<i64: 1, 4>}, {pipeline_mode = #tpu.pipeline_mode<synchronous>, transform_indices = @transform_4, window_bounds = array<i64: 1, 4>}, {pipeline_mode = #tpu.pipeline_mode<synchronous>, transform_indices = @transform_5, window_bounds = array<i64: 4, 16>}, {pipeline_mode = #tpu.pipeline_mode<synchronous>, transform_indices = @transform_6, window_bounds = array<i64: 4, 8>}, {pipeline_mode = #tpu.pipeline_mode<synchronous>, transform_indices = @transform_7, window_bounds = array<i64: 4, 8>}, {pipeline_mode = #tpu.pipeline_mode<synchronous>, transform_indices = @transform_8, window_bounds = array<i64: 4, 4>}, {transform_indices = @transform_9, window_bounds = array<i64: 512, 4>}, {transform_indices = @transform_10, window_bounds = array<i64: 1, 2, 4>}]} {
    %c0 = arith.constant 0 : index
    %c0_0 = arith.constant 0 : index
    %0 = vector.load %arg2[%c0, %c0_0] : memref<128x4xf32, #tpu.memory_space<vmem>>, vector<128x4xf32>
    %c0_1 = arith.constant 0 : index
    %c0_2 = arith.constant 0 : index
    %1 = vector.load %arg4[%c0_1, %c0_2] : memref<4x4xf32, #tpu.memory_space<vmem>>, vector<4x4xf32>
    %cst = arith.constant dense<0.000000e+00> : vector<128x4xf32>
    %2 = tpu.matmul %0, %1, %cst {dimension_numbers = #tpu.dot_dimension_numbers<[1], [0], [0], [1], [0, 0, 1, 1], [], []>} : vector<128x4xf32>, vector<4x4xf32>, vector<128x4xf32> -> vector<128x4xf32>
    %c0_3 = arith.constant 0 : index
    %c0_4 = arith.constant 0 : index
    %3 = vector.load %arg5[%c0_3, %c0_4] : memref<1x4xf32, #tpu.memory_space<vmem>>, vector<1x4xf32>
    %4 = vector.broadcast %3 : vector<1x4xf32> to vector<128x4xf32>
    %5 = arith.mulf %2, %4 : vector<128x4xf32>
    %c0_5 = arith.constant 0 : index
    %c0_6 = arith.constant 0 : index
    %6 = vector.load %arg6[%c0_5, %c0_6] : memref<1x4xf32, #tpu.memory_space<vmem>>, vector<1x4xf32>
    %7 = vector.broadcast %6 : vector<1x4xf32> to vector<128x4xf32>
    %8 = arith.addf %5, %7 : vector<128x4xf32>
    %cst_7 = arith.constant 0.000000e+00 : f32
    %9 = vector.broadcast %cst_7 : f32 to vector<128x4xf32>
    %10 = arith.maximumf %8, %9 : vector<128x4xf32>
    %c0_8 = arith.constant 0 : index
    %c0_9 = arith.constant 0 : index
    %11 = vector.load %arg3[%c0_8, %c0_9] : memref<16x4xf32, #tpu.memory_space<vmem>>, vector<16x4xf32>
    %c0_10 = arith.constant 0 : index
    %c0_11 = arith.constant 0 : index
    %12 = vector.load %arg4[%c0_10, %c0_11] : memref<4x4xf32, #tpu.memory_space<vmem>>, vector<4x4xf32>
    %cst_12 = arith.constant dense<0.000000e+00> : vector<16x4xf32>
    %13 = tpu.matmul %11, %12, %cst_12 {dimension_numbers = #tpu.dot_dimension_numbers<[1], [0], [0], [1], [0, 0, 1, 1], [], []>} : vector<16x4xf32>, vector<4x4xf32>, vector<16x4xf32> -> vector<16x4xf32>
    %c0_13 = arith.constant 0 : index
    %c0_14 = arith.constant 0 : index
    %14 = vector.load %arg5[%c0_13, %c0_14] : memref<1x4xf32, #tpu.memory_space<vmem>>, vector<1x4xf32>
    %15 = vector.broadcast %14 : vector<1x4xf32> to vector<16x4xf32>
    %16 = arith.mulf %13, %15 : vector<16x4xf32>
    %c0_15 = arith.constant 0 : index
    %c0_16 = arith.constant 0 : index
    %17 = vector.load %arg6[%c0_15, %c0_16] : memref<1x4xf32, #tpu.memory_space<vmem>>, vector<1x4xf32>
    %18 = vector.broadcast %17 : vector<1x4xf32> to vector<16x4xf32>
    %19 = arith.addf %16, %18 : vector<16x4xf32>
    %cst_17 = arith.constant 0.000000e+00 : f32
    %20 = vector.broadcast %cst_17 : f32 to vector<16x4xf32>
    %21 = arith.maximumf %19, %20 : vector<16x4xf32>
    %c1_i32 = arith.constant 1 : i32
    %22 = arith.cmpi slt, %arg1, %c1_i32 : i32
    %cst_18 = arith.constant 0.000000e+00 : f32
    %23 = vector.broadcast %cst_18 : f32 to vector<16x4xf32>
    %24 = arith.select %22, %21, %23 : vector<16x4xf32>
    %c0_19 = arith.constant 0 : index
    %c0_20 = arith.constant 0 : index
    %25 = vector.load %arg13[%c0_19, %c0_20] : memref<152x4xf32, #tpu.memory_space<vmem>>, vector<128x4xf32>
    tpu.vector_store %arg13[%c0_19, %c0_20], %10 {strides = array<i32>} : memref<152x4xf32, #tpu.memory_space<vmem>>, vector<128x4xf32>,
    %c128 = arith.constant 128 : index
    %c0_21 = arith.constant 0 : index
    %26 = vector.load %arg13[%c128, %c0_21] : memref<152x4xf32, #tpu.memory_space<vmem>>, vector<16x4xf32>
    tpu.vector_store %arg13[%c128, %c0_21], %24 {strides = array<i32>} : memref<152x4xf32, #tpu.memory_space<vmem>>, vector<16x4xf32>,
    %cst_22 = arith.constant 0.000000e+00 : f32
    %27 = vector.broadcast %cst_22 : f32 to vector<8x4xf32>
    %c144 = arith.constant 144 : index
    %c0_23 = arith.constant 0 : index
    %28 = vector.load %arg13[%c144, %c0_23] : memref<152x4xf32, #tpu.memory_space<vmem>>, vector<8x4xf32>
    tpu.vector_store %arg13[%c144, %c0_23], %27 {strides = array<i32>} : memref<152x4xf32, #tpu.memory_space<vmem>>, vector<8x4xf32>,
    %29 = tpu.iota {dimensions = array<i32: 0>} : vector<128x1xi32>
    %c16_i32 = arith.constant 16 : i32
    %c0_i32 = arith.constant 0 : i32
    %30 = arith.cmpi eq, %c16_i32, %c0_i32 : i32
    %c1_i32_24 = arith.constant 1 : i32
    %31 = arith.select %30, %c1_i32_24, %c16_i32 : i32
    %32 = vector.broadcast %31 : i32 to vector<128x1xi32>
    %33 = arith.remsi %29, %32 : vector<128x1xi32>
    %c0_i32_25 = arith.constant 0 : i32
    %34 = vector.broadcast %c0_i32_25 : i32 to vector<128x1xi32>
    %35 = arith.cmpi ne, %33, %34 : vector<128x1xi32>
    %c0_i32_26 = arith.constant 0 : i32
    %36 = vector.broadcast %c0_i32_26 : i32 to vector<128x1xi32>
    %37 = arith.cmpi slt, %33, %36 : vector<128x1xi32>
    %c0_i32_27 = arith.constant 0 : i32
    %38 = arith.cmpi slt, %31, %c0_i32_27 : i32
    %39 = vector.broadcast %38 : i1 to vector<128x1xi1>
    %40 = vector.broadcast %39 : vector<128x1xi1> to vector<128x1xi1>
    %41 = arith.xori %37, %40 : vector<128x1xi1>
    %42 = arith.andi %41, %35 : vector<128x1xi1>
    %43 = vector.broadcast %31 : i32 to vector<128x1xi32>
    %44 = arith.addi %33, %43 : vector<128x1xi32>
    %45 = arith.select %42, %44, %33 : vector<128x1xi1>, vector<128x1xi32>
    %c15_i32 = arith.constant 15 : i32
    %46 = vector.broadcast %c15_i32 : i32 to vector<128x1xi32>
    %47 = arith.cmpi ne, %45, %46 : vector<128x1xi32>
    %c0_28 = arith.constant 0 : index
    %c0_29 = arith.constant 0 : index
    %48 = vector.load %arg13[%c0_28, %c0_29] : memref<152x4xf32, #tpu.memory_space<vmem>>, vector<128x4xf32>
    %c16 = arith.constant 16 : index
    %c0_30 = arith.constant 0 : index
    %49 = vector.load %arg13[%c16, %c0_30] : memref<152x4xf32, #tpu.memory_space<vmem>>, vector<128x4xf32>
    %c1 = arith.constant 1 : index
    %c0_31 = arith.constant 0 : index
    %50 = vector.load %arg13[%c1, %c0_31] : memref<152x4xf32, #tpu.memory_space<vmem>>, vector<128x4xf32>
    %cst_32 = arith.constant 0.000000e+00 : f32
    %51 = vector.shape_cast %47 : vector<128x1xi1> to vector<128x1xi1>
    %52 = vector.broadcast %51 : vector<128x1xi1> to vector<128x4xi1>
    %53 = vector.broadcast %cst_32 : f32 to vector<128x4xf32>
    %54 = arith.select %52, %50, %53 : vector<128x4xi1>, vector<128x4xf32>
    %c17 = arith.constant 17 : index
    %c0_33 = arith.constant 0 : index
    %55 = vector.load %arg13[%c17, %c0_33] : memref<152x4xf32, #tpu.memory_space<vmem>>, vector<128x4xf32>
    %cst_34 = arith.constant 0.000000e+00 : f32
    %56 = vector.shape_cast %47 : vector<128x1xi1> to vector<128x1xi1>
    %57 = vector.broadcast %56 : vector<128x1xi1> to vector<128x4xi1>
    %58 = vector.broadcast %cst_34 : f32 to vector<128x4xf32>
    %59 = arith.select %57, %55, %58 : vector<128x4xi1>, vector<128x4xf32>
    %c0_35 = arith.constant 0 : index
    %c0_36 = arith.constant 0 : index
    %60 = vector.load %arg7[%c0_35, %c0_36] : memref<4x16xf32, #tpu.memory_space<vmem>>, vector<4x16xf32>
    %cst_37 = arith.constant dense<0.000000e+00> : vector<128x16xf32>
    %61 = tpu.matmul %48, %60, %cst_37 {dimension_numbers = #tpu.dot_dimension_numbers<[1], [0], [0], [1], [0, 0, 1, 1], [], []>} : vector<128x4xf32>, vector<4x16xf32>, vector<128x16xf32> -> vector<128x16xf32>
    %c0_38 = arith.constant 0 : index
    %c0_39 = arith.constant 0 : index
    %62 = vector.load %arg8[%c0_38, %c0_39] : memref<4x8xf32, #tpu.memory_space<vmem>>, vector<4x8xf32>
    %cst_40 = arith.constant dense<0.000000e+00> : vector<128x8xf32>
    %63 = tpu.matmul %49, %62, %cst_40 {dimension_numbers = #tpu.dot_dimension_numbers<[1], [0], [0], [1], [0, 0, 1, 1], [], []>} : vector<128x4xf32>, vector<4x8xf32>, vector<128x8xf32> -> vector<128x8xf32>
    %c0_41 = arith.constant 0 : index
    %c0_42 = arith.constant 0 : index
    %64 = vector.load %arg9[%c0_41, %c0_42] : memref<4x8xf32, #tpu.memory_space<vmem>>, vector<4x8xf32>
    %cst_43 = arith.constant dense<0.000000e+00> : vector<128x8xf32>
    %65 = tpu.matmul %54, %64, %cst_43 {dimension_numbers = #tpu.dot_dimension_numbers<[1], [0], [0], [1], [0, 0, 1, 1], [], []>} : vector<128x4xf32>, vector<4x8xf32>, vector<128x8xf32> -> vector<128x8xf32>
    %c0_44 = arith.constant 0 : index
    %c0_45 = arith.constant 0 : index
    %66 = vector.load %arg10[%c0_44, %c0_45] : memref<4x4xf32, #tpu.memory_space<vmem>>, vector<4x4xf32>
    %cst_46 = arith.constant dense<0.000000e+00> : vector<128x4xf32>
    %67 = tpu.matmul %59, %66, %cst_46 {dimension_numbers = #tpu.dot_dimension_numbers<[1], [0], [0], [1], [0, 0, 1, 1], [], []>} : vector<128x4xf32>, vector<4x4xf32>, vector<128x4xf32> -> vector<128x4xf32>
    %68 = vector.extract_strided_slice %61 {offsets = [0, 0], sizes = [128, 4], strides = [1, 1]} : vector<128x16xf32> to vector<128x4xf32>
    %69 = vector.extract_strided_slice %61 {offsets = [0, 4], sizes = [128, 4], strides = [1, 1]} : vector<128x16xf32> to vector<128x4xf32>
    %70 = vector.extract_strided_slice %65 {offsets = [0, 0], sizes = [128, 4], strides = [1, 1]} : vector<128x8xf32> to vector<128x4xf32>
    %71 = arith.addf %69, %70 : vector<128x4xf32>
    %72 = vector.extract_strided_slice %61 {offsets = [0, 8], sizes = [128, 4], strides = [1, 1]} : vector<128x16xf32> to vector<128x4xf32>
    %73 = vector.extract_strided_slice %63 {offsets = [0, 0], sizes = [128, 4], strides = [1, 1]} : vector<128x8xf32> to vector<128x4xf32>
    %74 = arith.addf %72, %73 : vector<128x4xf32>
    %75 = vector.extract_strided_slice %61 {offsets = [0, 12], sizes = [128, 4], strides = [1, 1]} : vector<128x16xf32> to vector<128x4xf32>
    %76 = vector.extract_strided_slice %63 {offsets = [0, 4], sizes = [128, 4], strides = [1, 1]} : vector<128x8xf32> to vector<128x4xf32>
    %77 = arith.addf %75, %76 : vector<128x4xf32>
    %78 = vector.extract_strided_slice %65 {offsets = [0, 4], sizes = [128, 4], strides = [1, 1]} : vector<128x8xf32> to vector<128x4xf32>
    %79 = arith.addf %77, %78 : vector<128x4xf32>
    %80 = arith.addf %79, %67 : vector<128x4xf32>
    %c0_47 = arith.constant 0 : index
    %c0_48 = arith.constant 0 : index
    %81 = vector.load %arg11[%c0_47, %c0_48] : memref<512x4xf32, #tpu.memory_space<vmem>>, vector<128x4xf32>
    tpu.vector_store %arg11[%c0_47, %c0_48], %68 {strides = array<i32>} : memref<512x4xf32, #tpu.memory_space<vmem>>, vector<128x4xf32>,
    %c128_49 = arith.constant 128 : index
    %c0_50 = arith.constant 0 : index
    %82 = vector.load %arg11[%c128_49, %c0_50] : memref<512x4xf32, #tpu.memory_space<vmem>>, vector<128x4xf32>
    tpu.vector_store %arg11[%c128_49, %c0_50], %71 {strides = array<i32>} : memref<512x4xf32, #tpu.memory_space<vmem>>, vector<128x4xf32>,
    %c256 = arith.constant 256 : index
    %c0_51 = arith.constant 0 : index
    %83 = vector.load %arg11[%c256, %c0_51] : memref<512x4xf32, #tpu.memory_space<vmem>>, vector<128x4xf32>
    tpu.vector_store %arg11[%c256, %c0_51], %74 {strides = array<i32>} : memref<512x4xf32, #tpu.memory_space<vmem>>, vector<128x4xf32>,
    %c384 = arith.constant 384 : index
    %c0_52 = arith.constant 0 : index
    %84 = vector.load %arg11[%c384, %c0_52] : memref<512x4xf32, #tpu.memory_space<vmem>>, vector<128x4xf32>
    tpu.vector_store %arg11[%c384, %c0_52], %80 {strides = array<i32>} : memref<512x4xf32, #tpu.memory_space<vmem>>, vector<128x4xf32>,
    %cst_53 = arith.constant dense<0.000000e+00> : vector<4xf32>
    %85 = vector.multi_reduction <add>, %68, %cst_53 [0] : vector<128x4xf32> to vector<4xf32>
    %86 = vector.shape_cast %85 : vector<4xf32> to vector<1x4xf32>
    %cst_54 = arith.constant dense<0.000000e+00> : vector<4xf32>
    %87 = vector.multi_reduction <add>, %71, %cst_54 [0] : vector<128x4xf32> to vector<4xf32>
    %88 = vector.shape_cast %87 : vector<4xf32> to vector<1x4xf32>
    %89 = arith.addf %86, %88 : vector<1x4xf32>
    %cst_55 = arith.constant dense<0.000000e+00> : vector<4xf32>
    %90 = vector.multi_reduction <add>, %74, %cst_55 [0] : vector<128x4xf32> to vector<4xf32>
    %91 = vector.shape_cast %90 : vector<4xf32> to vector<1x4xf32>
    %92 = arith.addf %89, %91 : vector<1x4xf32>
    %cst_56 = arith.constant dense<0.000000e+00> : vector<4xf32>
    %93 = vector.multi_reduction <add>, %80, %cst_56 [0] : vector<128x4xf32> to vector<4xf32>
    %94 = vector.shape_cast %93 : vector<4xf32> to vector<1x4xf32>
    %95 = arith.addf %92, %94 : vector<1x4xf32>
    %96 = arith.mulf %68, %68 : vector<128x4xf32>
    %cst_57 = arith.constant dense<0.000000e+00> : vector<4xf32>
    %97 = vector.multi_reduction <add>, %96, %cst_57 [0] : vector<128x4xf32> to vector<4xf32>
    %98 = vector.shape_cast %97 : vector<4xf32> to vector<1x4xf32>
    %99 = arith.mulf %71, %71 : vector<128x4xf32>
    %cst_58 = arith.constant dense<0.000000e+00> : vector<4xf32>
    %100 = vector.multi_reduction <add>, %99, %cst_58 [0] : vector<128x4xf32> to vector<4xf32>
    %101 = vector.shape_cast %100 : vector<4xf32> to vector<1x4xf32>
    %102 = arith.addf %98, %101 : vector<1x4xf32>
    %103 = arith.mulf %74, %74 : vector<128x4xf32>
    %cst_59 = arith.constant dense<0.000000e+00> : vector<4xf32>
    %104 = vector.multi_reduction <add>, %103, %cst_59 [0] : vector<128x4xf32> to vector<4xf32>
    %105 = vector.shape_cast %104 : vector<4xf32> to vector<1x4xf32>
    %106 = arith.addf %102, %105 : vector<1x4xf32>
    %107 = arith.mulf %80, %80 : vector<128x4xf32>
    %cst_60 = arith.constant dense<0.000000e+00> : vector<4xf32>
    %108 = vector.multi_reduction <add>, %107, %cst_60 [0] : vector<128x4xf32> to vector<4xf32>
    %109 = vector.shape_cast %108 : vector<4xf32> to vector<1x4xf32>
    %110 = arith.addf %106, %109 : vector<1x4xf32>
    %111 = tpu.concatenate %95, %110 in 0 : vector<1x4xf32>, vector<1x4xf32> -> vector<2x4xf32>
    %c0_61 = arith.constant 0 : index
    %c0_62 = arith.constant 0 : index
    %c0_63 = arith.constant 0 : index
    %112 = vector.load %arg12[%c0_61, %c0_62, %c0_63] : memref<1x2x4xf32, #tpu.memory_space<vmem>>, vector<1x2x4xf32>
    %113 = vector.shape_cast %112 : vector<1x2x4xf32> to vector<2x4xf32>
    %114 = vector.shape_cast %111 : vector<2x4xf32> to vector<1x2x4xf32>
    tpu.vector_store %arg12[%c0_61, %c0_62, %c0_63], %114 {strides = array<i32>} : memref<1x2x4xf32, #tpu.memory_space<vmem>>, vector<1x2x4xf32>,
    return
  }
  func.func @transform_0(%arg0: i32, %arg1: i32) -> (i32, i32) {
    %c2_i32 = arith.constant 2 : i32
    %0 = arith.muli %arg0, %c2_i32 : i32
    %1 = arith.addi %0, %arg1 : i32
    %c0_i32 = arith.constant 0 : i32
    %c0_i32_0 = arith.constant 0 : i32
    return %1, %c0_i32 : i32, i32
  }
  func.func @transform_1(%arg0: i32, %arg1: i32) -> (i32, i32) {
    %c16_i32 = arith.constant 16 : i32
    %0 = arith.muli %arg0, %c16_i32 : i32
    %c1_i32 = arith.constant 1 : i32
    %1 = arith.addi %arg1, %c1_i32 : i32
    %c8_i32 = arith.constant 8 : i32
    %2 = arith.muli %1, %c8_i32 : i32
    %3 = arith.addi %0, %2 : i32
    %c31_i32 = arith.constant 31 : i32
    %4 = arith.minsi %3, %c31_i32 : i32
    %c0_i32 = arith.constant 0 : i32
    %c0_i32_0 = arith.constant 0 : i32
    return %4, %c0_i32 : i32, i32
  }
  func.func @transform_2(%arg0: i32, %arg1: i32) -> (i32, i32) {
    %c0_i32 = arith.constant 0 : i32
    %c0_i32_0 = arith.constant 0 : i32
    %c0_i32_1 = arith.constant 0 : i32
    return %c0_i32, %c0_i32_0 : i32, i32
  }
  func.func @transform_3(%arg0: i32, %arg1: i32) -> (i32, i32) {
    %c0_i32 = arith.constant 0 : i32
    %c0_i32_0 = arith.constant 0 : i32
    %c0_i32_1 = arith.constant 0 : i32
    return %c0_i32, %c0_i32_0 : i32, i32
  }
  func.func @transform_4(%arg0: i32, %arg1: i32) -> (i32, i32) {
    %c0_i32 = arith.constant 0 : i32
    %c0_i32_0 = arith.constant 0 : i32
    %c0_i32_1 = arith.constant 0 : i32
    return %c0_i32, %c0_i32_0 : i32, i32
  }
  func.func @transform_5(%arg0: i32, %arg1: i32) -> (i32, i32) {
    %c0_i32 = arith.constant 0 : i32
    %c0_i32_0 = arith.constant 0 : i32
    %c0_i32_1 = arith.constant 0 : i32
    return %c0_i32, %c0_i32_0 : i32, i32
  }
  func.func @transform_6(%arg0: i32, %arg1: i32) -> (i32, i32) {
    %c0_i32 = arith.constant 0 : i32
    %c0_i32_0 = arith.constant 0 : i32
    %c0_i32_1 = arith.constant 0 : i32
    return %c0_i32, %c0_i32_0 : i32, i32
  }
  func.func @transform_7(%arg0: i32, %arg1: i32) -> (i32, i32) {
    %c0_i32 = arith.constant 0 : i32
    %c0_i32_0 = arith.constant 0 : i32
    %c0_i32_1 = arith.constant 0 : i32
    return %c0_i32, %c0_i32_0 : i32, i32
  }
  func.func @transform_8(%arg0: i32, %arg1: i32) -> (i32, i32) {
    %c0_i32 = arith.constant 0 : i32
    %c0_i32_0 = arith.constant 0 : i32
    %c0_i32_1 = arith.constant 0 : i32
    return %c0_i32, %c0_i32_0 : i32, i32
  }
  func.func @transform_9(%arg0: i32, %arg1: i32) -> (i32, i32) {
    %c2_i32 = arith.constant 2 : i32
    %0 = arith.muli %arg0, %c2_i32 : i32
    %1 = arith.addi %0, %arg1 : i32
    %c0_i32 = arith.constant 0 : i32
    %c0_i32_0 = arith.constant 0 : i32
    return %1, %c0_i32 : i32, i32
  }
  func.func @transform_10(%arg0: i32, %arg1: i32) -> (i32, i32, i32) {
    %c2_i32 = arith.constant 2 : i32
    %0 = arith.muli %arg0, %c2_i32 : i32
    %1 = arith.addi %0, %arg1 : i32
    %c0_i32 = arith.constant 0 : i32
    %c0_i32_0 = arith.constant 0 : i32
    %c0_i32_1 = arith.constant 0 : i32
    return %1, %c0_i32, %c0_i32_0 : i32, i32, i32
  }
}

module attributes {stable_mosaic.version = 11 : i64} {
  func.func @_bn_conv3_stats_kernel(%arg0: i32, %arg1: memref<1024x4xf32, #tpu.memory_space<vmem>>, %arg2: memref<1x4xf32, #tpu.memory_space<vmem>>, %arg3: memref<1x4xf32, #tpu.memory_space<vmem>>, %arg4: memref<4x8xf32, #tpu.memory_space<vmem>>, %arg5: memref<1024x8xf32, #tpu.memory_space<vmem>>, %arg6: memref<1x2x8xf32, #tpu.memory_space<vmem>>) attributes {dimension_semantics = [#tpu.dimension_semantics<parallel>], iteration_bounds = array<i64: 2>, scalar_prefetch = 0 : i64, scratch_operands = 0 : i64, tpu.core_type = #tpu.core_type<tc>, window_params = [{transform_indices = @transform_0, window_bounds = array<i64: 1024, 4>}, {pipeline_mode = #tpu.pipeline_mode<synchronous>, transform_indices = @transform_1, window_bounds = array<i64: 1, 4>}, {pipeline_mode = #tpu.pipeline_mode<synchronous>, transform_indices = @transform_2, window_bounds = array<i64: 1, 4>}, {pipeline_mode = #tpu.pipeline_mode<synchronous>, transform_indices = @transform_3, window_bounds = array<i64: 4, 8>}, {transform_indices = @transform_4, window_bounds = array<i64: 1024, 8>}, {transform_indices = @transform_5, window_bounds = array<i64: 1, 2, 8>}]} {
    %c0 = arith.constant 0 : index
    %c0_0 = arith.constant 0 : index
    %0 = vector.load %arg1[%c0, %c0_0] : memref<1024x4xf32, #tpu.memory_space<vmem>>, vector<1024x4xf32>
    %c0_1 = arith.constant 0 : index
    %c0_2 = arith.constant 0 : index
    %1 = vector.load %arg2[%c0_1, %c0_2] : memref<1x4xf32, #tpu.memory_space<vmem>>, vector<1x4xf32>
    %2 = vector.broadcast %1 : vector<1x4xf32> to vector<1024x4xf32>
    %3 = arith.mulf %0, %2 : vector<1024x4xf32>
    %c0_3 = arith.constant 0 : index
    %c0_4 = arith.constant 0 : index
    %4 = vector.load %arg3[%c0_3, %c0_4] : memref<1x4xf32, #tpu.memory_space<vmem>>, vector<1x4xf32>
    %5 = vector.broadcast %4 : vector<1x4xf32> to vector<1024x4xf32>
    %6 = arith.addf %3, %5 : vector<1024x4xf32>
    %cst = arith.constant 0.000000e+00 : f32
    %7 = vector.broadcast %cst : f32 to vector<1024x4xf32>
    %8 = arith.maximumf %6, %7 : vector<1024x4xf32>
    %c0_5 = arith.constant 0 : index
    %c0_6 = arith.constant 0 : index
    %9 = vector.load %arg4[%c0_5, %c0_6] : memref<4x8xf32, #tpu.memory_space<vmem>>, vector<4x8xf32>
    %cst_7 = arith.constant dense<0.000000e+00> : vector<1024x8xf32>
    %10 = tpu.matmul %8, %9, %cst_7 {dimension_numbers = #tpu.dot_dimension_numbers<[1], [0], [0], [1], [0, 0, 1, 1], [], []>} : vector<1024x4xf32>, vector<4x8xf32>, vector<1024x8xf32> -> vector<1024x8xf32>
    %c0_8 = arith.constant 0 : index
    %c0_9 = arith.constant 0 : index
    %11 = vector.load %arg5[%c0_8, %c0_9] : memref<1024x8xf32, #tpu.memory_space<vmem>>, vector<1024x8xf32>
    tpu.vector_store %arg5[%c0_8, %c0_9], %10 {strides = array<i32>} : memref<1024x8xf32, #tpu.memory_space<vmem>>, vector<1024x8xf32>,
    %cst_10 = arith.constant dense<0.000000e+00> : vector<8xf32>
    %12 = vector.multi_reduction <add>, %10, %cst_10 [0] : vector<1024x8xf32> to vector<8xf32>
    %13 = vector.shape_cast %12 : vector<8xf32> to vector<1x8xf32>
    %14 = arith.mulf %10, %10 : vector<1024x8xf32>
    %cst_11 = arith.constant dense<0.000000e+00> : vector<8xf32>
    %15 = vector.multi_reduction <add>, %14, %cst_11 [0] : vector<1024x8xf32> to vector<8xf32>
    %16 = vector.shape_cast %15 : vector<8xf32> to vector<1x8xf32>
    %17 = tpu.concatenate %13, %16 in 0 : vector<1x8xf32>, vector<1x8xf32> -> vector<2x8xf32>
    %c0_12 = arith.constant 0 : index
    %c0_13 = arith.constant 0 : index
    %c0_14 = arith.constant 0 : index
    %18 = vector.load %arg6[%c0_12, %c0_13, %c0_14] : memref<1x2x8xf32, #tpu.memory_space<vmem>>, vector<1x2x8xf32>
    %19 = vector.shape_cast %18 : vector<1x2x8xf32> to vector<2x8xf32>
    %20 = vector.shape_cast %17 : vector<2x8xf32> to vector<1x2x8xf32>
    tpu.vector_store %arg6[%c0_12, %c0_13, %c0_14], %20 {strides = array<i32>} : memref<1x2x8xf32, #tpu.memory_space<vmem>>, vector<1x2x8xf32>,
    return
  }
  func.func @transform_0(%arg0: i32) -> (i32, i32) {
    %c0_i32 = arith.constant 0 : i32
    %c0_i32_0 = arith.constant 0 : i32
    return %arg0, %c0_i32 : i32, i32
  }
  func.func @transform_1(%arg0: i32) -> (i32, i32) {
    %c0_i32 = arith.constant 0 : i32
    %c0_i32_0 = arith.constant 0 : i32
    %c0_i32_1 = arith.constant 0 : i32
    return %c0_i32, %c0_i32_0 : i32, i32
  }
  func.func @transform_2(%arg0: i32) -> (i32, i32) {
    %c0_i32 = arith.constant 0 : i32
    %c0_i32_0 = arith.constant 0 : i32
    %c0_i32_1 = arith.constant 0 : i32
    return %c0_i32, %c0_i32_0 : i32, i32
  }
  func.func @transform_3(%arg0: i32) -> (i32, i32) {
    %c0_i32 = arith.constant 0 : i32
    %c0_i32_0 = arith.constant 0 : i32
    %c0_i32_1 = arith.constant 0 : i32
    return %c0_i32, %c0_i32_0 : i32, i32
  }
  func.func @transform_4(%arg0: i32) -> (i32, i32) {
    %c0_i32 = arith.constant 0 : i32
    %c0_i32_0 = arith.constant 0 : i32
    return %arg0, %c0_i32 : i32, i32
  }
  func.func @transform_5(%arg0: i32) -> (i32, i32, i32) {
    %c0_i32 = arith.constant 0 : i32
    %c0_i32_0 = arith.constant 0 : i32
    %c0_i32_1 = arith.constant 0 : i32
    return %arg0, %c0_i32, %c0_i32_0 : i32, i32, i32
  }
}

module attributes {stable_mosaic.version = 11 : i64} {
  func.func @_bn_relu_kernel(%arg0: i32, %arg1: memref<1024x8xf32, #tpu.memory_space<vmem>>, %arg2: memref<1x8xf32, #tpu.memory_space<vmem>>, %arg3: memref<1x8xf32, #tpu.memory_space<vmem>>, %arg4: memref<1024x8xf32, #tpu.memory_space<vmem>>) attributes {dimension_semantics = [#tpu.dimension_semantics<parallel>], iteration_bounds = array<i64: 2>, scalar_prefetch = 0 : i64, scratch_operands = 0 : i64, tpu.core_type = #tpu.core_type<tc>, window_params = [{transform_indices = @transform_0, window_bounds = array<i64: 1024, 8>}, {pipeline_mode = #tpu.pipeline_mode<synchronous>, transform_indices = @transform_1, window_bounds = array<i64: 1, 8>}, {pipeline_mode = #tpu.pipeline_mode<synchronous>, transform_indices = @transform_2, window_bounds = array<i64: 1, 8>}, {transform_indices = @transform_3, window_bounds = array<i64: 1024, 8>}]} {
    %c0 = arith.constant 0 : index
    %c0_0 = arith.constant 0 : index
    %0 = vector.load %arg1[%c0, %c0_0] : memref<1024x8xf32, #tpu.memory_space<vmem>>, vector<1024x8xf32>
    %c0_1 = arith.constant 0 : index
    %c0_2 = arith.constant 0 : index
    %1 = vector.load %arg2[%c0_1, %c0_2] : memref<1x8xf32, #tpu.memory_space<vmem>>, vector<1x8xf32>
    %2 = vector.broadcast %1 : vector<1x8xf32> to vector<1024x8xf32>
    %3 = arith.mulf %0, %2 : vector<1024x8xf32>
    %c0_3 = arith.constant 0 : index
    %c0_4 = arith.constant 0 : index
    %4 = vector.load %arg3[%c0_3, %c0_4] : memref<1x8xf32, #tpu.memory_space<vmem>>, vector<1x8xf32>
    %5 = vector.broadcast %4 : vector<1x8xf32> to vector<1024x8xf32>
    %6 = arith.addf %3, %5 : vector<1024x8xf32>
    %cst = arith.constant 0.000000e+00 : f32
    %7 = vector.broadcast %cst : f32 to vector<1024x8xf32>
    %8 = arith.maximumf %6, %7 : vector<1024x8xf32>
    %c0_5 = arith.constant 0 : index
    %c0_6 = arith.constant 0 : index
    %9 = vector.load %arg4[%c0_5, %c0_6] : memref<1024x8xf32, #tpu.memory_space<vmem>>, vector<1024x8xf32>
    tpu.vector_store %arg4[%c0_5, %c0_6], %8 {strides = array<i32>} : memref<1024x8xf32, #tpu.memory_space<vmem>>, vector<1024x8xf32>,
    return
  }
  func.func @transform_0(%arg0: i32) -> (i32, i32) {
    %c0_i32 = arith.constant 0 : i32
    %c0_i32_0 = arith.constant 0 : i32
    return %arg0, %c0_i32 : i32, i32
  }
  func.func @transform_1(%arg0: i32) -> (i32, i32) {
    %c0_i32 = arith.constant 0 : i32
    %c0_i32_0 = arith.constant 0 : i32
    %c0_i32_1 = arith.constant 0 : i32
    return %c0_i32, %c0_i32_0 : i32, i32
  }
  func.func @transform_2(%arg0: i32) -> (i32, i32) {
    %c0_i32 = arith.constant 0 : i32
    %c0_i32_0 = arith.constant 0 : i32
    %c0_i32_1 = arith.constant 0 : i32
    return %c0_i32, %c0_i32_0 : i32, i32
  }
  func.func @transform_3(%arg0: i32) -> (i32, i32) {
    %c0_i32 = arith.constant 0 : i32
    %c0_i32_0 = arith.constant 0 : i32
    return %arg0, %c0_i32 : i32, i32
  }
}

</mosaic_0001>

<bundles_post_ra>
// kernel: trans_block_forward.4
= control target key start
LH: loop header
LB: loop body
LE: loop exit
PB: predicated region body
PF: predicated region fallthrough
CT: control target
= control target key end

     0   :  { %vm269_vm0 = vcmask 1043456   ;;  %vm76_vm1 = vcmask 31744   ;;  %vm812_vm2 = vcmask 1040384   ;;  %vm814_vm3 = vcmask 25600   ;;  %s1493_s1 = inlined_call_operand.vmem [shape: f32[4,4], index: 1, kind: input, shape index: {}]   ;;  %s1494_s0 = inlined_call_operand.vmem [shape: f32[512,4], index: 0, kind: input, shape index: {}]   ;;  %s1495_s2 = inlined_call_operand.vmem [shape: f32[1,2,4], index: 2, kind: output, shape index: {}]  }
   0x1   :  { %v75_v0 = vld [vmem:[%s1493_s1] sm:$0xf]  ;;  %v12_v3 = vld [vmem:[%s1494_s0 + $0x8] sm:$0xff]  ;;  %v13_v5 = vld [vmem:[%s1494_s0 + $0x10] sm:$0xff] }
   0x2   :  { %v11_v1 = vld [vmem:[%s1494_s0] sm:$0xff]  ;;  %820 = vmatpush.msk.msra.mxu0 %vm269_vm0, %v75_v0  ;;  %885 = vmatpush.msk.msra.mxu1 %vm269_vm0, %v75_v0  ;;  %v28_v4 = vld [vmem:[%s1494_s0 + $0x88] sm:$0xff]  ;;  %v29_v6 = vld [vmem:[%s1494_s0 + $0x90] sm:$0xff] }
   0x3   :  { %821 = vmatmul.msk.f32.vlgmr.msra.gmra.mxu0 %vm76_vm1, %v11_v1  ;;  %v27_v2 = vld [vmem:[%s1494_s0 + $0x80] sm:$0xff]  ;;  %886 = vmatpush.msk.msra.mxu2 %vm269_vm0, %v75_v0  ;;  %v14_v7 = vld [vmem:[%s1494_s0 + $0x18] sm:$0xff]  ;;  %v44_v12 = vld [vmem:[%s1494_s0 + $0x108] sm:$0xff] }
   0x4   :  { %837 = vmatmul.msk.f32.vlgmr.msra.gmra.mxu1 %vm76_vm1, %v27_v2  ;;  %887 = vmatpush.msk.msra.mxu3 %vm269_vm0, %v75_v0  ;;  %v30_v8 = vld [vmem:[%s1494_s0 + $0x98] sm:$0xff]  ;;  %v43_v9 = vld [vmem:[%s1494_s0 + $0x100] sm:$0xff]  ;;  %v16_v13 = vld [vmem:[%s1494_s0 + $0x28] sm:$0xff] }
   0x5   :  { %853 = vmatmul.msk.f32.vlgmr.msra.gmra.mxu2 %vm76_vm1, %v43_v9  ;;  %v15_v10 = vld [vmem:[%s1494_s0 + $0x20] sm:$0xff]  ;;  %v32_v14 = vld [vmem:[%s1494_s0 + $0xa8] sm:$0xff]  ;;  %v45_v15 = vld [vmem:[%s1494_s0 + $0x110] sm:$0xff] }
   0x6   :  { %v31_v11 = vld [vmem:[%s1494_s0 + $0xa0] sm:$0xff]  ;;  %v17_v16 = vld [vmem:[%s1494_s0 + $0x30] sm:$0xff]  ;;  %v46_v18 = vld [vmem:[%s1494_s0 + $0x118] sm:$0xff] }
   0x7   :  { %v33_v17 = vld [vmem:[%s1494_s0 + $0xb0] sm:$0xff]  ;;  %v18_v19 = vld [vmem:[%s1494_s0 + $0x38] sm:$0xff]  ;;  %v47_v21 = vld [vmem:[%s1494_s0 + $0x120] sm:$0xff] }
   0x8   :  { %v34_v20 = vld [vmem:[%s1494_s0 + $0xb8] sm:$0xff]  ;;  %v59_v22 = vld [vmem:[%s1494_s0 + $0x180] sm:$0xff]  ;;  %v48_v25 = vld [vmem:[%s1494_s0 + $0x128] sm:$0xff] }
   0x9   :  { %869 = vmatmul.msk.f32.vlgmr.msra.gmra.mxu3 %vm76_vm1, %v59_v22  ;;  %v19_v23 = vld [vmem:[%s1494_s0 + $0x40] sm:$0xff]  ;;  %v60_v26 = vld [vmem:[%s1494_s0 + $0x188] sm:$0xff]  ;;  %v49_v29 = vld [vmem:[%s1494_s0 + $0x130] sm:$0xff] }
   0xa   :  { %v35_v24 = vld [vmem:[%s1494_s0 + $0xc0] sm:$0xff]  ;;  %v20_v27 = vld [vmem:[%s1494_s0 + $0x48] sm:$0xff]  ;;  %v61_v30 = vld [vmem:[%s1494_s0 + $0x190] sm:$0xff] }
   0xb   :  { %822 = vmatmul.msk.f32.gmra.mxu0 %vm76_vm1, %v12_v3  ;;  %v36_v28 = vld [vmem:[%s1494_s0 + $0xc8] sm:$0xff]  ;;  %v21_v31 = vld [vmem:[%s1494_s0 + $0x50] sm:$0xff]  ;;  %v50_v33 = vld [vmem:[%s1494_s0 + $0x138] sm:$0xff] }
   0xc   :  { %838 = vmatmul.msk.f32.gmra.mxu1 %vm76_vm1, %v28_v4  ;;  %v37_v32 = vld [vmem:[%s1494_s0 + $0xd0] sm:$0xff]  ;;  %v62_v34 = vld [vmem:[%s1494_s0 + $0x198] sm:$0xff]  ;;  %v51_v37 = vld [vmem:[%s1494_s0 + $0x140] sm:$0xff] }
   0xd   :  { %854 = vmatmul.msk.f32.gmra.mxu2 %vm76_vm1, %v44_v12  ;;  %v22_v35 = vld [vmem:[%s1494_s0 + $0x58] sm:$0xff]  ;;  %v63_v38 = vld [vmem:[%s1494_s0 + $0x1a0] sm:$0xff]  ;;  %v52_v41 = vld [vmem:[%s1494_s0 + $0x148] sm:$0xff] }
   0xe   :  { %v38_v36 = vld [vmem:[%s1494_s0 + $0xd8] sm:$0xff]  ;;  %v23_v39 = vld [vmem:[%s1494_s0 + $0x60] sm:$0xff]  ;;  %v64_v42 = vld [vmem:[%s1494_s0 + $0x1a8] sm:$0xff] }
   0xf   :  { %v39_v40 = vld [vmem:[%s1494_s0 + $0xe0] sm:$0xff]  ;;  %v24_v43 = vld [vmem:[%s1494_s0 + $0x68] sm:$0xff]  ;;  %v53_v45 = vld [vmem:[%s1494_s0 + $0x150] sm:$0xff] }
  0x10   :  { %v40_v44 = vld [vmem:[%s1494_s0 + $0xe8] sm:$0xff]  ;;  %v65_v46 = vld [vmem:[%s1494_s0 + $0x1b0] sm:$0xff]  ;;  %v54_v49 = vld [vmem:[%s1494_s0 + $0x158] sm:$0xff] }
  0x11   :  { %870 = vmatmul.msk.f32.gmra.mxu3 %vm76_vm1, %v60_v26  ;;  %v25_v47 = vld [vmem:[%s1494_s0 + $0x70] sm:$0xff]  ;;  %v66_v50 = vld [vmem:[%s1494_s0 + $0x1b8] sm:$0xff]  ;;  %v55_v53 = vld [vmem:[%s1494_s0 + $0x160] sm:$0xff] }
  0x12   :  { %v41_v48 = vld [vmem:[%s1494_s0 + $0xf0] sm:$0xff]  ;;  %v26_v51 = vld [vmem:[%s1494_s0 + $0x78] sm:$0xff]  ;;  %v67_v54 = vld [vmem:[%s1494_s0 + $0x1c0] sm:$0xff] }
  0x13   :  { %823 = vmatmul.msk.f32.gmra.mxu0 %vm76_vm1, %v13_v5  ;;  %v42_v52 = vld [vmem:[%s1494_s0 + $0xf8] sm:$0xff]  ;;  %v56_v57 = vld [vmem:[%s1494_s0 + $0x168] sm:$0xff]  ;;  %v57_v5 = vld [vmem:[%s1494_s0 + $0x170] sm:$0xff] }
  0x14   :  { %839 = vmatmul.msk.f32.gmra.mxu1 %vm76_vm1, %v29_v6  ;;  %v68_v58 = vld [vmem:[%s1494_s0 + $0x1c8] sm:$0xff]  ;;  %v69_v6 = vld [vmem:[%s1494_s0 + $0x1d0] sm:$0xff] }
  0x15   :  { %855 = vmatmul.msk.f32.gmra.mxu2 %vm76_vm1, %v45_v15  ;;  %v70_v15 = vld [vmem:[%s1494_s0 + $0x1d8] sm:$0xff] }
  0x19   :  { %871 = vmatmul.msk.f32.gmra.mxu3 %vm76_vm1, %v61_v30 }
  0x1b   :  { %824 = vmatmul.msk.f32.gmra.mxu0 %vm76_vm1, %v14_v7 }
  0x1c   :  { %840 = vmatmul.msk.f32.gmra.mxu1 %vm76_vm1, %v30_v8 }
  0x1d   :  { %856 = vmatmul.msk.f32.gmra.mxu2 %vm76_vm1, %v46_v18 }
  0x21   :  { %872 = vmatmul.msk.f32.gmra.mxu3 %vm76_vm1, %v62_v34 }
  0x23   :  { %825 = vmatmul.msk.f32.gmra.mxu0 %vm76_vm1, %v15_v10 }
  0x24   :  { %841 = vmatmul.msk.f32.gmra.mxu1 %vm76_vm1, %v31_v11 }
  0x25   :  { %857 = vmatmul.msk.f32.gmra.mxu2 %vm76_vm1, %v47_v21 }
  0x29   :  { %873 = vmatmul.msk.f32.gmra.mxu3 %vm76_vm1, %v63_v38 }
  0x2b   :  { %826 = vmatmul.msk.f32.gmra.mxu0 %vm76_vm1, %v16_v13 }
  0x2c   :  { %842 = vmatmul.msk.f32.gmra.mxu1 %vm76_vm1, %v32_v14  ;;  %v58_v14 = vld [vmem:[%s1494_s0 + $0x178] sm:$0xff] }
  0x2d   :  { %858 = vmatmul.msk.f32.gmra.mxu2 %vm76_vm1, %v48_v25 }
  0x31   :  { %874 = vmatmul.msk.f32.gmra.mxu3 %vm76_vm1, %v64_v42 }
  0x33   :  { %827 = vmatmul.msk.f32.gmra.mxu0 %vm76_vm1, %v17_v16 }
  0x34   :  { %843 = vmatmul.msk.f32.gmra.mxu1 %vm76_vm1, %v33_v17 }
  0x35   :  { %859 = vmatmul.msk.f32.gmra.mxu2 %vm76_vm1, %v49_v29 }
  0x39   :  { %875 = vmatmul.msk.f32.gmra.mxu3 %vm76_vm1, %v65_v46 }
  0x3b   :  { %828 = vmatmul.msk.f32.gmra.mxu0 %vm76_vm1, %v18_v19 }
  0x3c   :  { %844 = vmatmul.msk.f32.gmra.mxu1 %vm76_vm1, %v34_v20 }
  0x3d   :  { %860 = vmatmul.msk.f32.gmra.mxu2 %vm76_vm1, %v50_v33 }
  0x41   :  { %876 = vmatmul.msk.f32.gmra.mxu3 %vm76_vm1, %v66_v50 }
  0x43   :  { %829 = vmatmul.msk.f32.gmra.mxu0 %vm76_vm1, %v19_v23  ;;  %v71_v23 = vld [vmem:[%s1494_s0 + $0x1e0] sm:$0xff] }
  0x44   :  { %845 = vmatmul.msk.f32.gmra.mxu1 %vm76_vm1, %v35_v24 }
  0x45   :  { %861 = vmatmul.msk.f32.gmra.mxu2 %vm76_vm1, %v51_v37 }
  0x49   :  { %877 = vmatmul.msk.f32.gmra.mxu3 %vm76_vm1, %v67_v54 }
  0x4b   :  { %830 = vmatmul.msk.f32.gmra.mxu0 %vm76_vm1, %v20_v27 }
  0x4c   :  { %846 = vmatmul.msk.f32.gmra.mxu1 %vm76_vm1, %v36_v28 }
  0x4d   :  { %862 = vmatmul.msk.f32.gmra.mxu2 %vm76_vm1, %v52_v41 }
  0x51   :  { %878 = vmatmul.msk.f32.gmra.mxu3 %vm76_vm1, %v68_v58 }
  0x53   :  { %831 = vmatmul.msk.f32.gmra.mxu0 %vm76_vm1, %v21_v31 }
  0x54   :  { %847 = vmatmul.msk.f32.gmra.mxu1 %vm76_vm1, %v37_v32  ;;  %v72_v32 = vld [vmem:[%s1494_s0 + $0x1e8] sm:$0xff] }
  0x55   :  { %863 = vmatmul.msk.f32.gmra.mxu2 %vm76_vm1, %v53_v45 }
  0x59   :  { %879 = vmatmul.msk.f32.gmra.mxu3 %vm76_vm1, %v69_v6 }
  0x5b   :  { %832 = vmatmul.msk.f32.gmra.mxu0 %vm76_vm1, %v22_v35  ;;  %v73_v35 = vld [vmem:[%s1494_s0 + $0x1f0] sm:$0xff] }
  0x5c   :  { %848 = vmatmul.msk.f32.gmra.mxu1 %vm76_vm1, %v38_v36 }
  0x5d   :  { %864 = vmatmul.msk.f32.gmra.mxu2 %vm76_vm1, %v54_v49 }
  0x61   :  { %880 = vmatmul.msk.f32.gmra.mxu3 %vm76_vm1, %v70_v15 }
  0x63   :  { %833 = vmatmul.msk.f32.gmra.mxu0 %vm76_vm1, %v23_v39  ;;  %v74_v39 = vld [vmem:[%s1494_s0 + $0x1f8] sm:$0xff] }
  0x64   :  { %849 = vmatmul.msk.f32.gmra.mxu1 %vm76_vm1, %v39_v40 }
  0x65   :  { %865 = vmatmul.msk.f32.gmra.mxu2 %vm76_vm1, %v55_v53 }
  0x69   :  { %881 = vmatmul.msk.f32.gmra.mxu3 %vm76_vm1, %v71_v23 }
  0x6b   :  { %834 = vmatmul.msk.f32.gmra.mxu0 %vm76_vm1, %v24_v43 }
  0x6c   :  { %850 = vmatmul.msk.f32.gmra.mxu1 %vm76_vm1, %v40_v44 }
  0x6d   :  { %866 = vmatmul.msk.f32.gmra.mxu2 %vm76_vm1, %v56_v57 }
  0x71   :  { %882 = vmatmul.msk.f32.gmra.mxu3 %vm76_vm1, %v72_v32 }
  0x73   :  { %835 = vmatmul.msk.f32.gmra.mxu0 %vm76_vm1, %v25_v47 }
  0x74   :  { %851 = vmatmul.msk.f32.gmra.mxu1 %vm76_vm1, %v41_v48 }
  0x75   :  { %867 = vmatmul.msk.f32.gmra.mxu2 %vm76_vm1, %v57_v5 }
  0x79   :  { %883 = vmatmul.msk.f32.gmra.mxu3 %vm76_vm1, %v73_v35 }
  0x7b   :  { %836 = vmatmul.msk.f32.gmra.mxu0 %vm76_vm1, %v26_v51 }
  0x7c   :  { %852 = vmatmul.msk.f32.gmra.mxu1 %vm76_vm1, %v42_v52 }
  0x7d   :  { %868 = vmatmul.msk.f32.gmra.mxu2 %vm76_vm1, %v58_v14 }
  0x80   :  { %v290_v55 = vpop.f32.mrf.mxu0 }
  0x81   :  { %v1122_v56 = vpop.f32.mrf.mxu1  ;;  %v615_v59 = vmul.f32 %v290_v55, %v290_v55  ;;  %v482_v61 = vsel %vm76_vm1, %v290_v55, 0.0  ;;  %884 = vmatmul.msk.f32.gmra.mxu3 %vm76_vm1, %v74_v39 }
  0x83   :  { %v679_v2 = vsel %vm76_vm1, %v615_v59, 0.0 }
  0x88   :  { %v293_v60 = vpop.f32.mrf.mxu0  ;;  %v1166_v25 = vpop.f32.mrf.mxu2 }
  0x89   :  { %v483_v62 = vsel %vm76_vm1, %v293_v60, 0.0  ;;  %v616_v63 = vmul.f32 %v293_v60, %v293_v60  ;;  %v1134_v0 = vpop.f32.mrf.mxu1 }
  0x8a   :  { %v484_v1 = vadd.f32 %v483_v62, %v482_v61 }
  0x8b   :  { %v680_v3 = vsel %vm76_vm1, %v616_v63, 0.0 }
  0x8c   :  { %v681_v4 = vadd.f32 %v680_v3, %v679_v2  ;;  %v1194_v44 = vpop.f32.mrf.mxu3 }
  0x90   :  { %v296_v7 = vpop.f32.mrf.mxu0  ;;  %v1176_v34 = vpop.f32.mrf.mxu2 }
  0x91   :  { %v485_v8 = vsel %vm76_vm1, %v296_v7, 0.0  ;;  %v617_v9 = vmul.f32 %v296_v7, %v296_v7  ;;  %v1147_v10 = vpop.f32.mrf.mxu1 }
  0x92   :  { %v486_v11 = vadd.f32 %v485_v8, %v484_v1 }
  0x93   :  { %v682_v12 = vsel %vm76_vm1, %v617_v9, 0.0 }
  0x94   :  { %v683_v13 = vadd.f32 %v682_v12, %v681_v4  ;;  %v1200_v48 = vpop.f32.mrf.mxu3 }
  0x98   :  { %v299_v16 = vpop.f32.mrf.mxu0  ;;  %v1184_v38 = vpop.f32.mrf.mxu2 }
  0x99   :  { %v487_v17 = vsel %vm76_vm1, %v299_v16, 0.0  ;;  %v618_v18 = vmul.f32 %v299_v16, %v299_v16  ;;  %v1159_v20 = vpop.f32.mrf.mxu1 }
  0x9a   :  { %v488_v19 = vadd.f32 %v487_v17, %v486_v11 }
  0x9b   :  { %v684_v21 = vsel %vm76_vm1, %v618_v18, 0.0 }
  0x9c   :  { %v685_v22 = vadd.f32 %v684_v21, %v683_v13  ;;  %v1206_v52 = vpop.f32.mrf.mxu3 }
  0xa0   :  { %v302_v24 = vpop.f32.mrf.mxu0  ;;  %v1192_v42 = vpop.f32.mrf.mxu2 }
  0xa1   :  { %v489_v26 = vsel %vm76_vm1, %v302_v24, 0.0  ;;  %v619_v27 = vmul.f32 %v302_v24, %v302_v24  ;;  %v1170_v31 = vpop.f32.mrf.mxu1 }
  0xa2   :  { %v490_v28 = vadd.f32 %v489_v26, %v488_v19 }
  0xa3   :  { %v686_v29 = vsel %vm76_vm1, %v619_v27, 0.0 }
  0xa4   :  { %v687_v30 = vadd.f32 %v686_v29, %v685_v22  ;;  %v1212_v57 = vpop.f32.mrf.mxu3 }
  0xa8   :  { %v305_v33 = vpop.f32.mrf.mxu0  ;;  %v1198_v46 = vpop.f32.mrf.mxu2 }
  0xa9   :  { %v1182_v36 = vpop.f32.mrf.mxu1  ;;  %v620_v60 = vmul.f32 %v305_v33, %v305_v33  ;;  %v491_v62 = vsel %vm76_vm1, %v305_v33, 0.0 }
  0xaa   :  { %v492_v5 = vadd.f32 %v491_v62, %v490_v28 }
  0xab   :  { %v688_v2 = vsel %vm76_vm1, %v620_v60, 0.0 }
  0xac   :  { %v1219_v1 = vpop.f32.mrf.mxu3  ;;  %v689_v9 = vadd.f32 %v688_v2, %v687_v30 }
  0xb0   :  { %v308_v37 = vpop.f32.mrf.mxu0  ;;  %v1204_v50 = vpop.f32.mrf.mxu2 }
  0xb1   :  { %v1190_v41 = vpop.f32.mrf.mxu1  ;;  %v621_v63 = vmul.f32 %v308_v37, %v308_v37  ;;  %v493_v3 = vsel %vm76_vm1, %v308_v37, 0.0 }
  0xb2   :  { %v494_v11 = vadd.f32 %v493_v3, %v492_v5 }
  0xb3   :  { %v690_v6 = vsel %vm76_vm1, %v621_v63, 0.0 }
  0xb4   :  { %v691_v16 = vadd.f32 %v690_v6, %v689_v9  ;;  %v1235_v33 = vpop.f32.mrf.mxu3 }
  0xb8   :  { %v311_v40 = vpop.f32.mrf.mxu0  ;;  %v1210_v55 = vpop.f32.mrf.mxu2 }
  0xb9   :  { %v1196_v45 = vpop.f32.mrf.mxu1  ;;  %v622_v4 = vmul.f32 %v311_v40, %v311_v40  ;;  %v495_v7 = vsel %vm76_vm1, %v311_v40, 0.0 }
  0xba   :  { %v496_v17 = vadd.f32 %v495_v7, %v494_v11 }
  0xbb   :  { %v692_v13 = vsel %vm76_vm1, %v622_v4, 0.0 }
  0xbc   :  { %v693_v23 = vadd.f32 %v692_v13, %v691_v16 }
  0xc0   :  { %v314_v43 = vpop.f32.mrf.mxu0  ;;  %v1216_v61 = vpop.f32.mrf.mxu2 }
  0xc1   :  { %v1202_v49 = vpop.f32.mrf.mxu1  ;;  %v623_v8 = vmul.f32 %v314_v43, %v314_v43  ;;  %v497_v14 = vsel %vm76_vm1, %v314_v43, 0.0 }
  0xc2   :  { %v498_v24 = vadd.f32 %v497_v14, %v496_v17 }
  0xc3   :  { %v694_v19 = vsel %vm76_vm1, %v623_v8, 0.0 }
  0xc4   :  { %v695_v30 = vadd.f32 %v694_v19, %v693_v23  ;;  %v1250_v19 = vpop.f32.mrf.mxu3 }
  0xc8   :  { %v317_v47 = vpop.f32.mrf.mxu0  ;;  %v1231_v26 = vpop.f32.mrf.mxu2 }
  0xc9   :  { %v1208_v53 = vpop.f32.mrf.mxu1  ;;  %v624_v15 = vmul.f32 %v317_v47, %v317_v47  ;;  %v499_v21 = vsel %vm76_vm1, %v317_v47, 0.0 }
  0xca   :  { %v500_v32 = vadd.f32 %v499_v21, %v498_v24 }
  0xcb   :  { %v696_v27 = vsel %vm76_vm1, %v624_v15, 0.0 }
  0xcc   :  { %v697_v40 = vadd.f32 %v696_v27, %v695_v30  ;;  %v513_v27 = vsel %vm76_vm1, %v1122_v56, 0.0 }
  0xd0   :  { %v320_v51 = vpop.f32.mrf.mxu0  ;;  %v1247_v14 = vpop.f32.mrf.mxu2 }
  0xd1   :  { %v1214_v59 = vpop.f32.mrf.mxu1  ;;  %v625_v22 = vmul.f32 %v320_v51, %v320_v51  ;;  %v501_v28 = vsel %vm76_vm1, %v320_v51, 0.0 }
  0xd2   :  { %v502_v43 = vadd.f32 %v501_v28, %v500_v32  ;;  %v632_v28 = vmul.f32 %v1134_v0, %v1134_v0 }
  0xd3   :  { %v698_v35 = vsel %vm76_vm1, %v625_v22, 0.0 }
  0xd4   :  { %v699_v2 = vadd.f32 %v698_v35, %v697_v40 }
  0xd8   :  { %v323_v54 = vpop.f32.mrf.mxu0 }
  0xd9   :  { %v1227_v18 = vpop.f32.mrf.mxu1  ;;  %v626_v29 = vmul.f32 %v323_v54, %v323_v54  ;;  %v503_v37 = vsel %vm76_vm1, %v323_v54, 0.0 }
  0xda   :  { %v504_v51 = vadd.f32 %v503_v37, %v502_v43  ;;  %v515_v37 = vsel %vm76_vm1, %v1134_v0, 0.0 }
  0xdb   :  { %v700_v60 = vsel %vm76_vm1, %v626_v29, 0.0 }
  0xdc   :  { %v701_v6 = vadd.f32 %v700_v60, %v699_v2  ;;  %v517_v60 = vsel %vm76_vm1, %v1147_v10, 0.0 }
  0xe0   :  { %v326_v58 = vpop.f32.mrf.mxu0 }
  0xe1   :  { %v627_v39 = vmul.f32 %v326_v58, %v326_v58  ;;  %v505_v62 = vsel %vm76_vm1, %v326_v58, 0.0  ;;  %v1243_v8 = vpop.f32.mrf.mxu1 }
  0xe2   :  { %v506_v7 = vadd.f32 %v505_v62, %v504_v51  ;;  %v634_v62 = vmul.f32 %v1159_v20, %v1159_v20  ;;  %v1272_v51 = vpop.f32.mrf.mxu2 }
  0xe3   :  { %v702_v3 = vsel %vm76_vm1, %v627_v39, 0.0  ;;  %v633_v39 = vmul.f32 %v1147_v10, %v1147_v10 }
  0xe4   :  { %v703_v11 = vadd.f32 %v702_v3, %v701_v6  ;;  %v519_v3 = vsel %vm76_vm1, %v1159_v20, 0.0  ;;  %v716_v10 = vsel %vm76_vm1, %v634_v62, 0.0  ;;  %v523_v20 = vsel %vm76_vm1, %v1182_v36, 0.0 }
  0xe5   :  { %v714_v0 = vsel %vm76_vm1, %v633_v39, 0.0 }
  0xe8   :  { %v329_v12 = vpop.f32.mrf.mxu0 }
  0xe9   :  { %v628_v63 = vmul.f32 %v329_v12, %v329_v12  ;;  %v507_v4 = vsel %vm76_vm1, %v329_v12, 0.0  ;;  %v631_v12 = vmul.f32 %v1122_v56, %v1122_v56  ;;  %v712_v56 = vsel %vm76_vm1, %v632_v28, 0.0 }
  0xea   :  { %v508_v13 = vadd.f32 %v507_v4, %v506_v7  ;;  %v635_v4 = vmul.f32 %v1170_v31, %v1170_v31  ;;  %v1279_v7 = vpop.f32.mrf.mxu3  ;;  %v639_v28 = vmul.f32 %v1202_v49, %v1202_v49 }
  0xeb   :  { %v704_v54 = vsel %vm76_vm1, %v628_v63, 0.0  ;;  %v710_v35 = vsel %vm76_vm1, %v631_v12, 0.0 }
  0xec   :  { %v705_v15 = vadd.f32 %v704_v54, %v703_v11  ;;  %v521_v54 = vsel %vm76_vm1, %v1170_v31, 0.0  ;;  %v525_v31 = vsel %vm76_vm1, %v1190_v41, 0.0 }
  0xf0   :  { %v332_v47 = vpop.f32.mrf.mxu0 }
  0xf1   :  { %v629_v5 = vmul.f32 %v332_v47, %v332_v47  ;;  %v509_v9 = vsel %vm76_vm1, %v332_v47, 0.0  ;;  %v1265_v47 = vpop.f32.mrf.mxu1 }
  0xf2   :  { %v510_v16 = vadd.f32 %v509_v9, %v508_v13  ;;  %v636_v9 = vmul.f32 %v1182_v36, %v1182_v36  ;;  %v527_v36 = vsel %vm76_vm1, %v1196_v45, 0.0 }
  0xf3   :  { %v706_v58 = vsel %vm76_vm1, %v629_v5, 0.0 }
  0xf4   :  { %v707_v23 = vadd.f32 %v706_v58, %v705_v15  ;;  %v718_v58 = vsel %vm76_vm1, %v635_v4, 0.0  ;;  %v637_v15 = vmul.f32 %v1190_v41, %v1190_v41  ;;  %v720_v12 = vsel %vm76_vm1, %v636_v9, 0.0 }
  0xf8   :  { %v335_v17 = vpop.f32.mrf.mxu0 }
  0xf9   :  { %v511_v21 = vsel %vm76_vm1, %v335_v17, 0.0  ;;  %v630_v22 = vmul.f32 %v335_v17, %v335_v17 }
  0xfa   :  { %v512_v24 = vadd.f32 %v511_v21, %v510_v16  ;;  %v638_v21 = vmul.f32 %v1196_v45, %v1196_v45  ;;  %v726_v45 = vsel %vm76_vm1, %v639_v28, 0.0 }
  0xfb   :  { %v708_v29 = vsel %vm76_vm1, %v630_v22, 0.0 }
  0xfc   :  { %v514_v30 = vadd.f32 %v513_v27, %v512_v24  ;;  %v709_v32 = vadd.f32 %v708_v29, %v707_v23  ;;  %v380_v24 = vpop.f32.mrf.mxu1  ;;  %v722_v27 = vsel %vm76_vm1, %v637_v15, 0.0  ;;  %v724_v41 = vsel %vm76_vm1, %v638_v21, 0.0 }
  0xfe   :  { %v516_v40 = vadd.f32 %v515_v37, %v514_v30  ;;  %v711_v43 = vadd.f32 %v710_v35, %v709_v32  ;;  %v1301_v32 = vpop.f32.mrf.mxu2  ;;  %v529_v35 = vsel %vm76_vm1, %v1202_v49, 0.0  ;;  %v640_v37 = vmul.f32 %v1208_v53, %v1208_v53 }
  0xff   :  { %v533_v49 = vsel %vm76_vm1, %v1214_v59, 0.0 }
 0x100   :  { %v518_v63 = vadd.f32 %v517_v60, %v516_v40  ;;  %v713_v2 = vadd.f32 %v712_v56, %v711_v43  ;;  %v1308_v43 = vpop.f32.mrf.mxu3  ;;  %v531_v56 = vsel %vm76_vm1, %v1208_v53, 0.0  ;;  %v641_v60 = vmul.f32 %v1214_v59, %v1214_v59 }
 0x101   :  { %v535_v53 = vsel %vm76_vm1, %v1227_v18, 0.0  ;;  %v537_v59 = vsel %vm76_vm1, %v1243_v8, 0.0 }
 0x102   :  { %v520_v5 = vadd.f32 %v519_v3, %v518_v63  ;;  %v715_v6 = vadd.f32 %v714_v0, %v713_v2  ;;  %v728_v2 = vsel %vm76_vm1, %v640_v37, 0.0  ;;  %v642_v0 = vmul.f32 %v1227_v18, %v1227_v18 }
 0x103   :  { %v545_v37 = vsel %vm76_vm1, %v1166_v25, 0.0 }
 0x104   :  { %v522_v11 = vadd.f32 %v521_v54, %v520_v5  ;;  %v717_v13 = vadd.f32 %v716_v10, %v715_v6  ;;  %v730_v5 = vsel %vm76_vm1, %v641_v60, 0.0  ;;  %v643_v6 = vmul.f32 %v1243_v8, %v1243_v8  ;;  %v383_v9 = vpop.f32.mrf.mxu1 }
 0x105   :  { %v649_v60 = vmul.f32 %v1184_v38, %v1184_v38 }
 0x106   :  { %v524_v16 = vadd.f32 %v523_v20, %v522_v11  ;;  %v719_v17 = vadd.f32 %v718_v58, %v717_v13  ;;  %v732_v11 = vsel %vm76_vm1, %v642_v0, 0.0  ;;  %v644_v13 = vmul.f32 %v1265_v47, %v1265_v47  ;;  %v1330_v15 = vpop.f32.mrf.mxu2 }
 0x107   :  { %v734_v18 = vsel %vm76_vm1, %v643_v6, 0.0  ;;  %v650_v0 = vmul.f32 %v1192_v42, %v1192_v42  ;;  %v651_v6 = vmul.f32 %v1198_v46, %v1198_v46 }
 0x108   :  { %v721_v22 = vadd.f32 %v720_v12, %v719_v17  ;;  %v526_v23 = vadd.f32 %v525_v31, %v524_v16  ;;  %v539_v16 = vsel %vm76_vm1, %v1265_v47, 0.0  ;;  %v645_v17 = vmul.f32 %v380_v24, %v380_v24 }
 0x109   :  { %v646_v12 = vmul.f32 %v383_v9, %v383_v9  ;;  %v736_v8 = vsel %vm76_vm1, %v644_v13, 0.0 }
 0x10a   :  { %v528_v29 = vadd.f32 %v527_v36, %v526_v23  ;;  %v723_v30 = vadd.f32 %v722_v27, %v721_v22  ;;  %v1335_v22 = vpop.f32.mrf.mxu3  ;;  %v541_v23 = vsel %vm76_vm1, %v380_v24, 0.0  ;;  %v543_v27 = vsel %vm76_vm1, %v383_v9, 0.0 }
 0x10b   :  { %v740_v47 = vsel %vm76_vm1, %v646_v12, 0.0  ;;  %v748_v9 = vsel %vm76_vm1, %v650_v0, 0.0  ;;  %v654_v12 = vmul.f32 %v1216_v61, %v1216_v61 }
 0x10c   :  { %v530_v39 = vadd.f32 %v529_v35, %v528_v29  ;;  %v725_v40 = vadd.f32 %v724_v41, %v723_v30  ;;  %v647_v29 = vmul.f32 %v1166_v25, %v1166_v25  ;;  %v738_v30 = vsel %vm76_vm1, %v645_v17, 0.0 }
 0x10d   :  { %v549_v25 = vsel %vm76_vm1, %v1184_v38, 0.0  ;;  %v553_v38 = vsel %vm76_vm1, %v1198_v46, 0.0  ;;  %v557_v46 = vsel %vm76_vm1, %v1210_v55, 0.0 }
 0x10e   :  { %v532_v62 = vadd.f32 %v531_v56, %v530_v39  ;;  %v727_v63 = vadd.f32 %v726_v45, %v725_v40  ;;  %v648_v39 = vmul.f32 %v1176_v34, %v1176_v34  ;;  %v742_v45 = vsel %vm76_vm1, %v647_v29, 0.0 }
 0x10f   :  { %v547_v56 = vsel %vm76_vm1, %v1176_v34, 0.0  ;;  %v746_v34 = vsel %vm76_vm1, %v649_v60, 0.0 }
 0x110   :  { %v534_v3 = vadd.f32 %v533_v49, %v532_v62  ;;  %v729_v4 = vadd.f32 %v728_v2, %v727_v63  ;;  %v425_v2 = vpop.f32.mrf.mxu2  ;;  %v744_v49 = vsel %vm76_vm1, %v648_v39, 0.0  ;;  %v657_v39 = vmul.f32 %v1272_v51, %v1272_v51 }
 0x112   :  { %v536_v10 = vadd.f32 %v535_v53, %v534_v3  ;;  %v731_v54 = vadd.f32 %v730_v5, %v729_v4  ;;  %v1358_v5 = vpop.f32.mrf.mxu3  ;;  %v551_v53 = vsel %vm76_vm1, %v1192_v42, 0.0  ;;  %v555_v42 = vsel %vm76_vm1, %v1204_v50, 0.0 }
 0x114   :  { %v733_v58 = vadd.f32 %v732_v11, %v731_v54  ;;  %v538_v20 = vadd.f32 %v537_v59, %v536_v10  ;;  %v652_v11 = vmul.f32 %v1204_v50, %v1204_v50  ;;  %v559_v50 = vsel %vm76_vm1, %v1216_v61, 0.0 }
 0x115   :  { %v563_v61 = vsel %vm76_vm1, %v1247_v14, 0.0 }
 0x116   :  { %v735_v31 = vadd.f32 %v734_v18, %v733_v58  ;;  %v540_v21 = vadd.f32 %v539_v16, %v538_v20  ;;  %v750_v58 = vsel %vm76_vm1, %v651_v6, 0.0  ;;  %v653_v20 = vmul.f32 %v1210_v55, %v1210_v55 }
 0x117   :  { %v752_v17 = vsel %vm76_vm1, %v652_v11, 0.0  ;;  %v756_v55 = vsel %vm76_vm1, %v654_v12, 0.0  ;;  %v577_v12 = vsel %vm76_vm1, %v1194_v44, 0.0 }
 0x118   :  { %v737_v36 = vadd.f32 %v736_v8, %v735_v31  ;;  %v542_v28 = vadd.f32 %v541_v23, %v540_v21  ;;  %v428_v8 = vpop.f32.mrf.mxu2  ;;  %v754_v23 = vsel %vm76_vm1, %v653_v20, 0.0 }
 0x11a   :  { %v739_v41 = vadd.f32 %v738_v30, %v737_v36  ;;  %v544_v35 = vadd.f32 %v543_v27, %v542_v28  ;;  %v655_v27 = vmul.f32 %v1231_v26, %v1231_v26  ;;  %v1385_v29 = vpop.f32.mrf.mxu3  ;;  %v561_v30 = vsel %vm76_vm1, %v1231_v26, 0.0 }
 0x11b   :  { %v565_v26 = vsel %vm76_vm1, %v1272_v51, 0.0  ;;  %v569_v51 = vsel %vm76_vm1, %v1330_v15, 0.0 }
 0x11c   :  { %v546_v24 = vadd.f32 %v545_v37, %v544_v35  ;;  %v741_v40 = vadd.f32 %v740_v47, %v739_v41  ;;  %v656_v47 = vmul.f32 %v1247_v14, %v1247_v14  ;;  %v758_v37 = vsel %vm76_vm1, %v655_v27, 0.0 }
 0x11d   :  { %v567_v14 = vsel %vm76_vm1, %v1301_v32, 0.0  ;;  %v665_v27 = vmul.f32 %v1206_v52, %v1206_v52 }
 0x11e   :  { %v548_v62 = vadd.f32 %v547_v56, %v546_v24  ;;  %v743_v63 = vadd.f32 %v742_v45, %v741_v40  ;;  %v760_v45 = vsel %vm76_vm1, %v656_v47, 0.0  ;;  %v658_v56 = vmul.f32 %v1301_v32, %v1301_v32 }
 0x11f   :  { %v571_v32 = vsel %vm76_vm1, %v425_v2, 0.0  ;;  %v666_v47 = vmul.f32 %v1212_v57, %v1212_v57 }
 0x120   :  { %v550_v3 = vadd.f32 %v549_v25, %v548_v62  ;;  %v745_v4 = vadd.f32 %v744_v49, %v743_v63  ;;  %v762_v63 = vsel %vm76_vm1, %v657_v39, 0.0  ;;  %v659_v49 = vmul.f32 %v1330_v15, %v1330_v15 }
 0x122   :  { %v552_v10 = vadd.f32 %v551_v53, %v550_v3  ;;  %v747_v54 = vadd.f32 %v746_v34, %v745_v4  ;;  %v431_v3 = vpop.f32.mrf.mxu2  ;;  %v764_v4 = vsel %vm76_vm1, %v658_v56, 0.0  ;;  %v660_v34 = vmul.f32 %v425_v2, %v425_v2 }
 0x124   :  { %v554_v59 = vadd.f32 %v553_v38, %v552_v10  ;;  %v749_v13 = vadd.f32 %v748_v9, %v747_v54  ;;  %v1410_v10 = vpop.f32.mrf.mxu3  ;;  %v766_v54 = vsel %vm76_vm1, %v659_v49, 0.0  ;;  %v661_v9 = vmul.f32 %v428_v8, %v428_v8 }
 0x125   :  { %v662_v38 = vmul.f32 %v431_v3, %v431_v3 }
 0x126   :  { %v556_v18 = vadd.f32 %v555_v42, %v554_v59  ;;  %v751_v16 = vadd.f32 %v750_v58, %v749_v13  ;;  %v768_v13 = vsel %vm76_vm1, %v660_v34, 0.0  ;;  %v573_v58 = vsel %vm76_vm1, %v428_v8, 0.0 }
 0x127   :  { %v575_v42 = vsel %vm76_vm1, %v431_v3, 0.0  ;;  %v671_v34 = vmul.f32 %v1308_v43, %v1308_v43 }
 0x128   :  { %v753_v31 = vadd.f32 %v752_v17, %v751_v16  ;;  %v558_v21 = vadd.f32 %v557_v46, %v556_v18  ;;  %v663_v18 = vmul.f32 %v1194_v44, %v1194_v44  ;;  %v770_v16 = vsel %vm76_vm1, %v661_v9, 0.0 }
 0x129   :  { %v772_v17 = vsel %vm76_vm1, %v662_v38, 0.0  ;;  %v581_v44 = vsel %vm76_vm1, %v1206_v52, 0.0  ;;  %v585_v52 = vsel %vm76_vm1, %v1219_v1, 0.0 }
 0x12a   :  { %v560_v36 = vadd.f32 %v559_v50, %v558_v21  ;;  %v755_v28 = vadd.f32 %v754_v23, %v753_v31  ;;  %v664_v31 = vmul.f32 %v1200_v48, %v1200_v48  ;;  %v774_v23 = vsel %vm76_vm1, %v663_v18, 0.0 }
 0x12b   :  { %v579_v50 = vsel %vm76_vm1, %v1200_v48, 0.0  ;;  %v583_v48 = vsel %vm76_vm1, %v1212_v57, 0.0  ;;  %v587_v57 = vsel %vm76_vm1, %v1235_v33, 0.0 }
 0x12c   :  { %v562_v41 = vadd.f32 %v561_v30, %v560_v36  ;;  %v757_v35 = vadd.f32 %v756_v55, %v755_v28  ;;  %v473_v55 = vpop.f32.mrf.mxu3  ;;  %v776_v30 = vsel %vm76_vm1, %v664_v31, 0.0 }
 0x12e   :  { %v564_v24 = vadd.f32 %v563_v61, %v562_v41  ;;  %v759_v40 = vadd.f32 %v758_v37, %v757_v35  ;;  %v778_v37 = vsel %vm76_vm1, %v665_v27, 0.0  ;;  %v667_v61 = vmul.f32 %v1219_v1, %v1219_v1 }
 0x12f   :  { %v589_v1 = vsel %vm76_vm1, %v1250_v19, 0.0  ;;  %v603_v27 = vsel %vm76_vm1, %v473_v55, 0.0 }
 0x130   :  { %v566_v60 = vadd.f32 %v565_v26, %v564_v24  ;;  %v761_v62 = vadd.f32 %v760_v45, %v759_v40  ;;  %v780_v40 = vsel %vm76_vm1, %v666_v47, 0.0  ;;  %v668_v45 = vmul.f32 %v1235_v33, %v1235_v33 }
 0x131   :  { %v591_v33 = vsel %vm76_vm1, %v1279_v7, 0.0 }
 0x132   :  { %v568_v25 = vadd.f32 %v567_v14, %v566_v60  ;;  %v763_v0 = vadd.f32 %v762_v63, %v761_v62  ;;  %v782_v60 = vsel %vm76_vm1, %v667_v61, 0.0  ;;  %v669_v62 = vmul.f32 %v1250_v19, %v1250_v19 }
 0x133   :  { %v784_v49 = vsel %vm76_vm1, %v668_v45, 0.0  ;;  %v593_v19 = vsel %vm76_vm1, %v1308_v43, 0.0  ;;  %v597_v43 = vsel %vm76_vm1, %v1358_v5, 0.0 }
 0x134   :  { %v765_v53 = vadd.f32 %v764_v4, %v763_v0  ;;  %v570_v6 = vadd.f32 %v569_v51, %v568_v25  ;;  %v670_v25 = vmul.f32 %v1279_v7, %v1279_v7  ;;  %v476_v4 = vpop.f32.mrf.mxu3  ;;  %v786_v51 = vsel %vm76_vm1, %v669_v62, 0.0 }
 0x135   :  { %v595_v7 = vsel %vm76_vm1, %v1335_v22, 0.0  ;;  %v605_v47 = vsel %vm76_vm1, %v476_v4, 0.0 }
 0x136   :  { %v767_v11 = vadd.f32 %v766_v54, %v765_v53  ;;  %v572_v59 = vadd.f32 %v571_v32, %v570_v6  ;;  %v788_v54 = vsel %vm76_vm1, %v670_v25, 0.0  ;;  %v672_v32 = vmul.f32 %v1335_v22, %v1335_v22 }
 0x137   :  { %v599_v22 = vsel %vm76_vm1, %v1385_v29, 0.0 }
 0x138   :  { %v769_v15 = vadd.f32 %v768_v13, %v767_v11  ;;  %v574_v20 = vadd.f32 %v573_v58, %v572_v59  ;;  %v790_v11 = vsel %vm76_vm1, %v671_v34, 0.0  ;;  %v673_v59 = vmul.f32 %v1358_v5, %v1358_v5 }
 0x139   :  { %v601_v5 = vsel %vm76_vm1, %v1410_v10, 0.0 }
 0x13a   :  { %v771_v2 = vadd.f32 %v770_v16, %v769_v15  ;;  %v576_v46 = vadd.f32 %v575_v42, %v574_v20  ;;  %v792_v42 = vsel %vm76_vm1, %v672_v32, 0.0  ;;  %v674_v15 = vmul.f32 %v1385_v29, %v1385_v29 }
 0x13b   :  { %v794_v16 = vsel %vm76_vm1, %v673_v59, 0.0 }
 0x13c   :  { %v578_v21 = vadd.f32 %v577_v12, %v576_v46  ;;  %v773_v8 = vadd.f32 %v772_v17, %v771_v2  ;;  %v675_v17 = vmul.f32 %v1410_v10, %v1410_v10  ;;  %v479_v12 = vpop.f32.mrf.mxu3  ;;  %v796_v31 = vsel %vm76_vm1, %v674_v15, 0.0 }
 0x13d   :  { %v678_v29 = vmul.f32 %v479_v12, %v479_v12 }
 0x13e   :  { %v580_v36 = vadd.f32 %v579_v50, %v578_v21  ;;  %v775_v28 = vadd.f32 %v774_v23, %v773_v8  ;;  %v676_v21 = vmul.f32 %v473_v55, %v473_v55  ;;  %v798_v50 = vsel %vm76_vm1, %v675_v17, 0.0 }
 0x140   :  { %v582_v41 = vadd.f32 %v581_v44, %v580_v36  ;;  %v777_v35 = vadd.f32 %v776_v30, %v775_v28  ;;  %v677_v36 = vmul.f32 %v476_v4, %v476_v4  ;;  %v800_v44 = vsel %vm76_vm1, %v676_v21, 0.0 }
 0x142   :  { %v584_v39 = vadd.f32 %v583_v48, %v582_v41  ;;  %v779_v24 = vadd.f32 %v778_v37, %v777_v35  ;;  %v607_v41 = vsel %vm76_vm1, %v479_v12, 0.0  ;;  %v802_v10 = vsel %vm76_vm1, %v677_v36, 0.0 }
 0x143   :  { %v804_v48 = vsel %vm76_vm1, %v678_v29, 0.0 }
 0x144   :  { %v586_v26 = vadd.f32 %v585_v52, %v584_v39  ;;  %v781_v56 = vadd.f32 %v780_v40, %v779_v24 }
 0x146   :  { %v588_v63 = vadd.f32 %v587_v57, %v586_v26  ;;  %v783_v14 = vadd.f32 %v782_v60, %v781_v56 }
 0x148   :  { %v785_v0 = vadd.f32 %v784_v49, %v783_v14  ;;  %v590_v3 = vadd.f32 %v589_v1, %v588_v63 }
 0x14a   :  { %v592_v53 = vadd.f32 %v591_v33, %v590_v3  ;;  %v787_v6 = vadd.f32 %v786_v51, %v785_v0 }
 0x14c   :  { %v594_v9 = vadd.f32 %v593_v19, %v592_v53  ;;  %v789_v38 = vadd.f32 %v788_v54, %v787_v6 }
 0x14e   :  { %v596_v13 = vadd.f32 %v595_v7, %v594_v9  ;;  %v791_v58 = vadd.f32 %v790_v11, %v789_v38 }
 0x150   :  { %v598_v20 = vadd.f32 %v597_v43, %v596_v13  ;;  %v793_v18 = vadd.f32 %v792_v42, %v791_v58 }
 0x152   :  { %v600_v2 = vadd.f32 %v599_v22, %v598_v20  ;;  %v795_v46 = vadd.f32 %v794_v16, %v793_v18 }
 0x154   :  { %v797_v8 = vadd.f32 %v796_v31, %v795_v46  ;;  %v602_v23 = vadd.f32 %v601_v5, %v600_v2 }
 0x156   :  { %v799_v28 = vadd.f32 %v798_v50, %v797_v8  ;;  %v604_v30 = vadd.f32 %v603_v27, %v602_v23 }
 0x158   :  { %v801_v35 = vadd.f32 %v800_v44, %v799_v28  ;;  %v606_v37 = vadd.f32 %v605_v47, %v604_v30 }
 0x15a   :  { %v803_v61 = vadd.f32 %v802_v10, %v801_v35  ;;  %v608_v39 = vadd.f32 %v607_v41, %v606_v37 }
 0x15c   :  { %v609_v24 = vrot.slane %v608_v39, 4  ;;  %v805_v55 = vadd.f32 %v804_v48, %v803_v61 }
 0x15e   :  { %v610_v40 = vadd.f32 %v609_v24, %v608_v39  ;;  %v806_v52 = vrot.slane %v805_v55, 4 }
 0x160   :  { %v611_v45 = vrot.slane %v610_v40, 2  ;;  %v807_v26 = vadd.f32 %v806_v52, %v805_v55 }
 0x162   :  { %v612_v56 = vadd.f32 %v611_v45, %v610_v40  ;;  %v808_v60 = vrot.slane %v807_v26, 2 }
 0x164   :  { %v613_v57 = vrot.slane %v612_v56, 1  ;;  %v809_v62 = vadd.f32 %v808_v60, %v807_v26 }
 0x166   :  { %v810_v63 = vrot.slane %v809_v62, 1  ;;  %v614_v14 = vadd.f32 %v613_v57, %v612_v56 }
 0x168   :  { %v811_v49 = vadd.f32 %v810_v63, %v809_v62 }
 0x16a   :  { %v813_v1 = vsel %vm812_vm2, %v614_v14, %v811_v49 }
 0x16b   :  { %815 = vst.msk [vmem:[%s1495_s2] sm:$0x3] %vm814_vm3, %v813_v1 }

// kernel: trans_block_forward.7
= control target key start
LH: loop header
LB: loop body
LE: loop exit
PB: predicated region body
PF: predicated region fallthrough
CT: control target
= control target key end

     0   :  { %s930_s12 = smov 0   ;;  %s1611_s0 = inlined_call_operand.vmem [shape: f32[2048,8], index: 0, kind: input, shape index: {}]   ;;  %s1612_s1 = inlined_call_operand.vmem [shape: f32[1,8], index: 1, kind: input, shape index: {}]   ;;  %s1613_s2 = inlined_call_operand.vmem [shape: f32[1,8], index: 2, kind: input, shape index: {}]   ;;  %s1614_s3 = inlined_call_operand.vmem [shape: f32[2048,8], index: 3, kind: output, shape index: {}]  }
   0x1 LB: > { %s879_s13 = sadd.s32 4294967295, %s908_s12   ;;  %p883_p0 = scmp.ge.s32.totalorder %s908_s12, 1  ;;  %s908_s12 = sphi %s930_s12, %s13_s12  }
   0x2   : > { %p138_p1 = scmp.lt.s32.totalorder %s908_s12, 3 }
   0x4   : > { %p139_p2 = pnand %p883_p0, %p138_p1 }
   0x5   : > { %s884_s14 = sshll.u32 (!%p139_p2), %s879_s13, 7 }
   0x6   : > { %142 = sbr.rel (%p139_p2) target bundleno = 149 (0x95), region = 32  ;;  %p163_p3 = scmp.lt.s32.totalorder (!%p139_p2), %s884_s14, 255 }
   0xb   : > { %s1616_s14 = smov (!%p163_p3, %s884_s14), 255  ;;  %v941_v0 = vld [vmem:[%s1612_s1] ss:$0 sm:$0xff]  ;;  %vm694_vm0 = vcmask 64512  }
   0xc   : > { %s885_s17 = sshll.u32 %s1616_s14, 3  ;;  %v951_v1 = vld [vmem:[%s1613_s2] ss:$0 sm:$0xff] }
   0xd   : > { %s946_s20 = scalar_lea.vmem %s1611_s0, %s885_s17  ;;  %s974_s25 = scalar_lea.vmem %s1614_s3, %s885_s17 }
   0xe   : > { %v174_v2 = vld [vmem:[%s946_s20] sm:$0xff]  ;;  %v175_v3 = vld [vmem:[%s946_s20 + $0x8] sm:$0xff]  ;;  %v176_v4 = vld [vmem:[%s946_s20 + $0x10] sm:$0xff] }
   0xf   : > { %v306_v5 = vmul.f32 %v941_v0, %v174_v2  ;;  %v307_v6 = vmul.f32 %v941_v0, %v175_v3  ;;  %v308_v7 = vmul.f32 %v941_v0, %v176_v4  ;;  %v177_v8 = vld [vmem:[%s946_s20 + $0x18] sm:$0xff]  ;;  %v178_v9 = vld [vmem:[%s946_s20 + $0x20] sm:$0xff]  ;;  %v179_v10 = vld [vmem:[%s946_s20 + $0x28] sm:$0xff] }
  0x10   : > { %v309_v11 = vmul.f32 %v941_v0, %v177_v8  ;;  %v310_v12 = vmul.f32 %v941_v0, %v178_v9  ;;  %v311_v13 = vmul.f32 %v941_v0, %v179_v10  ;;  %v180_v14 = vld [vmem:[%s946_s20 + $0x30] sm:$0xff]  ;;  %v181_v15 = vld [vmem:[%s946_s20 + $0x38] sm:$0xff]  ;;  %v182_v24 = vld [vmem:[%s946_s20 + $0x40] sm:$0xff] }
  0x11   : > { %v438_v16 = vadd.f32 %v951_v1, %v306_v5  ;;  %v439_v17 = vadd.f32 %v951_v1, %v307_v6  ;;  %v440_v18 = vadd.f32 %v951_v1, %v308_v7  ;;  %v312_v19 = vmul.f32 %v941_v0, %v180_v14  ;;  %v183_v25 = vld [vmem:[%s946_s20 + $0x48] sm:$0xff]  ;;  %v184_v26 = vld [vmem:[%s946_s20 + $0x50] sm:$0xff]  ;;  %v185_v31 = vld [vmem:[%s946_s20 + $0x58] sm:$0xff] }
  0x12   : > { %v441_v20 = vadd.f32 %v951_v1, %v309_v11  ;;  %v442_v21 = vadd.f32 %v951_v1, %v310_v12  ;;  %v443_v22 = vadd.f32 %v951_v1, %v311_v13  ;;  %v313_v23 = vmul.f32 %v941_v0, %v181_v15  ;;  %v186_v32 = vld [vmem:[%s946_s20 + $0x60] sm:$0xff]  ;;  %v187_v33 = vld [vmem:[%s946_s20 + $0x68] sm:$0xff]  ;;  %v188_v37 = vld [vmem:[%s946_s20 + $0x70] sm:$0xff] }
  0x13   : > { %v566_v27 = vmax.f32 %v438_v16, 0.0  ;;  %v567_v28 = vmax.f32 %v439_v17, 0.0  ;;  %v568_v29 = vmax.f32 %v440_v18, 0.0  ;;  %v444_v30 = vadd.f32 %v951_v1, %v312_v19  ;;  %v189_v42 = vld [vmem:[%s946_s20 + $0x78] sm:$0xff]  ;;  %v190_v54 = vld [vmem:[%s946_s20 + $0x80] sm:$0xff]  ;;  %v191_v55 = vld [vmem:[%s946_s20 + $0x88] sm:$0xff] }
  0x14   : > { %v569_v34 = vmax.f32 %v441_v20, 0.0  ;;  %v570_v35 = vmax.f32 %v442_v21, 0.0  ;;  %v445_v36 = vadd.f32 %v951_v1, %v313_v23  ;;  %v571_v38 = vmax.f32 %v443_v22, 0.0  ;;  %v192_v56 = vld [vmem:[%s946_s20 + $0x90] sm:$0xff]  ;;  %v193_v59 = vld [vmem:[%s946_s20 + $0x98] sm:$0xff]  ;;  %v194_v63 = vld [vmem:[%s946_s20 + $0xa0] sm:$0xff] }
  0x15   : > { %695 = vst.msk [vmem:[%s974_s25] sm:$0xff] %vm694_vm0, %v566_v27  ;;  %v314_v39 = vmul.f32 %v941_v0, %v182_v24  ;;  %v315_v40 = vmul.f32 %v941_v0, %v183_v25  ;;  %v316_v41 = vmul.f32 %v941_v0, %v184_v26  ;;  %v572_v43 = vmax.f32 %v444_v30, 0.0  ;;  %v195_v6 = vld [vmem:[%s946_s20 + $0xa8] sm:$0xff]  ;;  %v196_v10 = vld [vmem:[%s946_s20 + $0xb0] sm:$0xff]  ;;  %v197_v14 = vld [vmem:[%s946_s20 + $0xb8] sm:$0xff] }
  0x16   : > { %696 = vst.msk [vmem:[%s974_s25 + $0x8] sm:$0xff] %vm694_vm0, %v567_v28  ;;  %v317_v44 = vmul.f32 %v941_v0, %v185_v31  ;;  %v318_v45 = vmul.f32 %v941_v0, %v186_v32  ;;  %v319_v46 = vmul.f32 %v941_v0, %v187_v33  ;;  %v320_v50 = vmul.f32 %v941_v0, %v188_v37  ;;  %v198_v18 = vld [vmem:[%s946_s20 + $0xc0] sm:$0xff]  ;;  %v199_v22 = vld [vmem:[%s946_s20 + $0xc8] sm:$0xff]  ;;  %v200_v26 = vld [vmem:[%s946_s20 + $0xd0] sm:$0xff] }
  0x17   : > { %697 = vst.msk [vmem:[%s974_s25 + $0x10] sm:$0xff] %vm694_vm0, %v568_v29  ;;  %v446_v47 = vadd.f32 %v951_v1, %v314_v39  ;;  %v447_v48 = vadd.f32 %v951_v1, %v315_v40  ;;  %v448_v49 = vadd.f32 %v951_v1, %v316_v41  ;;  %v573_v51 = vmax.f32 %v445_v36, 0.0  ;;  %v201_v30 = vld [vmem:[%s946_s20 + $0xd8] sm:$0xff] }
  0x18   : > { %698 = vst.msk [vmem:[%s974_s25 + $0x18] sm:$0xff] %vm694_vm0, %v569_v34  ;;  %v449_v52 = vadd.f32 %v951_v1, %v317_v44  ;;  %v321_v53 = vmul.f32 %v941_v0, %v189_v42  ;;  %v450_v58 = vadd.f32 %v951_v1, %v318_v45  ;;  %v451_v62 = vadd.f32 %v951_v1, %v319_v46  ;;  %v202_v34 = vld [vmem:[%s946_s20 + $0xe0] sm:$0xff]  ;;  %v204_v42 = vld [vmem:[%s946_s20 + $0xf0] sm:$0xff]  ;;  %v205_v46 = vld [vmem:[%s946_s20 + $0xf8] sm:$0xff] }
  0x19   : > { %699 = vst.msk [vmem:[%s974_s25 + $0x20] sm:$0xff] %vm694_vm0, %v570_v35  ;;  %v574_v57 = vmax.f32 %v446_v47, 0.0  ;;  %v575_v60 = vmax.f32 %v447_v48, 0.0  ;;  %v576_v61 = vmax.f32 %v448_v49, 0.0  ;;  %v452_v2 = vadd.f32 %v951_v1, %v320_v50  ;;  %v206_v50 = vld [vmem:[%s946_s20 + $0x100] sm:$0xff] }
  0x1a   : > { %700 = vst.msk [vmem:[%s974_s25 + $0x28] sm:$0xff] %vm694_vm0, %v571_v38  ;;  %v322_v3 = vmul.f32 %v941_v0, %v190_v54  ;;  %v323_v4 = vmul.f32 %v941_v0, %v191_v55  ;;  %v324_v5 = vmul.f32 %v941_v0, %v192_v56  ;;  %v577_v7 = vmax.f32 %v449_v52, 0.0  ;;  %v203_v38 = vld [vmem:[%s946_s20 + $0xe8] sm:$0xff] }
  0x1b   : > { %701 = vst.msk [vmem:[%s974_s25 + $0x30] sm:$0xff] %vm694_vm0, %v572_v43  ;;  %v453_v8 = vadd.f32 %v951_v1, %v321_v53  ;;  %v325_v9 = vmul.f32 %v941_v0, %v193_v59  ;;  %v578_v11 = vmax.f32 %v450_v58, 0.0  ;;  %v326_v13 = vmul.f32 %v941_v0, %v194_v63  ;;  %v207_v54 = vld [vmem:[%s946_s20 + $0x108] sm:$0xff]  ;;  %v208_v58 = vld [vmem:[%s946_s20 + $0x110] sm:$0xff] }
  0x1c   : > { %702 = vst.msk [vmem:[%s974_s25 + $0x38] sm:$0xff] %vm694_vm0, %v573_v51  ;;  %v454_v12 = vadd.f32 %v951_v1, %v322_v3  ;;  %v579_v15 = vmax.f32 %v451_v62, 0.0  ;;  %v455_v16 = vadd.f32 %v951_v1, %v323_v4  ;;  %v327_v17 = vmul.f32 %v941_v0, %v195_v6  ;;  %v209_v62 = vld [vmem:[%s946_s20 + $0x118] sm:$0xff]  ;;  %v210_v4 = vld [vmem:[%s946_s20 + $0x120] sm:$0xff] }
  0x1d   : > { %703 = vst.msk [vmem:[%s974_s25 + $0x40] sm:$0xff] %vm694_vm0, %v574_v57  ;;  %v580_v19 = vmax.f32 %v452_v2, 0.0  ;;  %v456_v20 = vadd.f32 %v951_v1, %v324_v5  ;;  %v328_v21 = vmul.f32 %v941_v0, %v196_v10  ;;  %v581_v23 = vmax.f32 %v453_v8, 0.0  ;;  %v211_v8 = vld [vmem:[%s946_s20 + $0x128] sm:$0xff] }
  0x1e   : > { %704 = vst.msk [vmem:[%s974_s25 + $0x48] sm:$0xff] %vm694_vm0, %v575_v60  ;;  %v457_v24 = vadd.f32 %v951_v1, %v325_v9  ;;  %v329_v25 = vmul.f32 %v941_v0, %v197_v14  ;;  %v582_v27 = vmax.f32 %v454_v12, 0.0  ;;  %v458_v28 = vadd.f32 %v951_v1, %v326_v13  ;;  %v212_v12 = vld [vmem:[%s946_s20 + $0x130] sm:$0xff] }
  0x1f   : > { %705 = vst.msk [vmem:[%s974_s25 + $0x50] sm:$0xff] %vm694_vm0, %v576_v61  ;;  %v330_v29 = vmul.f32 %v941_v0, %v198_v18  ;;  %v583_v31 = vmax.f32 %v455_v16, 0.0  ;;  %v459_v32 = vadd.f32 %v951_v1, %v327_v17  ;;  %v331_v33 = vmul.f32 %v941_v0, %v199_v22  ;;  %v213_v16 = vld [vmem:[%s946_s20 + $0x138] sm:$0xff] }
  0x20   : > { %706 = vst.msk [vmem:[%s974_s25 + $0x58] sm:$0xff] %vm694_vm0, %v577_v7  ;;  %v584_v35 = vmax.f32 %v456_v20, 0.0  ;;  %v460_v36 = vadd.f32 %v951_v1, %v328_v21  ;;  %v332_v37 = vmul.f32 %v941_v0, %v200_v26  ;;  %v585_v39 = vmax.f32 %v457_v24, 0.0  ;;  %v214_v20 = vld [vmem:[%s946_s20 + $0x140] sm:$0xff]  ;;  %v215_v24 = vld [vmem:[%s946_s20 + $0x148] sm:$0xff] }
  0x21   : > { %707 = vst.msk [vmem:[%s974_s25 + $0x60] sm:$0xff] %vm694_vm0, %v578_v11  ;;  %v461_v40 = vadd.f32 %v951_v1, %v329_v25  ;;  %v333_v41 = vmul.f32 %v941_v0, %v201_v30  ;;  %v586_v43 = vmax.f32 %v458_v28, 0.0  ;;  %v462_v44 = vadd.f32 %v951_v1, %v330_v29  ;;  %v216_v28 = vld [vmem:[%s946_s20 + $0x150] sm:$0xff] }
  0x22   : > { %708 = vst.msk [vmem:[%s974_s25 + $0x68] sm:$0xff] %vm694_vm0, %v579_v15  ;;  %v334_v45 = vmul.f32 %v941_v0, %v202_v34  ;;  %v587_v47 = vmax.f32 %v459_v32, 0.0  ;;  %v463_v48 = vadd.f32 %v951_v1, %v331_v33  ;;  %v335_v49 = vmul.f32 %v941_v0, %v203_v38  ;;  %v217_v32 = vld [vmem:[%s946_s20 + $0x158] sm:$0xff] }
  0x23   : > { %709 = vst.msk [vmem:[%s974_s25 + $0x70] sm:$0xff] %vm694_vm0, %v580_v19  ;;  %v588_v51 = vmax.f32 %v460_v36, 0.0  ;;  %v464_v52 = vadd.f32 %v951_v1, %v332_v37  ;;  %v336_v53 = vmul.f32 %v941_v0, %v204_v42  ;;  %v589_v55 = vmax.f32 %v461_v40, 0.0  ;;  %v218_v36 = vld [vmem:[%s946_s20 + $0x160] sm:$0xff]  ;;  %v219_v40 = vld [vmem:[%s946_s20 + $0x168] sm:$0xff] }
  0x24   : > { %710 = vst.msk [vmem:[%s974_s25 + $0x78] sm:$0xff] %vm694_vm0, %v581_v23  ;;  %v465_v56 = vadd.f32 %v951_v1, %v333_v41  ;;  %v337_v57 = vmul.f32 %v941_v0, %v205_v46  ;;  %v590_v59 = vmax.f32 %v462_v44, 0.0  ;;  %v466_v60 = vadd.f32 %v951_v1, %v334_v45  ;;  %v220_v44 = vld [vmem:[%s946_s20 + $0x170] sm:$0xff] }
  0x25   : > { %711 = vst.msk [vmem:[%s974_s25 + $0x80] sm:$0xff] %vm694_vm0, %v582_v27  ;;  %v338_v61 = vmul.f32 %v941_v0, %v206_v50  ;;  %v591_v63 = vmax.f32 %v463_v48, 0.0  ;;  %v467_v2 = vadd.f32 %v951_v1, %v335_v49  ;;  %v339_v3 = vmul.f32 %v941_v0, %v207_v54  ;;  %v221_v48 = vld [vmem:[%s946_s20 + $0x178] sm:$0xff] }
  0x26   : > { %712 = vst.msk [vmem:[%s974_s25 + $0x88] sm:$0xff] %vm694_vm0, %v583_v31  ;;  %v592_v5 = vmax.f32 %v464_v52, 0.0  ;;  %v468_v6 = vadd.f32 %v951_v1, %v336_v53  ;;  %v340_v7 = vmul.f32 %v941_v0, %v208_v58  ;;  %v593_v9 = vmax.f32 %v465_v56, 0.0  ;;  %v222_v52 = vld [vmem:[%s946_s20 + $0x180] sm:$0xff]  ;;  %v223_v56 = vld [vmem:[%s946_s20 + $0x188] sm:$0xff] }
  0x27   : > { %713 = vst.msk [vmem:[%s974_s25 + $0x90] sm:$0xff] %vm694_vm0, %v584_v35  ;;  %v469_v10 = vadd.f32 %v951_v1, %v337_v57  ;;  %v341_v11 = vmul.f32 %v941_v0, %v209_v62  ;;  %v594_v13 = vmax.f32 %v466_v60, 0.0  ;;  %v470_v14 = vadd.f32 %v951_v1, %v338_v61  ;;  %v224_v60 = vld [vmem:[%s946_s20 + $0x190] sm:$0xff] }
  0x28   : > { %714 = vst.msk [vmem:[%s974_s25 + $0x98] sm:$0xff] %vm694_vm0, %v585_v39  ;;  %v342_v15 = vmul.f32 %v941_v0, %v210_v4  ;;  %v595_v17 = vmax.f32 %v467_v2, 0.0  ;;  %v471_v18 = vadd.f32 %v951_v1, %v339_v3  ;;  %v343_v19 = vmul.f32 %v941_v0, %v211_v8  ;;  %v225_v2 = vld [vmem:[%s946_s20 + $0x198] sm:$0xff] }
  0x29   : > { %715 = vst.msk [vmem:[%s974_s25 + $0xa0] sm:$0xff] %vm694_vm0, %v586_v43  ;;  %v596_v21 = vmax.f32 %v468_v6, 0.0  ;;  %v472_v22 = vadd.f32 %v951_v1, %v340_v7  ;;  %v344_v23 = vmul.f32 %v941_v0, %v212_v12  ;;  %v597_v25 = vmax.f32 %v469_v10, 0.0  ;;  %v226_v6 = vld [vmem:[%s946_s20 + $0x1a0] sm:$0xff]  ;;  %v227_v10 = vld [vmem:[%s946_s20 + $0x1a8] sm:$0xff] }
  0x2a   : > { %716 = vst.msk [vmem:[%s974_s25 + $0xa8] sm:$0xff] %vm694_vm0, %v587_v47  ;;  %v473_v26 = vadd.f32 %v951_v1, %v341_v11  ;;  %v345_v27 = vmul.f32 %v941_v0, %v213_v16  ;;  %v598_v29 = vmax.f32 %v470_v14, 0.0  ;;  %v474_v30 = vadd.f32 %v951_v1, %v342_v15  ;;  %v228_v14 = vld [vmem:[%s946_s20 + $0x1b0] sm:$0xff] }
  0x2b   : > { %717 = vst.msk [vmem:[%s974_s25 + $0xb0] sm:$0xff] %vm694_vm0, %v588_v51  ;;  %v346_v31 = vmul.f32 %v941_v0, %v214_v20  ;;  %v599_v33 = vmax.f32 %v471_v18, 0.0  ;;  %v475_v34 = vadd.f32 %v951_v1, %v343_v19  ;;  %v347_v35 = vmul.f32 %v941_v0, %v215_v24  ;;  %v229_v18 = vld [vmem:[%s946_s20 + $0x1b8] sm:$0xff] }
  0x2c   : > { %718 = vst.msk [vmem:[%s974_s25 + $0xb8] sm:$0xff] %vm694_vm0, %v589_v55  ;;  %v600_v37 = vmax.f32 %v472_v22, 0.0  ;;  %v476_v38 = vadd.f32 %v951_v1, %v344_v23  ;;  %v348_v39 = vmul.f32 %v941_v0, %v216_v28  ;;  %v601_v41 = vmax.f32 %v473_v26, 0.0  ;;  %v230_v22 = vld [vmem:[%s946_s20 + $0x1c0] sm:$0xff]  ;;  %v231_v26 = vld [vmem:[%s946_s20 + $0x1c8] sm:$0xff] }
  0x2d   : > { %719 = vst.msk [vmem:[%s974_s25 + $0xc0] sm:$0xff] %vm694_vm0, %v590_v59  ;;  %v477_v42 = vadd.f32 %v951_v1, %v345_v27  ;;  %v349_v43 = vmul.f32 %v941_v0, %v217_v32  ;;  %v602_v45 = vmax.f32 %v474_v30, 0.0  ;;  %v478_v46 = vadd.f32 %v951_v1, %v346_v31  ;;  %v232_v30 = vld [vmem:[%s946_s20 + $0x1d0] sm:$0xff] }
  0x2e   : > { %720 = vst.msk [vmem:[%s974_s25 + $0xc8] sm:$0xff] %vm694_vm0, %v591_v63  ;;  %v350_v47 = vmul.f32 %v941_v0, %v218_v36  ;;  %v603_v49 = vmax.f32 %v475_v34, 0.0  ;;  %v479_v50 = vadd.f32 %v951_v1, %v347_v35  ;;  %v351_v51 = vmul.f32 %v941_v0, %v219_v40  ;;  %v233_v34 = vld [vmem:[%s946_s20 + $0x1d8] sm:$0xff] }
  0x2f   : > { %721 = vst.msk [vmem:[%s974_s25 + $0xd0] sm:$0xff] %vm694_vm0, %v592_v5  ;;  %v604_v53 = vmax.f32 %v476_v38, 0.0  ;;  %v480_v54 = vadd.f32 %v951_v1, %v348_v39  ;;  %v352_v55 = vmul.f32 %v941_v0, %v220_v44  ;;  %v605_v57 = vmax.f32 %v477_v42, 0.0  ;;  %v234_v38 = vld [vmem:[%s946_s20 + $0x1e0] sm:$0xff]  ;;  %v235_v42 = vld [vmem:[%s946_s20 + $0x1e8] sm:$0xff] }
  0x30   : > { %722 = vst.msk [vmem:[%s974_s25 + $0xd8] sm:$0xff] %vm694_vm0, %v593_v9  ;;  %v481_v58 = vadd.f32 %v951_v1, %v349_v43  ;;  %v353_v59 = vmul.f32 %v941_v0, %v221_v48  ;;  %v606_v61 = vmax.f32 %v478_v46, 0.0  ;;  %v482_v62 = vadd.f32 %v951_v1, %v350_v47  ;;  %v236_v46 = vld [vmem:[%s946_s20 + $0x1f0] sm:$0xff] }
  0x31   : > { %723 = vst.msk [vmem:[%s974_s25 + $0xe0] sm:$0xff] %vm694_vm0, %v594_v13  ;;  %v354_v63 = vmul.f32 %v941_v0, %v222_v52  ;;  %v607_v3 = vmax.f32 %v479_v50, 0.0  ;;  %v483_v4 = vadd.f32 %v951_v1, %v351_v51  ;;  %v355_v5 = vmul.f32 %v941_v0, %v223_v56  ;;  %v237_v50 = vld [vmem:[%s946_s20 + $0x1f8] sm:$0xff] }
  0x32   : > { %724 = vst.msk [vmem:[%s974_s25 + $0xe8] sm:$0xff] %vm694_vm0, %v595_v17  ;;  %v608_v7 = vmax.f32 %v480_v54, 0.0  ;;  %v484_v8 = vadd.f32 %v951_v1, %v352_v55  ;;  %v356_v9 = vmul.f32 %v941_v0, %v224_v60  ;;  %v609_v11 = vmax.f32 %v481_v58, 0.0  ;;  %v238_v54 = vld [vmem:[%s946_s20 + $0x200] sm:$0xff]  ;;  %v239_v58 = vld [vmem:[%s946_s20 + $0x208] sm:$0xff] }
  0x33   : > { %725 = vst.msk [vmem:[%s974_s25 + $0xf0] sm:$0xff] %vm694_vm0, %v596_v21  ;;  %v485_v12 = vadd.f32 %v951_v1, %v353_v59  ;;  %v357_v13 = vmul.f32 %v941_v0, %v225_v2  ;;  %v610_v15 = vmax.f32 %v482_v62, 0.0  ;;  %v486_v16 = vadd.f32 %v951_v1, %v354_v63  ;;  %v240_v62 = vld [vmem:[%s946_s20 + $0x210] sm:$0xff] }
  0x34   : > { %726 = vst.msk [vmem:[%s974_s25 + $0xf8] sm:$0xff] %vm694_vm0, %v597_v25  ;;  %v358_v17 = vmul.f32 %v941_v0, %v226_v6  ;;  %v611_v19 = vmax.f32 %v483_v4, 0.0  ;;  %v487_v20 = vadd.f32 %v951_v1, %v355_v5  ;;  %v359_v21 = vmul.f32 %v941_v0, %v227_v10  ;;  %v241_v4 = vld [vmem:[%s946_s20 + $0x218] sm:$0xff] }
  0x35   : > { %727 = vst.msk [vmem:[%s974_s25 + $0x100] sm:$0xff] %vm694_vm0, %v598_v29  ;;  %v612_v23 = vmax.f32 %v484_v8, 0.0  ;;  %v488_v24 = vadd.f32 %v951_v1, %v356_v9  ;;  %v360_v25 = vmul.f32 %v941_v0, %v228_v14  ;;  %v613_v27 = vmax.f32 %v485_v12, 0.0  ;;  %v242_v8 = vld [vmem:[%s946_s20 + $0x220] sm:$0xff]  ;;  %v243_v12 = vld [vmem:[%s946_s20 + $0x228] sm:$0xff] }
  0x36   : > { %728 = vst.msk [vmem:[%s974_s25 + $0x108] sm:$0xff] %vm694_vm0, %v599_v33  ;;  %v489_v28 = vadd.f32 %v951_v1, %v357_v13  ;;  %v361_v29 = vmul.f32 %v941_v0, %v229_v18  ;;  %v614_v31 = vmax.f32 %v486_v16, 0.0  ;;  %v490_v32 = vadd.f32 %v951_v1, %v358_v17  ;;  %v244_v16 = vld [vmem:[%s946_s20 + $0x230] sm:$0xff] }
  0x37   : > { %729 = vst.msk [vmem:[%s974_s25 + $0x110] sm:$0xff] %vm694_vm0, %v600_v37  ;;  %v362_v33 = vmul.f32 %v941_v0, %v230_v22  ;;  %v615_v35 = vmax.f32 %v487_v20, 0.0  ;;  %v491_v36 = vadd.f32 %v951_v1, %v359_v21  ;;  %v363_v37 = vmul.f32 %v941_v0, %v231_v26  ;;  %v245_v20 = vld [vmem:[%s946_s20 + $0x238] sm:$0xff] }
  0x38   : > { %730 = vst.msk [vmem:[%s974_s25 + $0x118] sm:$0xff] %vm694_vm0, %v601_v41  ;;  %v616_v39 = vmax.f32 %v488_v24, 0.0  ;;  %v492_v40 = vadd.f32 %v951_v1, %v360_v25  ;;  %v364_v41 = vmul.f32 %v941_v0, %v232_v30  ;;  %v617_v43 = vmax.f32 %v489_v28, 0.0  ;;  %v246_v24 = vld [vmem:[%s946_s20 + $0x240] sm:$0xff]  ;;  %v247_v28 = vld [vmem:[%s946_s20 + $0x248] sm:$0xff] }
  0x39   : > { %731 = vst.msk [vmem:[%s974_s25 + $0x120] sm:$0xff] %vm694_vm0, %v602_v45  ;;  %v493_v44 = vadd.f32 %v951_v1, %v361_v29  ;;  %v365_v45 = vmul.f32 %v941_v0, %v233_v34  ;;  %v618_v47 = vmax.f32 %v490_v32, 0.0  ;;  %v494_v48 = vadd.f32 %v951_v1, %v362_v33  ;;  %v248_v32 = vld [vmem:[%s946_s20 + $0x250] sm:$0xff] }
  0x3a   : > { %732 = vst.msk [vmem:[%s974_s25 + $0x128] sm:$0xff] %vm694_vm0, %v603_v49  ;;  %v366_v49 = vmul.f32 %v941_v0, %v234_v38  ;;  %v619_v51 = vmax.f32 %v491_v36, 0.0  ;;  %v495_v52 = vadd.f32 %v951_v1, %v363_v37  ;;  %v620_v55 = vmax.f32 %v492_v40, 0.0  ;;  %v249_v36 = vld [vmem:[%s946_s20 + $0x258] sm:$0xff]  ;;  %v250_v40 = vld [vmem:[%s946_s20 + $0x260] sm:$0xff] }
  0x3b   : > { %733 = vst.msk [vmem:[%s974_s25 + $0x130] sm:$0xff] %vm694_vm0, %v604_v53  ;;  %v367_v53 = vmul.f32 %v941_v0, %v235_v42  ;;  %v496_v56 = vadd.f32 %v951_v1, %v364_v41  ;;  %v621_v59 = vmax.f32 %v493_v44, 0.0  ;;  %v497_v60 = vadd.f32 %v951_v1, %v365_v45  ;;  %v251_v44 = vld [vmem:[%s946_s20 + $0x268] sm:$0xff] }
  0x3c   : > { %734 = vst.msk [vmem:[%s974_s25 + $0x138] sm:$0xff] %vm694_vm0, %v605_v57  ;;  %v368_v57 = vmul.f32 %v941_v0, %v236_v46  ;;  %v622_v63 = vmax.f32 %v494_v48, 0.0  ;;  %v498_v2 = vadd.f32 %v951_v1, %v366_v49  ;;  %v623_v5 = vmax.f32 %v495_v52, 0.0  ;;  %v252_v48 = vld [vmem:[%s946_s20 + $0x270] sm:$0xff]  ;;  %v253_v52 = vld [vmem:[%s946_s20 + $0x278] sm:$0xff] }
  0x3d   : > { %735 = vst.msk [vmem:[%s974_s25 + $0x140] sm:$0xff] %vm694_vm0, %v606_v61  ;;  %v369_v61 = vmul.f32 %v941_v0, %v237_v50  ;;  %v499_v6 = vadd.f32 %v951_v1, %v367_v53  ;;  %v624_v9 = vmax.f32 %v496_v56, 0.0  ;;  %v625_v13 = vmax.f32 %v497_v60, 0.0  ;;  %v254_v56 = vld [vmem:[%s946_s20 + $0x280] sm:$0xff]  ;;  %v255_v60 = vld [vmem:[%s946_s20 + $0x288] sm:$0xff] }
  0x3e   : > { %736 = vst.msk [vmem:[%s974_s25 + $0x148] sm:$0xff] %vm694_vm0, %v607_v3  ;;  %v370_v3 = vmul.f32 %v941_v0, %v238_v54  ;;  %v500_v10 = vadd.f32 %v951_v1, %v368_v57  ;;  %v626_v17 = vmax.f32 %v498_v2, 0.0  ;;  %v256_v2 = vld [vmem:[%s946_s20 + $0x290] sm:$0xff] }
  0x3f   : > { %737 = vst.msk [vmem:[%s974_s25 + $0x150] sm:$0xff] %vm694_vm0, %v608_v7  ;;  %v371_v7 = vmul.f32 %v941_v0, %v239_v58  ;;  %v501_v14 = vadd.f32 %v951_v1, %v369_v61  ;;  %v627_v21 = vmax.f32 %v499_v6, 0.0  ;;  %v257_v6 = vld [vmem:[%s946_s20 + $0x298] sm:$0xff] }
  0x40   : > { %738 = vst.msk [vmem:[%s974_s25 + $0x158] sm:$0xff] %vm694_vm0, %v609_v11  ;;  %v372_v11 = vmul.f32 %v941_v0, %v240_v62  ;;  %v502_v18 = vadd.f32 %v951_v1, %v370_v3  ;;  %v628_v25 = vmax.f32 %v500_v10, 0.0  ;;  %v258_v10 = vld [vmem:[%s946_s20 + $0x2a0] sm:$0xff] }
  0x41   : > { %739 = vst.msk [vmem:[%s974_s25 + $0x160] sm:$0xff] %vm694_vm0, %v610_v15  ;;  %v373_v15 = vmul.f32 %v941_v0, %v241_v4  ;;  %v503_v22 = vadd.f32 %v951_v1, %v371_v7  ;;  %v629_v29 = vmax.f32 %v501_v14, 0.0  ;;  %v259_v14 = vld [vmem:[%s946_s20 + $0x2a8] sm:$0xff] }
  0x42   : > { %740 = vst.msk [vmem:[%s974_s25 + $0x168] sm:$0xff] %vm694_vm0, %v611_v19  ;;  %v374_v19 = vmul.f32 %v941_v0, %v242_v8  ;;  %v504_v26 = vadd.f32 %v951_v1, %v372_v11  ;;  %v630_v33 = vmax.f32 %v502_v18, 0.0  ;;  %v260_v18 = vld [vmem:[%s946_s20 + $0x2b0] sm:$0xff] }
  0x43   : > { %741 = vst.msk [vmem:[%s974_s25 + $0x170] sm:$0xff] %vm694_vm0, %v612_v23  ;;  %v375_v23 = vmul.f32 %v941_v0, %v243_v12  ;;  %v505_v30 = vadd.f32 %v951_v1, %v373_v15  ;;  %v631_v37 = vmax.f32 %v503_v22, 0.0  ;;  %v261_v22 = vld [vmem:[%s946_s20 + $0x2b8] sm:$0xff] }
  0x44   : > { %742 = vst.msk [vmem:[%s974_s25 + $0x178] sm:$0xff] %vm694_vm0, %v613_v27  ;;  %v376_v27 = vmul.f32 %v941_v0, %v244_v16  ;;  %v506_v34 = vadd.f32 %v951_v1, %v374_v19  ;;  %v632_v41 = vmax.f32 %v504_v26, 0.0  ;;  %v262_v26 = vld [vmem:[%s946_s20 + $0x2c0] sm:$0xff] }
  0x45   : > { %743 = vst.msk [vmem:[%s974_s25 + $0x180] sm:$0xff] %vm694_vm0, %v614_v31  ;;  %v377_v31 = vmul.f32 %v941_v0, %v245_v20  ;;  %v507_v38 = vadd.f32 %v951_v1, %v375_v23  ;;  %v633_v45 = vmax.f32 %v505_v30, 0.0  ;;  %v263_v30 = vld [vmem:[%s946_s20 + $0x2c8] sm:$0xff] }
  0x46   : > { %744 = vst.msk [vmem:[%s974_s25 + $0x188] sm:$0xff] %vm694_vm0, %v615_v35  ;;  %v378_v35 = vmul.f32 %v941_v0, %v246_v24  ;;  %v508_v42 = vadd.f32 %v951_v1, %v376_v27  ;;  %v634_v49 = vmax.f32 %v506_v34, 0.0  ;;  %v264_v34 = vld [vmem:[%s946_s20 + $0x2d0] sm:$0xff] }
  0x47   : > { %745 = vst.msk [vmem:[%s974_s25 + $0x190] sm:$0xff] %vm694_vm0, %v616_v39  ;;  %v379_v39 = vmul.f32 %v941_v0, %v247_v28  ;;  %v509_v46 = vadd.f32 %v951_v1, %v377_v31  ;;  %v635_v53 = vmax.f32 %v507_v38, 0.0  ;;  %v265_v38 = vld [vmem:[%s946_s20 + $0x2d8] sm:$0xff] }
  0x48   : > { %746 = vst.msk [vmem:[%s974_s25 + $0x198] sm:$0xff] %vm694_vm0, %v617_v43  ;;  %v380_v43 = vmul.f32 %v941_v0, %v248_v32  ;;  %v510_v50 = vadd.f32 %v951_v1, %v378_v35  ;;  %v636_v57 = vmax.f32 %v508_v42, 0.0  ;;  %v266_v42 = vld [vmem:[%s946_s20 + $0x2e0] sm:$0xff] }
  0x49   : > { %747 = vst.msk [vmem:[%s974_s25 + $0x1a0] sm:$0xff] %vm694_vm0, %v618_v47  ;;  %v381_v47 = vmul.f32 %v941_v0, %v249_v36  ;;  %v511_v54 = vadd.f32 %v951_v1, %v379_v39  ;;  %v637_v61 = vmax.f32 %v509_v46, 0.0  ;;  %v267_v46 = vld [vmem:[%s946_s20 + $0x2e8] sm:$0xff] }
  0x4a   : > { %748 = vst.msk [vmem:[%s974_s25 + $0x1a8] sm:$0xff] %vm694_vm0, %v619_v51  ;;  %v382_v51 = vmul.f32 %v941_v0, %v250_v40  ;;  %v512_v58 = vadd.f32 %v951_v1, %v380_v43  ;;  %v638_v3 = vmax.f32 %v510_v50, 0.0  ;;  %v268_v50 = vld [vmem:[%s946_s20 + $0x2f0] sm:$0xff] }
  0x4b   : > { %749 = vst.msk [vmem:[%s974_s25 + $0x1b0] sm:$0xff] %vm694_vm0, %v620_v55  ;;  %v383_v55 = vmul.f32 %v941_v0, %v251_v44  ;;  %v513_v62 = vadd.f32 %v951_v1, %v381_v47  ;;  %v639_v7 = vmax.f32 %v511_v54, 0.0  ;;  %v269_v54 = vld [vmem:[%s946_s20 + $0x2f8] sm:$0xff] }
  0x4c   : > { %750 = vst.msk [vmem:[%s974_s25 + $0x1b8] sm:$0xff] %vm694_vm0, %v621_v59  ;;  %v384_v59 = vmul.f32 %v941_v0, %v252_v48  ;;  %v514_v4 = vadd.f32 %v951_v1, %v382_v51  ;;  %v640_v11 = vmax.f32 %v512_v58, 0.0  ;;  %v270_v58 = vld [vmem:[%s946_s20 + $0x300] sm:$0xff] }
  0x4d   : > { %751 = vst.msk [vmem:[%s974_s25 + $0x1c0] sm:$0xff] %vm694_vm0, %v622_v63  ;;  %v385_v63 = vmul.f32 %v941_v0, %v253_v52  ;;  %v515_v8 = vadd.f32 %v951_v1, %v383_v55  ;;  %v641_v15 = vmax.f32 %v513_v62, 0.0  ;;  %v271_v62 = vld [vmem:[%s946_s20 + $0x308] sm:$0xff] }
  0x4e   : > { %752 = vst.msk [vmem:[%s974_s25 + $0x1c8] sm:$0xff] %vm694_vm0, %v623_v5  ;;  %v386_v5 = vmul.f32 %v941_v0, %v254_v56  ;;  %v516_v12 = vadd.f32 %v951_v1, %v384_v59  ;;  %v642_v19 = vmax.f32 %v514_v4, 0.0  ;;  %v272_v4 = vld [vmem:[%s946_s20 + $0x310] sm:$0xff] }
  0x4f   : > { %753 = vst.msk [vmem:[%s974_s25 + $0x1d0] sm:$0xff] %vm694_vm0, %v624_v9  ;;  %v387_v9 = vmul.f32 %v941_v0, %v255_v60  ;;  %v517_v16 = vadd.f32 %v951_v1, %v385_v63  ;;  %v643_v23 = vmax.f32 %v515_v8, 0.0  ;;  %v273_v8 = vld [vmem:[%s946_s20 + $0x318] sm:$0xff] }
  0x50   : > { %754 = vst.msk [vmem:[%s974_s25 + $0x1d8] sm:$0xff] %vm694_vm0, %v625_v13  ;;  %v388_v13 = vmul.f32 %v941_v0, %v256_v2  ;;  %v518_v20 = vadd.f32 %v951_v1, %v386_v5  ;;  %v644_v27 = vmax.f32 %v516_v12, 0.0  ;;  %v274_v12 = vld [vmem:[%s946_s20 + $0x320] sm:$0xff] }
  0x51   : > { %755 = vst.msk [vmem:[%s974_s25 + $0x1e0] sm:$0xff] %vm694_vm0, %v626_v17  ;;  %v389_v17 = vmul.f32 %v941_v0, %v257_v6  ;;  %v519_v24 = vadd.f32 %v951_v1, %v387_v9  ;;  %v645_v31 = vmax.f32 %v517_v16, 0.0  ;;  %v275_v16 = vld [vmem:[%s946_s20 + $0x328] sm:$0xff] }
  0x52   : > { %756 = vst.msk [vmem:[%s974_s25 + $0x1e8] sm:$0xff] %vm694_vm0, %v627_v21  ;;  %v390_v21 = vmul.f32 %v941_v0, %v258_v10  ;;  %v520_v28 = vadd.f32 %v951_v1, %v388_v13  ;;  %v646_v35 = vmax.f32 %v518_v20, 0.0  ;;  %v276_v20 = vld [vmem:[%s946_s20 + $0x330] sm:$0xff] }
  0x53   : > { %757 = vst.msk [vmem:[%s974_s25 + $0x1f0] sm:$0xff] %vm694_vm0, %v628_v25  ;;  %v391_v25 = vmul.f32 %v941_v0, %v259_v14  ;;  %v521_v32 = vadd.f32 %v951_v1, %v389_v17  ;;  %v647_v39 = vmax.f32 %v519_v24, 0.0  ;;  %v277_v24 = vld [vmem:[%s946_s20 + $0x338] sm:$0xff] }
  0x54   : > { %758 = vst.msk [vmem:[%s974_s25 + $0x1f8] sm:$0xff] %vm694_vm0, %v629_v29  ;;  %v392_v29 = vmul.f32 %v941_v0, %v260_v18  ;;  %v522_v36 = vadd.f32 %v951_v1, %v390_v21  ;;  %v648_v43 = vmax.f32 %v520_v28, 0.0  ;;  %v278_v28 = vld [vmem:[%s946_s20 + $0x340] sm:$0xff] }
  0x55   : > { %759 = vst.msk [vmem:[%s974_s25 + $0x200] sm:$0xff] %vm694_vm0, %v630_v33  ;;  %v393_v33 = vmul.f32 %v941_v0, %v261_v22  ;;  %v523_v40 = vadd.f32 %v951_v1, %v391_v25  ;;  %v649_v47 = vmax.f32 %v521_v32, 0.0  ;;  %v279_v32 = vld [vmem:[%s946_s20 + $0x348] sm:$0xff] }
  0x56   : > { %760 = vst.msk [vmem:[%s974_s25 + $0x208] sm:$0xff] %vm694_vm0, %v631_v37  ;;  %v394_v37 = vmul.f32 %v941_v0, %v262_v26  ;;  %v524_v44 = vadd.f32 %v951_v1, %v392_v29  ;;  %v650_v51 = vmax.f32 %v522_v36, 0.0  ;;  %v280_v36 = vld [vmem:[%s946_s20 + $0x350] sm:$0xff] }
  0x57   : > { %761 = vst.msk [vmem:[%s974_s25 + $0x210] sm:$0xff] %vm694_vm0, %v632_v41  ;;  %v395_v41 = vmul.f32 %v941_v0, %v263_v30  ;;  %v525_v48 = vadd.f32 %v951_v1, %v393_v33  ;;  %v651_v55 = vmax.f32 %v523_v40, 0.0  ;;  %v281_v40 = vld [vmem:[%s946_s20 + $0x358] sm:$0xff] }
  0x58   : > { %762 = vst.msk [vmem:[%s974_s25 + $0x218] sm:$0xff] %vm694_vm0, %v633_v45  ;;  %v396_v45 = vmul.f32 %v941_v0, %v264_v34  ;;  %v526_v52 = vadd.f32 %v951_v1, %v394_v37  ;;  %v652_v59 = vmax.f32 %v524_v44, 0.0 }
  0x59   : > { %763 = vst.msk [vmem:[%s974_s25 + $0x220] sm:$0xff] %vm694_vm0, %v634_v49  ;;  %v397_v49 = vmul.f32 %v941_v0, %v265_v38  ;;  %v527_v56 = vadd.f32 %v951_v1, %v395_v41  ;;  %v653_v63 = vmax.f32 %v525_v48, 0.0  ;;  %v283_v48 = vld [vmem:[%s946_s20 + $0x368] sm:$0xff] }
  0x5a   : > { %764 = vst.msk [vmem:[%s974_s25 + $0x228] sm:$0xff] %vm694_vm0, %v635_v53  ;;  %v398_v53 = vmul.f32 %v941_v0, %v266_v42  ;;  %v528_v60 = vadd.f32 %v951_v1, %v396_v45  ;;  %v654_v5 = vmax.f32 %v526_v52, 0.0  ;;  %v282_v45 = vld [vmem:[%s946_s20 + $0x360] sm:$0xff]  ;;  %v284_v52 = vld [vmem:[%s946_s20 + $0x370] sm:$0xff] }
  0x5b   : > { %765 = vst.msk [vmem:[%s974_s25 + $0x230] sm:$0xff] %vm694_vm0, %v636_v57  ;;  %v399_v57 = vmul.f32 %v941_v0, %v267_v46  ;;  %v529_v2 = vadd.f32 %v951_v1, %v397_v49  ;;  %v655_v9 = vmax.f32 %v527_v56, 0.0  ;;  %v1473_v46 = vld [vmem:[%s1613_s2] ss:$0 sm:$0xff]  ;;  %v285_v56 = vld [vmem:[%s946_s20 + $0x378] sm:$0xff] }
  0x5c   : > { %766 = vst.msk [vmem:[%s974_s25 + $0x238] sm:$0xff] %vm694_vm0, %v637_v61  ;;  %v400_v61 = vmul.f32 %v941_v0, %v268_v50  ;;  %v530_v6 = vadd.f32 %v951_v1, %v398_v53  ;;  %v656_v13 = vmax.f32 %v528_v60, 0.0  ;;  %v286_v60 = vld [vmem:[%s946_s20 + $0x380] sm:$0xff] }
  0x5d   : > { %767 = vst.msk [vmem:[%s974_s25 + $0x240] sm:$0xff] %vm694_vm0, %v638_v3  ;;  %v401_v3 = vmul.f32 %v941_v0, %v269_v54  ;;  %v531_v10 = vadd.f32 %v951_v1, %v399_v57  ;;  %v657_v17 = vmax.f32 %v529_v2, 0.0  ;;  %v287_v2 = vld [vmem:[%s946_s20 + $0x388] sm:$0xff] }
  0x5e   : > { %768 = vst.msk [vmem:[%s974_s25 + $0x248] sm:$0xff] %vm694_vm0, %v639_v7  ;;  %v402_v7 = vmul.f32 %v941_v0, %v270_v58  ;;  %v532_v14 = vadd.f32 %v951_v1, %v400_v61  ;;  %v658_v21 = vmax.f32 %v530_v6, 0.0  ;;  %v288_v6 = vld [vmem:[%s946_s20 + $0x390] sm:$0xff] }
  0x5f   : > { %769 = vst.msk [vmem:[%s974_s25 + $0x250] sm:$0xff] %vm694_vm0, %v640_v11  ;;  %v403_v11 = vmul.f32 %v941_v0, %v271_v62  ;;  %v533_v18 = vadd.f32 %v951_v1, %v401_v3  ;;  %v659_v25 = vmax.f32 %v531_v10, 0.0  ;;  %v289_v10 = vld [vmem:[%s946_s20 + $0x398] sm:$0xff] }
  0x60   : > { %770 = vst.msk [vmem:[%s974_s25 + $0x258] sm:$0xff] %vm694_vm0, %v641_v15  ;;  %v404_v15 = vmul.f32 %v941_v0, %v272_v4  ;;  %v534_v22 = vadd.f32 %v951_v1, %v402_v7  ;;  %v660_v29 = vmax.f32 %v532_v14, 0.0  ;;  %v290_v14 = vld [vmem:[%s946_s20 + $0x3a0] sm:$0xff] }
  0x61   : > { %771 = vst.msk [vmem:[%s974_s25 + $0x260] sm:$0xff] %vm694_vm0, %v642_v19  ;;  %v405_v19 = vmul.f32 %v941_v0, %v273_v8  ;;  %v535_v26 = vadd.f32 %v951_v1, %v403_v11  ;;  %v661_v33 = vmax.f32 %v533_v18, 0.0  ;;  %v291_v18 = vld [vmem:[%s946_s20 + $0x3a8] sm:$0xff] }
  0x62   : > { %772 = vst.msk [vmem:[%s974_s25 + $0x268] sm:$0xff] %vm694_vm0, %v643_v23  ;;  %v406_v23 = vmul.f32 %v941_v0, %v274_v12  ;;  %v536_v30 = vadd.f32 %v951_v1, %v404_v15  ;;  %v662_v37 = vmax.f32 %v534_v22, 0.0  ;;  %v292_v22 = vld [vmem:[%s946_s20 + $0x3b0] sm:$0xff] }
  0x63   : > { %773 = vst.msk [vmem:[%s974_s25 + $0x270] sm:$0xff] %vm694_vm0, %v644_v27  ;;  %v407_v27 = vmul.f32 %v941_v0, %v275_v16  ;;  %v537_v34 = vadd.f32 %v951_v1, %v405_v19  ;;  %v663_v41 = vmax.f32 %v535_v26, 0.0  ;;  %v293_v26 = vld [vmem:[%s946_s20 + $0x3b8] sm:$0xff] }
  0x64   : > { %774 = vst.msk [vmem:[%s974_s25 + $0x278] sm:$0xff] %vm694_vm0, %v645_v31  ;;  %v408_v31 = vmul.f32 %v941_v0, %v276_v20  ;;  %v538_v38 = vadd.f32 %v951_v1, %v406_v23 }
  0x65   : > { %775 = vst.msk [vmem:[%s974_s25 + $0x280] sm:$0xff] %vm694_vm0, %v646_v35  ;;  %v409_v35 = vmul.f32 %v941_v0, %v277_v24  ;;  %v539_v42 = vadd.f32 %v951_v1, %v407_v27  ;;  %v665_v49 = vmax.f32 %v537_v34, 0.0  ;;  %v295_v34 = vld [vmem:[%s946_s20 + $0x3c8] sm:$0xff] }
  0x66   : > { %776 = vst.msk [vmem:[%s974_s25 + $0x288] sm:$0xff] %vm694_vm0, %v647_v39  ;;  %v410_v39 = vmul.f32 %v941_v0, %v278_v28  ;;  %v664_v0 = vmax.f32 %v536_v30, 0.0  ;;  %v540_v1 = vadd.f32 %v1473_v46, %v408_v31  ;;  %v666_v53 = vmax.f32 %v538_v38, 0.0  ;;  %v294_v30 = vld [vmem:[%s946_s20 + $0x3c0] sm:$0xff]  ;;  %v296_v38 = vld [vmem:[%s946_s20 + $0x3d0] sm:$0xff] }
  0x67   : > { %777 = vst.msk [vmem:[%s974_s25 + $0x290] sm:$0xff] %vm694_vm0, %v648_v43  ;;  %v1464_v43 = vld [vmem:[%s1612_s1] ss:$0 sm:$0xff]  ;;  %v541_v50 = vadd.f32 %v1473_v46, %v409_v35  ;;  %v667_v57 = vmax.f32 %v539_v42, 0.0  ;;  %v297_v42 = vld [vmem:[%s946_s20 + $0x3d8] sm:$0xff] }
  0x68   : > { %778 = vst.msk [vmem:[%s974_s25 + $0x298] sm:$0xff] %vm694_vm0, %v649_v47  ;;  %v411_v44 = vmul.f32 %v1464_v43, %v279_v32  ;;  %v412_v47 = vmul.f32 %v1464_v43, %v280_v36  ;;  %v542_v54 = vadd.f32 %v1473_v46, %v410_v39  ;;  %v668_v61 = vmax.f32 %v540_v1, 0.0  ;;  %v298_v1 = vld [vmem:[%s946_s20 + $0x3e0] sm:$0xff] }
  0x69   : > { %779 = vst.msk [vmem:[%s974_s25 + $0x2a0] sm:$0xff] %vm694_vm0, %v650_v51  ;;  %v413_v51 = vmul.f32 %v1464_v43, %v281_v40  ;;  %v669_v3 = vmax.f32 %v541_v50, 0.0  ;;  %v299_v50 = vld [vmem:[%s946_s20 + $0x3e8] sm:$0xff] }
  0x6a   : > { %780 = vst.msk [vmem:[%s974_s25 + $0x2a8] sm:$0xff] %vm694_vm0, %v651_v55  ;;  %v414_v55 = vmul.f32 %v1464_v43, %v282_v45  ;;  %v543_v58 = vadd.f32 %v1473_v46, %v411_v44  ;;  %v544_v62 = vadd.f32 %v1473_v46, %v412_v47  ;;  %v670_v7 = vmax.f32 %v542_v54, 0.0  ;;  %v300_v54 = vld [vmem:[%s946_s20 + $0x3f0] sm:$0xff] }
  0x6b   : > { %781 = vst.msk [vmem:[%s974_s25 + $0x2b0] sm:$0xff] %vm694_vm0, %v652_v59  ;;  %v415_v59 = vmul.f32 %v1464_v43, %v283_v48  ;;  %v545_v4 = vadd.f32 %v1473_v46, %v413_v51 }
  0x6c   : > { %782 = vst.msk [vmem:[%s974_s25 + $0x2b8] sm:$0xff] %vm694_vm0, %v653_v63  ;;  %v416_v63 = vmul.f32 %v1464_v43, %v284_v52  ;;  %v546_v8 = vadd.f32 %v1473_v46, %v414_v55  ;;  %v671_v11 = vmax.f32 %v543_v58, 0.0  ;;  %v672_v15 = vmax.f32 %v544_v62, 0.0  ;;  %v301_v58 = vld [vmem:[%s946_s20 + $0x3f8] sm:$0xff] }
  0x6d   : > { %783 = vst.msk [vmem:[%s974_s25 + $0x2c0] sm:$0xff] %vm694_vm0, %v654_v5  ;;  %v417_v5 = vmul.f32 %v1464_v43, %v285_v56  ;;  %v547_v12 = vadd.f32 %v1473_v46, %v415_v59  ;;  %v673_v19 = vmax.f32 %v545_v4, 0.0 }
  0x6e   : > { %784 = vst.msk [vmem:[%s974_s25 + $0x2c8] sm:$0xff] %vm694_vm0, %v655_v9  ;;  %v418_v9 = vmul.f32 %v1464_v43, %v286_v60  ;;  %v548_v16 = vadd.f32 %v1473_v46, %v416_v63  ;;  %v674_v23 = vmax.f32 %v546_v8, 0.0 }
  0x6f   : > { %785 = vst.msk [vmem:[%s974_s25 + $0x2d0] sm:$0xff] %vm694_vm0, %v656_v13  ;;  %v419_v13 = vmul.f32 %v1464_v43, %v287_v2  ;;  %v549_v20 = vadd.f32 %v1473_v46, %v417_v5  ;;  %v675_v27 = vmax.f32 %v547_v12, 0.0  ;;  %v432_v2 = vmul.f32 %v1464_v43, %v300_v54 }
  0x70   : > { %786 = vst.msk [vmem:[%s974_s25 + $0x2d8] sm:$0xff] %vm694_vm0, %v657_v17  ;;  %v420_v17 = vmul.f32 %v1464_v43, %v288_v6  ;;  %v550_v24 = vadd.f32 %v1473_v46, %v418_v9  ;;  %v676_v31 = vmax.f32 %v548_v16, 0.0  ;;  %v433_v5 = vmul.f32 %v1464_v43, %v301_v58 }
  0x71   : > { %787 = vst.msk [vmem:[%s974_s25 + $0x2e0] sm:$0xff] %vm694_vm0, %v658_v21  ;;  %v421_v21 = vmul.f32 %v1464_v43, %v289_v10  ;;  %v551_v28 = vadd.f32 %v1473_v46, %v419_v13  ;;  %v677_v35 = vmax.f32 %v549_v20, 0.0 }
  0x72   : > { %788 = vst.msk [vmem:[%s974_s25 + $0x2e8] sm:$0xff] %vm694_vm0, %v659_v25  ;;  %v422_v25 = vmul.f32 %v1464_v43, %v290_v14  ;;  %v552_v32 = vadd.f32 %v1473_v46, %v420_v17  ;;  %v678_v39 = vmax.f32 %v550_v24, 0.0  ;;  %v565_v12 = vadd.f32 %v1473_v46, %v433_v5 }
  0x73   : > { %789 = vst.msk [vmem:[%s974_s25 + $0x2f0] sm:$0xff] %vm694_vm0, %v660_v29  ;;  %v423_v29 = vmul.f32 %v1464_v43, %v291_v18  ;;  %v553_v36 = vadd.f32 %v1473_v46, %v421_v21  ;;  %v679_v44 = vmax.f32 %v551_v28, 0.0 }
  0x74   : > { %790 = vst.msk [vmem:[%s974_s25 + $0x2f8] sm:$0xff] %vm694_vm0, %v661_v33  ;;  %v424_v33 = vmul.f32 %v1464_v43, %v292_v22  ;;  %v554_v40 = vadd.f32 %v1473_v46, %v422_v25  ;;  %v680_v47 = vmax.f32 %v552_v32, 0.0  ;;  %v693_v16 = vmax.f32 %v565_v12, 0.0 }
  0x75   : > { %791 = vst.msk [vmem:[%s974_s25 + $0x300] sm:$0xff] %vm694_vm0, %v662_v37  ;;  %v425_v37 = vmul.f32 %v1464_v43, %v293_v26  ;;  %v555_v45 = vadd.f32 %v1473_v46, %v423_v29  ;;  %v681_v51 = vmax.f32 %v553_v36, 0.0 }
  0x76   : > { %792 = vst.msk [vmem:[%s974_s25 + $0x308] sm:$0xff] %vm694_vm0, %v663_v41  ;;  %v426_v41 = vmul.f32 %v1464_v43, %v294_v30  ;;  %v556_v48 = vadd.f32 %v1473_v46, %v424_v33  ;;  %v682_v55 = vmax.f32 %v554_v40, 0.0 }
  0x77   : > { %793 = vst.msk [vmem:[%s974_s25 + $0x310] sm:$0xff] %vm694_vm0, %v664_v0  ;;  %v427_v0 = vmul.f32 %v1464_v43, %v295_v34  ;;  %v557_v52 = vadd.f32 %v1473_v46, %v425_v37  ;;  %v683_v59 = vmax.f32 %v555_v45, 0.0 }
  0x78   : > { %794 = vst.msk [vmem:[%s974_s25 + $0x318] sm:$0xff] %vm694_vm0, %v665_v49  ;;  %v428_v49 = vmul.f32 %v1464_v43, %v296_v38  ;;  %v558_v56 = vadd.f32 %v1473_v46, %v426_v41  ;;  %v684_v62 = vmax.f32 %v556_v48, 0.0 }
  0x79   : > { %795 = vst.msk [vmem:[%s974_s25 + $0x320] sm:$0xff] %vm694_vm0, %v666_v53  ;;  %v429_v53 = vmul.f32 %v1464_v43, %v297_v42  ;;  %v559_v60 = vadd.f32 %v1473_v46, %v427_v0 }
  0x7a   : > { %796 = vst.msk [vmem:[%s974_s25 + $0x328] sm:$0xff] %vm694_vm0, %v667_v57  ;;  %v430_v57 = vmul.f32 %v1464_v43, %v298_v1  ;;  %v560_v63 = vadd.f32 %v1473_v46, %v428_v49  ;;  %v686_v6 = vmax.f32 %v558_v56, 0.0 }
  0x7b   : > { %797 = vst.msk [vmem:[%s974_s25 + $0x330] sm:$0xff] %vm694_vm0, %v668_v61  ;;  %v431_v61 = vmul.f32 %v1464_v43, %v299_v50  ;;  %v561_v4 = vadd.f32 %v1473_v46, %v429_v53  ;;  %v687_v8 = vmax.f32 %v559_v60, 0.0  ;;  %v564_v43 = vadd.f32 %v1473_v46, %v432_v2 }
  0x7c   : > { %798 = vst.msk [vmem:[%s974_s25 + $0x338] sm:$0xff] %vm694_vm0, %v669_v3  ;;  %v685_v3 = vmax.f32 %v557_v52, 0.0  ;;  %v688_v10 = vmax.f32 %v560_v63, 0.0 }
  0x7d   : > { %799 = vst.msk [vmem:[%s974_s25 + $0x340] sm:$0xff] %vm694_vm0, %v670_v7  ;;  %v562_v7 = vadd.f32 %v1473_v46, %v430_v57  ;;  %v563_v9 = vadd.f32 %v1473_v46, %v431_v61 }
  0x7e   : > { %800 = vst.msk [vmem:[%s974_s25 + $0x348] sm:$0xff] %vm694_vm0, %v671_v11  ;;  %v689_v11 = vmax.f32 %v561_v4, 0.0 }
  0x7f   : > { %801 = vst.msk [vmem:[%s974_s25 + $0x350] sm:$0xff] %vm694_vm0, %v672_v15  ;;  %v690_v13 = vmax.f32 %v562_v7, 0.0  ;;  %v691_v14 = vmax.f32 %v563_v9, 0.0  ;;  %v692_v15 = vmax.f32 %v564_v43, 0.0 }
  0x80   : > { %802 = vst.msk [vmem:[%s974_s25 + $0x358] sm:$0xff] %vm694_vm0, %v673_v19 }
  0x81   : > { %803 = vst.msk [vmem:[%s974_s25 + $0x360] sm:$0xff] %vm694_vm0, %v674_v23 }
  0x82   : > { %804 = vst.msk [vmem:[%s974_s25 + $0x368] sm:$0xff] %vm694_vm0, %v675_v27 }
  0x83   : > { %805 = vst.msk [vmem:[%s974_s25 + $0x370] sm:$0xff] %vm694_vm0, %v676_v31 }
  0x84   : > { %806 = vst.msk [vmem:[%s974_s25 + $0x378] sm:$0xff] %vm694_vm0, %v677_v35 }
  0x85   : > { %807 = vst.msk [vmem:[%s974_s25 + $0x380] sm:$0xff] %vm694_vm0, %v678_v39 }
  0x86   : > { %808 = vst.msk [vmem:[%s974_s25 + $0x388] sm:$0xff] %vm694_vm0, %v679_v44 }
  0x87   : > { %809 = vst.msk [vmem:[%s974_s25 + $0x390] sm:$0xff] %vm694_vm0, %v680_v47 }
  0x88   : > { %810 = vst.msk [vmem:[%s974_s25 + $0x398] sm:$0xff] %vm694_vm0, %v681_v51 }
  0x89   : > { %811 = vst.msk [vmem:[%s974_s25 + $0x3a0] sm:$0xff] %vm694_vm0, %v682_v55 }
  0x8a   : > { %812 = vst.msk [vmem:[%s974_s25 + $0x3a8] sm:$0xff] %vm694_vm0, %v683_v59 }
  0x8b   : > { %813 = vst.msk [vmem:[%s974_s25 + $0x3b0] sm:$0xff] %vm694_vm0, %v684_v62 }
  0x8c   : > { %814 = vst.msk [vmem:[%s974_s25 + $0x3b8] sm:$0xff] %vm694_vm0, %v685_v3 }
  0x8d   : > { %815 = vst.msk [vmem:[%s974_s25 + $0x3c0] sm:$0xff] %vm694_vm0, %v686_v6 }
  0x8e   : > { %816 = vst.msk [vmem:[%s974_s25 + $0x3c8] sm:$0xff] %vm694_vm0, %v687_v8 }
  0x8f   : > { %817 = vst.msk [vmem:[%s974_s25 + $0x3d0] sm:$0xff] %vm694_vm0, %v688_v10 }
  0x90   : > { %818 = vst.msk [vmem:[%s974_s25 + $0x3d8] sm:$0xff] %vm694_vm0, %v689_v11 }
  0x91   : > { %819 = vst.msk [vmem:[%s974_s25 + $0x3e0] sm:$0xff] %vm694_vm0, %v690_v13 }
  0x92   : > { %820 = vst.msk [vmem:[%s974_s25 + $0x3e8] sm:$0xff] %vm694_vm0, %v691_v14 }
  0x93   : > { %821 = vst.msk [vmem:[%s974_s25 + $0x3f0] sm:$0xff] %vm694_vm0, %v692_v15 }
  0x94   : > { %822 = vst.msk [vmem:[%s974_s25 + $0x3f8] sm:$0xff] %vm694_vm0, %v693_v16 }
  0x95 PF: > { %s13_s12 = sadd.s32 1, %s908_s12  }
  0x96   : > { %p10_p4 = scmp.ge.s32.totalorder %s13_s12, 4  }
  0x98   :  { %12 = sbr.rel (!%p10_p4) target bundleno = 1 (0x1), region = 62 }

// kernel: trans_block_forward.5
= control target key start
LH: loop header
LB: loop body
LE: loop exit
PB: predicated region body
PF: predicated region fallthrough
CT: control target
= control target key end

     0   :  { %s2848_s13 = smov 0   ;;  %s2850_s14 = smov 0   ;;  %s3984_s0 = inlined_call_operand.vmem [shape: f32[512,4], index: 0, kind: input, shape index: {}, may-alias: {0,1}]   ;;  %s3985_s1 = inlined_call_operand.vmem [shape: f32[512,4], index: 1, kind: input, shape index: {}, may-alias: {0,1}]   ;;  %s3986_s2 = inlined_call_operand.vmem [shape: f32[4,4], index: 2, kind: input, shape index: {}]   ;;  %s3987_s3 = inlined_call_operand.vmem [shape: f32[1,4], index: 3, kind: input, shape index: {}]   ;;  %s3988_s4 = inlined_call_operand.vmem [shape: f32[1,4], index: 4, kind: input, shape index: {}]   ;;  %s3989_s5 = inlined_call_operand.vmem [shape: f32[4,16], index: 5, kind: input, shape index: {}]   ;;  %s3990_s6 = inlined_call_operand.vmem [shape: f32[4,8], index: 6, kind: input, shape index: {}]   ;;  %s3991_s7 = inlined_call_operand.vmem [shape: f32[4,8], index: 7, kind: input, shape index: {}]   ;;  %s3992_s8 = inlined_call_operand.vmem [shape: f32[4,4], index: 8, kind: input, shape index: {}]   ;;  %s3993_s9 = inlined_call_operand.vmem [shape: f32[2048,4], index: 9, kind: output, shape index: {0}]   ;;  %s3994_s10 = inlined_call_operand.vmem [shape: f32[4,2,4], index: 10, kind: output, shape index: {1}]  }
   0x1   :  { %s2852_s15 = smov 0   ;;  %s2854_s16 = smov 0  }
   0x2   :  { %s2856_s17 = smov 0  }
   0x3 LB: > { %s30_s18 = sadd.s32 1, %s2776_s15  ;;  %s33_s19 = sadd.s32 1, %s2780_s16  ;;  %s2784_s17 = sphi %s2856_s17, %s21_s17   ;;  %s2780_s16 = sphi %s2854_s16, %s4016_s16   ;;  %s2776_s15 = sphi %s2852_s15, %s4015_s15   ;;  %s2772_s14 = sphi %s2850_s14, %s4014_s14   ;;  %s2768_s13 = sphi %s2848_s13, %s4013_s13  }
   0x4   : > { %p31_p0 = scmp.ge.s32.totalorder %s30_s18, 2  ;;  %p2585_p1 = scmp.ge.s32.totalorder %s2784_s17, 1 }
   0x5   : > { %p379_p2 = scmp.lt.s32.totalorder %s2784_s17, 5 }
   0x6   : > { %s4018_s18 = smov (%p31_p0, %s30_s18), 0  ;;  %s4020_s19 = smov (!%p31_p0, %s33_s19), %s2780_s16 }
   0x7   : > { %p380_p3 = pnand %p2585_p1, %p379_p2  ;;  %p35_p4 = scmp.ge.s32.totalorder %s4020_s19, 2 }
   0x8   : > { %s2586_s22 = sshll.u32 (!%p380_p3), %s2772_s14, 1  ;;  %s2692_s11 = sshll.u32 (!%p380_p3), %s2768_s13, 3 }
   0x9   : > { %s4022_s19 = smov (%p35_p4, %s4020_s19), 0  ;;  %383 = sbr.rel (%p380_p3) target bundleno = 736 (0x2e0), region = 56 }
   0xa   : > { %s2888_s23 = sadd.s32 (!%p380_p3), %s2768_s13, %s2586_s22  ;;  %s2589_s12 = sshll.u32 (!%p380_p3), %s2772_s14, 4 }
   0xb   : > { %s2587_s24 = sshll.u32 (!%p380_p3), %s2888_s23, 4  ;;  %s2693_s20 = sadd.s32 (!%p380_p3), 8, %s2692_s11 }
   0xc   : > { %p441_p5 = scmp.lt.s32.totalorder (!%p380_p3), %s2587_s24, 63  ;;  %s451_s21 = sadd.s32 (!%p380_p3), %s2693_s20, %s2589_s12 }
   0xd   : > { %p452_p6 = scmp.lt.s32.totalorder (!%p380_p3), %s451_s21, 31  ;;  %p712_p8 = scmp.lt.s32.totalorder (!%p380_p3), %s2768_s13, 1 }
   0xe   : > { %v500_v0 = vld [vmem:[%s3986_s2] sm:$0xf]  ;;  %vm550_vm0 = vcmask 1043456   ;;  %s4024_s24 = smov (!%p441_p5, %s2587_s24), 63  ;;  %vm501_vm1 = vcmask 31744   ;;  %v737_v36 = vlaneseq  ;;  %s2594_s13 = sshll.u32 %s2888_s23, 6 }
   0xf   : > { %2598 = vmatpush.msk.msra.mxu0 %vm550_vm0, %v500_v0  ;;  %2694 = vmatpush.msk.msra.mxu1 %vm550_vm0, %v500_v0  ;;  %s2588_s25 = sshll.u32 %s4024_s24, 3  ;;  %v1179_v5 = vld [vmem:[%s3990_s6] sm:$0xf]  ;;  %s4026_s21 = smov (!%p452_p6, %s451_s21), 31  ;;  %vm2085_vm11 = vcmask 64544   ;;  %vm2128_vm12 = vcmask 97344  }
  0x10   : > { %2695 = vmatpush.msk.msra.mxu2 %vm550_vm0, %v500_v0  ;;  %2696 = vmatpush.msk.msra.mxu3 %vm550_vm0, %v500_v0  ;;  %s2898_s28 = scalar_lea.vmem %s3984_s0, %s2588_s25  ;;  %s2591_s22 = sshll.u32 %s4026_s21, 1  ;;  %v1062_v20 = vld [vmem:[%s3989_s5] sm:$0xf]  ;;  %v2975_v41 = vshrl.u32 %v737_v36, 7  ;;  %vm2171_vm13 = vcmask 130144   ;;  %vm2444_vm14 = vcmask 1040384  }
  0x11   : > { %2615 = vmatpush.msk.msrb.mxu1 %vm550_vm0, %v500_v0  ;;  %v484_v1 = vld [vmem:[%s2898_s28] sm:$0xff]  ;;  %v489_v2 = vld [vmem:[%s2898_s28 + $0x28] sm:$0xff]  ;;  %v490_v3 = vld [vmem:[%s2898_s28 + $0x30] sm:$0xff]  ;;  %p455_p7 = scmp.lt.s32.totalorder %s2591_s22, 63  ;;  %p469_p9 = scmp.lt.s32.totalorder %s2594_s13, 255  ;;  %vm2446_vm15 = vcmask 25600  }
  0x12   : > { %2599 = vmatmul.msk.f32.vlgmr.msra.gmra.mxu0 %vm501_vm1, %v484_v1  ;;  %2604 = vmatmul.msk.f32.vlgmr.msra.gmra.mxu1 %vm501_vm1, %v489_v2  ;;  %v495_v4 = vld [vmem:[%s2898_s28 + $0x58] sm:$0xff]  ;;  %v485_v6 = vld [vmem:[%s2898_s28 + $0x8] sm:$0xff]  ;;  %v496_v8 = vld [vmem:[%s2898_s28 + $0x60] sm:$0xff]  ;;  %v739_v46 = vadd.s32 8, %v2975_v41  ;;  %s713_s25 = scalar_select %p712_p8, 1, 0 }
  0x13   : > { %2605 = vmatmul.msk.f32.vlgmr.msra.gmra.mxu2 %vm501_vm1, %v490_v3  ;;  %2610 = vmatmul.msk.f32.vlgmr.msra.gmra.mxu3 %vm501_vm1, %v495_v4  ;;  %v491_v7 = vld [vmem:[%s2898_s28 + $0x38] sm:$0xff]  ;;  %v486_v9 = vld [vmem:[%s2898_s28 + $0x10] sm:$0xff]  ;;  %v492_v10 = vld [vmem:[%s2898_s28 + $0x40] sm:$0xff]  ;;  %s4028_s22 = smov (!%p455_p7, %s2591_s22), 63  ;;  %s4030_s13 = smov (!%p469_p9, %s2594_s13), 255 }
  0x14   : > { %2635 = vmatpush.msk.msrb.mxu3 %vm550_vm0, %v1179_v5  ;;  %v497_v11 = vld [vmem:[%s2898_s28 + $0x68] sm:$0xff]  ;;  %v487_v12 = vld [vmem:[%s2898_s28 + $0x18] sm:$0xff]  ;;  %v498_v14 = vld [vmem:[%s2898_s28 + $0x70] sm:$0xff]  ;;  %s2592_s24 = sshll.u32 %s4028_s22, 3  ;;  %2618 = vmatpush.msk.msrb.mxu2 %vm550_vm0, %v1062_v20  ;;  %v765_v53 = vand.u32 15, %v739_v46  ;;  %s2595_s26 = sshll.u32 %s4030_s13, 3 }
  0x15   : > { %v493_v13 = vld [vmem:[%s2898_s28 + $0x48] sm:$0xff]  ;;  %v488_v15 = vld [vmem:[%s2898_s28 + $0x20] sm:$0xff]  ;;  %v494_v16 = vld [vmem:[%s2898_s28 + $0x50] sm:$0xff]  ;;  %s458_s27 = scalar_lea.vmem %s3985_s1, %s2592_s24  ;;  %s3164_s14 = scalar_lea.vmem %s3993_s9, %s2595_s26 }
  0x16   : > { %v499_v17 = vld [vmem:[%s2898_s28 + $0x78] sm:$0xff]  ;;  %v675_v18 = vld [vmem:[%s458_s27] sm:$0xff]  ;;  %v676_v19 = vld [vmem:[%s458_s27 + $0x8] sm:$0xff]  ;;  %vm2990_vm2 = vcmp.ne.s32.totalorder %v765_v53, 15  ;;  %s2787_s29 = smov 8   ;;  %s2788_s30 = smov 4  }
  0x17   : > { %v1254_v21 = vld [vmem:[%s3991_s7] sm:$0xf]  ;;  %s2789_s11 = smov 12   ;;  %s2790_s12 = smov 124  }
  0x18   : > { %v1371_v22 = vld [vmem:[%s3992_s8] sm:$0xf]  ;;  %2652 = vmatpush.msk.msra.mxu1 %vm550_vm0, %v1254_v21  ;;  %s2791_s20 = smov 116   ;;  %s2792_s21 = smov 120  }
  0x19   : > { %2669 = vmatpush.msk.msrb.mxu0 %vm550_vm0, %v1371_v22  ;;  %v2958_v23 = vld [vmem:[%s3987_s3] ss:$0 sm:$0xff]  ;;  %p478_p10 = scmp.lt.s32.totalorder %s2888_s23, 3 }
  0x1a   : > { %2600 = vmatmul.msk.f32.gmra.mxu0 %vm501_vm1, %v485_v6  ;;  %2616 = vmatmul.msk.f32.vlgmr.msrb.gmra.mxu1 %vm501_vm1, %v675_v18  ;;  %v2963_v24 = vld [vmem:[%s3988_s4] ss:$0 sm:$0xff]  ;;  %v741_v6 = vadd.s32 24, %v2975_v41 }
  0x1b   : > { %2606 = vmatmul.msk.f32.gmra.mxu2 %vm501_vm1, %v491_v7  ;;  %2611 = vmatmul.msk.f32.gmra.mxu3 %vm501_vm1, %v496_v8  ;;  %s4032_s23 = smov (!%p478_p10, %s2888_s23), 3 }
  0x1c   : > { %s2597_s22 = sshll.u32 %s4032_s23, 1 }
  0x1d   : > { %s481_s13 = scalar_lea.vmem %s3994_s10, %s2597_s22 }
  0x22   : > { %2601 = vmatmul.msk.f32.gmra.mxu0 %vm501_vm1, %v486_v9  ;;  %2617 = vmatmul.msk.f32.gmra.mxu1 %vm501_vm1, %v676_v19 }
  0x23   : > { %2607 = vmatmul.msk.f32.gmra.mxu2 %vm501_vm1, %v492_v10  ;;  %2612 = vmatmul.msk.f32.gmra.mxu3 %vm501_vm1, %v497_v11 }
  0x2a   : > { %2602 = vmatmul.msk.f32.gmra.mxu0 %vm501_vm1, %v487_v12  ;;  %v779_v12 = vand.u32 15, %v741_v6 }
  0x2b   : > { %2608 = vmatmul.msk.f32.gmra.mxu2 %vm501_vm1, %v493_v13  ;;  %2613 = vmatmul.msk.f32.gmra.mxu3 %vm501_vm1, %v498_v14 }
  0x2c   : > { %vm3014_vm3 = vcmp.ne.s32.totalorder %v779_v12, 15 }
  0x32   : > { %2603 = vmatmul.msk.f32.gmra.mxu0 %vm501_vm1, %v488_v15  ;;  %v749_v15 = vadd.s32 88, %v2975_v41 }
  0x33   : > { %2609 = vmatmul.msk.f32.gmra.mxu2 %vm501_vm1, %v494_v16  ;;  %2614 = vmatmul.msk.f32.gmra.mxu3 %vm501_vm1, %v499_v17 }
  0x8f   : > { %v571_v25 = vpop.f32.mrf.mxu0  ;;  %v586_v28 = vpop.f32.mrf.mxu1 }
  0x90   : > { %v623_v26 = vmul.f32 %v2958_v23, %v571_v25  ;;  %v628_v30 = vmul.f32 %v2958_v23, %v586_v28  ;;  %v743_v25 = vadd.s32 40, %v2975_v41 }
  0x92   : > { %v643_v27 = vadd.f32 %v2963_v24, %v623_v26  ;;  %v648_v31 = vadd.f32 %v2963_v24, %v628_v30 }
  0x94   : > { %v659_v29 = vmax.f32 %v643_v27, 0.0  ;;  %v664_v34 = vmax.f32 %v648_v31, 0.0 }
  0x96   : > { %718 = vst.msk [vmem:[#allocation2] sm:$0xff] %vm501_vm1, %v659_v29  ;;  %v589_v39 = vpop.f32.mrf.mxu2  ;;  %v793_v29 = vand.u32 15, %v743_v25  ;;  %v604_v31 = vpop.f32.mrf.mxu3 }
  0x97   : > { %v574_v32 = vpop.f32.mrf.mxu0  ;;  %723 = vst.msk [vmem:[#allocation2 + $0x28] sm:$0xff] %vm501_vm1, %v664_v34  ;;  %v629_v42 = vmul.f32 %v2958_v23, %v589_v39 }
  0x98   : > { %v624_v33 = vmul.f32 %v2958_v23, %v574_v32  ;;  %v634_v32 = vmul.f32 %v2958_v23, %v604_v31  ;;  %vm3036_vm4 = vcmp.ne.s32.totalorder %v793_v29, 15 }
  0x99   : > { %v649_v44 = vadd.f32 %v2963_v24, %v629_v42 }
  0x9a   : > { %v644_v35 = vadd.f32 %v2963_v24, %v624_v33 }
  0x9b   : > { %v665_v47 = vmax.f32 %v649_v44, 0.0 }
  0x9c   : > { %v660_v37 = vmax.f32 %v644_v35, 0.0  ;;  %v654_v35 = vadd.f32 %v2963_v24, %v634_v32 }
  0x9d   : > { %v962_v38 = vld [vmem:[#allocation2] sm:$0xff]  ;;  %724 = vst.msk [vmem:[#allocation2 + $0x30] sm:$0xff] %vm501_vm1, %v665_v47 }
  0x9e   : > { %719 = vst.msk [vmem:[#allocation2 + $0x8] sm:$0xff] %vm501_vm1, %v660_v37  ;;  %2619 = vmatmul.msk.f32.vlgmr.msrb.gmra.mxu2 %vm501_vm1, %v962_v38  ;;  %v592_v51 = vpop.f32.mrf.mxu2  ;;  %v967_v27 = vld [vmem:[#allocation2 + $0x28] sm:$0xff]  ;;  %v670_v37 = vmax.f32 %v654_v35, 0.0 }
  0x9f   : > { %v577_v40 = vpop.f32.mrf.mxu0  ;;  %v630_v54 = vmul.f32 %v2958_v23, %v592_v51 }
  0xa0   : > { %v625_v43 = vmul.f32 %v2958_v23, %v577_v40  ;;  %729 = vst.msk [vmem:[#allocation2 + $0x58] sm:$0xff] %vm501_vm1, %v670_v37  ;;  %v607_v40 = vpop.f32.mrf.mxu3 }
  0xa1   : > { %v650_v56 = vadd.f32 %v2963_v24, %v630_v54  ;;  %v635_v42 = vmul.f32 %v2958_v23, %v607_v40 }
  0xa2   : > { %v645_v45 = vadd.f32 %v2963_v24, %v625_v43  ;;  %v745_v43 = vadd.s32 56, %v2975_v41 }
  0xa3   : > { %v666_v59 = vmax.f32 %v650_v56, 0.0  ;;  %v655_v44 = vadd.f32 %v2963_v24, %v635_v42 }
  0xa4   : > { %v661_v48 = vmax.f32 %v645_v45, 0.0  ;;  %v985_v34 = vld [vmem:[#allocation2 + $0x29] sm:$0xff] }
  0xa5   : > { %v963_v49 = vld [vmem:[#allocation2 + $0x8] sm:$0xff]  ;;  %725 = vst.msk [vmem:[#allocation2 + $0x38] sm:$0xff] %vm501_vm1, %v666_v59  ;;  %v968_v36 = vld [vmem:[#allocation2 + $0x30] sm:$0xff]  ;;  %v1033_v38 = vsel %vm3036_vm4, %v985_v34, 0.0  ;;  %v1049_v39 = vsel %vm3014_vm3, %v985_v34, 0.0  ;;  %v671_v46 = vmax.f32 %v655_v44, 0.0 }
  0xa6   : > { %v980_v50 = vld [vmem:[#allocation2 + $0x1] sm:$0xff]  ;;  %720 = vst.msk [vmem:[#allocation2 + $0x10] sm:$0xff] %vm501_vm1, %v661_v48  ;;  %2620 = vmatmul.msk.f32.gmra.mxu2 %vm501_vm1, %v963_v49  ;;  %v595_v0 = vpop.f32.mrf.mxu2  ;;  %v807_v48 = vand.u32 15, %v745_v43  ;;  %v753_v43 = vadd.s32 120, %v2975_v41 }
  0xa7   : > { %2653 = vmatmul.msk.f32.vlgmr.msra.gmra.mxu1 %vm501_vm1, %v980_v50  ;;  %v580_v52 = vpop.f32.mrf.mxu0  ;;  %v631_v2 = vmul.f32 %v2958_v23, %v595_v0  ;;  %730 = vst.msk [vmem:[#allocation2 + $0x60] sm:$0xff] %vm501_vm1, %v671_v46 }
  0xa8   : > { %v626_v55 = vmul.f32 %v2958_v23, %v580_v52  ;;  %v610_v49 = vpop.f32.mrf.mxu3  ;;  %vm3059_vm5 = vcmp.ne.s32.totalorder %v807_v48, 15  ;;  %v863_v46 = vand.u32 15, %v753_v43 }
  0xa9   : > { %v651_v4 = vadd.f32 %v2963_v24, %v631_v2  ;;  %v636_v50 = vmul.f32 %v2958_v23, %v610_v49 }
  0xaa   : > { %v646_v57 = vadd.f32 %v2963_v24, %v626_v55  ;;  %vm3152_vm10 = vcmp.ne.s32.totalorder %v863_v46, 15 }
  0xab   : > { %v667_v7 = vmax.f32 %v651_v4, 0.0  ;;  %v656_v53 = vadd.f32 %v2963_v24, %v636_v50 }
  0xac   : > { %v662_v60 = vmax.f32 %v646_v57, 0.0  ;;  %v969_v45 = vld [vmem:[#allocation2 + $0x38] sm:$0xff] }
  0xad   : > { %v964_v61 = vld [vmem:[#allocation2 + $0x10] sm:$0xff]  ;;  %726 = vst.msk [vmem:[#allocation2 + $0x40] sm:$0xff] %vm501_vm1, %v667_v7  ;;  %v672_v55 = vmax.f32 %v656_v53, 0.0 }
  0xae   : > { %v981_v62 = vld [vmem:[#allocation2 + $0x9] sm:$0xff]  ;;  %721 = vst.msk [vmem:[#allocation2 + $0x18] sm:$0xff] %vm501_vm1, %v662_v60  ;;  %2621 = vmatmul.msk.f32.gmra.mxu2 %vm501_vm1, %v964_v61  ;;  %2636 = vmatmul.msk.f32.vlgmr.msrb.gmra.mxu3 %vm501_vm1, %v964_v61  ;;  %v598_v11 = vpop.f32.mrf.mxu2  ;;  %v986_v47 = vld [vmem:[#allocation2 + $0x31] sm:$0xff]  ;;  %v747_v60 = vadd.s32 72, %v2975_v41 }
  0xaf   : > { %v1029_v63 = vsel %vm2990_vm2, %v981_v62, 0.0  ;;  %v583_v1 = vpop.f32.mrf.mxu0  ;;  %v632_v13 = vmul.f32 %v2958_v23, %v598_v11  ;;  %731 = vst.msk [vmem:[#allocation2 + $0x68] sm:$0xff] %vm501_vm1, %v672_v55  ;;  %v700_v11 = vpop.f32.mrf.mxu1 }
  0xb0   : > { %2654 = vmatmul.msk.f32.gmra.mxu1 %vm501_vm1, %v1029_v63  ;;  %v627_v3 = vmul.f32 %v2958_v23, %v583_v1  ;;  %v613_v58 = vpop.f32.mrf.mxu3  ;;  %v821_v1 = vand.u32 15, %v747_v60  ;;  %v706_v12 = vmul.f32 %v2958_v23, %v700_v11 }
  0xb1   : > { %v652_v14 = vadd.f32 %v2963_v24, %v632_v13  ;;  %v637_v59 = vmul.f32 %v2958_v23, %v613_v58  ;;  %v714_v13 = vstv %s713_s25 }
  0xb2   : > { %v647_v5 = vadd.f32 %v2963_v24, %v627_v3  ;;  %vm3083_vm6 = vcmp.ne.s32.totalorder %v821_v1, 15  ;;  %vm3100_vm7 = vcmp.eq.s32.totalorder %v714_v13, 1 }
  0xb3   : > { %v668_v16 = vmax.f32 %v652_v14, 0.0  ;;  %v657_v61 = vadd.f32 %v2963_v24, %v637_v59  ;;  %v708_v14 = vadd.f32 %v2963_v24, %v706_v12 }
  0xb4   : > { %v663_v8 = vmax.f32 %v647_v5, 0.0  ;;  %v987_v51 = vld [vmem:[#allocation2 + $0x39] sm:$0xff] }
  0xb5   : > { %v965_v9 = vld [vmem:[#allocation2 + $0x18] sm:$0xff]  ;;  %727 = vst.msk [vmem:[#allocation2 + $0x48] sm:$0xff] %vm501_vm1, %v668_v16  ;;  %v970_v54 = vld [vmem:[#allocation2 + $0x40] sm:$0xff]  ;;  %v1051_v56 = vsel %vm3036_vm4, %v987_v51, 0.0  ;;  %v1035_v57 = vsel %vm3059_vm5, %v987_v51, 0.0  ;;  %v673_v63 = vmax.f32 %v657_v61, 0.0 }
  0xb6   : > { %v982_v10 = vld [vmem:[#allocation2 + $0x11] sm:$0xff]  ;;  %722 = vst.msk [vmem:[#allocation2 + $0x20] sm:$0xff] %vm501_vm1, %v663_v8  ;;  %2622 = vmatmul.msk.f32.gmra.mxu2 %vm501_vm1, %v965_v9  ;;  %2637 = vmatmul.msk.f32.gmra.mxu3 %vm501_vm1, %v965_v9  ;;  %v601_v21 = vpop.f32.mrf.mxu2  ;;  %v975_v33 = vld [vmem:[#allocation2 + $0x68] sm:$0xff] }
  0xb7   : > { %2670 = vmatmul.msk.f32.vlgmr.msrb.gmra.mxu0 %vm501_vm1, %v982_v10  ;;  %v633_v22 = vmul.f32 %v2958_v23, %v601_v21  ;;  %732 = vst.msk [vmem:[#allocation2 + $0x70] sm:$0xff] %vm501_vm1, %v673_v63  ;;  %v835_v21 = vand.u32 15, %v749_v15  ;;  %v992_v34 = vld [vmem:[#allocation2 + $0x61] sm:$0xff] }
  0xb8   : > { %2655 = vmatmul.msk.f32.gmra.mxu1 %vm501_vm1, %v982_v10  ;;  %v616_v2 = vpop.f32.mrf.mxu3 }
  0xb9   : > { %v653_v26 = vadd.f32 %v2963_v24, %v633_v22  ;;  %v638_v3 = vmul.f32 %v2958_v23, %v616_v2  ;;  %v703_v22 = vpop.f32.mrf.mxu1  ;;  %vm3113_vm8 = vcmp.ne.s32.totalorder %v835_v21, 15 }
  0xba   : > { %v707_v25 = vmul.f32 %v2958_v23, %v703_v22 }
  0xbb   : > { %v669_v28 = vmax.f32 %v653_v26, 0.0  ;;  %v658_v6 = vadd.f32 %v2963_v24, %v638_v3 }
  0xbc   : > { %v971_v62 = vld [vmem:[#allocation2 + $0x48] sm:$0xff]  ;;  %v709_v26 = vadd.f32 %v2963_v24, %v707_v25  ;;  %v751_v24 = vadd.s32 104, %v2975_v41 }
  0xbd   : > { %v966_v17 = vld [vmem:[#allocation2 + $0x20] sm:$0xff]  ;;  %728 = vst.msk [vmem:[#allocation2 + $0x50] sm:$0xff] %vm501_vm1, %v669_v28  ;;  %v674_v8 = vmax.f32 %v658_v6, 0.0 }
  0xbe   : > { %v983_v18 = vld [vmem:[#allocation2 + $0x19] sm:$0xff]  ;;  %2623 = vmatmul.msk.f32.gmra.mxu2 %vm501_vm1, %v966_v17  ;;  %2638 = vmatmul.msk.f32.gmra.mxu3 %vm501_vm1, %v966_v17  ;;  %v984_v30 = vld [vmem:[#allocation2 + $0x21] sm:$0xff]  ;;  %v710_v17 = vmax.f32 %v708_v14, 0.0  ;;  %v711_v29 = vmax.f32 %v709_v26, 0.0  ;;  %v849_v35 = vand.u32 15, %v751_v24  ;;  %v993_v37 = vld [vmem:[#allocation2 + $0x69] sm:$0xff] }
  0xbf   : > { %v1031_v19 = vsel %vm3014_vm3, %v983_v18, 0.0  ;;  %v1047_v20 = vsel %vm2990_vm2, %v983_v18, 0.0  ;;  %v988_v0 = vld [vmem:[#allocation2 + $0x41] sm:$0xff]  ;;  %733 = vst.msk [vmem:[#allocation2 + $0x78] sm:$0xff] %vm501_vm1, %v674_v8  ;;  %v973_v18 = vld [vmem:[#allocation2 + $0x58] sm:$0xff]  ;;  %v1057_v40 = vsel %vm3113_vm8, %v993_v37, 0.0 }
  0xc0   : > { %2656 = vmatmul.msk.f32.gmra.mxu1 %vm501_vm1, %v1031_v19  ;;  %2671 = vmatmul.msk.f32.gmra.mxu0 %vm501_vm1, %v1047_v20  ;;  %v716_v20 = vsel %vm3100_vm7, %v710_v17, 0.0  ;;  %v717_v23 = vsel %vm3100_vm7, %v711_v29, 0.0  ;;  %vm3134_vm9 = vcmp.ne.s32.totalorder %v849_v35, 15 }
  0xc1   : > { %734 = vst.msk [vmem:[#allocation2 + $0x80] sm:$0xff] %vm501_vm1, %v716_v20  ;;  %v1041_v42 = vsel %vm3134_vm9, %v993_v37, 0.0 }
  0xc2   : > { %735 = vst.msk [vmem:[#allocation2 + $0x88] sm:$0xff] %vm501_vm1, %v717_v23 }
  0xc4   : > { %v989_v4 = vld [vmem:[#allocation2 + $0x49] sm:$0xff]  ;;  %v990_v19 = vld [vmem:[#allocation2 + $0x51] sm:$0xff] }
  0xc5   : > { %v972_v7 = vld [vmem:[#allocation2 + $0x50] sm:$0xff]  ;;  %v1053_v9 = vsel %vm3059_vm5, %v989_v4, 0.0  ;;  %v1037_v10 = vsel %vm3083_vm6, %v989_v4, 0.0 }
  0xc6   : > { %2624 = vmatmul.msk.f32.gmra.mxu2 %vm501_vm1, %v967_v27  ;;  %2639 = vmatmul.msk.f32.gmra.mxu3 %vm501_vm1, %v967_v27  ;;  %v991_v27 = vld [vmem:[#allocation2 + $0x59] sm:$0xff] }
  0xc7   : > { %v1055_v31 = vsel %vm3083_vm6, %v991_v27, 0.0  ;;  %v1039_v32 = vsel %vm3113_vm8, %v991_v27, 0.0  ;;  %v977_v44 = vld [vmem:[#allocation2 + $0x78] sm:$0xff] }
  0xc8   : > { %2657 = vmatmul.msk.f32.gmra.mxu1 %vm501_vm1, %v984_v30  ;;  %2672 = vmatmul.msk.f32.gmra.mxu0 %vm501_vm1, %v984_v30  ;;  %v974_v30 = vld [vmem:[#allocation2 + $0x60] sm:$0xff] }
  0xc9   : > { %v978_v49 = vld [vmem:[#allocation2 + $0x80] sm:$0xff]  ;;  %v979_v53 = vld [vmem:[#allocation2 + $0x88] sm:$0xff] }
  0xce   : > { %2625 = vmatmul.msk.f32.gmra.mxu2 %vm501_vm1, %v968_v36  ;;  %2640 = vmatmul.msk.f32.gmra.mxu3 %vm501_vm1, %v968_v36  ;;  %v2786_v36 = vmov 0.0  }
  0xcf   : > { %736 = vst.msk [vmem:[#allocation2 + $0x90] sm:$0xff] %vm501_vm1, %v2786_v36 }
  0xd0   : > { %2658 = vmatmul.msk.f32.gmra.mxu1 %vm501_vm1, %v1033_v38  ;;  %2673 = vmatmul.msk.f32.gmra.mxu0 %vm501_vm1, %v1049_v39  ;;  %v976_v39 = vld [vmem:[#allocation2 + $0x70] sm:$0xff] }
  0xd6   : > { %2626 = vmatmul.msk.f32.gmra.mxu2 %vm501_vm1, %v969_v45  ;;  %2641 = vmatmul.msk.f32.gmra.mxu3 %vm501_vm1, %v969_v45  ;;  %v994_v45 = vld [vmem:[#allocation2 + $0x71] sm:$0xff] }
  0xd8   : > { %2659 = vmatmul.msk.f32.gmra.mxu1 %vm501_vm1, %v986_v47  ;;  %2674 = vmatmul.msk.f32.gmra.mxu0 %vm501_vm1, %v986_v47  ;;  %v995_v47 = vld [vmem:[#allocation2 + $0x79] sm:$0xff] }
  0xd9   : > { %v1059_v41 = vsel %vm3134_vm9, %v995_v47, 0.0  ;;  %v1043_v50 = vsel %vm3152_vm10, %v995_v47, 0.0 }
  0xde   : > { %2627 = vmatmul.msk.f32.gmra.mxu2 %vm501_vm1, %v970_v54  ;;  %2642 = vmatmul.msk.f32.gmra.mxu3 %vm501_vm1, %v970_v54  ;;  %v1044_v54 = vld [vmem:[#allocation2 + $0x81] sm:$0xff] }
  0xe0   : > { %2675 = vmatmul.msk.f32.gmra.mxu0 %vm501_vm1, %v1051_v56  ;;  %2660 = vmatmul.msk.f32.gmra.mxu1 %vm501_vm1, %v1035_v57  ;;  %v1045_v56 = vld [vmem:[#allocation2 + $0x89] sm:$0xff] }
  0xe1   : > { %v1061_v58 = vsel %vm3152_vm10, %v1045_v56, 0.0 }
  0xe6   : > { %2628 = vmatmul.msk.f32.gmra.mxu2 %vm501_vm1, %v971_v62  ;;  %2643 = vmatmul.msk.f32.gmra.mxu3 %vm501_vm1, %v971_v62 }
  0xe8   : > { %2676 = vmatmul.msk.f32.gmra.mxu0 %vm501_vm1, %v988_v0  ;;  %2661 = vmatmul.msk.f32.gmra.mxu1 %vm501_vm1, %v988_v0 }
  0xee   : > { %2629 = vmatmul.msk.f32.gmra.mxu2 %vm501_vm1, %v972_v7  ;;  %2644 = vmatmul.msk.f32.gmra.mxu3 %vm501_vm1, %v972_v7 }
  0xf0   : > { %2677 = vmatmul.msk.f32.gmra.mxu0 %vm501_vm1, %v1053_v9  ;;  %2662 = vmatmul.msk.f32.gmra.mxu1 %vm501_vm1, %v1037_v10 }
  0xf6   : > { %2630 = vmatmul.msk.f32.gmra.mxu2 %vm501_vm1, %v973_v18  ;;  %2645 = vmatmul.msk.f32.gmra.mxu3 %vm501_vm1, %v973_v18 }
  0xf8   : > { %2678 = vmatmul.msk.f32.gmra.mxu0 %vm501_vm1, %v990_v19  ;;  %2663 = vmatmul.msk.f32.gmra.mxu1 %vm501_vm1, %v990_v19 }
  0xfe   : > { %2631 = vmatmul.msk.f32.gmra.mxu2 %vm501_vm1, %v974_v30  ;;  %2646 = vmatmul.msk.f32.gmra.mxu3 %vm501_vm1, %v974_v30 }
 0x100   : > { %2679 = vmatmul.msk.f32.gmra.mxu0 %vm501_vm1, %v1055_v31  ;;  %2664 = vmatmul.msk.f32.gmra.mxu1 %vm501_vm1, %v1039_v32 }
 0x106   : > { %2632 = vmatmul.msk.f32.gmra.mxu2 %vm501_vm1, %v975_v33  ;;  %2647 = vmatmul.msk.f32.gmra.mxu3 %vm501_vm1, %v975_v33 }
 0x108   : > { %2680 = vmatmul.msk.f32.gmra.mxu0 %vm501_vm1, %v992_v34  ;;  %2665 = vmatmul.msk.f32.gmra.mxu1 %vm501_vm1, %v992_v34 }
 0x10e   : > { %2633 = vmatmul.msk.f32.gmra.mxu2 %vm501_vm1, %v976_v39  ;;  %2648 = vmatmul.msk.f32.gmra.mxu3 %vm501_vm1, %v976_v39 }
 0x110   : > { %2681 = vmatmul.msk.f32.gmra.mxu0 %vm501_vm1, %v1057_v40  ;;  %2666 = vmatmul.msk.f32.gmra.mxu1 %vm501_vm1, %v1041_v42 }
 0x116   : > { %2634 = vmatmul.msk.f32.gmra.mxu2 %vm501_vm1, %v977_v44  ;;  %2649 = vmatmul.msk.f32.gmra.mxu3 %vm501_vm1, %v977_v44 }
 0x118   : > { %2682 = vmatmul.msk.f32.gmra.mxu0 %vm501_vm1, %v994_v45  ;;  %2667 = vmatmul.msk.f32.gmra.mxu1 %vm501_vm1, %v994_v45 }
 0x11e   : > { %2650 = vmatmul.msk.f32.gmra.mxu3 %vm501_vm1, %v978_v49 }
 0x120   : > { %2683 = vmatmul.msk.f32.gmra.mxu0 %vm501_vm1, %v1059_v41  ;;  %2668 = vmatmul.msk.f32.gmra.mxu1 %vm501_vm1, %v1043_v50 }
 0x121   : > { %v3168_v51 = vpop.f32.mrf.mxu2 }
 0x122   : > { %1792 = vst.msk [vmem:[%s3164_s14] sm:$0xff] %vm501_vm1, %v3168_v51 }
 0x124   : > { %v1323_v52 = vpop.f32.mrf.mxu1 }
 0x125   : > { %1648 = vrot.lane.b32.xlu2 %v1323_v52, %s2787_s29  ;;  %1504 = vrot.lane.b32.xlu0 %v1323_v52, %s2788_s30 }
 0x126   : > { %2651 = vmatmul.msk.f32.gmra.mxu3 %vm501_vm1, %v979_v53 }
 0x128   : > { %2684 = vmatmul.msk.f32.gmra.mxu0 %vm501_vm1, %v1044_v54 }
 0x129   : > { %v3177_v55 = vpop.f32.mrf.mxu2 }
 0x12a   : > { %1793 = vst.msk [vmem:[%s3164_s14 + $0x8] sm:$0xff] %vm501_vm1, %v3177_v55 }
 0x12d   : > { %v1326_v57 = vpop.f32.mrf.mxu1 }
 0x12e   : > { %1506 = vrot.lane.b32.xlu0 %v1326_v57, %s2788_s30 }
 0x130   : > { %2685 = vmatmul.msk.f32.gmra.mxu0 %vm501_vm1, %v1061_v58 }
 0x131   : > { %v3186_v59 = vpop.f32.mrf.mxu2  ;;  %v1206_v60 = vpop.f32.mrf.mxu3 }
 0x132   : > { %1794 = vst.msk [vmem:[%s3164_s14 + $0x10] sm:$0xff] %vm501_vm1, %v3186_v59  ;;  %1584 = vrot.lane.b32.xlu1 %v1206_v60, %s2787_s29 }
 0x134   : > { %v1440_v62 = vpop.f32.mrf.mxu0 }
 0x135   : > { %v1329_v61 = vpop.f32.mrf.mxu1 }
 0x136   : > { %1650 = vrot.lane.b32.xlu0 %v1326_v57, %s2787_s29 }
 0x139   : > { %v3193_v63 = vpop.f32.mrf.mxu2  ;;  %v1209_v0 = vpop.f32.mrf.mxu3 }
 0x13a   : > { %1795 = vst.msk [vmem:[%s3164_s14 + $0x18] sm:$0xff] %vm501_vm1, %v3193_v63  ;;  %1508 = vrot.lane.b32.xlu1 %v1329_v61, %s2788_s30  ;;  %1586 = vrot.lane.b32.xlu2 %v1209_v0, %s2787_s29 }
 0x13d   : > { %v1332_v1 = vpop.f32.mrf.mxu1  ;;  %v1443_v2 = vpop.f32.mrf.mxu0 }
 0x13e   : > { %1728 = vrot.lane.b32.xlu0 %v1440_v62, %s2789_s11 }
 0x141   : > { %v3201_v3 = vpop.f32.mrf.mxu2  ;;  %v1212_v4 = vpop.f32.mrf.mxu3 }
 0x142   : > { %1796 = vst.msk [vmem:[%s3164_s14 + $0x20] sm:$0xff] %vm501_vm1, %v3201_v3  ;;  %1652 = vrot.lane.b32.xlu1 %v1329_v61, %s2787_s29  ;;  %1654 = vrot.lane.b32.xlu2 %v1332_v1, %s2787_s29 }
 0x145   : > { %v1335_v5 = vpop.f32.mrf.mxu1  ;;  %v1446_v7 = vpop.f32.mrf.mxu0 }
 0x146   : > { %1588 = vrot.lane.b32.xlu0 %v1212_v4, %s2787_s29 }
 0x149   : > { %v3209_v6 = vpop.f32.mrf.mxu2  ;;  %v1215_v8 = vpop.f32.mrf.mxu3 }
 0x14a   : > { %1797 = vst.msk [vmem:[%s3164_s14 + $0x28] sm:$0xff] %vm501_vm1, %v3209_v6  ;;  %1510 = vrot.lane.b32.xlu1 %v1332_v1, %s2788_s30  ;;  %1512 = vrot.lane.b32.xlu2 %v1335_v5, %s2788_s30 }
 0x14d   : > { %v1338_v10 = vpop.f32.mrf.mxu1  ;;  %v1449_v11 = vpop.f32.mrf.mxu0 }
 0x14e   : > { %1656 = vrot.lane.b32.xlu0 %v1335_v5, %s2787_s29 }
 0x151   : > { %v3217_v9 = vpop.f32.mrf.mxu2  ;;  %v1218_v13 = vpop.f32.mrf.mxu3 }
 0x152   : > { %1798 = vst.msk [vmem:[%s3164_s14 + $0x30] sm:$0xff] %vm501_vm1, %v3217_v9  ;;  %1730 = vrot.lane.b32.xlu1 %v1443_v2, %s2789_s11  ;;  %1732 = vrot.lane.b32.xlu2 %v1446_v7, %s2789_s11 }
 0x155   : > { %v1341_v14 = vpop.f32.mrf.mxu1  ;;  %v1452_v15 = vpop.f32.mrf.mxu0 }
 0x156   : > { %1734 = vrot.lane.b32.xlu0 %v1449_v11, %s2789_s11 }
 0x159   : > { %v3225_v12 = vpop.f32.mrf.mxu2  ;;  %v1221_v17 = vpop.f32.mrf.mxu3 }
 0x15a   : > { %1799 = vst.msk [vmem:[%s3164_s14 + $0x38] sm:$0xff] %vm501_vm1, %v3225_v12  ;;  %1514 = vrot.lane.b32.xlu2 %v1338_v10, %s2788_s30  ;;  %1590 = vrot.lane.b32.xlu1 %v1215_v8, %s2787_s29 }
 0x15d   : > { %v1455_v19 = vpop.f32.mrf.mxu0  ;;  %v1344_v20 = vpop.f32.mrf.mxu1 }
 0x15e   : > { %1516 = vrot.lane.b32.xlu0 %v1341_v14, %s2788_s30 }
 0x161   : > { %v3233_v16 = vpop.f32.mrf.mxu2  ;;  %v1224_v21 = vpop.f32.mrf.mxu3 }
 0x162   : > { %1800 = vst.msk [vmem:[%s3164_s14 + $0x40] sm:$0xff] %vm501_vm1, %v3233_v16  ;;  %1658 = vrot.lane.b32.xlu1 %v1338_v10, %s2787_s29  ;;  %1592 = vrot.lane.b32.xlu2 %v1218_v13, %s2787_s29 }
 0x165   : > { %v1347_v25 = vpop.f32.mrf.mxu1  ;;  %v1458_v26 = vpop.f32.mrf.mxu0 }
 0x166   : > { %1594 = vrot.lane.b32.xlu0 %v1221_v17, %s2787_s29 }
 0x169   : > { %v3241_v18 = vpop.f32.mrf.mxu2  ;;  %v1227_v28 = vpop.f32.mrf.mxu3 }
 0x16a   : > { %1801 = vst.msk [vmem:[%s3164_s14 + $0x48] sm:$0xff] %vm501_vm1, %v3241_v18  ;;  %1736 = vrot.lane.b32.xlu1 %v1452_v15, %s2789_s11  ;;  %1660 = vrot.lane.b32.xlu2 %v1341_v14, %s2787_s29 }
 0x16d   : > { %v1350_v29 = vpop.f32.mrf.mxu1  ;;  %v1461_v30 = vpop.f32.mrf.mxu0 }
 0x16e   : > { %1662 = vrot.lane.b32.xlu0 %v1344_v20, %s2787_s29 }
 0x171   : > { %v3249_v22 = vpop.f32.mrf.mxu2  ;;  %v1230_v32 = vpop.f32.mrf.mxu3 }
 0x172   : > { %1802 = vst.msk [vmem:[%s3164_s14 + $0x50] sm:$0xff] %vm501_vm1, %v3249_v22  ;;  %1518 = vrot.lane.b32.xlu1 %v1344_v20, %s2788_s30  ;;  %1738 = vrot.lane.b32.xlu2 %v1455_v19, %s2789_s11 }
 0x175   : > { %v1353_v23 = vpop.f32.mrf.mxu1  ;;  %v1464_v33 = vpop.f32.mrf.mxu0 }
 0x176   : > { %1740 = vrot.lane.b32.xlu0 %v1458_v26, %s2789_s11 }
 0x179   : > { %v3257_v27 = vpop.f32.mrf.mxu2  ;;  %v1233_v35 = vpop.f32.mrf.mxu3 }
 0x17a   : > { %1803 = vst.msk [vmem:[%s3164_s14 + $0x58] sm:$0xff] %vm501_vm1, %v3257_v27  ;;  %1520 = vrot.lane.b32.xlu2 %v1347_v25, %s2788_s30  ;;  %1596 = vrot.lane.b32.xlu1 %v1224_v21, %s2787_s29 }
 0x17d   : > { %v1356_v37 = vpop.f32.mrf.mxu1  ;;  %v1467_v38 = vpop.f32.mrf.mxu0 }
 0x17e   : > { %1522 = vrot.lane.b32.xlu0 %v1350_v29, %s2788_s30 }
 0x17f   : > { %v3280_v34 = vpop.permute.xlu2 %1648 }
 0x181   : > { %v3265_v31 = vpop.f32.mrf.mxu2  ;;  %v1236_v43 = vpop.f32.mrf.mxu3 }
 0x182   : > { %1804 = vst.msk [vmem:[%s3164_s14 + $0x60] sm:$0xff] %vm501_vm1, %v3265_v31  ;;  %1664 = vrot.lane.b32.xlu1 %v1347_v25, %s2787_s29  ;;  %1598 = vrot.lane.b32.xlu2 %v1227_v28, %s2787_s29 }
 0x185   : > { %v1359_v44 = vpop.f32.mrf.mxu1  ;;  %v1470_v48 = vpop.f32.mrf.mxu0 }
 0x186   : > { %1600 = vrot.lane.b32.xlu0 %v1230_v32, %s2787_s29 }
 0x189   : > { %v3273_v24 = vpop.f32.mrf.mxu2  ;;  %v1239_v56 = vpop.f32.mrf.mxu3 }
 0x18a   : > { %1805 = vst.msk [vmem:[%s3164_s14 + $0x68] sm:$0xff] %vm501_vm1, %v3273_v24  ;;  %1742 = vrot.lane.b32.xlu1 %v1461_v30, %s2789_s11  ;;  %1666 = vrot.lane.b32.xlu2 %v1350_v29, %s2787_s29 }
 0x18d   : > { %v1362_v1 = vpop.f32.mrf.mxu1  ;;  %v1473_v2 = vpop.f32.mrf.mxu0 }
 0x18e   : > { %1668 = vrot.lane.b32.xlu0 %v1353_v23, %s2787_s29 }
 0x191   : > { %v3283_v36 = vpop.f32.mrf.mxu2  ;;  %v1242_v13 = vpop.f32.mrf.mxu3 }
 0x192   : > { %1806 = vst.msk [vmem:[%s3164_s14 + $0x70] sm:$0xff] %vm501_vm1, %v3283_v36  ;;  %1524 = vrot.lane.b32.xlu1 %v1353_v23, %s2788_s30  ;;  %1744 = vrot.lane.b32.xlu2 %v1464_v33, %s2789_s11 }
 0x194   : > { %v1587_v39 = vpop.permute.xlu2 %1586 }
 0x195   : > { %v3337_v19 = vadd.f32 %v1587_v39, %v3177_v55  ;;  %v1365_v20 = vpop.f32.mrf.mxu1  ;;  %v1476_v25 = vpop.f32.mrf.mxu0 }
 0x196   : > { %1746 = vrot.lane.b32.xlu0 %v1467_v38, %s2789_s11 }
 0x197   : > { %v1505_v40 = vpop.permute.xlu0 %1504  ;;  %v2326_v30 = vmul.f32 %v3337_v19, %v3337_v19  ;;  %v2130_v33 = vsel %vm2128_vm12, %v3337_v19, 0.0 }
 0x198   : > { %v3299_v45 = vadd.f32 %v1505_v40, %v3168_v51 }
 0x199   : > { %v3291_v42 = vpop.f32.mrf.mxu2  ;;  %v2342_v39 = vsel %vm2128_vm12, %v2326_v30, 0.0  ;;  %v1245_v40 = vpop.f32.mrf.mxu3 }
 0x19a   : > { %1807 = vst.msk [vmem:[%s3164_s14 + $0x78] sm:$0xff] %vm501_vm1, %v3291_v42  ;;  %1526 = vrot.lane.b32.xlu2 %v1356_v37, %s2788_s30  ;;  %1602 = vrot.lane.b32.xlu1 %v1233_v35, %s2787_s29  ;;  %v2267_v49 = vmul.f32 %v3299_v45, %v3299_v45  ;;  %v2086_v50 = vsel %vm2085_vm11, %v3299_v45, 0.0 }
 0x19c   : > { %v3301_v46 = vpop.permute.xlu2 %1654  ;;  %v2283_v57 = vsel %vm2085_vm11, %v2267_v49, 0.0 }
 0x19d   : > { %v1368_v49 = vpop.f32.mrf.mxu1 }
 0x19e   : > { %1528 = vrot.lane.b32.xlu0 %v1359_v44, %s2788_s30 }
 0x1a0   : > { %v1507_v47 = vpop.permute.xlu0 %1506 }
 0x1a1   : > { %v3307_v41 = vadd.f32 %v1507_v47, %v3177_v55 }
 0x1a2   : > { %1670 = vrot.lane.b32.xlu1 %v1356_v37, %s2787_s29  ;;  %1604 = vrot.lane.b32.xlu2 %v1236_v43, %s2787_s29 }
 0x1a3   : > { %v2087_v52 = vsel %vm2085_vm11, %v3307_v41, 0.0  ;;  %v2268_v53 = vmul.f32 %v3307_v41, %v3307_v41 }
 0x1a4   : > { %v2088_v54 = vadd.f32 %v2087_v52, %v2086_v50  ;;  %v1585_v60 = vpop.permute.xlu1 %1584  ;;  %v1513_v62 = vpop.permute.xlu2 %1512 }
 0x1a5   : > { %v2284_v58 = vsel %vm2085_vm11, %v2268_v53, 0.0  ;;  %v3333_v14 = vadd.f32 %v1585_v60, %v3168_v51  ;;  %v3363_v53 = vadd.f32 %v1513_v62, %v3201_v3 }
 0x1a6   : > { %v2285_v61 = vadd.f32 %v2284_v58, %v2283_v57  ;;  %1606 = vrot.lane.b32.xlu0 %v1239_v56, %s2787_s29 }
 0x1a7   : > { %v2325_v26 = vmul.f32 %v3333_v14, %v3333_v14  ;;  %v2129_v32 = vsel %vm2128_vm12, %v3333_v14, 0.0  ;;  %v1696_v58 = vadd.f32 %v3280_v34, %v3333_v14 }
 0x1a8   : > { %v3320_v0 = vpop.permute.xlu0 %1650  ;;  %v2131_v38 = vadd.f32 %v2130_v33, %v2129_v32 }
 0x1a9   : > { %v2341_v35 = vsel %vm2128_vm12, %v2325_v26, 0.0 }
 0x1aa   : > { %1748 = vrot.lane.b32.xlu1 %v1470_v48, %s2789_s11  ;;  %1672 = vrot.lane.b32.xlu2 %v1359_v44, %s2787_s29  ;;  %v2343_v47 = vadd.f32 %v2342_v39, %v2341_v35  ;;  %v1479_v35 = vpop.f32.mrf.mxu0 }
 0x1ac   : > { %v1509_v4 = vpop.permute.xlu1 %1508  ;;  %v1733_v7 = vpop.permute.xlu2 %1732 }
 0x1ad   : > { %v3325_v5 = vadd.f32 %v1509_v4, %v3186_v59 }
 0x1ae   : > { %1674 = vrot.lane.b32.xlu0 %v1362_v1, %s2787_s29 }
 0x1af   : > { %v2089_v8 = vsel %vm2085_vm11, %v3325_v5, 0.0  ;;  %v2269_v10 = vmul.f32 %v3325_v5, %v3325_v5 }
 0x1b0   : > { %v1729_v11 = vpop.permute.xlu0 %1728  ;;  %v2090_v15 = vadd.f32 %v2089_v8, %v2088_v54  ;;  %v2093_v8 = vsel %vm2085_vm11, %v3363_v53, 0.0 }
 0x1b1   : > { %v2286_v17 = vsel %vm2085_vm11, %v2269_v10, 0.0  ;;  %v1776_v10 = vadd.f32 %v1729_v11, %v1696_v58 }
 0x1b2   : > { %v2287_v21 = vadd.f32 %v2286_v17, %v2285_v61  ;;  %1530 = vrot.lane.b32.xlu1 %v1362_v1, %s2788_s30  ;;  %1750 = vrot.lane.b32.xlu2 %v1473_v2, %s2789_s11 }
 0x1b3   : > { %v2383_v30 = vmul.f32 %v1776_v10, %v1776_v10 }
 0x1b4   : > { %v1653_v28 = vpop.permute.xlu1 %1652  ;;  %v1515_v29 = vpop.permute.xlu2 %1514 }
 0x1b5   : > { %v3374_v60 = vadd.f32 %v1515_v29, %v3209_v6  ;;  %v2399_v39 = vsel %vm2171_vm13, %v2383_v30, 0.0 }
 0x1b6   : > { %1752 = vrot.lane.b32.xlu0 %v1476_v25, %s2789_s11  ;;  %v1697_v25 = vadd.f32 %v3320_v0, %v3337_v19 }
 0x1b7   : > { %v2095_v26 = vsel %vm2085_vm11, %v3374_v60, 0.0 }
 0x1b8   : > { %v1589_v23 = vpop.permute.xlu0 %1588 }
 0x1b9   : > { %v3352_v37 = vadd.f32 %v1589_v23, %v3186_v59 }
 0x1ba   : > { %1532 = vrot.lane.b32.xlu2 %v1365_v20, %s2788_s30  ;;  %1608 = vrot.lane.b32.xlu1 %v1242_v13, %s2787_s29 }
 0x1bb   : > { %v2132_v43 = vsel %vm2128_vm12, %v3352_v37, 0.0  ;;  %v2327_v44 = vmul.f32 %v3352_v37, %v3352_v37  ;;  %v1698_v2 = vadd.f32 %v1653_v28, %v3352_v37  ;;  %v1248_v28 = vpop.f32.mrf.mxu3 }
 0x1bc   : > { %v2133_v48 = vadd.f32 %v2132_v43, %v2131_v38  ;;  %v1511_v52 = vpop.permute.xlu1 %1510  ;;  %v3368_v57 = vpop.permute.xlu2 %1592 }
 0x1bd   : > { %v2344_v50 = vsel %vm2128_vm12, %v2327_v44, 0.0  ;;  %v3366_v56 = vadd.f32 %v1511_v52, %v3193_v63 }
 0x1be   : > { %v2345_v54 = vadd.f32 %v2344_v50, %v2343_v47  ;;  %1534 = vrot.lane.b32.xlu0 %v1368_v49, %s2788_s30 }
 0x1bf   : > { %v2091_v61 = vsel %vm2085_vm11, %v3366_v56, 0.0  ;;  %v2270_v62 = vmul.f32 %v3366_v56, %v3366_v56 }
 0x1c0   : > { %v3380_v1 = vpop.permute.xlu0 %1656  ;;  %v2092_v4 = vadd.f32 %v2091_v61, %v2090_v15  ;;  %v3394_v15 = vadd.f32 %v1733_v7, %v1698_v2 }
 0x1c1   : > { %v2288_v34 = vsel %vm2085_vm11, %v2270_v62, 0.0 }
 0x1c2   : > { %v2094_v13 = vadd.f32 %v2093_v8, %v2092_v4  ;;  %v3386_v17 = vadd.f32 %v2288_v34, %v2287_v21  ;;  %1676 = vrot.lane.b32.xlu1 %v1365_v20, %s2787_s29  ;;  %1610 = vrot.lane.b32.xlu2 %v1245_v40, %s2787_s29  ;;  %v2172_v20 = vsel %vm2171_vm13, %v1776_v10, 0.0  ;;  %v2385_v33 = vmul.f32 %v3394_v15, %v3394_v15 }
 0x1c3   : > { %v2175_v43 = vsel %vm2171_vm13, %v3394_v15, 0.0 }
 0x1c4   : > { %v1731_v11 = vpop.permute.xlu1 %1730  ;;  %v3396_v29 = vadd.f32 %v2095_v26, %v2094_v13  ;;  %v3400_v32 = vpop.permute.xlu2 %1660  ;;  %v2402_v50 = vsel %vm2171_vm13, %v2385_v33, 0.0 }
 0x1c5   : > { %v3398_v21 = vadd.f32 %v1731_v11, %v1697_v25  ;;  %v1482_v25 = vpop.f32.mrf.mxu0 }
 0x1c6   : > { %1612 = vrot.lane.b32.xlu0 %v1248_v28, %s2787_s29 }
 0x1c7   : > { %v2173_v0 = vsel %vm2171_vm13, %v3398_v21, 0.0  ;;  %v2384_v7 = vmul.f32 %v3398_v21, %v3398_v21 }
 0x1c8   : > { %v1735_v23 = vpop.permute.xlu0 %1734  ;;  %v2174_v38 = vadd.f32 %v2173_v0, %v2172_v20 }
 0x1c9   : > { %v2400_v40 = vsel %vm2171_vm13, %v2384_v7, 0.0  ;;  %v1251_v7 = vpop.f32.mrf.mxu3 }
 0x1ca   : > { %v2401_v44 = vadd.f32 %v2400_v40, %v2399_v39  ;;  %1824 = vrot.lane.b32.xlu1 %v3299_v45, %s2790_s12  ;;  %1678 = vrot.lane.b32.xlu2 %v1368_v49, %s2787_s29  ;;  %v2176_v47 = vadd.f32 %v2175_v43, %v2174_v38 }
 0x1cc   : > { %v1591_v52 = vpop.permute.xlu1 %1590  ;;  %v2403_v58 = vadd.f32 %v2402_v50, %v2401_v44  ;;  %v1739_v62 = vpop.permute.xlu2 %1738 }
 0x1cd   : > { %v3419_v61 = vadd.f32 %v1591_v52, %v3193_v63 }
 0x1ce   : > { %1828 = vrot.lane.b32.xlu0 %v3325_v5, %s2790_s12 }
 0x1cf   : > { %v2134_v2 = vsel %vm2128_vm12, %v3419_v61, 0.0  ;;  %v2328_v45 = vmul.f32 %v3419_v61, %v3419_v61  ;;  %v1699_v49 = vadd.f32 %v3301_v46, %v3419_v61 }
 0x1d0   : > { %v3427_v4 = vpop.permute.xlu0 %1516  ;;  %v3431_v8 = vadd.f32 %v2134_v2, %v2133_v48 }
 0x1d1   : > { %v2346_v34 = vsel %vm2128_vm12, %v2328_v45, 0.0  ;;  %v1779_v13 = vadd.f32 %v1735_v23, %v1699_v49  ;;  %v1485_v23 = vpop.f32.mrf.mxu0 }
 0x1d2   : > { %v3434_v26 = vadd.f32 %v2346_v34, %v2345_v54  ;;  %1754 = vrot.lane.b32.xlu1 %v1479_v35, %s2789_s11  ;;  %1826 = vrot.lane.b32.xlu2 %v3307_v41, %s2790_s12  ;;  %v3446_v54 = vadd.f32 %v3368_v57, %v3201_v3 }
 0x1d3   : > { %v2177_v5 = vsel %vm2171_vm13, %v1779_v13, 0.0  ;;  %v2386_v28 = vmul.f32 %v1779_v13, %v1779_v13 }
 0x1d4   : > { %v1659_v11 = vpop.permute.xlu1 %1658  ;;  %v2178_v30 = vadd.f32 %v2177_v5, %v2176_v47  ;;  %v3440_v20 = vpop.permute.xlu2 %1520  ;;  %v1700_v41 = vadd.f32 %v3380_v1, %v3446_v54 }
 0x1d5   : > { %v2404_v46 = vsel %vm2171_vm13, %v2386_v28, 0.0 }
 0x1d6   : > { %1984 = vrot.lane.b32.xlu0 %v1776_v10, %s2791_s20  ;;  %v2405_v48 = vadd.f32 %v2404_v46, %v2403_v58 }
 0x1d8   : > { %v1595_v0 = vpop.permute.xlu0 %1594 }
 0x1d9   : > { %v3463_v1 = vadd.f32 %v1595_v0, %v3209_v6 }
 0x1da   : > { %1756 = vrot.lane.b32.xlu2 %v1482_v25, %s2789_s11  ;;  %1614 = vrot.lane.b32.xlu1 %v1251_v7, %s2787_s29 }
 0x1db   : > { %v1701_v47 = vadd.f32 %v1659_v11, %v3463_v1 }
 0x1dc   : > { %v1737_v33 = vpop.permute.xlu1 %1736  ;;  %v3452_v10 = vpop.permute.xlu2 %1598 }
 0x1dd   : > { %v1780_v35 = vadd.f32 %v1737_v33, %v1700_v41 }
 0x1de   : > { %1758 = vrot.lane.b32.xlu0 %v1485_v23, %s2789_s11 }
 0x1df   : > { %v2179_v38 = vsel %vm2171_vm13, %v1780_v35, 0.0  ;;  %v2387_v50 = vmul.f32 %v1780_v35, %v1780_v35 }
 0x1e0   : > { %v3456_v57 = vpop.permute.xlu0 %1662  ;;  %v2180_v39 = vadd.f32 %v2179_v38, %v2178_v30 }
 0x1e1   : > { %v2406_v52 = vsel %vm2171_vm13, %v2387_v50, 0.0  ;;  %v3527_v50 = vadd.f32 %v3452_v10, %v3225_v12 }
 0x1e2   : > { %1904 = vrot.lane.b32.xlu2 %v3333_v14, %s2792_s21  ;;  %1830 = vrot.lane.b32.xlu1 %v3366_v56, %s2790_s12  ;;  %v1781_v14 = vadd.f32 %v1739_v62, %v1701_v47  ;;  %v2407_v49 = vadd.f32 %v2406_v52, %v2405_v48 }
 0x1e3   : > { %v1703_v10 = vadd.f32 %v3456_v57, %v3527_v50 }
 0x1e4   : > { %v1519_v40 = vpop.permute.xlu1 %1518  ;;  %v3465_v43 = vpop.permute.xlu2 %1666  ;;  %v2388_v45 = vmul.f32 %v1781_v14, %v1781_v14  ;;  %v2181_v34 = vsel %vm2171_vm13, %v1781_v14, 0.0 }
 0x1e5   : > { %v2182_v25 = vadd.f32 %v2181_v34, %v2180_v39  ;;  %v1559_v33 = vadd.f32 %v1519_v40, %v3225_v12 }
 0x1e6   : > { %1906 = vrot.lane.b32.xlu0 %v3337_v19, %s2792_s21  ;;  %v2408_v5 = vsel %vm2171_vm13, %v2388_v45, 0.0 }
 0x1e7   : > { %v2409_v46 = vadd.f32 %v2408_v5, %v2407_v49  ;;  %v2274_v49 = vmul.f32 %v1559_v33, %v1559_v33 }
 0x1e8   : > { %v1741_v44 = vpop.permute.xlu0 %1740 }
 0x1ea   : > { %1986 = vrot.lane.b32.xlu1 %v3398_v21, %s2791_s20  ;;  %1832 = vrot.lane.b32.xlu2 %v3363_v53, %s2790_s12 }
 0x1ec   : > { %v1597_v56 = vpop.permute.xlu1 %1596  ;;  %v3478_v2 = vpop.permute.xlu2 %1744 }
 0x1ed   : > { %v3476_v58 = vadd.f32 %v1597_v56, %v3217_v9 }
 0x1ee   : > { %1834 = vrot.lane.b32.xlu0 %v3374_v60, %s2790_s12 }
 0x1ef   : > { %v1702_v21 = vadd.f32 %v3400_v32, %v3476_v58 }
 0x1f0   : > { %v1523_v19 = vpop.permute.xlu0 %1522 }
 0x1f1   : > { %v1782_v62 = vadd.f32 %v1741_v44, %v1702_v21  ;;  %v1561_v47 = vadd.f32 %v1523_v19, %v3241_v18 }
 0x1f2   : > { %1908 = vrot.lane.b32.xlu1 %v3352_v37, %s2792_s21  ;;  %1988 = vrot.lane.b32.xlu2 %v3394_v15, %s2791_s20  ;;  %v1558_v15 = vadd.f32 %v3427_v4, %v3217_v9  ;;  %v1560_v4 = vadd.f32 %v3440_v20, %v3233_v16  ;;  %v2271_v20 = vmul.f32 %v3363_v53, %v3363_v53 }
 0x1f3   : > { %v2183_v28 = vsel %vm2171_vm13, %v1782_v62, 0.0  ;;  %v2389_v11 = vmul.f32 %v1782_v62, %v1782_v62  ;;  %v2272_v53 = vmul.f32 %v3374_v60, %v3374_v60 }
 0x1f4   : > { %v1665_v30 = vpop.permute.xlu1 %1664  ;;  %v3491_v0 = vadd.f32 %v2183_v28, %v2182_v25  ;;  %v1527_v32 = vpop.permute.xlu2 %1526  ;;  %v2290_v52 = vsel %vm2085_vm11, %v2271_v20, 0.0  ;;  %v2273_v19 = vmul.f32 %v1558_v15, %v1558_v15  ;;  %v2275_v20 = vmul.f32 %v1560_v4, %v1560_v4 }
 0x1f5   : > { %v2410_v48 = vsel %vm2171_vm13, %v2389_v11, 0.0  ;;  %v2291_v45 = vadd.f32 %v2290_v52, %v3386_v17  ;;  %v2292_v5 = vsel %vm2085_vm11, %v2272_v53, 0.0  ;;  %v1563_v57 = vadd.f32 %v1527_v32, %v3257_v27 }
 0x1f6   : > { %1990 = vrot.lane.b32.xlu0 %v1779_v13, %s2791_s20  ;;  %v3495_v7 = vadd.f32 %v2410_v48, %v2409_v46  ;;  %v2294_v60 = vsel %vm2085_vm11, %v2273_v19, 0.0  ;;  %v2296_v11 = vsel %vm2085_vm11, %v2274_v49, 0.0  ;;  %v2276_v52 = vmul.f32 %v1561_v47, %v1561_v47 }
 0x1f7   : > { %v2293_v17 = vadd.f32 %v2292_v5, %v2291_v45  ;;  %v2099_v32 = vsel %vm2085_vm11, %v1559_v33, 0.0  ;;  %v2298_v45 = vsel %vm2085_vm11, %v2275_v20, 0.0 }
 0x1f8   : > { %v1601_v37 = vpop.permute.xlu0 %1600  ;;  %v2300_v5 = vsel %vm2085_vm11, %v2276_v52, 0.0 }
 0x1f9   : > { %v3547_v34 = vadd.f32 %v1601_v37, %v3233_v16  ;;  %v2097_v37 = vsel %vm2085_vm11, %v1558_v15, 0.0 }
 0x1fa   : > { %1910 = vrot.lane.b32.xlu2 %v3419_v61, %s2792_s21  ;;  %1836 = vrot.lane.b32.xlu1 %v1558_v15, %s2790_s12 }
 0x1fb   : > { %v1704_v48 = vadd.f32 %v1665_v30, %v3547_v34 }
 0x1fc   : > { %v1743_v41 = vpop.permute.xlu1 %1742  ;;  %v3502_v23 = vpop.permute.xlu2 %1604 }
 0x1fd   : > { %v3576_v15 = vadd.f32 %v3478_v2, %v1704_v48 }
 0x1fe   : > { %1912 = vrot.lane.b32.xlu0 %v3446_v54, %s2792_s21 }
 0x200   : > { %v3506_v13 = vpop.permute.xlu0 %1668 }
 0x202   : > { %1992 = vrot.lane.b32.xlu1 %v1780_v35, %s2791_s20  ;;  %1838 = vrot.lane.b32.xlu2 %v1559_v33, %s2790_s12 }
 0x204   : > { %v1525_v61 = vpop.permute.xlu1 %1524  ;;  %v3513_v38 = vpop.permute.xlu2 %1672 }
 0x205   : > { %v1562_v25 = vadd.f32 %v1525_v61, %v3249_v22 }
 0x206   : > { %1840 = vrot.lane.b32.xlu0 %v1560_v4, %s2790_s12 }
 0x207   : > { %v2277_v30 = vmul.f32 %v1562_v25, %v1562_v25 }
 0x208   : > { %v1747_v39 = vpop.permute.xlu0 %1746 }
 0x209   : > { %v2302_v2 = vsel %vm2085_vm11, %v2277_v30, 0.0  ;;  %v3603_v30 = vadd.f32 %v3502_v23, %v3249_v22 }
 0x20a   : > { %1914 = vrot.lane.b32.xlu1 %v3463_v1, %s2792_s21  ;;  %1994 = vrot.lane.b32.xlu2 %v1781_v14, %s2791_s20 }
 0x20c   : > { %v1603_v44 = vpop.permute.xlu1 %1602  ;;  %v3519_v40 = vpop.permute.xlu2 %1750 }
 0x20d   : > { %v3559_v28 = vadd.f32 %v1603_v44, %v3241_v18 }
 0x20e   : > { %1996 = vrot.lane.b32.xlu0 %v1782_v62, %s2791_s20  ;;  %v3549_v62 = vadd.f32 %v1743_v41, %v1703_v10  ;;  %v2295_v41 = vadd.f32 %v2294_v60, %v2293_v17  ;;  %v2098_v10 = vadd.f32 %v2097_v37, %v3396_v29  ;;  %v2101_v29 = vsel %vm2085_vm11, %v1560_v4, 0.0 }
 0x20f   : > { %v1705_v19 = vadd.f32 %v3465_v43, %v3559_v28  ;;  %v2278_v37 = vmul.f32 %v1563_v57, %v1563_v57 }
 0x210   : > { %v1529_v35 = vpop.permute.xlu0 %1528  ;;  %v2297_v53 = vadd.f32 %v2296_v11, %v2295_v41  ;;  %v2100_v49 = vadd.f32 %v2099_v32, %v2098_v10  ;;  %v2103_v11 = vsel %vm2085_vm11, %v1561_v47, 0.0 }
 0x211   : > { %v1564_v60 = vadd.f32 %v1529_v35, %v3265_v31  ;;  %v3585_v33 = vadd.f32 %v1747_v39, %v1705_v19  ;;  %v2105_v39 = vsel %vm2085_vm11, %v1562_v25, 0.0  ;;  %v2304_v10 = vsel %vm2085_vm11, %v2278_v37, 0.0 }
 0x212   : > { %1916 = vrot.lane.b32.xlu2 %v3476_v58, %s2792_s21  ;;  %1842 = vrot.lane.b32.xlu1 %v1561_v47, %s2790_s12  ;;  %v2299_v43 = vadd.f32 %v2298_v45, %v2297_v53  ;;  %v2102_v20 = vadd.f32 %v2101_v29, %v2100_v49  ;;  %v2329_v47 = vmul.f32 %v3446_v54, %v3446_v54 }
 0x213   : > { %v2279_v52 = vmul.f32 %v1564_v60, %v1564_v60 }
 0x214   : > { %v3532_v14 = vpop.permute.xlu1 %1670  ;;  %v3534_v56 = vpop.permute.xlu2 %1532  ;;  %v2301_v48 = vadd.f32 %v2300_v5, %v2299_v43  ;;  %v2104_v53 = vadd.f32 %v2103_v11, %v2102_v20  ;;  %v2136_v43 = vsel %vm2128_vm12, %v3446_v54, 0.0  ;;  %v2348_v37 = vsel %vm2128_vm12, %v2329_v47, 0.0 }
 0x215   : > { %v2306_v49 = vsel %vm2085_vm11, %v2279_v52, 0.0  ;;  %v1706_v54 = vadd.f32 %v3506_v13, %v3603_v30 }
 0x216   : > { %1918 = vrot.lane.b32.xlu0 %v3527_v50, %s2792_s21  ;;  %v2303_v32 = vadd.f32 %v2302_v2, %v2301_v48  ;;  %v2106_v45 = vadd.f32 %v2105_v39, %v2104_v53  ;;  %v2330_v2 = vmul.f32 %v3463_v1, %v3463_v1  ;;  %v2138_v39 = vsel %vm2128_vm12, %v3463_v1, 0.0 }
 0x217   : > { %v2137_v1 = vadd.f32 %v2136_v43, %v3431_v8 }
 0x218   : > { %v3544_v21 = vpop.permute.xlu0 %1606  ;;  %v2305_v5 = vadd.f32 %v2304_v10, %v2303_v32 }
 0x219   : > { %v3632_v47 = vadd.f32 %v3544_v21, %v3257_v27 }
 0x21a   : > { %1998 = vrot.lane.b32.xlu1 %v3549_v62, %s2791_s20  ;;  %1844 = vrot.lane.b32.xlu2 %v1562_v25, %s2790_s12  ;;  %v1566_v25 = vadd.f32 %v3534_v56, %v3283_v36  ;;  %v2109_v56 = vsel %vm2085_vm11, %v1564_v60, 0.0  ;;  %v2307_v11 = vadd.f32 %v2306_v49, %v2305_v5  ;;  %v2350_v49 = vsel %vm2128_vm12, %v2330_v2, 0.0 }
 0x21b   : > { %v2140_v5 = vsel %vm2128_vm12, %v3476_v58, 0.0 }
 0x21c   : > { %v3562_v46 = vpop.permute.xlu1 %1748  ;;  %v3566_v61 = vpop.permute.xlu2 %1610  ;;  %v2281_v52 = vmul.f32 %v1566_v25, %v1566_v25 }
 0x21d   : > { %v3635_v13 = vadd.f32 %v3562_v46, %v1706_v54  ;;  %v2139_v46 = vadd.f32 %v2138_v39, %v2137_v1  ;;  %v2333_v39 = vmul.f32 %v3547_v34, %v3547_v34 }
 0x21e   : > { %1846 = vrot.lane.b32.xlu0 %v1563_v57, %s2790_s12 }
 0x220   : > { %v3570_v44 = vpop.permute.xlu0 %1674 }
 0x222   : > { %1920 = vrot.lane.b32.xlu1 %v3547_v34, %s2792_s21  ;;  %2000 = vrot.lane.b32.xlu2 %v3576_v15, %s2791_s20 }
 0x224   : > { %v1531_v17 = vpop.permute.xlu1 %1530  ;;  %v3591_v41 = vpop.permute.xlu2 %1678 }
 0x225   : > { %v1565_v35 = vadd.f32 %v1531_v17, %v3273_v24  ;;  %v2107_v17 = vsel %vm2085_vm11, %v1563_v57, 0.0  ;;  %v2331_v57 = vmul.f32 %v3476_v58, %v3476_v58  ;;  %v2332_v58 = vmul.f32 %v3527_v50, %v3527_v50 }
 0x226   : > { %2002 = vrot.lane.b32.xlu0 %v3585_v33, %s2791_s20  ;;  %v2108_v20 = vadd.f32 %v2107_v17, %v2106_v45  ;;  %v2349_v45 = vadd.f32 %v2348_v37, %v3434_v26  ;;  %v2141_v37 = vadd.f32 %v2140_v5, %v2139_v46  ;;  %v2185_v5 = vsel %vm2171_vm13, %v3549_v62, 0.0 }
 0x227   : > { %v2280_v19 = vmul.f32 %v1565_v35, %v1565_v35  ;;  %v2352_v8 = vsel %vm2128_vm12, %v2331_v57, 0.0  ;;  %v2390_v57 = vmul.f32 %v3549_v62, %v3549_v62 }
 0x228   : > { %v3596_v4 = vpop.permute.xlu0 %1752  ;;  %v2351_v2 = vadd.f32 %v2350_v49, %v2349_v45  ;;  %v2144_v49 = vsel %vm2128_vm12, %v3547_v34, 0.0  ;;  %v2391_v34 = vmul.f32 %v3576_v15, %v3576_v15 }
 0x229   : > { %v2308_v29 = vsel %vm2085_vm11, %v2280_v19, 0.0  ;;  %v2110_v19 = vadd.f32 %v2109_v56, %v2108_v20 }
 0x22a   : > { %1922 = vrot.lane.b32.xlu2 %v3559_v28, %s2792_s21  ;;  %1848 = vrot.lane.b32.xlu1 %v1564_v60, %s2790_s12  ;;  %v2111_v60 = vsel %vm2085_vm11, %v1565_v35, 0.0  ;;  %v2309_v32 = vadd.f32 %v2308_v29, %v2307_v11  ;;  %v2310_v29 = vsel %vm2085_vm11, %v2281_v52, 0.0  ;;  %v2353_v52 = vadd.f32 %v2352_v8, %v2351_v2 }
 0x22b   : > { %v2112_v17 = vadd.f32 %v2111_v60, %v2110_v19  ;;  %v2142_v19 = vsel %vm2128_vm12, %v3527_v50, 0.0  ;;  %v2412_v50 = vsel %vm2171_vm13, %v2390_v57, 0.0  ;;  %v2186_v2 = vadd.f32 %v2185_v5, %v3491_v0 }
 0x22c   : > { %v1609_v23 = vpop.permute.xlu1 %1608  ;;  %v1827_v48 = vpop.permute.xlu2 %1826  ;;  %v2311_v43 = vadd.f32 %v2310_v29, %v2309_v32  ;;  %v2334_v29 = vmul.f32 %v3559_v28, %v3559_v28  ;;  %v2336_v0 = vmul.f32 %v3632_v47, %v3632_v47 }
 0x22d   : > { %1873 = vst.msk [vmem:[%s3164_s14 + $0x88] sm:$0xff] %vm501_vm1, %v1827_v48  ;;  %v3653_v26 = vadd.f32 %v1609_v23, %v3265_v31  ;;  %v1707_v48 = vadd.f32 %v3532_v14, %v3632_v47 }
 0x22e   : > { %1924 = vrot.lane.b32.xlu0 %v3603_v30, %s2792_s21 }
 0x22f   : > { %v1708_v32 = vadd.f32 %v3513_v38, %v3653_v26  ;;  %v3677_v45 = vadd.f32 %v3519_v40, %v1707_v48  ;;  %v2143_v38 = vadd.f32 %v2142_v19, %v2141_v37  ;;  %v2146_v40 = vsel %vm2128_vm12, %v3559_v28, 0.0 }
 0x230   : > { %v1535_v53 = vpop.permute.xlu0 %1534  ;;  %v2358_v48 = vsel %vm2128_vm12, %v2334_v29, 0.0  ;;  %v2413_v28 = vadd.f32 %v2412_v50, %v3495_v7  ;;  %v2392_v37 = vmul.f32 %v3585_v33, %v3585_v33  ;;  %v2148_v7 = vsel %vm2128_vm12, %v3603_v30, 0.0 }
 0x231   : > { %v3638_v10 = vadd.f32 %v1535_v53, %v3291_v42  ;;  %v3697_v62 = vadd.f32 %v3596_v4, %v1708_v32  ;;  %v2145_v8 = vadd.f32 %v2144_v49, %v2143_v38  ;;  %v2150_v29 = vsel %vm2128_vm12, %v3632_v47, 0.0 }
 0x232   : > { %2004 = vrot.lane.b32.xlu1 %v3635_v13, %s2791_s20  ;;  %1850 = vrot.lane.b32.xlu2 %v1565_v35, %s2790_s12  ;;  %v2113_v35 = vsel %vm2085_vm11, %v1566_v25, 0.0  ;;  %v2362_v38 = vsel %vm2128_vm12, %v2336_v0, 0.0 }
 0x233   : > { %v2282_v21 = vmul.f32 %v3638_v10, %v3638_v10  ;;  %v2115_v54 = vsel %vm2085_vm11, %v3638_v10, 0.0  ;;  %v2114_v60 = vadd.f32 %v2113_v35, %v2112_v17 }
 0x234   : > { %v3658_v11 = vpop.permute.xlu1 %1676  ;;  %v3665_v20 = vpop.permute.xlu2 %1756 }
 0x235   : > { %v2312_v56 = vsel %vm2085_vm11, %v2282_v21, 0.0  ;;  %v2116_v1 = vadd.f32 %v2115_v54, %v2114_v60  ;;  %v2356_v21 = vsel %vm2128_vm12, %v2333_v39, 0.0  ;;  %v2147_v54 = vadd.f32 %v2146_v40, %v2145_v8 }
 0x236   : > { %v2313_v23 = vadd.f32 %v2312_v56, %v2311_v43  ;;  %1852 = vrot.lane.b32.xlu0 %v1566_v25, %s2790_s12  ;;  %v2354_v25 = vsel %vm2128_vm12, %v2332_v58, 0.0  ;;  %v2335_v43 = vmul.f32 %v3603_v30, %v3603_v30  ;;  %v2414_v39 = vsel %vm2171_vm13, %v2391_v34, 0.0 }
 0x237   : > { %v2355_v17 = vadd.f32 %v2354_v25, %v2353_v52  ;;  %v2117_v58 = vrot.slane %v2116_v1, 4  ;;  %v1645_v52 = vadd.f32 %v3566_v61, %v3273_v24  ;;  %v2415_v49 = vadd.f32 %v2414_v39, %v2413_v28 }
 0x238   : > { %v1613_v14 = vpop.permute.xlu0 %1612  ;;  %v2314_v53 = vrot.slane %v2313_v23, 4  ;;  %v2360_v32 = vsel %vm2128_vm12, %v2335_v43, 0.0  ;;  %v2189_v30 = vsel %vm2171_vm13, %v3585_v33, 0.0  ;;  %v2416_v61 = vsel %vm2171_vm13, %v2392_v37, 0.0 }
 0x239   : > { %v2357_v35 = vadd.f32 %v2356_v21, %v2355_v17  ;;  %v2118_v25 = vadd.f32 %v2117_v58, %v2116_v1  ;;  %v2149_v5 = vadd.f32 %v2148_v7, %v2147_v54  ;;  %v2191_v17 = vsel %vm2171_vm13, %v3635_v13, 0.0 }
 0x23a   : > { %1926 = vrot.lane.b32.xlu1 %v3632_v47, %s2792_s21  ;;  %2006 = vrot.lane.b32.xlu2 %v3677_v45, %s2791_s20  ;;  %v2315_v46 = vadd.f32 %v2314_v53, %v2313_v23  ;;  %v2187_v23 = vsel %vm2171_vm13, %v3576_v15, 0.0  ;;  %v2393_v15 = vmul.f32 %v3635_v13, %v3635_v13  ;;  %v1709_v1 = vadd.f32 %v3570_v44, %v1645_v52 }
 0x23b   : > { %v2359_v53 = vadd.f32 %v2358_v48, %v2357_v35  ;;  %v2188_v19 = vadd.f32 %v2187_v23, %v2186_v2  ;;  %v2337_v33 = vmul.f32 %v3653_v26, %v3653_v26  ;;  %v1646_v21 = vadd.f32 %v1613_v14, %v3283_v36 }
 0x23c   : > { %v1825_v56 = vpop.permute.xlu1 %1824  ;;  %v1905_v4 = vpop.permute.xlu2 %1904  ;;  %v2316_v60 = vrot.slane %v2315_v46, 2  ;;  %v2417_v34 = vadd.f32 %v2416_v61, %v2415_v49  ;;  %v2119_v13 = vrot.slane %v2118_v25, 2  ;;  %v2151_v43 = vadd.f32 %v2150_v29, %v2149_v5 }
 0x23d   : > { %1872 = vst.msk [vmem:[%s3164_s14 + $0x80] sm:$0xff] %vm501_vm1, %v1825_v56  ;;  %v2361_v47 = vadd.f32 %v2360_v32, %v2359_v53  ;;  %v2190_v40 = vadd.f32 %v2189_v30, %v2188_v19  ;;  %v2418_v2 = vsel %vm2171_vm13, %v2393_v15, 0.0  ;;  %v2394_v56 = vmul.f32 %v3677_v45, %v3677_v45 }
 0x23e   : > { %2008 = vrot.lane.b32.xlu0 %v3697_v62, %s2791_s20  ;;  %1952 = vst.msk [vmem:[%s3164_s14 + $0x100] sm:$0xff] %vm501_vm1, %v1905_v4  ;;  %v2317_v50 = vadd.f32 %v2316_v60, %v2315_v46  ;;  %v2395_v48 = vmul.f32 %v3697_v62, %v3697_v62  ;;  %v2364_v28 = vsel %vm2128_vm12, %v2337_v33, 0.0  ;;  %v2193_v37 = vsel %vm2171_vm13, %v3677_v45, 0.0 }
 0x23f   : > { %v2363_v14 = vadd.f32 %v2362_v38, %v2361_v47  ;;  %v2192_v46 = vadd.f32 %v2191_v17, %v2190_v40  ;;  %v2154_v54 = vsel %vm2128_vm12, %v1645_v52, 0.0  ;;  %v2419_v0 = vadd.f32 %v2418_v2, %v2417_v34 }
 0x240   : > { %v1829_v57 = vpop.permute.xlu0 %1828  ;;  %v2318_v35 = vrot.slane %v2317_v50, 1  ;;  %v2120_v7 = vadd.f32 %v2119_v13, %v2118_v25  ;;  %v2338_v39 = vmul.f32 %v1645_v52, %v1645_v52  ;;  %v2195_v60 = vsel %vm2171_vm13, %v3697_v62, 0.0 }
 0x241   : > { %1874 = vst.msk [vmem:[%s3164_s14 + $0x90] sm:$0xff] %vm501_vm1, %v1829_v57  ;;  %v2339_v57 = vmul.f32 %v1646_v21, %v1646_v21  ;;  %v2365_v32 = vadd.f32 %v2364_v28, %v2363_v14  ;;  %v2194_v53 = vadd.f32 %v2193_v37, %v2192_v46  ;;  %v2420_v45 = vsel %vm2171_vm13, %v2394_v56, 0.0 }
 0x242   : > { %1928 = vrot.lane.b32.xlu2 %v3653_v26, %s2792_s21  ;;  %1854 = vrot.lane.b32.xlu1 %v3638_v10, %s2790_s12  ;;  %v2152_v10 = vsel %vm2128_vm12, %v3653_v26, 0.0  ;;  %v1710_v26 = vadd.f32 %v3658_v11, %v1646_v21  ;;  %v2422_v19 = vsel %vm2171_vm13, %v2395_v48, 0.0  ;;  %v2319_v62 = vadd.f32 %v2318_v35, %v2317_v50 }
 0x243   : > { %v2153_v23 = vadd.f32 %v2152_v10, %v2151_v43  ;;  %v2421_v30 = vadd.f32 %v2420_v45, %v2419_v0  ;;  %v2196_v61 = vadd.f32 %v2195_v60, %v2194_v53  ;;  %v2121_v29 = vrot.slane %v2120_v7, 1 }
 0x244   : > { %v1755_v8 = vpop.permute.xlu1 %1754  ;;  %v1833_v44 = vpop.permute.xlu2 %1832  ;;  %v3769_v15 = vadd.f32 %v3665_v20, %v1710_v26  ;;  %v2366_v38 = vsel %vm2128_vm12, %v2338_v39, 0.0  ;;  %v2368_v17 = vsel %vm2128_vm12, %v2339_v57, 0.0 }
 0x245   : > { %v3745_v58 = vadd.f32 %v1755_v8, %v1709_v1  ;;  %1876 = vst.msk [vmem:[%s3164_s14 + $0xa0] sm:$0xff] %vm501_vm1, %v1833_v44  ;;  %v2155_v49 = vadd.f32 %v2154_v54, %v2153_v23  ;;  %v2367_v47 = vadd.f32 %v2366_v38, %v2365_v32  ;;  %v2423_v40 = vadd.f32 %v2422_v19, %v2421_v30 }
 0x246   : > { %1930 = vrot.lane.b32.xlu0 %v1645_v52, %s2792_s21  ;;  %v2156_v52 = vsel %vm2128_vm12, %v1646_v21, 0.0  ;;  %v2397_v2 = vmul.f32 %v3769_v15, %v3769_v15  ;;  %v2122_v46 = vadd.f32 %v2121_v29, %v2120_v7  ;;  %v2199_v28 = vsel %vm2171_vm13, %v3769_v15, 0.0 }
 0x247   : > { %v2396_v11 = vmul.f32 %v3745_v58, %v3745_v58  ;;  %v2197_v25 = vsel %vm2171_vm13, %v3745_v58, 0.0  ;;  %v2369_v10 = vadd.f32 %v2368_v17, %v2367_v47 }
 0x248   : > { %v1985_v4 = vpop.permute.xlu0 %1984  ;;  %v2198_v50 = vadd.f32 %v2197_v25, %v2196_v61  ;;  %v2426_v54 = vsel %vm2171_vm13, %v2397_v2, 0.0 }
 0x249   : > { %2032 = vst.msk [vmem:[%s3164_s14 + $0x180] sm:$0xff] %vm501_vm1, %v1985_v4  ;;  %v2424_v1 = vsel %vm2171_vm13, %v2396_v11, 0.0 }
 0x24a   : > { %1932 = vrot.lane.b32.xlu1 %v1646_v21, %s2792_s21  ;;  %v2157_v21 = vadd.f32 %v2156_v52, %v2155_v49  ;;  %v2425_v44 = vadd.f32 %v2424_v1, %v2423_v40  ;;  %v2200_v26 = vadd.f32 %v2199_v28, %v2198_v50 }
 0x24c   : > { %v1615_v5 = vpop.permute.xlu1 %1614  ;;  %v1989_v33 = vpop.permute.xlu2 %1988  ;;  %v2427_v23 = vadd.f32 %v2426_v54, %v2425_v44 }
 0x24d   : > { %v1647_v20 = vadd.f32 %v1615_v5, %v3291_v42  ;;  %2034 = vst.msk [vmem:[%s3164_s14 + $0x190] sm:$0xff] %vm501_vm1, %v1989_v33 }
 0x24e   : > { %2321 = vrot.lane.b32.xlu0 %v2319_v62, %s2790_s12 }
 0x24f   : > { %v2158_v34 = vsel %vm2128_vm12, %v1647_v20, 0.0  ;;  %v2340_v8 = vmul.f32 %v1647_v20, %v1647_v20  ;;  %v1711_v43 = vadd.f32 %v3591_v41, %v1647_v20  ;;  %1934 = vrot.lane.b32.xlu2 %v1647_v20, %s2792_s21 }
 0x250   : > { %v1759_v13 = vpop.permute.xlu0 %1758  ;;  %v2159_v14 = vadd.f32 %v2158_v34, %v2157_v21 }
 0x251   : > { %v2370_v56 = vsel %vm2128_vm12, %v2340_v8, 0.0  ;;  %v1791_v48 = vadd.f32 %v1759_v13, %v1711_v43 }
 0x252   : > { %2124 = vrot.lane.b32.xlu1 %v2122_v46, %s2790_s12  ;;  %v2160_v41 = vrot.slane %v2159_v14, 4  ;;  %v2371_v37 = vadd.f32 %v2370_v56, %v2369_v10 }
 0x253   : > { %v2201_v4 = vsel %vm2171_vm13, %v1791_v48, 0.0  ;;  %v2398_v35 = vmul.f32 %v1791_v48, %v1791_v48 }
 0x254   : > { %v2202_v0 = vadd.f32 %v2201_v4, %v2200_v26  ;;  %v1831_v7 = vpop.permute.xlu1 %1830  ;;  %v2161_v39 = vadd.f32 %v2160_v41, %v2159_v14  ;;  %v2372_v57 = vrot.slane %v2371_v37, 4  ;;  %v1911_v11 = vpop.permute.xlu2 %1910 }
 0x255   : > { %v2428_v60 = vsel %vm2171_vm13, %v2398_v35, 0.0  ;;  %1875 = vst.msk [vmem:[%s3164_s14 + $0x98] sm:$0xff] %vm501_vm1, %v1831_v7 }
 0x256   : > { %v2203_v32 = vrot.slane %v2202_v0, 4  ;;  %v2429_v53 = vadd.f32 %v2428_v60, %v2427_v23  ;;  %1955 = vst.msk [vmem:[%s3164_s14 + $0x118] sm:$0xff] %vm501_vm1, %v1911_v11  ;;  %v2162_v45 = vrot.slane %v2161_v39, 2  ;;  %v2373_v19 = vadd.f32 %v2372_v57, %v2371_v37 }
 0x257   : > { %v2214_v11 = vmul.f32 %v3168_v51, %v3168_v51 }
 0x258   : > { %v1907_v52 = vpop.permute.xlu0 %1906  ;;  %v2163_v25 = vadd.f32 %v2162_v45, %v2161_v39  ;;  %v2374_v62 = vrot.slane %v2373_v19, 2  ;;  %v2430_v49 = vrot.slane %v2429_v53, 4  ;;  %v2204_v30 = vadd.f32 %v2203_v32, %v2202_v0 }
 0x259   : > { %1953 = vst.msk [vmem:[%s3164_s14 + $0x108] sm:$0xff] %vm501_vm1, %v1907_v52  ;;  %v2215_v39 = vmul.f32 %v3177_v55, %v3177_v55  ;;  %v2216_v32 = vmul.f32 %v3186_v59, %v3186_v59  ;;  %v2230_v52 = vsel %vm501_vm1, %v2214_v11, 0.0  ;;  %v2067_v11 = vsel %vm501_vm1, %v3249_v22, 0.0 }
 0x25a   : > { %v2164_v61 = vrot.slane %v2163_v25, 1  ;;  %v2375_v5 = vadd.f32 %v2374_v62, %v2373_v19  ;;  %v2431_v29 = vadd.f32 %v2430_v49, %v2429_v53  ;;  %v2205_v38 = vrot.slane %v2204_v30, 2 }
 0x25b   : > { %v2231_v45 = vsel %vm501_vm1, %v2215_v39, 0.0  ;;  %v2217_v19 = vmul.f32 %v3193_v63, %v3193_v63  ;;  %v2233_v62 = vsel %vm501_vm1, %v2216_v32, 0.0  ;;  %v2218_v49 = vmul.f32 %v3201_v3, %v3201_v3 }
 0x25c   : > { %v1987_v17 = vpop.permute.xlu1 %1986  ;;  %v2165_v1 = vadd.f32 %v2164_v61, %v2163_v25  ;;  %v2376_v20 = vrot.slane %v2375_v5, 1  ;;  %v2432_v33 = vrot.slane %v2431_v29, 2  ;;  %v1839_v21 = vpop.permute.xlu2 %1838  ;;  %v2206_v40 = vadd.f32 %v2205_v38, %v2204_v30 }
 0x25d   : > { %2033 = vst.msk [vmem:[%s3164_s14 + $0x188] sm:$0xff] %vm501_vm1, %v1987_v17  ;;  %v2049_v25 = vsel %vm501_vm1, %v3177_v55, 0.0  ;;  %v2232_v30 = vadd.f32 %v2231_v45, %v2230_v52  ;;  %v2048_v61 = vsel %vm501_vm1, %v3168_v51, 0.0  ;;  %v2219_v38 = vmul.f32 %v3209_v6, %v3209_v6 }
 0x25e   : > { %1879 = vst.msk [vmem:[%s3164_s14 + $0xb8] sm:$0xff] %vm501_vm1, %v1839_v21  ;;  %2167 = vrot.lane.b32.xlu0 %v2165_v1, %s2792_s21  ;;  %v2377_v47 = vadd.f32 %v2376_v20, %v2375_v5  ;;  %v2433_v50 = vadd.f32 %v2432_v33, %v2431_v29  ;;  %v2207_v43 = vrot.slane %v2206_v40, 1  ;;  %v2051_v5 = vsel %vm501_vm1, %v3186_v59, 0.0 }
 0x25f   : > { %v2235_v29 = vsel %vm501_vm1, %v2217_v19, 0.0  ;;  %v2050_v17 = vadd.f32 %v2049_v25, %v2048_v61  ;;  %v2234_v1 = vadd.f32 %v2233_v62, %v2232_v30  ;;  %v2053_v33 = vsel %vm501_vm1, %v3193_v63, 0.0 }
 0x260   : > { %v1835_v34 = vpop.permute.xlu0 %1834  ;;  %2379 = vrot.lane.b32.xlu2 %v2377_v47, %s2792_s21  ;;  %v2434_v8 = vrot.slane %v2433_v50, 1  ;;  %v2208_v44 = vadd.f32 %v2207_v43, %v2206_v40  ;;  %v2237_v51 = vsel %vm501_vm1, %v2218_v49, 0.0  ;;  %v2220_v59 = vmul.f32 %v3217_v9, %v3217_v9 }
 0x261   : > { %1877 = vst.msk [vmem:[%s3164_s14 + $0xa8] sm:$0xff] %vm501_vm1, %v1835_v34  ;;  %v2052_v21 = vadd.f32 %v2051_v5, %v2050_v17  ;;  %v2236_v47 = vadd.f32 %v2235_v29, %v2234_v1  ;;  %v2055_v40 = vsel %vm501_vm1, %v3201_v3, 0.0  ;;  %v2239_v34 = vsel %vm501_vm1, %v2219_v38, 0.0 }
 0x262   : > { %v2435_v13 = vadd.f32 %v2434_v8, %v2433_v50  ;;  %v2221_v8 = vmul.f32 %v3225_v12, %v3225_v12  ;;  %v2057_v43 = vsel %vm501_vm1, %v3209_v6, 0.0  ;;  %v2061_v6 = vsel %vm501_vm1, %v3225_v12, 0.0 }
 0x263   : > { %v2054_v63 = vadd.f32 %v2053_v33, %v2052_v21  ;;  %v2069_v52 = vsel %vm501_vm1, %v3257_v27, 0.0  ;;  %v2228_v62 = vmul.f32 %v3283_v36, %v3283_v36  ;;  %v2071_v61 = vsel %vm501_vm1, %v3265_v31, 0.0 }
 0x264   : > { %v1909_v2 = vpop.permute.xlu1 %1908  ;;  %2437 = vrot.lane.b32.xlu1 %v2435_v13, %s2791_s20  ;;  %v1995_v10 = vpop.permute.xlu2 %1994  ;;  %v2238_v13 = vadd.f32 %v2237_v51, %v2236_v47  ;;  %v2229_v29 = vmul.f32 %v3291_v42, %v3291_v42  ;;  %v2077_v47 = vsel %vm501_vm1, %v3291_v42, 0.0 }
 0x265   : > { %1954 = vst.msk [vmem:[%s3164_s14 + $0x110] sm:$0xff] %vm501_vm1, %v1909_v2  ;;  %v2241_v2 = vsel %vm501_vm1, %v2220_v59, 0.0  ;;  %v2257_v17 = vsel %vm501_vm1, %v2228_v62, 0.0 }
 0x266   : > { %2037 = vst.msk [vmem:[%s3164_s14 + $0x1a8] sm:$0xff] %vm501_vm1, %v1995_v10  ;;  %2014 = vrot.lane.b32.xlu0 %v1791_v48, %s2791_s20  ;;  %v2222_v10 = vmul.f32 %v3233_v16, %v3233_v16  ;;  %v2240_v3 = vadd.f32 %v2239_v34, %v2238_v13  ;;  %v2259_v33 = vsel %vm501_vm1, %v2229_v29, 0.0 }
 0x268   : > { %v1991_v14 = vpop.permute.xlu0 %1990  ;;  %2210 = vrot.lane.b32.xlu2 %v2208_v44, %s2791_s20  ;;  %v2056_v44 = vadd.f32 %v2055_v40, %v2054_v63 }
 0x269   : > { %2035 = vst.msk [vmem:[%s3164_s14 + $0x198] sm:$0xff] %vm501_vm1, %v1991_v14  ;;  %v2059_v14 = vsel %vm501_vm1, %v3217_v9, 0.0  ;;  %v2224_v9 = vmul.f32 %v3249_v22, %v3249_v22 }
 0x26b   : > { %v2249_v39 = vsel %vm501_vm1, %v2224_v9, 0.0 }
 0x26c   : > { %v1837_v46 = vpop.permute.xlu1 %1836  ;;  %2010 = vrot.lane.b32.xlu1 %v3745_v58, %s2791_s20  ;;  %v1917_v56 = vpop.permute.xlu2 %1916 }
 0x26d   : > { %1878 = vst.msk [vmem:[%s3164_s14 + $0xb0] sm:$0xff] %vm501_vm1, %v1837_v46  ;;  %v2243_v46 = vsel %vm501_vm1, %v2221_v8, 0.0 }
 0x26e   : > { %1958 = vst.msk [vmem:[%s3164_s14 + $0x130] sm:$0xff] %vm501_vm1, %v1917_v56  ;;  %v2223_v56 = vmul.f32 %v3241_v18, %v3241_v18 }
 0x270   : > { %v1913_v48 = vpop.permute.xlu0 %1912  ;;  %2012 = vrot.lane.b32.xlu2 %v3769_v15, %s2791_s20 }
 0x271   : > { %1956 = vst.msk [vmem:[%s3164_s14 + $0x120] sm:$0xff] %vm501_vm1, %v1913_v48 }
 0x274   : > { %v1993_v28 = vpop.permute.xlu1 %1992  ;;  %v1845_v58 = vpop.permute.xlu2 %1844 }
 0x275   : > { %2036 = vst.msk [vmem:[%s3164_s14 + $0x1a0] sm:$0xff] %vm501_vm1, %v1993_v28  ;;  %v2058_v28 = vadd.f32 %v2057_v43, %v2056_v44 }
 0x276   : > { %1882 = vst.msk [vmem:[%s3164_s14 + $0xd0] sm:$0xff] %vm501_vm1, %v1845_v58  ;;  %v2242_v58 = vadd.f32 %v2241_v2, %v2240_v3 }
 0x278   : > { %v1841_v26 = vpop.permute.xlu0 %1840 }
 0x279   : > { %1880 = vst.msk [vmem:[%s3164_s14 + $0xc0] sm:$0xff] %vm501_vm1, %v1841_v26  ;;  %v2245_v26 = vsel %vm501_vm1, %v2222_v10, 0.0 }
 0x27c   : > { %v1915_v41 = vpop.permute.xlu1 %1914  ;;  %v2001_v37 = vpop.permute.xlu2 %2000 }
 0x27d   : > { %1957 = vst.msk [vmem:[%s3164_s14 + $0x128] sm:$0xff] %vm501_vm1, %v1915_v41  ;;  %v2060_v41 = vadd.f32 %v2059_v14, %v2058_v28 }
 0x27e   : > { %2040 = vst.msk [vmem:[%s3164_s14 + $0x1c0] sm:$0xff] %vm501_vm1, %v2001_v37  ;;  %v2244_v37 = vadd.f32 %v2243_v46, %v2242_v58 }
 0x27f   : > { %v2062_v12 = vadd.f32 %v2061_v6, %v2060_v41 }
 0x280   : > { %v1997_v15 = vpop.permute.xlu0 %1996 }
 0x281   : > { %2038 = vst.msk [vmem:[%s3164_s14 + $0x1b0] sm:$0xff] %vm501_vm1, %v1997_v15 }
 0x284   : > { %v1843_v4 = vpop.permute.xlu1 %1842  ;;  %v1923_v35 = vpop.permute.xlu2 %1922 }
 0x285   : > { %1881 = vst.msk [vmem:[%s3164_s14 + $0xc8] sm:$0xff] %vm501_vm1, %v1843_v4  ;;  %v2063_v4 = vsel %vm501_vm1, %v3233_v16, 0.0 }
 0x286   : > { %1961 = vst.msk [vmem:[%s3164_s14 + $0x148] sm:$0xff] %vm501_vm1, %v1923_v35  ;;  %v2247_v35 = vsel %vm501_vm1, %v2223_v56, 0.0  ;;  %v2064_v16 = vadd.f32 %v2063_v4, %v2062_v12 }
 0x288   : > { %v1919_v54 = vpop.permute.xlu0 %1918 }
 0x289   : > { %1959 = vst.msk [vmem:[%s3164_s14 + $0x138] sm:$0xff] %vm501_vm1, %v1919_v54  ;;  %v2225_v54 = vmul.f32 %v3257_v27, %v3257_v27 }
 0x28b   : > { %v2251_v32 = vsel %vm501_vm1, %v2225_v54, 0.0 }
 0x28c   : > { %v1999_v0 = vpop.permute.xlu1 %1998  ;;  %v1851_v23 = vpop.permute.xlu2 %1850 }
 0x28d   : > { %2039 = vst.msk [vmem:[%s3164_s14 + $0x1b8] sm:$0xff] %vm501_vm1, %v1999_v0  ;;  %v2246_v0 = vadd.f32 %v2245_v26, %v2244_v37 }
 0x28e   : > { %1885 = vst.msk [vmem:[%s3164_s14 + $0xe8] sm:$0xff] %vm501_vm1, %v1851_v23 }
 0x290   : > { %v1847_v7 = vpop.permute.xlu0 %1846 }
 0x291   : > { %1883 = vst.msk [vmem:[%s3164_s14 + $0xd8] sm:$0xff] %vm501_vm1, %v1847_v7  ;;  %v2065_v7 = vsel %vm501_vm1, %v3241_v18, 0.0 }
 0x292   : > { %v2066_v18 = vadd.f32 %v2065_v7, %v2064_v16 }
 0x294   : > { %v1921_v57 = vpop.permute.xlu1 %1920  ;;  %v2007_v60 = vpop.permute.xlu2 %2006  ;;  %v2068_v22 = vadd.f32 %v2067_v11, %v2066_v18 }
 0x295   : > { %1960 = vst.msk [vmem:[%s3164_s14 + $0x140] sm:$0xff] %vm501_vm1, %v1921_v57  ;;  %v2226_v57 = vmul.f32 %v3265_v31, %v3265_v31  ;;  %v2075_v31 = vsel %vm501_vm1, %v3283_v36, 0.0 }
 0x296   : > { %2043 = vst.msk [vmem:[%s3164_s14 + $0x1d8] sm:$0xff] %vm501_vm1, %v2007_v60  ;;  %v2248_v60 = vadd.f32 %v2247_v35, %v2246_v0  ;;  %v2070_v27 = vadd.f32 %v2069_v52, %v2068_v22 }
 0x297   : > { %v2253_v25 = vsel %vm501_vm1, %v2226_v57, 0.0 }
 0x298   : > { %v2003_v53 = vpop.permute.xlu0 %2002  ;;  %v2250_v19 = vadd.f32 %v2249_v39, %v2248_v60  ;;  %v2072_v1 = vadd.f32 %v2071_v61, %v2070_v27 }
 0x299   : > { %2041 = vst.msk [vmem:[%s3164_s14 + $0x1c8] sm:$0xff] %vm501_vm1, %v2003_v53  ;;  %v2227_v53 = vmul.f32 %v3273_v24, %v3273_v24 }
 0x29a   : > { %v2252_v49 = vadd.f32 %v2251_v32, %v2250_v19 }
 0x29b   : > { %v2255_v5 = vsel %vm501_vm1, %v2227_v53, 0.0 }
 0x29c   : > { %v1849_v55 = vpop.permute.xlu1 %1848  ;;  %v1929_v20 = vpop.permute.xlu2 %1928  ;;  %v2254_v38 = vadd.f32 %v2253_v25, %v2252_v49 }
 0x29d   : > { %1884 = vst.msk [vmem:[%s3164_s14 + $0xe0] sm:$0xff] %vm501_vm1, %v1849_v55  ;;  %v2073_v55 = vsel %vm501_vm1, %v3273_v24, 0.0 }
 0x29e   : > { %1964 = vst.msk [vmem:[%s3164_s14 + $0x160] sm:$0xff] %vm501_vm1, %v1929_v20  ;;  %v2256_v20 = vadd.f32 %v2255_v5, %v2254_v38  ;;  %v2074_v59 = vadd.f32 %v2073_v55, %v2072_v1 }
 0x2a0   : > { %v1925_v50 = vpop.permute.xlu0 %1924  ;;  %v2258_v21 = vadd.f32 %v2257_v17, %v2256_v20 }
 0x2a1   : > { %1962 = vst.msk [vmem:[%s3164_s14 + $0x150] sm:$0xff] %vm501_vm1, %v1925_v50  ;;  %v2076_v50 = vadd.f32 %v2075_v31, %v2074_v59 }
 0x2a2   : > { %v2260_v40 = vadd.f32 %v2259_v33, %v2258_v21 }
 0x2a3   : > { %v2078_v34 = vadd.f32 %v2077_v47, %v2076_v50 }
 0x2a4   : > { %v2005_v48 = vpop.permute.xlu1 %2004  ;;  %v2261_v63 = vrot.slane %v2260_v40, 4 }
 0x2a5   : > { %2042 = vst.msk [vmem:[%s3164_s14 + $0x1d0] sm:$0xff] %vm501_vm1, %v2005_v48  ;;  %v2079_v13 = vrot.slane %v2078_v34, 4 }
 0x2a6   : > { %v2262_v43 = vadd.f32 %v2261_v63, %v2260_v40 }
 0x2a7   : > { %v2080_v2 = vadd.f32 %v2079_v13, %v2078_v34 }
 0x2a8   : > { %v1853_v15 = vpop.permute.xlu0 %1852  ;;  %v2263_v44 = vrot.slane %v2262_v43, 2 }
 0x2a9   : > { %1886 = vst.msk [vmem:[%s3164_s14 + $0xf0] sm:$0xff] %vm501_vm1, %v1853_v15  ;;  %v1935_v23 = vpop.permute.xlu2 %1934  ;;  %v2081_v42 = vrot.slane %v2080_v2, 2 }
 0x2aa   : > { %1967 = vst.msk [vmem:[%s3164_s14 + $0x178] sm:$0xff] %vm501_vm1, %v1935_v23  ;;  %v2264_v3 = vadd.f32 %v2263_v44, %v2262_v43 }
 0x2ab   : > { %v2082_v46 = vadd.f32 %v2081_v42, %v2080_v2 }
 0x2ac   : > { %v1927_v45 = vpop.permute.xlu1 %1926  ;;  %v2265_v48 = vrot.slane %v2264_v3, 1 }
 0x2ad   : > { %1963 = vst.msk [vmem:[%s3164_s14 + $0x158] sm:$0xff] %vm501_vm1, %v1927_v45  ;;  %v2083_v28 = vrot.slane %v2082_v46, 1 }
 0x2ae   : > { %v2266_v6 = vadd.f32 %v2265_v48, %v2264_v3 }
 0x2af   : > { %v2084_v41 = vadd.f32 %v2083_v28, %v2082_v46 }
 0x2b0   : > { %v2009_v30 = vpop.permute.xlu0 %2008 }
 0x2b1   : > { %2044 = vst.msk [vmem:[%s3164_s14 + $0x1e0] sm:$0xff] %vm501_vm1, %v2009_v30 }
 0x2b4   : > { %v1855_v51 = vpop.permute.xlu1 %1854 }
 0x2b5   : > { %1887 = vst.msk [vmem:[%s3164_s14 + $0xf8] sm:$0xff] %vm501_vm1, %v1855_v51 }
 0x2b8   : > { %v1931_v24 = vpop.permute.xlu0 %1930 }
 0x2b9   : > { %1965 = vst.msk [vmem:[%s3164_s14 + $0x168] sm:$0xff] %vm501_vm1, %v1931_v24 }
 0x2ba   : > { %v2380_v8 = vpop.permute.xlu2 %2379 }
 0x2bc   : > { %v1933_v36 = vpop.permute.xlu1 %1932 }
 0x2bd   : > { %1966 = vst.msk [vmem:[%s3164_s14 + $0x170] sm:$0xff] %vm501_vm1, %v1933_v36 }
 0x2c0   : > { %v2322_v14 = vpop.permute.xlu0 %2321 }
 0x2c1   : > { %v2324_v9 = vadd.f32 %v2322_v14, %v2266_v6 }
 0x2c2   : > { %v2211_v10 = vpop.permute.xlu2 %2210 }
 0x2c3   : > { %v2382_v4 = vadd.f32 %v2380_v8, %v2324_v9 }
 0x2c4   : > { %v2125_v58 = vpop.permute.xlu1 %2124 }
 0x2c5   : > { %v2127_v37 = vadd.f32 %v2125_v58, %v2084_v41 }
 0x2ca   : > { %v2013_v56 = vpop.permute.xlu2 %2012 }
 0x2cb   : > { %2046 = vst.msk [vmem:[%s3164_s14 + $0x1f0] sm:$0xff] %vm501_vm1, %v2013_v56 }
 0x2d0   : > { %v2168_v26 = vpop.permute.xlu0 %2167 }
 0x2d1   : > { %v2170_v15 = vadd.f32 %v2168_v26, %v2127_v37 }
 0x2d3   : > { %v2213_v0 = vadd.f32 %v2211_v10, %v2170_v15 }
 0x2d6   : > { %v2438_v35 = vpop.permute.xlu1 %2437 }
 0x2d7   : > { %v2440_v54 = vadd.f32 %v2438_v35, %v2382_v4 }
 0x2d8   : > { %v2015_v12 = vpop.permute.xlu0 %2014 }
 0x2d9   : > { %v2442_v23 = vrot.slane %v2440_v54, 7  ;;  %2047 = vst.msk [vmem:[%s3164_s14 + $0x1f8] sm:$0xff] %vm501_vm1, %v2015_v12 }
 0x2db   : > { %v2445_v7 = vsel %vm2444_vm14, %v2213_v0, %v2442_v23 }
 0x2dc   : > { %2447 = vst.msk [vmem:[%s481_s13] sm:$0x3] %vm2446_vm15, %v2445_v7 }
 0x2de   : > { %v2011_v39 = vpop.permute.xlu1 %2010 }
 0x2df   : > { %2045 = vst.msk [vmem:[%s3164_s14 + $0x1e8] sm:$0xff] %vm501_vm1, %v2011_v39 }
 0x2e0 PF: > { %s21_s17 = sadd.s32 1, %s2784_s17   ;;  %s4013_s13 = smov %s2776_s15 }
 0x2e1   : > { %p18_p11 = scmp.ge.s32.totalorder %s21_s17, 6   ;;  %s4014_s14 = smov %s2780_s16 }
 0x2e2   : > { %s4015_s15 = smov %s4018_s18  ;;  %s4016_s16 = smov %s4022_s19 }
 0x2e3   :  { %20 = sbr.rel (!%p18_p11) target bundleno = 3 (0x3), region = 101 }

// kernel: trans_block_forward.6
= control target key start
LH: loop header
LB: loop body
LE: loop exit
PB: predicated region body
PF: predicated region fallthrough
CT: control target
= control target key end

     0   :  { %s2616_s18 = smov 0   ;;  %s4369_s0 = inlined_call_operand.vmem [shape: f32[2048,4], index: 0, kind: input, shape index: {}]   ;;  %s4370_s1 = inlined_call_operand.vmem [shape: f32[1,4], index: 1, kind: input, shape index: {}]   ;;  %s4371_s2 = inlined_call_operand.vmem [shape: f32[1,4], index: 2, kind: input, shape index: {}]   ;;  %s4372_s3 = inlined_call_operand.vmem [shape: f32[4,8], index: 3, kind: input, shape index: {}]   ;;  %s4373_s4 = inlined_call_operand.vmem [shape: f32[2048,8], index: 4, kind: output, shape index: {0}]   ;;  %s4374_s5 = inlined_call_operand.vmem [shape: f32[2,2,8], index: 5, kind: output, shape index: {1}]  }
   0x1 LB: > { %s2622_s19 = sadd.s32 4294967295, %s2584_s18   ;;  %p2424_p0 = scmp.ge.s32.totalorder %s2584_s18, 1  ;;  %s2584_s18 = sphi %s2616_s18, %s16_s18  }
   0x2   : > { %p191_p1 = scmp.lt.s32.totalorder %s2584_s18, 3 }
   0x4   : > { %p192_p2 = pnand %p2424_p0, %p191_p1 }
   0x6   : > { %195 = sbr.rel (%p192_p2) target bundleno = 609 (0x261), region = 36 }
   0xb   : > { %v759_v0 = vld [vmem:[%s4372_s3] sm:$0xf]  ;;  %vm1145_vm0 = vcmask 1043456   ;;  %s2425_s22 = sshll.u32 %s2622_s19, 7  ;;  %vm760_vm1 = vcmask 31744   ;;  %vm1550_vm2 = vcmask 64512  }
   0xc   : > { %2430 = vmatpush.msk.msra.mxu0 %vm1145_vm0, %v759_v0  ;;  %p224_p3 = scmp.lt.s32.totalorder %s2425_s22, 255  ;;  %2561 = vmatpush.msk.msra.mxu1 %vm1145_vm0, %v759_v0  ;;  %v2635_v1 = vld [vmem:[%s4370_s1] ss:$0 sm:$0xff]  ;;  %p235_p4 = scmp.lt.s32.totalorder %s2622_s19, 1  ;;  %vm2329_vm3 = vcmask 1040384   ;;  %vm2331_vm4 = vcmask 58368  }
   0xd   : > { %2562 = vmatpush.msk.msra.mxu2 %vm1145_vm0, %v759_v0  ;;  %2563 = vmatpush.msk.msra.mxu3 %vm1145_vm0, %v759_v0  ;;  %v2648_v2 = vld [vmem:[%s4371_s2] ss:$0 sm:$0xff] }
   0xe   : > { %s4436_s22 = smov (!%p224_p3, %s2425_s22), 255  ;;  %s4438_s19 = smov (!%p235_p4, %s2622_s19), 1 }
   0xf   : > { %s2426_s25 = sshll.u32 %s4436_s22, 3  ;;  %s2429_s17 = sshll.u32 %s4438_s19, 1 }
  0x10   : > { %s2643_s28 = scalar_lea.vmem %s4369_s0, %s2426_s25  ;;  %s2793_s8 = scalar_lea.vmem %s4373_s4, %s2426_s25 }
  0x11   : > { %v239_v3 = vld [vmem:[%s2643_s28] sm:$0xff]  ;;  %v240_v4 = vld [vmem:[%s2643_s28 + $0x8] sm:$0xff]  ;;  %v241_v10 = vld [vmem:[%s2643_s28 + $0x10] sm:$0xff]  ;;  %s238_s22 = scalar_lea.vmem %s4374_s5, %s2429_s17 }
  0x12   : > { %v371_v5 = vmul.f32 %v2635_v1, %v239_v3  ;;  %v372_v7 = vmul.f32 %v2635_v1, %v240_v4  ;;  %v373_v12 = vmul.f32 %v2635_v1, %v241_v10  ;;  %v242_v14 = vld [vmem:[%s2643_s28 + $0x18] sm:$0xff]  ;;  %v243_v18 = vld [vmem:[%s2643_s28 + $0x20] sm:$0xff]  ;;  %v244_v22 = vld [vmem:[%s2643_s28 + $0x28] sm:$0xff] }
  0x13   : > { %v374_v16 = vmul.f32 %v2635_v1, %v242_v14  ;;  %v375_v20 = vmul.f32 %v2635_v1, %v243_v18  ;;  %v271_v23 = vld [vmem:[%s2643_s28 + $0x100] sm:$0xff]  ;;  %v376_v26 = vmul.f32 %v2635_v1, %v244_v22  ;;  %v245_v30 = vld [vmem:[%s2643_s28 + $0x30] sm:$0xff]  ;;  %v272_v31 = vld [vmem:[%s2643_s28 + $0x108] sm:$0xff] }
  0x14   : > { %v503_v6 = vadd.f32 %v2648_v2, %v371_v5  ;;  %v504_v9 = vadd.f32 %v2648_v2, %v372_v7  ;;  %v505_v13 = vadd.f32 %v2648_v2, %v373_v12  ;;  %v403_v24 = vmul.f32 %v2635_v1, %v271_v23  ;;  %v246_v38 = vld [vmem:[%s2643_s28 + $0x38] sm:$0xff]  ;;  %v273_v39 = vld [vmem:[%s2643_s28 + $0x110] sm:$0xff]  ;;  %v247_v46 = vld [vmem:[%s2643_s28 + $0x40] sm:$0xff] }
  0x15   : > { %v506_v17 = vadd.f32 %v2648_v2, %v374_v16  ;;  %v507_v21 = vadd.f32 %v2648_v2, %v375_v20  ;;  %v508_v29 = vadd.f32 %v2648_v2, %v376_v26  ;;  %v404_v32 = vmul.f32 %v2635_v1, %v272_v31  ;;  %v274_v47 = vld [vmem:[%s2643_s28 + $0x118] sm:$0xff]  ;;  %v248_v54 = vld [vmem:[%s2643_s28 + $0x48] sm:$0xff]  ;;  %v275_v55 = vld [vmem:[%s2643_s28 + $0x120] sm:$0xff] }
  0x16   : > { %v631_v8 = vmax.f32 %v503_v6, 0.0  ;;  %v632_v11 = vmax.f32 %v504_v9, 0.0  ;;  %v633_v15 = vmax.f32 %v505_v13, 0.0  ;;  %v535_v27 = vadd.f32 %v2648_v2, %v403_v24  ;;  %v249_v62 = vld [vmem:[%s2643_s28 + $0x50] sm:$0xff]  ;;  %v276_v63 = vld [vmem:[%s2643_s28 + $0x128] sm:$0xff]  ;;  %v251_v16 = vld [vmem:[%s2643_s28 + $0x60] sm:$0xff] }
  0x17   : > { %v634_v19 = vmax.f32 %v506_v17, 0.0  ;;  %v635_v25 = vmax.f32 %v507_v21, 0.0  ;;  %v636_v33 = vmax.f32 %v508_v29, 0.0  ;;  %v377_v34 = vmul.f32 %v2635_v1, %v245_v30  ;;  %v277_v9 = vld [vmem:[%s2643_s28 + $0x130] sm:$0xff]  ;;  %v278_v17 = vld [vmem:[%s2643_s28 + $0x138] sm:$0xff]  ;;  %v279_v29 = vld [vmem:[%s2643_s28 + $0x140] sm:$0xff] }
  0x18   : > { %2431 = vmatmul.msk.f32.vlgmr.msra.gmra.mxu0 %vm760_vm1, %v631_v8  ;;  %v663_v28 = vmax.f32 %v535_v27, 0.0  ;;  %v536_v35 = vadd.f32 %v2648_v2, %v404_v32  ;;  %v405_v40 = vmul.f32 %v2635_v1, %v273_v39  ;;  %v378_v42 = vmul.f32 %v2635_v1, %v246_v38  ;;  %v250_v8 = vld [vmem:[%s2643_s28 + $0x58] sm:$0xff]  ;;  %v304_v31 = vld [vmem:[%s2643_s28 + $0x208] sm:$0xff] }
  0x19   : > { %v509_v37 = vadd.f32 %v2648_v2, %v377_v34  ;;  %v406_v48 = vmul.f32 %v2635_v1, %v274_v47  ;;  %v379_v50 = vmul.f32 %v2635_v1, %v247_v46  ;;  %v407_v56 = vmul.f32 %v2635_v1, %v275_v55  ;;  %v306_v55 = vld [vmem:[%s2643_s28 + $0x218] sm:$0xff] }
  0x1a   : > { %2463 = vmatmul.msk.f32.vlgmr.msra.gmra.mxu1 %vm760_vm1, %v663_v28  ;;  %v664_v36 = vmax.f32 %v536_v35, 0.0  ;;  %v537_v43 = vadd.f32 %v2648_v2, %v405_v40  ;;  %v510_v45 = vadd.f32 %v2648_v2, %v378_v42  ;;  %v380_v58 = vmul.f32 %v2635_v1, %v248_v54  ;;  %v252_v28 = vld [vmem:[%s2643_s28 + $0x68] sm:$0xff]  ;;  %v253_v40 = vld [vmem:[%s2643_s28 + $0x70] sm:$0xff] }
  0x1b   : > { %v637_v41 = vmax.f32 %v509_v37, 0.0  ;;  %v538_v51 = vadd.f32 %v2648_v2, %v406_v48  ;;  %v511_v53 = vadd.f32 %v2648_v2, %v379_v50  ;;  %v539_v59 = vadd.f32 %v2648_v2, %v407_v56 }
  0x1c   : > { %v665_v44 = vmax.f32 %v537_v43, 0.0  ;;  %v638_v49 = vmax.f32 %v510_v45, 0.0  ;;  %v512_v61 = vadd.f32 %v2648_v2, %v380_v58  ;;  %v408_v0 = vmul.f32 %v2635_v1, %v276_v63  ;;  %v305_v43 = vld [vmem:[%s2643_s28 + $0x210] sm:$0xff] }
  0x1d   : > { %v666_v52 = vmax.f32 %v538_v51, 0.0  ;;  %v639_v57 = vmax.f32 %v511_v53, 0.0  ;;  %v667_v60 = vmax.f32 %v539_v59, 0.0  ;;  %v381_v4 = vmul.f32 %v2635_v1, %v249_v62  ;;  %v281_v53 = vld [vmem:[%s2643_s28 + $0x150] sm:$0xff] }
  0x1e   : > { %v640_v3 = vmax.f32 %v512_v61, 0.0  ;;  %v540_v5 = vadd.f32 %v2648_v2, %v408_v0  ;;  %v409_v10 = vmul.f32 %v2635_v1, %v277_v9  ;;  %v382_v12 = vmul.f32 %v2635_v1, %v250_v8  ;;  %v255_v0 = vld [vmem:[%s2643_s28 + $0x80] sm:$0xff] }
  0x1f   : > { %v513_v7 = vadd.f32 %v2648_v2, %v381_v4  ;;  %v410_v18 = vmul.f32 %v2635_v1, %v278_v17  ;;  %v383_v21 = vmul.f32 %v2635_v1, %v251_v16  ;;  %v411_v30 = vmul.f32 %v2635_v1, %v279_v29  ;;  %v308_v17 = vld [vmem:[%s2643_s28 + $0x228] sm:$0xff] }
  0x20   : > { %2432 = vmatmul.msk.f32.gmra.mxu0 %vm760_vm1, %v632_v11  ;;  %v668_v6 = vmax.f32 %v540_v5, 0.0  ;;  %v541_v13 = vadd.f32 %v2648_v2, %v409_v10  ;;  %v436_v35 = vmul.f32 %v2635_v1, %v304_v31  ;;  %v385_v45 = vmul.f32 %v2635_v1, %v253_v40  ;;  %v307_v5 = vld [vmem:[%s2643_s28 + $0x220] sm:$0xff] }
  0x21   : > { %v641_v11 = vmax.f32 %v513_v7, 0.0  ;;  %v542_v22 = vadd.f32 %v2648_v2, %v410_v18  ;;  %v515_v26 = vadd.f32 %v2648_v2, %v383_v21  ;;  %v543_v34 = vadd.f32 %v2648_v2, %v411_v30  ;;  %v309_v30 = vld [vmem:[%s2643_s28 + $0x230] sm:$0xff] }
  0x22   : > { %2464 = vmatmul.msk.f32.gmra.mxu1 %vm760_vm1, %v664_v36  ;;  %v669_v14 = vmax.f32 %v541_v13, 0.0  ;;  %v568_v37 = vadd.f32 %v2648_v2, %v436_v35  ;;  %v437_v47 = vmul.f32 %v2635_v1, %v305_v43  ;;  %v517_v50 = vadd.f32 %v2648_v2, %v385_v45  ;;  %v310_v43 = vld [vmem:[%s2643_s28 + $0x238] sm:$0xff] }
  0x23   : > { %v670_v24 = vmax.f32 %v542_v22, 0.0  ;;  %v643_v32 = vmax.f32 %v515_v26, 0.0  ;;  %v671_v36 = vmax.f32 %v543_v34, 0.0  ;;  %v413_v54 = vmul.f32 %v2635_v1, %v281_v53  ;;  %v257_v26 = vld [vmem:[%s2643_s28 + $0x90] sm:$0xff] }
  0x24   : > { %v696_v39 = vmax.f32 %v568_v37, 0.0  ;;  %v645_v56 = vmax.f32 %v517_v50, 0.0  ;;  %v438_v59 = vmul.f32 %v2635_v1, %v306_v55  ;;  %v387_v7 = vmul.f32 %v2635_v1, %v255_v0 }
  0x25   : > { %v545_v58 = vadd.f32 %v2648_v2, %v413_v54  ;;  %v439_v9 = vmul.f32 %v2635_v1, %v307_v5  ;;  %v440_v21 = vmul.f32 %v2635_v1, %v308_v17  ;;  %v441_v34 = vmul.f32 %v2635_v1, %v309_v30  ;;  %v286_v54 = vld [vmem:[%s2643_s28 + $0x178] sm:$0xff] }
  0x26   : > { %v570_v61 = vadd.f32 %v2648_v2, %v438_v59  ;;  %v418_v55 = vmul.f32 %v2635_v1, %v286_v54 }
  0x27   : > { %v573_v37 = vadd.f32 %v2648_v2, %v441_v34 }
  0x28   : > { %2433 = vmatmul.msk.f32.gmra.mxu0 %vm760_vm1, %v633_v15  ;;  %v514_v15 = vadd.f32 %v2648_v2, %v382_v12  ;;  %v698_v63 = vmax.f32 %v570_v61, 0.0  ;;  %v519_v12 = vadd.f32 %v2648_v2, %v387_v7 }
  0x29   : > { %v701_v40 = vmax.f32 %v573_v37, 0.0 }
  0x2a   : > { %2465 = vmatmul.msk.f32.gmra.mxu1 %vm760_vm1, %v665_v44  ;;  %v642_v20 = vmax.f32 %v514_v15, 0.0  ;;  %v283_v15 = vld [vmem:[%s2643_s28 + $0x160] sm:$0xff]  ;;  %v647_v18 = vmax.f32 %v519_v12, 0.0  ;;  %v312_v12 = vld [vmem:[%s2643_s28 + $0x248] sm:$0xff] }
  0x2b   : > { %v415_v16 = vmul.f32 %v2635_v1, %v283_v15 }
  0x30   : > { %2434 = vmatmul.msk.f32.gmra.mxu0 %vm760_vm1, %v634_v19  ;;  %v303_v19 = vld [vmem:[%s2643_s28 + $0x200] sm:$0xff] }
  0x31   : > { %v435_v23 = vmul.f32 %v2635_v1, %v303_v19 }
  0x32   : > { %2466 = vmatmul.msk.f32.gmra.mxu1 %vm760_vm1, %v666_v52  ;;  %v254_v52 = vld [vmem:[%s2643_s28 + $0x78] sm:$0xff] }
  0x38   : > { %2435 = vmatmul.msk.f32.gmra.mxu0 %vm760_vm1, %v635_v25  ;;  %v567_v25 = vadd.f32 %v2648_v2, %v435_v23 }
  0x3a   : > { %2467 = vmatmul.msk.f32.gmra.mxu1 %vm760_vm1, %v667_v60  ;;  %v695_v27 = vmax.f32 %v567_v25, 0.0  ;;  %v673_v60 = vmax.f32 %v545_v58, 0.0  ;;  %v335_v58 = vld [vmem:[%s2643_s28 + $0x300] sm:$0xff] }
  0x3c   : > { %2495 = vmatmul.msk.f32.vlgmr.msra.gmra.mxu2 %vm760_vm1, %v695_v27 }
  0x40   : > { %2436 = vmatmul.msk.f32.gmra.mxu0 %vm760_vm1, %v636_v33  ;;  %v384_v33 = vmul.f32 %v2635_v1, %v252_v28  ;;  %v284_v28 = vld [vmem:[%s2643_s28 + $0x168] sm:$0xff] }
  0x41   : > { %v416_v29 = vmul.f32 %v2635_v1, %v284_v28  ;;  %v288_v28 = vld [vmem:[%s2643_s28 + $0x188] sm:$0xff] }
  0x42   : > { %2468 = vmatmul.msk.f32.gmra.mxu1 %vm760_vm1, %v668_v6  ;;  %v516_v38 = vadd.f32 %v2648_v2, %v384_v33 }
  0x43   : > { %v548_v33 = vadd.f32 %v2648_v2, %v416_v29  ;;  %v420_v29 = vmul.f32 %v2635_v1, %v288_v28 }
  0x44   : > { %2496 = vmatmul.msk.f32.gmra.mxu2 %vm760_vm1, %v696_v39  ;;  %v644_v44 = vmax.f32 %v516_v38, 0.0  ;;  %v258_v39 = vld [vmem:[%s2643_s28 + $0x98] sm:$0xff] }
  0x45   : > { %v390_v45 = vmul.f32 %v2635_v1, %v258_v39  ;;  %v552_v34 = vadd.f32 %v2648_v2, %v420_v29 }
  0x48   : > { %2437 = vmatmul.msk.f32.gmra.mxu0 %vm760_vm1, %v637_v41  ;;  %v280_v41 = vld [vmem:[%s2643_s28 + $0x148] sm:$0xff] }
  0x49   : > { %v412_v42 = vmul.f32 %v2635_v1, %v280_v41  ;;  %v285_v41 = vld [vmem:[%s2643_s28 + $0x170] sm:$0xff] }
  0x4a   : > { %2469 = vmatmul.msk.f32.gmra.mxu1 %vm760_vm1, %v669_v14  ;;  %v256_v14 = vld [vmem:[%s2643_s28 + $0x88] sm:$0xff] }
  0x4b   : > { %v544_v46 = vadd.f32 %v2648_v2, %v412_v42  ;;  %v388_v19 = vmul.f32 %v2635_v1, %v256_v14  ;;  %v417_v42 = vmul.f32 %v2635_v1, %v285_v41  ;;  %v680_v41 = vmax.f32 %v552_v34, 0.0 }
  0x4d   : > { %v672_v48 = vmax.f32 %v544_v46, 0.0  ;;  %v520_v25 = vadd.f32 %v2648_v2, %v388_v19  ;;  %v549_v46 = vadd.f32 %v2648_v2, %v417_v42 }
  0x4f   : > { %v648_v31 = vmax.f32 %v520_v25, 0.0  ;;  %v261_v25 = vld [vmem:[%s2643_s28 + $0xb0] sm:$0xff] }
  0x50   : > { %2438 = vmatmul.msk.f32.gmra.mxu0 %vm760_vm1, %v638_v49  ;;  %v569_v49 = vadd.f32 %v2648_v2, %v437_v47  ;;  %v442_v47 = vmul.f32 %v2635_v1, %v310_v43  ;;  %v393_v30 = vmul.f32 %v2635_v1, %v261_v25 }
  0x52   : > { %2470 = vmatmul.msk.f32.gmra.mxu1 %vm760_vm1, %v670_v24  ;;  %v697_v51 = vmax.f32 %v569_v49, 0.0  ;;  %v572_v24 = vadd.f32 %v2648_v2, %v440_v21  ;;  %v677_v49 = vmax.f32 %v549_v46, 0.0  ;;  %v574_v50 = vadd.f32 %v2648_v2, %v442_v47  ;;  %v289_v46 = vld [vmem:[%s2643_s28 + $0x190] sm:$0xff] }
  0x54   : > { %2497 = vmatmul.msk.f32.gmra.mxu2 %vm760_vm1, %v697_v51  ;;  %v700_v27 = vmax.f32 %v572_v24, 0.0  ;;  %v522_v51 = vadd.f32 %v2648_v2, %v390_v45  ;;  %v702_v53 = vmax.f32 %v574_v50, 0.0 }
  0x56   : > { %v650_v59 = vmax.f32 %v522_v51, 0.0 }
  0x58   : > { %2439 = vmatmul.msk.f32.gmra.mxu0 %vm760_vm1, %v639_v57  ;;  %v386_v57 = vmul.f32 %v2635_v1, %v254_v52  ;;  %v259_v52 = vld [vmem:[%s2643_s28 + $0xa0] sm:$0xff] }
  0x5a   : > { %2471 = vmatmul.msk.f32.gmra.mxu1 %vm760_vm1, %v671_v36  ;;  %v518_v62 = vadd.f32 %v2648_v2, %v386_v57  ;;  %v676_v36 = vmax.f32 %v548_v33, 0.0  ;;  %v311_v57 = vld [vmem:[%s2643_s28 + $0x240] sm:$0xff] }
  0x5b   : > { %v443_v61 = vmul.f32 %v2635_v1, %v311_v57 }
  0x5c   : > { %2498 = vmatmul.msk.f32.gmra.mxu2 %vm760_vm1, %v698_v63  ;;  %v646_v6 = vmax.f32 %v518_v62, 0.0  ;;  %v467_v62 = vmul.f32 %v2635_v1, %v335_v58 }
  0x5e   : > { %v599_v5 = vadd.f32 %v2648_v2, %v467_v62 }
  0x60   : > { %2440 = vmatmul.msk.f32.gmra.mxu0 %vm760_vm1, %v640_v3  ;;  %v282_v3 = vld [vmem:[%s2643_s28 + $0x158] sm:$0xff] }
  0x61   : > { %v414_v4 = vmul.f32 %v2635_v1, %v282_v3 }
  0x62   : > { %2472 = vmatmul.msk.f32.gmra.mxu1 %vm760_vm1, %v672_v48 }
  0x63   : > { %v546_v8 = vadd.f32 %v2648_v2, %v414_v4  ;;  %v575_v4 = vadd.f32 %v2648_v2, %v443_v61 }
  0x65   : > { %v674_v10 = vmax.f32 %v546_v8, 0.0  ;;  %v703_v7 = vmax.f32 %v575_v4, 0.0  ;;  %v727_v8 = vmax.f32 %v599_v5, 0.0 }
  0x67   : > { %2527 = vmatmul.msk.f32.vlgmr.msra.gmra.mxu3 %vm760_vm1, %v727_v8 }
  0x68   : > { %2441 = vmatmul.msk.f32.gmra.mxu0 %vm760_vm1, %v641_v11  ;;  %v571_v11 = vadd.f32 %v2648_v2, %v439_v9  ;;  %v287_v9 = vld [vmem:[%s2643_s28 + $0x180] sm:$0xff] }
  0x6a   : > { %2473 = vmatmul.msk.f32.gmra.mxu1 %vm760_vm1, %v673_v60  ;;  %v699_v13 = vmax.f32 %v571_v11, 0.0  ;;  %v550_v60 = vadd.f32 %v2648_v2, %v418_v55 }
  0x6c   : > { %2499 = vmatmul.msk.f32.gmra.mxu2 %vm760_vm1, %v699_v13  ;;  %v678_v0 = vmax.f32 %v550_v60, 0.0  ;;  %v336_v13 = vld [vmem:[%s2643_s28 + $0x308] sm:$0xff] }
  0x6d   : > { %v468_v17 = vmul.f32 %v2635_v1, %v336_v13 }
  0x70   : > { %2442 = vmatmul.msk.f32.gmra.mxu0 %vm760_vm1, %v642_v20  ;;  %v547_v20 = vadd.f32 %v2648_v2, %v415_v16  ;;  %v444_v16 = vmul.f32 %v2635_v1, %v312_v12 }
  0x72   : > { %2474 = vmatmul.msk.f32.gmra.mxu1 %vm760_vm1, %v674_v10  ;;  %v675_v23 = vmax.f32 %v547_v20, 0.0  ;;  %v419_v10 = vmul.f32 %v2635_v1, %v287_v9  ;;  %v576_v21 = vadd.f32 %v2648_v2, %v444_v16 }
  0x74   : > { %2500 = vmatmul.msk.f32.gmra.mxu2 %vm760_vm1, %v700_v27  ;;  %v551_v15 = vadd.f32 %v2648_v2, %v419_v10  ;;  %v290_v10 = vld [vmem:[%s2643_s28 + $0x198] sm:$0xff] }
  0x76   : > { %v679_v20 = vmax.f32 %v551_v15, 0.0 }
  0x78   : > { %2443 = vmatmul.msk.f32.gmra.mxu0 %vm760_vm1, %v643_v32  ;;  %v389_v32 = vmul.f32 %v2635_v1, %v257_v26  ;;  %v704_v26 = vmax.f32 %v576_v21, 0.0  ;;  %v339_v21 = vld [vmem:[%s2643_s28 + $0x320] sm:$0xff] }
  0x7a   : > { %2475 = vmatmul.msk.f32.gmra.mxu1 %vm760_vm1, %v675_v23  ;;  %v521_v38 = vadd.f32 %v2648_v2, %v389_v32  ;;  %v600_v23 = vadd.f32 %v2648_v2, %v468_v17  ;;  %v337_v32 = vld [vmem:[%s2643_s28 + $0x310] sm:$0xff] }
  0x7b   : > { %v469_v37 = vmul.f32 %v2635_v1, %v337_v32 }
  0x7c   : > { %2501 = vmatmul.msk.f32.gmra.mxu2 %vm760_vm1, %v701_v40  ;;  %v728_v27 = vmax.f32 %v600_v23, 0.0  ;;  %v525_v40 = vadd.f32 %v2648_v2, %v393_v30 }
  0x7d   : > { %v601_v43 = vadd.f32 %v2648_v2, %v469_v37  ;;  %v264_v37 = vld [vmem:[%s2643_s28 + $0xc8] sm:$0xff] }
  0x7e   : > { %2528 = vmatmul.msk.f32.gmra.mxu3 %vm760_vm1, %v728_v27  ;;  %v653_v51 = vmax.f32 %v525_v40, 0.0 }
  0x7f   : > { %v729_v47 = vmax.f32 %v601_v43, 0.0  ;;  %v291_v43 = vld [vmem:[%s2643_s28 + $0x1a0] sm:$0xff] }
  0x80   : > { %2444 = vmatmul.msk.f32.gmra.mxu0 %vm760_vm1, %v644_v44  ;;  %v649_v44 = vmax.f32 %v521_v38, 0.0 }
  0x82   : > { %2476 = vmatmul.msk.f32.gmra.mxu1 %vm760_vm1, %v676_v36 }
  0x84   : > { %2502 = vmatmul.msk.f32.gmra.mxu2 %vm760_vm1, %v702_v53  ;;  %v338_v53 = vld [vmem:[%s2643_s28 + $0x318] sm:$0xff] }
  0x85   : > { %v470_v57 = vmul.f32 %v2635_v1, %v338_v53  ;;  %v316_v53 = vld [vmem:[%s2643_s28 + $0x268] sm:$0xff] }
  0x86   : > { %2529 = vmatmul.msk.f32.gmra.mxu3 %vm760_vm1, %v729_v47  ;;  %v423_v47 = vmul.f32 %v2635_v1, %v291_v43 }
  0x88   : > { %2445 = vmatmul.msk.f32.gmra.mxu0 %vm760_vm1, %v645_v56  ;;  %v391_v56 = vmul.f32 %v2635_v1, %v259_v52  ;;  %v314_v52 = vld [vmem:[%s2643_s28 + $0x258] sm:$0xff] }
  0x8a   : > { %2477 = vmatmul.msk.f32.gmra.mxu1 %vm760_vm1, %v677_v49  ;;  %v523_v3 = vadd.f32 %v2648_v2, %v391_v56  ;;  %v421_v49 = vmul.f32 %v2635_v1, %v289_v46  ;;  %v446_v56 = vmul.f32 %v2635_v1, %v314_v52  ;;  %v396_v52 = vmul.f32 %v2635_v1, %v264_v37 }
  0x8c   : > { %v651_v11 = vmax.f32 %v523_v3, 0.0  ;;  %2503 = vmatmul.msk.f32.gmra.mxu2 %vm760_vm1, %v703_v7  ;;  %v553_v55 = vadd.f32 %v2648_v2, %v421_v49  ;;  %v578_v3 = vadd.f32 %v2648_v2, %v446_v56  ;;  %v602_v7 = vadd.f32 %v2648_v2, %v470_v57 }
  0x8d   : > { %v448_v56 = vmul.f32 %v2635_v1, %v316_v53 }
  0x8e   : > { %v706_v9 = vmax.f32 %v578_v3, 0.0  ;;  %v730_v13 = vmax.f32 %v602_v7, 0.0 }
  0x90   : > { %2446 = vmatmul.msk.f32.gmra.mxu0 %vm760_vm1, %v646_v6  ;;  %v260_v6 = vld [vmem:[%s2643_s28 + $0xa8] sm:$0xff]  ;;  %2530 = vmatmul.msk.f32.gmra.mxu3 %vm760_vm1, %v730_v13 }
  0x91   : > { %v392_v14 = vmul.f32 %v2635_v1, %v260_v6  ;;  %v263_v6 = vld [vmem:[%s2643_s28 + $0xc0] sm:$0xff] }
  0x92   : > { %2478 = vmatmul.msk.f32.gmra.mxu1 %vm760_vm1, %v678_v0  ;;  %v681_v0 = vmax.f32 %v553_v55, 0.0  ;;  %v555_v55 = vadd.f32 %v2648_v2, %v423_v47 }
  0x93   : > { %v524_v24 = vadd.f32 %v2648_v2, %v392_v14  ;;  %v422_v14 = vmul.f32 %v2635_v1, %v290_v10 }
  0x94   : > { %2504 = vmatmul.msk.f32.gmra.mxu2 %vm760_vm1, %v704_v26  ;;  %v683_v7 = vmax.f32 %v555_v55, 0.0  ;;  %v342_v55 = vld [vmem:[%s2643_s28 + $0x338] sm:$0xff] }
  0x95   : > { %v2799_v22 = vpop.f32.mrf.mxu0  ;;  %v652_v33 = vmax.f32 %v524_v24, 0.0  ;;  %v554_v24 = vadd.f32 %v2648_v2, %v422_v14 }
  0x96   : > { %1551 = vst.msk [vmem:[%s2793_s8] sm:$0xff] %vm1550_vm2, %v2799_v22  ;;  %v1940_v58 = vmul.f32 %v2799_v22, %v2799_v22 }
  0x97   : > { %v2875_v19 = vpop.f32.mrf.mxu1  ;;  %v682_v34 = vmax.f32 %v554_v24, 0.0 }
  0x98   : > { %2447 = vmatmul.msk.f32.gmra.mxu0 %vm760_vm1, %v647_v18  ;;  %1583 = vst.msk [vmem:[%s2793_s8 + $0x100] sm:$0xff] %vm1550_vm2, %v2875_v19  ;;  %v2068_v8 = vsel %vm1550_vm2, %v1940_v58, 0.0 }
  0x9a   : > { %2479 = vmatmul.msk.f32.gmra.mxu1 %vm760_vm1, %v679_v20  ;;  %v315_v20 = vld [vmem:[%s2643_s28 + $0x260] sm:$0xff] }
  0x9b   : > { %v447_v25 = vmul.f32 %v2635_v1, %v315_v20 }
  0x9d   : > { %v2816_v35 = vpop.f32.mrf.mxu0 }
  0x9e   : > { %1552 = vst.msk [vmem:[%s2793_s8 + $0x8] sm:$0xff] %vm1550_vm2, %v2816_v35  ;;  %v1941_v50 = vmul.f32 %v2816_v35, %v2816_v35  ;;  %v1680_v61 = vsel %vm1550_vm2, %v2816_v35, 0.0  ;;  %v1679_v35 = vsel %vm1550_vm2, %v2799_v22, 0.0  ;;  %v395_v22 = vmul.f32 %v2635_v1, %v263_v6 }
  0x9f   : > { %v2901_v39 = vpop.f32.mrf.mxu1  ;;  %v528_v6 = vadd.f32 %v2648_v2, %v396_v52 }
  0xa0   : > { %2448 = vmatmul.msk.f32.gmra.mxu0 %vm760_vm1, %v648_v31  ;;  %v313_v31 = vld [vmem:[%s2643_s28 + $0x250] sm:$0xff]  ;;  %1584 = vst.msk [vmem:[%s2793_s8 + $0x108] sm:$0xff] %vm1550_vm2, %v2901_v39  ;;  %v2069_v4 = vsel %vm1550_vm2, %v1941_v50, 0.0 }
  0xa1   : > { %v445_v36 = vmul.f32 %v2635_v1, %v313_v31  ;;  %v2070_v15 = vadd.f32 %v2069_v4, %v2068_v8  ;;  %v656_v24 = vmax.f32 %v528_v6, 0.0 }
  0xa2   : > { %2480 = vmatmul.msk.f32.gmra.mxu1 %vm760_vm1, %v680_v41 }
  0xa3   : > { %v577_v42 = vadd.f32 %v2648_v2, %v445_v36  ;;  %v579_v36 = vadd.f32 %v2648_v2, %v447_v25 }
  0xa5   : > { %v2833_v48 = vpop.f32.mrf.mxu0  ;;  %v705_v45 = vmax.f32 %v577_v42, 0.0  ;;  %v707_v42 = vmax.f32 %v579_v36, 0.0 }
  0xa6   : > { %1553 = vst.msk [vmem:[%s2793_s8 + $0x10] sm:$0xff] %vm1550_vm2, %v2833_v48  ;;  %v1942_v62 = vmul.f32 %v2833_v48, %v2833_v48  ;;  %v1682_v16 = vsel %vm1550_vm2, %v2833_v48, 0.0  ;;  %v471_v48 = vmul.f32 %v2635_v1, %v339_v21 }
  0xa7   : > { %2505 = vmatmul.msk.f32.gmra.mxu2 %vm760_vm1, %v705_v45  ;;  %v2931_v60 = vpop.f32.mrf.mxu1 }
  0xa8   : > { %2449 = vmatmul.msk.f32.gmra.mxu0 %vm760_vm1, %v649_v44  ;;  %v262_v44 = vld [vmem:[%s2643_s28 + $0xb8] sm:$0xff]  ;;  %1585 = vst.msk [vmem:[%s2793_s8 + $0x110] sm:$0xff] %vm1550_vm2, %v2931_v60  ;;  %v2071_v17 = vsel %vm1550_vm2, %v1942_v62, 0.0 }
  0xa9   : > { %v394_v54 = vmul.f32 %v2635_v1, %v262_v44  ;;  %v2072_v29 = vadd.f32 %v2071_v17, %v2070_v15  ;;  %v292_v15 = vld [vmem:[%s2643_s28 + $0x1a8] sm:$0xff] }
  0xaa   : > { %2481 = vmatmul.msk.f32.gmra.mxu1 %vm760_vm1, %v681_v0  ;;  %v424_v20 = vmul.f32 %v2635_v1, %v292_v15 }
  0xab   : > { %v526_v5 = vadd.f32 %v2648_v2, %v394_v54  ;;  %v340_v54 = vld [vmem:[%s2643_s28 + $0x328] sm:$0xff] }
  0xad   : > { %v2852_v63 = vpop.f32.mrf.mxu0  ;;  %v654_v23 = vmax.f32 %v526_v5, 0.0 }
  0xae   : > { %1554 = vst.msk [vmem:[%s2793_s8 + $0x18] sm:$0xff] %vm1550_vm2, %v2852_v63  ;;  %v1943_v12 = vmul.f32 %v2852_v63, %v2852_v63  ;;  %v1684_v30 = vsel %vm1550_vm2, %v2852_v63, 0.0  ;;  %v603_v63 = vadd.f32 %v2648_v2, %v471_v48  ;;  %v317_v48 = vld [vmem:[%s2643_s28 + $0x270] sm:$0xff] }
  0xaf   : > { %2506 = vmatmul.msk.f32.gmra.mxu2 %vm760_vm1, %v706_v9  ;;  %v2968_v27 = vpop.f32.mrf.mxu1 }
  0xb0   : > { %2450 = vmatmul.msk.f32.gmra.mxu0 %vm760_vm1, %v650_v59  ;;  %v2073_v31 = vsel %vm1550_vm2, %v1943_v12, 0.0  ;;  %1586 = vst.msk [vmem:[%s2793_s8 + $0x118] sm:$0xff] %vm1550_vm2, %v2968_v27  ;;  %v731_v46 = vmax.f32 %v603_v63, 0.0 }
  0xb1   : > { %v2074_v41 = vadd.f32 %v2073_v31, %v2072_v29  ;;  %v556_v29 = vadd.f32 %v2648_v2, %v424_v20 }
  0xb2   : > { %2482 = vmatmul.msk.f32.gmra.mxu1 %vm760_vm1, %v682_v34  ;;  %2531 = vmatmul.msk.f32.gmra.mxu3 %vm760_vm1, %v731_v46  ;;  %v266_v46 = vld [vmem:[%s2643_s28 + $0xd8] sm:$0xff] }
  0xb5   : > { %v2873_v18 = vpop.f32.mrf.mxu0 }
  0xb6   : > { %1555 = vst.msk [vmem:[%s2793_s8 + $0x20] sm:$0xff] %vm1550_vm2, %v2873_v18  ;;  %v1944_v32 = vmul.f32 %v2873_v18, %v2873_v18  ;;  %v1686_v44 = vsel %vm1550_vm2, %v2873_v18, 0.0 }
  0xb7   : > { %2507 = vmatmul.msk.f32.gmra.mxu2 %vm760_vm1, %v707_v42  ;;  %v684_v42 = vmax.f32 %v556_v29, 0.0 }
  0xb8   : > { %2451 = vmatmul.msk.f32.gmra.mxu0 %vm760_vm1, %v651_v11  ;;  %v1681_v11 = vadd.f32 %v1680_v61, %v1679_v35  ;;  %v2075_v49 = vsel %vm1550_vm2, %v1944_v32, 0.0  ;;  %v3005_v61 = vpop.f32.mrf.mxu1  ;;  %v580_v35 = vadd.f32 %v2648_v2, %v448_v56 }
  0xb9   : > { %v2076_v62 = vadd.f32 %v2075_v49, %v2074_v41  ;;  %1587 = vst.msk [vmem:[%s2793_s8 + $0x120] sm:$0xff] %vm1550_vm2, %v3005_v61 }
  0xba   : > { %v1683_v28 = vadd.f32 %v1682_v16, %v1681_v11  ;;  %2483 = vmatmul.msk.f32.gmra.mxu1 %vm760_vm1, %v683_v7  ;;  %v708_v14 = vmax.f32 %v580_v35, 0.0 }
  0xbc   : > { %v1685_v40 = vadd.f32 %v1684_v30, %v1683_v28  ;;  %v449_v30 = vmul.f32 %v2635_v1, %v317_v48 }
  0xbd   : > { %v2899_v38 = vpop.f32.mrf.mxu0 }
  0xbe   : > { %1556 = vst.msk [vmem:[%s2793_s8 + $0x28] sm:$0xff] %vm1550_vm2, %v2899_v38  ;;  %v1945_v45 = vmul.f32 %v2899_v38, %v2899_v38  ;;  %v1688_v50 = vsel %vm1550_vm2, %v2899_v38, 0.0  ;;  %v472_v38 = vmul.f32 %v2635_v1, %v340_v54  ;;  %v1687_v57 = vadd.f32 %v1686_v44, %v1685_v40 }
  0xbf   : > { %2508 = vmatmul.msk.f32.gmra.mxu2 %vm760_vm1, %v708_v14  ;;  %v581_v43 = vadd.f32 %v2648_v2, %v449_v30  ;;  %v398_v54 = vmul.f32 %v2635_v1, %v266_v46 }
  0xc0   : > { %2452 = vmatmul.msk.f32.gmra.mxu0 %vm760_vm1, %v652_v33  ;;  %v527_v33 = vadd.f32 %v2648_v2, %v395_v22  ;;  %v2077_v0 = vsel %vm1550_vm2, %v1945_v45, 0.0  ;;  %v1689_v5 = vadd.f32 %v1688_v50, %v1687_v57  ;;  %v604_v11 = vadd.f32 %v2648_v2, %v472_v38  ;;  %v3036_v36 = vpop.f32.mrf.mxu1 }
  0xc1   : > { %v2078_v12 = vadd.f32 %v2077_v0, %v2076_v62  ;;  %1588 = vst.msk [vmem:[%s2793_s8 + $0x128] sm:$0xff] %vm1550_vm2, %v3036_v36  ;;  %v709_v50 = vmax.f32 %v581_v43, 0.0  ;;  %v530_v6 = vadd.f32 %v2648_v2, %v398_v54 }
  0xc2   : > { %v732_v22 = vmax.f32 %v604_v11, 0.0  ;;  %2484 = vmatmul.msk.f32.gmra.mxu1 %vm760_vm1, %v684_v42 }
  0xc3   : > { %v658_v15 = vmax.f32 %v530_v6, 0.0 }
  0xc4   : > { %2532 = vmatmul.msk.f32.gmra.mxu3 %vm760_vm1, %v732_v22 }
  0xc5   : > { %v2929_v59 = vpop.f32.mrf.mxu0 }
  0xc6   : > { %1557 = vst.msk [vmem:[%s2793_s8 + $0x30] sm:$0xff] %vm1550_vm2, %v2929_v59  ;;  %v1946_v18 = vmul.f32 %v2929_v59, %v2929_v59  ;;  %v1690_v3 = vsel %vm1550_vm2, %v2929_v59, 0.0  ;;  %v265_v59 = vld [vmem:[%s2643_s28 + $0xd0] sm:$0xff] }
  0xc7   : > { %v1691_v13 = vadd.f32 %v1690_v3, %v1689_v5  ;;  %v397_v25 = vmul.f32 %v2635_v1, %v265_v59  ;;  %2509 = vmatmul.msk.f32.gmra.mxu2 %vm760_vm1, %v709_v50  ;;  %v267_v59 = vld [vmem:[%s2643_s28 + $0xe0] sm:$0xff] }
  0xc8   : > { %2453 = vmatmul.msk.f32.gmra.mxu0 %vm760_vm1, %v653_v51  ;;  %v655_v51 = vmax.f32 %v527_v33, 0.0  ;;  %v2079_v8 = vsel %vm1550_vm2, %v1946_v18, 0.0  ;;  %v318_v18 = vld [vmem:[%s2643_s28 + $0x278] sm:$0xff]  ;;  %v3061_v0 = vpop.f32.mrf.mxu1  ;;  %v399_v22 = vmul.f32 %v2635_v1, %v267_v59 }
  0xc9   : > { %v2080_v21 = vadd.f32 %v2079_v8, %v2078_v12  ;;  %v529_v45 = vadd.f32 %v2648_v2, %v397_v25  ;;  %v450_v57 = vmul.f32 %v2635_v1, %v318_v18  ;;  %1589 = vst.msk [vmem:[%s2793_s8 + $0x130] sm:$0xff] %vm1550_vm2, %v3061_v0  ;;  %v294_v12 = vld [vmem:[%s2643_s28 + $0x1b8] sm:$0xff]  ;;  %v3116_v18 = vpop.f32.mrf.mxu2 }
  0xca   : > { %v426_v14 = vmul.f32 %v2635_v1, %v294_v12  ;;  %1615 = vst.msk [vmem:[%s2793_s8 + $0x200] sm:$0xff] %vm1550_vm2, %v3116_v18 }
  0xcb   : > { %v657_v56 = vmax.f32 %v529_v45, 0.0  ;;  %v582_v35 = vadd.f32 %v2648_v2, %v450_v57  ;;  %v344_v45 = vld [vmem:[%s2643_s28 + $0x348] sm:$0xff] }
  0xcc   : > { %v558_v20 = vadd.f32 %v2648_v2, %v426_v14  ;;  %v476_v50 = vmul.f32 %v2635_v1, %v344_v45 }
  0xcd   : > { %v1187_v26 = vpop.f32.mrf.mxu0  ;;  %v710_v11 = vmax.f32 %v582_v35, 0.0 }
  0xce   : > { %1558 = vst.msk [vmem:[%s2793_s8 + $0x38] sm:$0xff] %vm1550_vm2, %v1187_v26  ;;  %v1947_v4 = vmul.f32 %v1187_v26, %v1187_v26  ;;  %v1692_v9 = vsel %vm1550_vm2, %v1187_v26, 0.0  ;;  %v341_v26 = vld [vmem:[%s2643_s28 + $0x330] sm:$0xff]  ;;  %v686_v29 = vmax.f32 %v558_v20, 0.0 }
  0xcf   : > { %v473_v31 = vmul.f32 %v2635_v1, %v341_v26  ;;  %2510 = vmatmul.msk.f32.gmra.mxu2 %vm760_vm1, %v710_v11 }
  0xd0   : > { %2454 = vmatmul.msk.f32.gmra.mxu0 %vm760_vm1, %v654_v23  ;;  %v2081_v16 = vsel %vm1550_vm2, %v1947_v4, 0.0  ;;  %v1693_v23 = vadd.f32 %v1692_v9, %v1691_v13  ;;  %v3086_v25 = vpop.f32.mrf.mxu1 }
  0xd1   : > { %v2082_v33 = vadd.f32 %v2081_v16, %v2080_v21  ;;  %v605_v47 = vadd.f32 %v2648_v2, %v473_v31  ;;  %v319_v16 = vld [vmem:[%s2643_s28 + $0x280] sm:$0xff]  ;;  %1590 = vst.msk [vmem:[%s2793_s8 + $0x138] sm:$0xff] %vm1550_vm2, %v3086_v25 }
  0xd2   : > { %v451_v21 = vmul.f32 %v2635_v1, %v319_v16 }
  0xd3   : > { %v733_v52 = vmax.f32 %v605_v47, 0.0 }
  0xd4   : > { %v583_v30 = vadd.f32 %v2648_v2, %v451_v21 }
  0xd5   : > { %v1190_v58 = vpop.f32.mrf.mxu0  ;;  %2533 = vmatmul.msk.f32.gmra.mxu3 %vm760_vm1, %v733_v52 }
  0xd6   : > { %1559 = vst.msk [vmem:[%s2793_s8 + $0x40] sm:$0xff] %vm1550_vm2, %v1190_v58  ;;  %v1948_v10 = vmul.f32 %v1190_v58, %v1190_v58  ;;  %v1694_v17 = vsel %vm1550_vm2, %v1190_v58, 0.0  ;;  %v474_v58 = vmul.f32 %v2635_v1, %v342_v55 }
  0xd7   : > { %v1695_v32 = vadd.f32 %v1694_v17, %v1693_v23  ;;  %v343_v17 = vld [vmem:[%s2643_s28 + $0x340] sm:$0xff] }
  0xd8   : > { %2455 = vmatmul.msk.f32.gmra.mxu0 %vm760_vm1, %v655_v51  ;;  %v2083_v28 = vsel %vm1550_vm2, %v1948_v10, 0.0  ;;  %v293_v51 = vld [vmem:[%s2643_s28 + $0x1b0] sm:$0xff]  ;;  %v606_v9 = vadd.f32 %v2648_v2, %v474_v58  ;;  %v475_v23 = vmul.f32 %v2635_v1, %v343_v17  ;;  %v3111_v52 = vpop.f32.mrf.mxu1 }
  0xd9   : > { %v2084_v40 = vadd.f32 %v2083_v28, %v2082_v33  ;;  %v425_v53 = vmul.f32 %v2635_v1, %v293_v51  ;;  %v268_v33 = vld [vmem:[%s2643_s28 + $0xe8] sm:$0xff]  ;;  %1591 = vst.msk [vmem:[%s2793_s8 + $0x140] sm:$0xff] %vm1550_vm2, %v3111_v52 }
  0xda   : > { %v734_v13 = vmax.f32 %v606_v9, 0.0  ;;  %v400_v43 = vmul.f32 %v2635_v1, %v268_v33  ;;  %v321_v9 = vld [vmem:[%s2643_s28 + $0x290] sm:$0xff] }
  0xdb   : > { %v557_v38 = vadd.f32 %v2648_v2, %v425_v53 }
  0xdd   : > { %v1193_v34 = vpop.f32.mrf.mxu0  ;;  %v685_v7 = vmax.f32 %v557_v38, 0.0  ;;  %2534 = vmatmul.msk.f32.gmra.mxu3 %vm760_vm1, %v734_v13 }
  0xde   : > { %1560 = vst.msk [vmem:[%s2793_s8 + $0x48] sm:$0xff] %vm1550_vm2, %v1193_v34  ;;  %v1696_v37 = vsel %vm1550_vm2, %v1193_v34, 0.0  ;;  %v1949_v63 = vmul.f32 %v1193_v34, %v1193_v34  ;;  %v607_v34 = vadd.f32 %v2648_v2, %v475_v23 }
  0xdf   : > { %v1697_v41 = vadd.f32 %v1696_v37, %v1695_v32  ;;  %2485 = vmatmul.msk.f32.gmra.mxu1 %vm760_vm1, %v685_v7  ;;  %v531_v32 = vadd.f32 %v2648_v2, %v399_v22  ;;  %v3140_v7 = vld [vmem:[%s4370_s1] ss:$0 sm:$0xff]  ;;  %v3156_v22 = vpop.f32.mrf.mxu2 }
  0xe0   : > { %v2085_v44 = vsel %vm1550_vm2, %v1949_v63, 0.0  ;;  %2456 = vmatmul.msk.f32.gmra.mxu0 %vm760_vm1, %v656_v24  ;;  %v711_v63 = vmax.f32 %v583_v30, 0.0  ;;  %v453_v12 = vmul.f32 %v3140_v7, %v321_v9  ;;  %1616 = vst.msk [vmem:[%s2793_s8 + $0x208] sm:$0xff] %vm1550_vm2, %v3156_v22  ;;  %v297_v30 = vld [vmem:[%s2643_s28 + $0x1d0] sm:$0xff] }
  0xe1   : > { %v2086_v49 = vadd.f32 %v2085_v44, %v2084_v40  ;;  %v295_v40 = vld [vmem:[%s2643_s28 + $0x1c0] sm:$0xff]  ;;  %v320_v44 = vld [vmem:[%s2643_s28 + $0x288] sm:$0xff]  ;;  %v659_v46 = vmax.f32 %v531_v32, 0.0  ;;  %v429_v33 = vmul.f32 %v3140_v7, %v297_v30 }
  0xe2   : > { %v427_v42 = vmul.f32 %v2635_v1, %v295_v40  ;;  %2511 = vmatmul.msk.f32.gmra.mxu2 %vm760_vm1, %v711_v63  ;;  %v346_v63 = vld [vmem:[%s2643_s28 + $0x358] sm:$0xff] }
  0xe4   : > { %v559_v47 = vadd.f32 %v2648_v2, %v427_v42  ;;  %v3121_v2 = vld [vmem:[%s4371_s2] ss:$0 sm:$0xff] }
  0xe5   : > { %v1196_v62 = vpop.f32.mrf.mxu0  ;;  %v608_v58 = vadd.f32 %v3121_v2, %v476_v50 }
  0xe6   : > { %1561 = vst.msk [vmem:[%s2793_s8 + $0x50] sm:$0xff] %vm1550_vm2, %v1196_v62  ;;  %v1698_v3 = vsel %vm1550_vm2, %v1196_v62, 0.0  ;;  %v1950_v4 = vmul.f32 %v1196_v62, %v1196_v62 }
  0xe7   : > { %v1699_v5 = vadd.f32 %v1698_v3, %v1697_v41  ;;  %2486 = vmatmul.msk.f32.gmra.mxu1 %vm760_vm1, %v686_v29  ;;  %v735_v41 = vmax.f32 %v607_v34, 0.0  ;;  %v269_v3 = vld [vmem:[%s2643_s28 + $0xf0] sm:$0xff]  ;;  %v736_v6 = vmax.f32 %v608_v58, 0.0 }
  0xe8   : > { %v2087_v8 = vsel %vm1550_vm2, %v1950_v4, 0.0  ;;  %2457 = vmatmul.msk.f32.gmra.mxu0 %vm760_vm1, %v657_v56  ;;  %v687_v56 = vmax.f32 %v559_v47, 0.0  ;;  %v401_v59 = vmul.f32 %v3140_v7, %v269_v3  ;;  %v323_v3 = vld [vmem:[%s2643_s28 + $0x2a0] sm:$0xff] }
  0xe9   : > { %v2088_v10 = vadd.f32 %v2087_v8, %v2086_v49  ;;  %2535 = vmatmul.msk.f32.gmra.mxu3 %vm760_vm1, %v735_v41  ;;  %v452_v49 = vmul.f32 %v2635_v1, %v320_v44  ;;  %v532_v1 = vadd.f32 %v3121_v2, %v400_v43  ;;  %v561_v41 = vadd.f32 %v3121_v2, %v429_v33 }
  0xea   : > { %v478_v43 = vmul.f32 %v3140_v7, %v346_v63 }
  0xeb   : > { %v584_v38 = vadd.f32 %v3121_v2, %v452_v49  ;;  %v660_v8 = vmax.f32 %v532_v1, 0.0  ;;  %v3186_v49 = vpop.f32.mrf.mxu2 }
  0xec   : > { %1617 = vst.msk [vmem:[%s2793_s8 + $0x210] sm:$0xff] %vm1550_vm2, %v3186_v49  ;;  %v610_v1 = vadd.f32 %v3121_v2, %v478_v43 }
  0xed   : > { %v1199_v24 = vpop.f32.mrf.mxu0  ;;  %v712_v4 = vmax.f32 %v584_v38, 0.0  ;;  %v298_v38 = vld [vmem:[%s2643_s28 + $0x1d8] sm:$0xff] }
  0xee   : > { %1562 = vst.msk [vmem:[%s2793_s8 + $0x58] sm:$0xff] %vm1550_vm2, %v1199_v24  ;;  %v1700_v48 = vsel %vm1550_vm2, %v1199_v24, 0.0  ;;  %v1951_v26 = vmul.f32 %v1199_v24, %v1199_v24  ;;  %v533_v24 = vadd.f32 %v3121_v2, %v401_v59  ;;  %v738_v58 = vmax.f32 %v610_v1, 0.0  ;;  %v349_v1 = vld [vmem:[%s2643_s28 + $0x370] sm:$0xff] }
  0xef   : > { %v1701_v28 = vadd.f32 %v1700_v48, %v1699_v5  ;;  %2487 = vmatmul.msk.f32.gmra.mxu1 %vm760_vm1, %v687_v56  ;;  %v296_v5 = vld [vmem:[%s2643_s28 + $0x1c8] sm:$0xff]  ;;  %2512 = vmatmul.msk.f32.gmra.mxu2 %vm760_vm1, %v712_v4  ;;  %v270_v48 = vld [vmem:[%s2643_s28 + $0xf8] sm:$0xff]  ;;  %v347_v4 = vld [vmem:[%s2643_s28 + $0x360] sm:$0xff] }
  0xf0   : > { %v2089_v31 = vsel %vm1550_vm2, %v1951_v26, 0.0  ;;  %2458 = vmatmul.msk.f32.gmra.mxu0 %vm760_vm1, %v658_v15  ;;  %v428_v35 = vmul.f32 %v3140_v7, %v296_v5  ;;  %v3151_v15 = vpop.f32.mrf.mxu1  ;;  %v585_v26 = vadd.f32 %v3121_v2, %v453_v12  ;;  %v402_v34 = vmul.f32 %v3140_v7, %v270_v48 }
  0xf1   : > { %v2090_v37 = vadd.f32 %v2089_v31, %v2088_v10  ;;  %v345_v10 = vld [vmem:[%s2643_s28 + $0x350] sm:$0xff]  ;;  %2536 = vmatmul.msk.f32.gmra.mxu3 %vm760_vm1, %v736_v6  ;;  %1592 = vst.msk [vmem:[%s2793_s8 + $0x148] sm:$0xff] %vm1550_vm2, %v3151_v15  ;;  %v661_v40 = vmax.f32 %v533_v24, 0.0 }
  0xf2   : > { %v560_v11 = vadd.f32 %v3121_v2, %v428_v35  ;;  %v477_v13 = vmul.f32 %v3140_v7, %v345_v10  ;;  %v713_v31 = vmax.f32 %v585_v26, 0.0  ;;  %v455_v35 = vmul.f32 %v3140_v7, %v323_v3 }
  0xf3   : > { %v3214_v12 = vpop.f32.mrf.mxu2 }
  0xf4   : > { %v688_v21 = vmax.f32 %v560_v11, 0.0  ;;  %1618 = vst.msk [vmem:[%s2793_s8 + $0x218] sm:$0xff] %vm1550_vm2, %v3214_v12 }
  0xf5   : > { %v1202_v51 = vpop.f32.mrf.mxu0 }
  0xf6   : > { %1563 = vst.msk [vmem:[%s2793_s8 + $0x60] sm:$0xff] %vm1550_vm2, %v1202_v51  ;;  %v1702_v53 = vsel %vm1550_vm2, %v1202_v51, 0.0  ;;  %v1952_v54 = vmul.f32 %v1202_v51, %v1202_v51  ;;  %v689_v51 = vmax.f32 %v561_v41, 0.0 }
  0xf7   : > { %v1703_v55 = vadd.f32 %v1702_v53, %v1701_v28  ;;  %v609_v28 = vadd.f32 %v3121_v2, %v477_v13  ;;  %2488 = vmatmul.msk.f32.gmra.mxu1 %vm760_vm1, %v688_v21  ;;  %2513 = vmatmul.msk.f32.gmra.mxu2 %vm760_vm1, %v713_v31 }
  0xf8   : > { %v2091_v57 = vsel %vm1550_vm2, %v1952_v54, 0.0  ;;  %2459 = vmatmul.msk.f32.gmra.mxu0 %vm760_vm1, %v659_v46  ;;  %v3181_v45 = vpop.f32.mrf.mxu1  ;;  %v534_v54 = vadd.f32 %v3121_v2, %v402_v34 }
  0xf9   : > { %v2092_v62 = vadd.f32 %v2091_v57, %v2090_v37  ;;  %v737_v32 = vmax.f32 %v609_v28, 0.0  ;;  %v322_v37 = vld [vmem:[%s2643_s28 + $0x298] sm:$0xff]  ;;  %1593 = vst.msk [vmem:[%s2793_s8 + $0x150] sm:$0xff] %vm1550_vm2, %v3181_v45  ;;  %v324_v28 = vld [vmem:[%s2643_s28 + $0x2a8] sm:$0xff] }
  0xfa   : > { %v454_v42 = vmul.f32 %v3140_v7, %v322_v37  ;;  %v662_v5 = vmax.f32 %v534_v54, 0.0  ;;  %v456_v31 = vmul.f32 %v3140_v7, %v324_v28 }
  0xfb   : > { %2537 = vmatmul.msk.f32.gmra.mxu3 %vm760_vm1, %v737_v32 }
  0xfd   : > { %v1205_v14 = vpop.f32.mrf.mxu0 }
  0xfe   : > { %1564 = vst.msk [vmem:[%s2793_s8 + $0x68] sm:$0xff] %vm1550_vm2, %v1205_v14  ;;  %v1704_v16 = vsel %vm1550_vm2, %v1205_v14, 0.0  ;;  %v1953_v17 = vmul.f32 %v1205_v14, %v1205_v14 }
  0xff   : > { %v1705_v20 = vadd.f32 %v1704_v16, %v1703_v55  ;;  %v586_v55 = vadd.f32 %v3121_v2, %v454_v42  ;;  %2489 = vmatmul.msk.f32.gmra.mxu1 %vm760_vm1, %v689_v51 }
 0x100   : > { %v2093_v23 = vsel %vm1550_vm2, %v1953_v17, 0.0  ;;  %2460 = vmatmul.msk.f32.gmra.mxu0 %vm760_vm1, %v660_v8  ;;  %v479_v8 = vmul.f32 %v3140_v7, %v347_v4  ;;  %v3209_v10 = vpop.f32.mrf.mxu1  ;;  %v587_v17 = vadd.f32 %v3121_v2, %v455_v35 }
 0x101   : > { %v2094_v29 = vadd.f32 %v2093_v23, %v2092_v62  ;;  %v714_v57 = vmax.f32 %v586_v55, 0.0  ;;  %v430_v62 = vmul.f32 %v3140_v7, %v298_v38  ;;  %1594 = vst.msk [vmem:[%s2793_s8 + $0x158] sm:$0xff] %vm1550_vm2, %v3209_v10  ;;  %v299_v23 = vld [vmem:[%s2643_s28 + $0x1e0] sm:$0xff]  ;;  %v325_v55 = vld [vmem:[%s2643_s28 + $0x2b0] sm:$0xff] }
 0x102   : > { %v715_v24 = vmax.f32 %v587_v17, 0.0  ;;  %v431_v26 = vmul.f32 %v3140_v7, %v299_v23  ;;  %v457_v38 = vmul.f32 %v3140_v7, %v325_v55 }
 0x103   : > { %2514 = vmatmul.msk.f32.gmra.mxu2 %vm760_vm1, %v714_v57  ;;  %2538 = vmatmul.msk.f32.gmra.mxu3 %vm760_vm1, %v738_v58  ;;  %v562_v6 = vadd.f32 %v3121_v2, %v430_v62  ;;  %v481_v57 = vmul.f32 %v3140_v7, %v349_v1 }
 0x104   : > { %v563_v30 = vadd.f32 %v3121_v2, %v431_v26 }
 0x105   : > { %v1208_v44 = vpop.f32.mrf.mxu0  ;;  %v690_v14 = vmax.f32 %v562_v6, 0.0 }
 0x106   : > { %1565 = vst.msk [vmem:[%s2793_s8 + $0x70] sm:$0xff] %vm1550_vm2, %v1208_v44  ;;  %v1706_v46 = vsel %vm1550_vm2, %v1208_v44, 0.0  ;;  %v1954_v47 = vmul.f32 %v1208_v44, %v1208_v44  ;;  %v691_v42 = vmax.f32 %v563_v30, 0.0  ;;  %v588_v44 = vadd.f32 %v3121_v2, %v456_v31 }
 0x107   : > { %v1707_v50 = vadd.f32 %v1706_v46, %v1705_v20  ;;  %v611_v20 = vadd.f32 %v3121_v2, %v479_v8  ;;  %2490 = vmatmul.msk.f32.gmra.mxu1 %vm760_vm1, %v690_v14 }
 0x108   : > { %v2095_v53 = vsel %vm1550_vm2, %v1954_v47, 0.0  ;;  %2461 = vmatmul.msk.f32.gmra.mxu0 %vm760_vm1, %v661_v40  ;;  %v3236_v34 = vpop.f32.mrf.mxu1  ;;  %v3241_v40 = vpop.f32.mrf.mxu2  ;;  %v716_v51 = vmax.f32 %v588_v44, 0.0 }
 0x109   : > { %v2096_v56 = vadd.f32 %v2095_v53, %v2094_v29  ;;  %v739_v48 = vmax.f32 %v611_v20, 0.0  ;;  %v348_v29 = vld [vmem:[%s2643_s28 + $0x368] sm:$0xff]  ;;  %1595 = vst.msk [vmem:[%s2793_s8 + $0x160] sm:$0xff] %vm1550_vm2, %v3236_v34  ;;  %v326_v20 = vld [vmem:[%s2643_s28 + $0x2b8] sm:$0xff] }
 0x10a   : > { %v480_v32 = vmul.f32 %v3140_v7, %v348_v29  ;;  %1619 = vst.msk [vmem:[%s2793_s8 + $0x220] sm:$0xff] %vm1550_vm2, %v3241_v40 }
 0x10b   : > { %2515 = vmatmul.msk.f32.gmra.mxu2 %vm760_vm1, %v715_v24  ;;  %2539 = vmatmul.msk.f32.gmra.mxu3 %vm760_vm1, %v739_v48  ;;  %v458_v24 = vmul.f32 %v3140_v7, %v326_v20 }
 0x10c   : > { %v612_v46 = vadd.f32 %v3121_v2, %v480_v32 }
 0x10d   : > { %v1211_v9 = vpop.f32.mrf.mxu0 }
 0x10e   : > { %1566 = vst.msk [vmem:[%s2793_s8 + $0x78] sm:$0xff] %vm1550_vm2, %v1211_v9  ;;  %v1708_v59 = vsel %vm1550_vm2, %v1211_v9, 0.0  ;;  %v1955_v11 = vmul.f32 %v1211_v9, %v1211_v9  ;;  %v740_v53 = vmax.f32 %v612_v46, 0.0  ;;  %v589_v9 = vadd.f32 %v3121_v2, %v457_v38 }
 0x10f   : > { %v1709_v13 = vadd.f32 %v1708_v59, %v1707_v50  ;;  %2491 = vmatmul.msk.f32.gmra.mxu1 %vm760_vm1, %v691_v42  ;;  %v300_v50 = vld [vmem:[%s2643_s28 + $0x1e8] sm:$0xff]  ;;  %v613_v59 = vadd.f32 %v3121_v2, %v481_v57 }
 0x110   : > { %v2097_v16 = vsel %vm1550_vm2, %v1955_v11, 0.0  ;;  %2462 = vmatmul.msk.f32.gmra.mxu0 %vm760_vm1, %v662_v5  ;;  %v432_v54 = vmul.f32 %v3140_v7, %v300_v50  ;;  %v3262_v62 = vpop.f32.mrf.mxu1  ;;  %v3267_v5 = vpop.f32.mrf.mxu2  ;;  %v717_v14 = vmax.f32 %v589_v9, 0.0  ;;  %v327_v50 = vld [vmem:[%s2643_s28 + $0x2c0] sm:$0xff] }
 0x111   : > { %v2098_v21 = vadd.f32 %v2097_v16, %v2096_v56  ;;  %1596 = vst.msk [vmem:[%s2793_s8 + $0x168] sm:$0xff] %vm1550_vm2, %v3262_v62  ;;  %v741_v16 = vmax.f32 %v613_v59, 0.0 }
 0x112   : > { %v564_v56 = vadd.f32 %v3121_v2, %v432_v54  ;;  %1620 = vst.msk [vmem:[%s2793_s8 + $0x228] sm:$0xff] %vm1550_vm2, %v3267_v5  ;;  %v459_v54 = vmul.f32 %v3140_v7, %v327_v50 }
 0x113   : > { %2516 = vmatmul.msk.f32.gmra.mxu2 %vm760_vm1, %v716_v51  ;;  %2540 = vmatmul.msk.f32.gmra.mxu3 %vm760_vm1, %v740_v53  ;;  %v351_v51 = vld [vmem:[%s2643_s28 + $0x380] sm:$0xff] }
 0x114   : > { %v692_v35 = vmax.f32 %v564_v56, 0.0  ;;  %v483_v55 = vmul.f32 %v3140_v7, %v351_v51 }
 0x115   : > { %v1214_v33 = vpop.f32.mrf.mxu0 }
 0x116   : > { %1567 = vst.msk [vmem:[%s2793_s8 + $0x80] sm:$0xff] %vm1550_vm2, %v1214_v33  ;;  %v1710_v37 = vsel %vm1550_vm2, %v1214_v33, 0.0  ;;  %v1956_v63 = vmul.f32 %v1214_v33, %v1214_v33 }
 0x117   : > { %v1711_v41 = vadd.f32 %v1710_v37, %v1709_v13  ;;  %2492 = vmatmul.msk.f32.gmra.mxu1 %vm760_vm1, %v692_v35  ;;  %v301_v13 = vld [vmem:[%s2643_s28 + $0x1f0] sm:$0xff]  ;;  %v591_v35 = vadd.f32 %v3121_v2, %v459_v54 }
 0x118   : > { %v2099_v43 = vsel %vm1550_vm2, %v1956_v63, 0.0  ;;  %v433_v17 = vmul.f32 %v3140_v7, %v301_v13  ;;  %v3288_v28 = vpop.f32.mrf.mxu1  ;;  %v3293_v31 = vpop.f32.mrf.mxu2  ;;  %v590_v63 = vadd.f32 %v3121_v2, %v458_v24  ;;  %v328_v13 = vld [vmem:[%s2643_s28 + $0x2c8] sm:$0xff] }
 0x119   : > { %v2100_v47 = vadd.f32 %v2099_v43, %v2098_v21  ;;  %v350_v21 = vld [vmem:[%s2643_s28 + $0x378] sm:$0xff]  ;;  %1597 = vst.msk [vmem:[%s2793_s8 + $0x170] sm:$0xff] %vm1550_vm2, %v3288_v28  ;;  %v719_v59 = vmax.f32 %v591_v35, 0.0 }
 0x11a   : > { %v565_v23 = vadd.f32 %v3121_v2, %v433_v17  ;;  %v482_v48 = vmul.f32 %v3140_v7, %v350_v21  ;;  %1621 = vst.msk [vmem:[%s2793_s8 + $0x230] sm:$0xff] %vm1550_vm2, %v3293_v31  ;;  %v302_v43 = vld [vmem:[%s2643_s28 + $0x1f8] sm:$0xff]  ;;  %v718_v44 = vmax.f32 %v590_v63, 0.0 }
 0x11b   : > { %2517 = vmatmul.msk.f32.gmra.mxu2 %vm760_vm1, %v717_v14  ;;  %2541 = vmatmul.msk.f32.gmra.mxu3 %vm760_vm1, %v741_v16  ;;  %v352_v14 = vld [vmem:[%s2643_s28 + $0x388] sm:$0xff]  ;;  %v460_v16 = vmul.f32 %v3140_v7, %v328_v13 }
 0x11c   : > { %v693_v33 = vmax.f32 %v565_v23, 0.0  ;;  %v484_v17 = vmul.f32 %v3140_v7, %v352_v14 }
 0x11d   : > { %v1217_v58 = vpop.f32.mrf.mxu0 }
 0x11e   : > { %1568 = vst.msk [vmem:[%s2793_s8 + $0x88] sm:$0xff] %vm1550_vm2, %v1217_v58  ;;  %v1712_v3 = vsel %vm1550_vm2, %v1217_v58, 0.0  ;;  %v1957_v4 = vmul.f32 %v1217_v58, %v1217_v58 }
 0x11f   : > { %v1713_v6 = vadd.f32 %v1712_v3, %v1711_v41  ;;  %v614_v41 = vadd.f32 %v3121_v2, %v482_v48  ;;  %2493 = vmatmul.msk.f32.gmra.mxu1 %vm760_vm1, %v693_v33 }
 0x120   : > { %v2101_v8 = vsel %vm1550_vm2, %v1957_v4, 0.0  ;;  %v3314_v56 = vpop.f32.mrf.mxu1  ;;  %v3319_v58 = vpop.f32.mrf.mxu2 }
 0x121   : > { %v2102_v11 = vadd.f32 %v2101_v8, %v2100_v47  ;;  %v742_v46 = vmax.f32 %v614_v41, 0.0  ;;  %v434_v47 = vmul.f32 %v3140_v7, %v302_v43  ;;  %1598 = vst.msk [vmem:[%s2793_s8 + $0x178] sm:$0xff] %vm1550_vm2, %v3314_v56  ;;  %v615_v8 = vadd.f32 %v3121_v2, %v483_v55  ;;  %v353_v43 = vld [vmem:[%s2643_s28 + $0x390] sm:$0xff] }
 0x122   : > { %1622 = vst.msk [vmem:[%s2793_s8 + $0x238] sm:$0xff] %vm1550_vm2, %v3319_v58 }
 0x123   : > { %2518 = vmatmul.msk.f32.gmra.mxu2 %vm760_vm1, %v718_v44  ;;  %2542 = vmatmul.msk.f32.gmra.mxu3 %vm760_vm1, %v742_v46  ;;  %v566_v53 = vadd.f32 %v3121_v2, %v434_v47  ;;  %v485_v46 = vmul.f32 %v3140_v7, %v353_v43 }
 0x125   : > { %v1220_v26 = vpop.f32.mrf.mxu0  ;;  %v694_v4 = vmax.f32 %v566_v53, 0.0  ;;  %v617_v54 = vadd.f32 %v3121_v2, %v485_v46  ;;  %v332_v46 = vld [vmem:[%s2643_s28 + $0x2e8] sm:$0xff] }
 0x126   : > { %1569 = vst.msk [vmem:[%s2793_s8 + $0x90] sm:$0xff] %vm1550_vm2, %v1220_v26  ;;  %v1714_v29 = vsel %vm1550_vm2, %v1220_v26, 0.0  ;;  %v1958_v30 = vmul.f32 %v1220_v26, %v1220_v26  ;;  %v592_v26 = vadd.f32 %v3121_v2, %v460_v16 }
 0x127   : > { %v1715_v32 = vadd.f32 %v1714_v29, %v1713_v6  ;;  %2494 = vmatmul.msk.f32.gmra.mxu1 %vm760_vm1, %v694_v4  ;;  %v616_v29 = vadd.f32 %v3121_v2, %v484_v17  ;;  %v331_v17 = vld [vmem:[%s2643_s28 + $0x2e0] sm:$0xff] }
 0x128   : > { %v2103_v37 = vsel %vm1550_vm2, %v1958_v30, 0.0  ;;  %v3340_v24 = vpop.f32.mrf.mxu1  ;;  %v3342_v48 = vpop.f32.mrf.mxu2 }
 0x129   : > { %v2104_v42 = vadd.f32 %v2103_v37, %v2102_v11  ;;  %v743_v11 = vmax.f32 %v615_v8, 0.0  ;;  %1599 = vst.msk [vmem:[%s2793_s8 + $0x180] sm:$0xff] %vm1550_vm2, %v3340_v24  ;;  %v720_v37 = vmax.f32 %v592_v26, 0.0  ;;  %v744_v41 = vmax.f32 %v616_v29, 0.0 }
 0x12a   : > { %1623 = vst.msk [vmem:[%s2793_s8 + $0x240] sm:$0xff] %vm1550_vm2, %v3342_v48 }
 0x12b   : > { %2519 = vmatmul.msk.f32.gmra.mxu2 %vm760_vm1, %v719_v59  ;;  %2543 = vmatmul.msk.f32.gmra.mxu3 %vm760_vm1, %v743_v11 }
 0x12d   : > { %v1223_v1 = vpop.f32.mrf.mxu0 }
 0x12e   : > { %1570 = vst.msk [vmem:[%s2793_s8 + $0x98] sm:$0xff] %vm1550_vm2, %v1223_v1  ;;  %v1716_v38 = vsel %vm1550_vm2, %v1223_v1, 0.0  ;;  %v1959_v57 = vmul.f32 %v1223_v1, %v1223_v1 }
 0x12f   : > { %v1717_v3 = vadd.f32 %v1716_v38, %v1715_v32  ;;  %v3351_v32 = vpop.f32.mrf.mxu3  ;;  %v745_v38 = vmax.f32 %v617_v54, 0.0  ;;  %v464_v54 = vmul.f32 %v3140_v7, %v332_v46 }
 0x130   : > { %v2105_v6 = vsel %vm1550_vm2, %v1959_v57, 0.0  ;;  %4405 = vst [vmem:[#allocation2_spill] sm:$0xff] %v3351_v32  ;;  %v3373_v50 = vpop.f32.mrf.mxu1  ;;  %v3375_v51 = vpop.f32.mrf.mxu2  ;;  %v330_v57 = vld [vmem:[%s2643_s28 + $0x2d8] sm:$0xff] }
 0x131   : > { %v2106_v9 = vadd.f32 %v2105_v6, %v2104_v42  ;;  %1647 = vst.msk [vmem:[%s2793_s8 + $0x300] sm:$0xff] %vm1550_vm2, %v3351_v32  ;;  %v329_v42 = vld [vmem:[%s2643_s28 + $0x2d0] sm:$0xff]  ;;  %v462_v4 = vmul.f32 %v3140_v7, %v330_v57 }
 0x132   : > { %v461_v44 = vmul.f32 %v3140_v7, %v329_v42  ;;  %1600 = vst.msk [vmem:[%s2793_s8 + $0x188] sm:$0xff] %vm1550_vm2, %v3373_v50  ;;  %v361_v32 = vld [vmem:[%s2643_s28 + $0x3d0] sm:$0xff] }
 0x133   : > { %2520 = vmatmul.msk.f32.gmra.mxu2 %vm760_vm1, %v720_v37  ;;  %2544 = vmatmul.msk.f32.gmra.mxu3 %vm760_vm1, %v744_v41  ;;  %1624 = vst.msk [vmem:[%s2793_s8 + $0x248] sm:$0xff] %vm1550_vm2, %v3375_v51  ;;  %v594_v59 = vadd.f32 %v3121_v2, %v462_v4  ;;  %v596_v4 = vadd.f32 %v3121_v2, %v464_v54 }
 0x134   : > { %v593_v53 = vadd.f32 %v3121_v2, %v461_v44 }
 0x135   : > { %v1226_v20 = vpop.f32.mrf.mxu0  ;;  %v722_v14 = vmax.f32 %v594_v59, 0.0 }
 0x136   : > { %1571 = vst.msk [vmem:[%s2793_s8 + $0xa0] sm:$0xff] %vm1550_vm2, %v1226_v20  ;;  %v1718_v21 = vsel %vm1550_vm2, %v1226_v20, 0.0  ;;  %v1960_v23 = vmul.f32 %v1226_v20, %v1226_v20  ;;  %v721_v1 = vmax.f32 %v593_v53, 0.0  ;;  %v355_v20 = vld [vmem:[%s2643_s28 + $0x3a0] sm:$0xff]  ;;  %v356_v53 = vld [vmem:[%s2643_s28 + $0x3a8] sm:$0xff] }
 0x137   : > { %v3346_v30 = vadd.f32 %v1718_v21, %v1717_v3  ;;  %v3382_v55 = vpop.f32.mrf.mxu3  ;;  %v354_v3 = vld [vmem:[%s2643_s28 + $0x398] sm:$0xff]  ;;  %v463_v21 = vmul.f32 %v3140_v7, %v331_v17  ;;  %v357_v17 = vld [vmem:[%s2643_s28 + $0x3b0] sm:$0xff] }
 0x138   : > { %v2107_v33 = vsel %vm1550_vm2, %v1960_v23, 0.0  ;;  %4406 = vst [vmem:[#allocation3_spill] sm:$0xff] %v3382_v55  ;;  %v486_v6 = vmul.f32 %v3140_v7, %v354_v3  ;;  %v3401_v8 = vpop.f32.mrf.mxu1  ;;  %v487_v23 = vmul.f32 %v3140_v7, %v355_v20 }
 0x139   : > { %v3357_v63 = vadd.f32 %v2107_v33, %v2106_v9  ;;  %1648 = vst.msk [vmem:[%s2793_s8 + $0x308] sm:$0xff] %vm1550_vm2, %v3382_v55  ;;  %v3403_v9 = vpop.f32.mrf.mxu2  ;;  %v595_v37 = vadd.f32 %v3121_v2, %v463_v21  ;;  %v489_v21 = vmul.f32 %v3140_v7, %v357_v17 }
 0x13a   : > { %v618_v11 = vadd.f32 %v3121_v2, %v486_v6  ;;  %1601 = vst.msk [vmem:[%s2793_s8 + $0x190] sm:$0xff] %vm1550_vm2, %v3401_v8  ;;  %v619_v41 = vadd.f32 %v3121_v2, %v487_v23 }
 0x13b   : > { %2521 = vmatmul.msk.f32.gmra.mxu2 %vm760_vm1, %v721_v1  ;;  %2545 = vmatmul.msk.f32.gmra.mxu3 %vm760_vm1, %v745_v38  ;;  %1625 = vst.msk [vmem:[%s2793_s8 + $0x250] sm:$0xff] %vm1550_vm2, %v3403_v9  ;;  %v723_v43 = vmax.f32 %v595_v37, 0.0  ;;  %v488_v1 = vmul.f32 %v3140_v7, %v356_v53 }
 0x13c   : > { %v746_v16 = vmax.f32 %v618_v11, 0.0  ;;  %v747_v44 = vmax.f32 %v619_v41, 0.0  ;;  %v724_v11 = vmax.f32 %v596_v4, 0.0  ;;  %v358_v4 = vld [vmem:[%s2643_s28 + $0x3b8] sm:$0xff] }
 0x13d   : > { %v3368_v47 = vpop.f32.mrf.mxu0  ;;  %v620_v6 = vadd.f32 %v3121_v2, %v488_v1  ;;  %v334_v1 = vld [vmem:[%s2643_s28 + $0x2f8] sm:$0xff] }
 0x13e   : > { %1572 = vst.msk [vmem:[%s2793_s8 + $0xa8] sm:$0xff] %vm1550_vm2, %v3368_v47 }
 0x13f   : > { %v3410_v13 = vpop.f32.mrf.mxu3 }
 0x140   : > { %4407 = vst [vmem:[#allocation4_spill] sm:$0xff] %v3410_v13  ;;  %v3429_v29 = vpop.f32.mrf.mxu1 }
 0x141   : > { %1649 = vst.msk [vmem:[%s2793_s8 + $0x310] sm:$0xff] %vm1550_vm2, %v3410_v13  ;;  %v3431_v33 = vpop.f32.mrf.mxu2 }
 0x142   : > { %1602 = vst.msk [vmem:[%s2793_s8 + $0x198] sm:$0xff] %vm1550_vm2, %v3429_v29 }
 0x143   : > { %2522 = vmatmul.msk.f32.gmra.mxu2 %vm760_vm1, %v722_v14  ;;  %2546 = vmatmul.msk.f32.gmra.mxu3 %vm760_vm1, %v746_v16  ;;  %1626 = vst.msk [vmem:[%s2793_s8 + $0x258] sm:$0xff] %vm1550_vm2, %v3431_v33  ;;  %v748_v14 = vmax.f32 %v620_v6, 0.0  ;;  %v333_v16 = vld [vmem:[%s2643_s28 + $0x2f0] sm:$0xff]  ;;  %v466_v6 = vmul.f32 %v3140_v7, %v334_v1 }
 0x144   : > { %v465_v20 = vmul.f32 %v3140_v7, %v333_v16 }
 0x145   : > { %v3396_v35 = vpop.f32.mrf.mxu0 }
 0x146   : > { %1573 = vst.msk [vmem:[%s2793_s8 + $0xb0] sm:$0xff] %vm1550_vm2, %v3396_v35  ;;  %v1722_v13 = vsel %vm1550_vm2, %v3396_v35, 0.0 }
 0x147   : > { %v3438_v42 = vpop.f32.mrf.mxu3 }
 0x148   : > { %4408 = vst [vmem:[#allocation5_spill] sm:$0xff] %v3438_v42  ;;  %v3457_v57 = vpop.f32.mrf.mxu1 }
 0x149   : > { %1650 = vst.msk [vmem:[%s2793_s8 + $0x318] sm:$0xff] %vm1550_vm2, %v3438_v42  ;;  %v3459_v3 = vpop.f32.mrf.mxu2 }
 0x14a   : > { %4409 = vst [vmem:[#allocation6_spill] sm:$0xff] %v3459_v3 }
 0x14b   : > { %2523 = vmatmul.msk.f32.gmra.mxu2 %vm760_vm1, %v723_v43  ;;  %2547 = vmatmul.msk.f32.gmra.mxu3 %vm760_vm1, %v747_v44  ;;  %1603 = vst.msk [vmem:[%s2793_s8 + $0x1a0] sm:$0xff] %vm1550_vm2, %v3457_v57  ;;  %v597_v43 = vadd.f32 %v3121_v2, %v465_v20  ;;  %v621_v44 = vadd.f32 %v3121_v2, %v489_v21 }
 0x14c   : > { %1627 = vst.msk [vmem:[%s2793_s8 + $0x260] sm:$0xff] %vm1550_vm2, %v3459_v3  ;;  %v598_v20 = vadd.f32 %v3121_v2, %v466_v6  ;;  %v362_v3 = vld [vmem:[%s2643_s28 + $0x3d8] sm:$0xff] }
 0x14d   : > { %v3424_v26 = vpop.f32.mrf.mxu0  ;;  %v725_v53 = vmax.f32 %v597_v43, 0.0  ;;  %v749_v54 = vmax.f32 %v621_v44, 0.0 }
 0x14e   : > { %1574 = vst.msk [vmem:[%s2793_s8 + $0xb8] sm:$0xff] %vm1550_vm2, %v3424_v26  ;;  %v726_v44 = vmax.f32 %v598_v20, 0.0  ;;  %v1963_v55 = vmul.f32 %v3424_v26, %v3424_v26 }
 0x14f   : > { %v3466_v59 = vpop.f32.mrf.mxu3 }
 0x150   : > { %4410 = vst [vmem:[#allocation7_spill] sm:$0xff] %v3466_v59  ;;  %v3485_v37 = vpop.f32.mrf.mxu1 }
 0x151   : > { %1651 = vst.msk [vmem:[%s2793_s8 + $0x320] sm:$0xff] %vm1550_vm2, %v3466_v59  ;;  %v3487_v41 = vpop.f32.mrf.mxu2 }
 0x152   : > { %4411 = vst [vmem:[#allocation8_spill] sm:$0xff] %v3487_v41 }
 0x153   : > { %2524 = vmatmul.msk.f32.gmra.mxu2 %vm760_vm1, %v724_v11  ;;  %2548 = vmatmul.msk.f32.gmra.mxu3 %vm760_vm1, %v748_v14  ;;  %1604 = vst.msk [vmem:[%s2793_s8 + $0x1a8] sm:$0xff] %vm1550_vm2, %v3485_v37  ;;  %v490_v11 = vmul.f32 %v3140_v7, %v358_v4 }
 0x154   : > { %1628 = vst.msk [vmem:[%s2793_s8 + $0x268] sm:$0xff] %vm1550_vm2, %v3487_v41 }
 0x155   : > { %v3452_v38 = vpop.f32.mrf.mxu0  ;;  %v622_v21 = vadd.f32 %v3121_v2, %v490_v11 }
 0x156   : > { %1575 = vst.msk [vmem:[%s2793_s8 + $0xc0] sm:$0xff] %vm1550_vm2, %v3452_v38 }
 0x157   : > { %v3494_v46 = vpop.f32.mrf.mxu3 }
 0x158   : > { %4412 = vst [vmem:[#allocation9_spill] sm:$0xff] %v3494_v46 }
 0x159   : > { %1652 = vst.msk [vmem:[%s2793_s8 + $0x328] sm:$0xff] %vm1550_vm2, %v3494_v46  ;;  %v3515_v17 = vpop.f32.mrf.mxu2 }
 0x15a   : > { %4413 = vst [vmem:[#allocation10_spill] sm:$0xff] %v3515_v17 }
 0x15b   : > { %2525 = vmatmul.msk.f32.gmra.mxu2 %vm760_vm1, %v725_v53  ;;  %2549 = vmatmul.msk.f32.gmra.mxu3 %vm760_vm1, %v749_v54  ;;  %1629 = vst.msk [vmem:[%s2793_s8 + $0x270] sm:$0xff] %vm1550_vm2, %v3515_v17  ;;  %v750_v53 = vmax.f32 %v622_v21, 0.0  ;;  %v359_v54 = vld [vmem:[%s2643_s28 + $0x3c0] sm:$0xff] }
 0x15c   : > { %v3513_v16 = vpop.f32.mrf.mxu1  ;;  %v491_v1 = vmul.f32 %v3140_v7, %v359_v54 }
 0x15d   : > { %v3480_v23 = vpop.f32.mrf.mxu0  ;;  %1605 = vst.msk [vmem:[%s2793_s8 + $0x1b0] sm:$0xff] %vm1550_vm2, %v3513_v16 }
 0x15e   : > { %1576 = vst.msk [vmem:[%s2793_s8 + $0xc8] sm:$0xff] %vm1550_vm2, %v3480_v23  ;;  %v623_v20 = vadd.f32 %v3121_v2, %v491_v1 }
 0x15f   : > { %v3522_v43 = vpop.f32.mrf.mxu3 }
 0x160   : > { %4414 = vst [vmem:[#allocation11_spill] sm:$0xff] %v3522_v43 }
 0x161   : > { %1653 = vst.msk [vmem:[%s2793_s8 + $0x330] sm:$0xff] %vm1550_vm2, %v3522_v43  ;;  %v3541_v11 = vpop.f32.mrf.mxu2  ;;  %v1961_v43 = vmul.f32 %v3368_v47, %v3368_v47 }
 0x162   : > { %4415 = vst [vmem:[#allocation12_spill] sm:$0xff] %v3541_v11 }
 0x163   : > { %2526 = vmatmul.msk.f32.gmra.mxu2 %vm760_vm1, %v726_v44  ;;  %2550 = vmatmul.msk.f32.gmra.mxu3 %vm760_vm1, %v750_v53  ;;  %1630 = vst.msk [vmem:[%s2793_s8 + $0x278] sm:$0xff] %vm1550_vm2, %v3541_v11  ;;  %v751_v44 = vmax.f32 %v623_v20, 0.0  ;;  %v360_v53 = vld [vmem:[%s2643_s28 + $0x3c8] sm:$0xff] }
 0x164   : > { %v3539_v6 = vpop.f32.mrf.mxu1  ;;  %v492_v54 = vmul.f32 %v3140_v7, %v360_v53  ;;  %v1962_v53 = vmul.f32 %v3396_v35, %v3396_v35 }
 0x165   : > { %v3508_v14 = vpop.f32.mrf.mxu0  ;;  %1606 = vst.msk [vmem:[%s2793_s8 + $0x1b8] sm:$0xff] %vm1550_vm2, %v3539_v6 }
 0x166   : > { %1577 = vst.msk [vmem:[%s2793_s8 + $0xd0] sm:$0xff] %vm1550_vm2, %v3508_v14  ;;  %v2111_v11 = vsel %vm1550_vm2, %v1962_v53, 0.0 }
 0x167   : > { %v3547_v21 = vpop.f32.mrf.mxu3 }
 0x168   : > { %4416 = vst [vmem:[#allocation13_spill] sm:$0xff] %v3547_v21 }
 0x169   : > { %1654 = vst.msk [vmem:[%s2793_s8 + $0x338] sm:$0xff] %vm1550_vm2, %v3547_v21  ;;  %v3564_v59 = vpop.f32.mrf.mxu2  ;;  %v624_v21 = vadd.f32 %v3121_v2, %v492_v54  ;;  %v2109_v54 = vsel %vm1550_vm2, %v1961_v43, 0.0  ;;  %v493_v43 = vmul.f32 %v3140_v7, %v361_v32 }
 0x16a   : > { %4417 = vst [vmem:[#allocation14_spill] sm:$0xff] %v3564_v59  ;;  %v2110_v35 = vadd.f32 %v2109_v54, %v3357_v63  ;;  %v1728_v54 = vsel %vm1550_vm2, %v3480_v23, 0.0 }
 0x16b   : > { %2551 = vmatmul.msk.f32.gmra.mxu3 %vm760_vm1, %v751_v44  ;;  %v1720_v44 = vsel %vm1550_vm2, %v3368_v47, 0.0  ;;  %1631 = vst.msk [vmem:[%s2793_s8 + $0x280] sm:$0xff] %vm1550_vm2, %v3564_v59  ;;  %v752_v42 = vmax.f32 %v624_v21, 0.0  ;;  %v1724_v59 = vsel %vm1550_vm2, %v3424_v26, 0.0  ;;  %v1964_v21 = vmul.f32 %v3452_v38, %v3452_v38 }
 0x16c   : > { %v3562_v46 = vpop.f32.mrf.mxu1  ;;  %v1721_v47 = vadd.f32 %v1720_v44, %v3346_v30  ;;  %v2113_v30 = vsel %vm1550_vm2, %v1963_v55, 0.0  ;;  %v1726_v44 = vsel %vm1550_vm2, %v3452_v38, 0.0  ;;  %v1965_v26 = vmul.f32 %v3480_v23, %v3480_v23 }
 0x16d   : > { %v3534_v4 = vpop.f32.mrf.mxu0  ;;  %1607 = vst.msk [vmem:[%s2793_s8 + $0x1c0] sm:$0xff] %vm1550_vm2, %v3562_v46  ;;  %v625_v32 = vadd.f32 %v3121_v2, %v493_v43  ;;  %v2112_v63 = vadd.f32 %v2111_v11, %v2110_v35  ;;  %v2115_v38 = vsel %vm1550_vm2, %v1964_v21, 0.0  ;;  %v1730_v21 = vsel %vm1550_vm2, %v3508_v14, 0.0 }
 0x16e   : > { %1578 = vst.msk [vmem:[%s2793_s8 + $0xd8] sm:$0xff] %vm1550_vm2, %v3534_v4  ;;  %v1967_v23 = vmul.f32 %v3534_v4, %v3534_v4 }
 0x16f   : > { %v3570_v20 = vpop.f32.mrf.mxu3  ;;  %v2114_v43 = vadd.f32 %v2113_v30, %v2112_v63  ;;  %v1732_v30 = vsel %vm1550_vm2, %v3534_v4, 0.0 }
 0x170   : > { %4418 = vst [vmem:[#allocation15_spill] sm:$0xff] %v3570_v20 }
 0x171   : > { %1655 = vst.msk [vmem:[%s2793_s8 + $0x340] sm:$0xff] %vm1550_vm2, %v3570_v20  ;;  %v1723_v20 = vadd.f32 %v1722_v13, %v1721_v47  ;;  %v1966_v47 = vmul.f32 %v3508_v14, %v3508_v14  ;;  %v2116_v35 = vadd.f32 %v2115_v38, %v2114_v43 }
 0x173   : > { %2552 = vmatmul.msk.f32.gmra.mxu3 %vm760_vm1, %v752_v42  ;;  %v3606_v42 = vpop.f32.mrf.mxu2  ;;  %v1725_v13 = vadd.f32 %v1724_v59, %v1723_v20  ;;  %v753_v59 = vmax.f32 %v625_v32, 0.0  ;;  %v2117_v20 = vsel %vm1550_vm2, %v1965_v26, 0.0  ;;  %v494_v26 = vmul.f32 %v3140_v7, %v362_v3 }
 0x174   : > { %v3604_v53 = vpop.f32.mrf.mxu1  ;;  %4419 = vst [vmem:[#allocation16_spill] sm:$0xff] %v3606_v42  ;;  %v2118_v32 = vadd.f32 %v2117_v20, %v2116_v35 }
 0x175   : > { %v1250_v1 = vpop.f32.mrf.mxu0  ;;  %1608 = vst.msk [vmem:[%s2793_s8 + $0x1c8] sm:$0xff] %vm1550_vm2, %v3604_v53  ;;  %v1727_v11 = vadd.f32 %v1726_v44, %v1725_v13  ;;  %v2121_v13 = vsel %vm1550_vm2, %v1967_v23, 0.0  ;;  %v626_v4 = vadd.f32 %v3121_v2, %v494_v26 }
 0x176   : > { %1579 = vst.msk [vmem:[%s2793_s8 + $0xe0] sm:$0xff] %vm1550_vm2, %v1250_v1  ;;  %v1968_v44 = vmul.f32 %v1250_v1, %v1250_v1  ;;  %v1734_v38 = vsel %vm1550_vm2, %v1250_v1, 0.0 }
 0x177   : > { %v3612_v55 = vpop.f32.mrf.mxu3  ;;  %1632 = vst.msk [vmem:[%s2793_s8 + $0x288] sm:$0xff] %vm1550_vm2, %v3606_v42  ;;  %v1729_v41 = vadd.f32 %v1728_v54, %v1727_v11  ;;  %v2119_v42 = vsel %vm1550_vm2, %v1966_v47, 0.0  ;;  %v754_v23 = vmax.f32 %v626_v4, 0.0  ;;  %v1972_v4 = vmul.f32 %v2875_v19, %v2875_v19 }
 0x178   : > { %1656 = vst.msk [vmem:[%s2793_s8 + $0x348] sm:$0xff] %vm1550_vm2, %v3612_v55  ;;  %v2120_v43 = vadd.f32 %v2119_v42, %v2118_v32  ;;  %v2123_v1 = vsel %vm1550_vm2, %v1968_v44, 0.0  ;;  %v363_v44 = vld [vmem:[%s2643_s28 + $0x3e0] sm:$0xff] }
 0x179   : > { %v1731_v14 = vadd.f32 %v1730_v21, %v1729_v41 }
 0x17a   : > { %v2122_v21 = vadd.f32 %v2121_v13, %v2120_v43 }
 0x17b   : > { %2553 = vmatmul.msk.f32.gmra.mxu3 %vm760_vm1, %v753_v59  ;;  %v1733_v11 = vadd.f32 %v1732_v30, %v1731_v14  ;;  %v3646_v3 = vpop.f32.mrf.mxu2  ;;  %v495_v14 = vmul.f32 %v3140_v7, %v363_v44  ;;  %v1744_v44 = vsel %vm1550_vm2, %v2901_v39, 0.0 }
 0x17c   : > { %v3640_v47 = vpop.f32.mrf.mxu1  ;;  %1633 = vst.msk [vmem:[%s2793_s8 + $0x290] sm:$0xff] %vm1550_vm2, %v3646_v3  ;;  %v2124_v26 = vadd.f32 %v2123_v1, %v2122_v21 }
 0x17d   : > { %v1253_v17 = vpop.f32.mrf.mxu0  ;;  %1609 = vst.msk [vmem:[%s2793_s8 + $0x1d0] sm:$0xff] %vm1550_vm2, %v3640_v47  ;;  %v1735_v42 = vadd.f32 %v1734_v38, %v1733_v11  ;;  %v627_v1 = vadd.f32 %v3121_v2, %v495_v14  ;;  %v2131_v14 = vsel %vm1550_vm2, %v1972_v4, 0.0 }
 0x17e   : > { %1580 = vst.msk [vmem:[%s2793_s8 + $0xe8] sm:$0xff] %vm1550_vm2, %v1253_v17  ;;  %v1969_v54 = vmul.f32 %v1253_v17, %v1253_v17  ;;  %v1736_v59 = vsel %vm1550_vm2, %v1253_v17, 0.0 }
 0x17f   : > { %v3648_v41 = vpop.f32.mrf.mxu3  ;;  %v1737_v32 = vadd.f32 %v1736_v59, %v1735_v42 }
 0x180   : > { %1657 = vst.msk [vmem:[%s2793_s8 + $0x350] sm:$0xff] %vm1550_vm2, %v3648_v41  ;;  %v2125_v35 = vsel %vm1550_vm2, %v1969_v54, 0.0 }
 0x181   : > { %v2126_v13 = vadd.f32 %v2125_v35, %v2124_v26  ;;  %v1742_v35 = vsel %vm1550_vm2, %v2875_v19, 0.0 }
 0x183   : > { %2554 = vmatmul.msk.f32.gmra.mxu3 %vm760_vm1, %v754_v23  ;;  %v1973_v23 = vmul.f32 %v2901_v39, %v2901_v39 }
 0x184   : > { %v3669_v11 = vpop.f32.mrf.mxu1 }
 0x185   : > { %v1256_v63 = vpop.f32.mrf.mxu0  ;;  %1610 = vst.msk [vmem:[%s2793_s8 + $0x1d8] sm:$0xff] %vm1550_vm2, %v3669_v11 }
 0x186   : > { %1581 = vst.msk [vmem:[%s2793_s8 + $0xf0] sm:$0xff] %vm1550_vm2, %v1256_v63  ;;  %v1970_v20 = vmul.f32 %v1256_v63, %v1256_v63  ;;  %v1738_v30 = vsel %vm1550_vm2, %v1256_v63, 0.0  ;;  %v3675_v21 = vpop.f32.mrf.mxu2 }
 0x187   : > { %v1739_v38 = vadd.f32 %v1738_v30, %v1737_v32  ;;  %v3677_v42 = vpop.f32.mrf.mxu3  ;;  %1634 = vst.msk [vmem:[%s2793_s8 + $0x298] sm:$0xff] %vm1550_vm2, %v3675_v21 }
 0x188   : > { %v2127_v17 = vsel %vm1550_vm2, %v1970_v20, 0.0  ;;  %1658 = vst.msk [vmem:[%s2793_s8 + $0x358] sm:$0xff] %vm1550_vm2, %v3677_v42 }
 0x189   : > { %v2128_v59 = vadd.f32 %v2127_v17, %v2126_v13  ;;  %v1974_v17 = vmul.f32 %v2931_v60, %v2931_v60  ;;  %v755_v13 = vmax.f32 %v627_v1, 0.0 }
 0x18b   : > { %2555 = vmatmul.msk.f32.gmra.mxu3 %vm760_vm1, %v755_v13  ;;  %v2135_v1 = vsel %vm1550_vm2, %v1974_v17, 0.0  ;;  %v1977_v13 = vmul.f32 %v3036_v36, %v3036_v36 }
 0x18d   : > { %v1259_v43 = vpop.f32.mrf.mxu0 }
 0x18e   : > { %1582 = vst.msk [vmem:[%s2793_s8 + $0xf8] sm:$0xff] %vm1550_vm2, %v1259_v43  ;;  %v1740_v63 = vsel %vm1550_vm2, %v1259_v43, 0.0  ;;  %v1971_v54 = vmul.f32 %v1259_v43, %v1259_v43  ;;  %v364_v43 = vld [vmem:[%s2643_s28 + $0x3e8] sm:$0xff] }
 0x18f   : > { %v1741_v20 = vadd.f32 %v1740_v63, %v1739_v38  ;;  %v2133_v63 = vsel %vm1550_vm2, %v1973_v23, 0.0  ;;  %v496_v39 = vmul.f32 %v3140_v7, %v364_v43  ;;  %v1976_v23 = vmul.f32 %v3005_v61, %v3005_v61  ;;  %v3716_v17 = vpop.f32.mrf.mxu3 }
 0x190   : > { %v2129_v30 = vsel %vm1550_vm2, %v1971_v54, 0.0  ;;  %v1746_v54 = vsel %vm1550_vm2, %v2931_v60, 0.0  ;;  %v3708_v60 = vpop.f32.mrf.mxu1  ;;  %1659 = vst.msk [vmem:[%s2793_s8 + $0x360] sm:$0xff] %vm1550_vm2, %v3716_v17 }
 0x191   : > { %v1743_v26 = vadd.f32 %v1742_v35, %v1741_v20  ;;  %v2130_v32 = vadd.f32 %v2129_v30, %v2128_v59  ;;  %v1975_v59 = vmul.f32 %v2968_v27, %v2968_v27  ;;  %v1748_v35 = vsel %vm1550_vm2, %v2968_v27, 0.0  ;;  %1611 = vst.msk [vmem:[%s2793_s8 + $0x1e0] sm:$0xff] %vm1550_vm2, %v3708_v60 }
 0x192   : > { %v628_v30 = vadd.f32 %v3121_v2, %v496_v39  ;;  %v1750_v27 = vsel %vm1550_vm2, %v3005_v61, 0.0  ;;  %v1978_v61 = vmul.f32 %v3061_v0, %v3061_v0 }
 0x193   : > { %v1745_v19 = vadd.f32 %v1744_v44, %v1743_v26  ;;  %v2132_v38 = vadd.f32 %v2131_v14, %v2130_v32  ;;  %v3714_v44 = vpop.f32.mrf.mxu2  ;;  %v2137_v14 = vsel %vm1550_vm2, %v1975_v59, 0.0 }
 0x194   : > { %1635 = vst.msk [vmem:[%s2793_s8 + $0x2a0] sm:$0xff] %vm1550_vm2, %v3714_v44  ;;  %v756_v43 = vmax.f32 %v628_v30, 0.0 }
 0x195   : > { %v1747_v20 = vadd.f32 %v1746_v54, %v1745_v19  ;;  %v2134_v4 = vadd.f32 %v2133_v63, %v2132_v38  ;;  %v2139_v63 = vsel %vm1550_vm2, %v1976_v23, 0.0  ;;  %v1752_v54 = vsel %vm1550_vm2, %v3036_v36, 0.0 }
 0x196   : > { %2556 = vmatmul.msk.f32.gmra.mxu3 %vm760_vm1, %v756_v43 }
 0x197   : > { %v1749_v26 = vadd.f32 %v1748_v35, %v1747_v20  ;;  %v2136_v32 = vadd.f32 %v2135_v1, %v2134_v4  ;;  %v365_v20 = vld [vmem:[%s2643_s28 + $0x3f0] sm:$0xff]  ;;  %v2141_v4 = vsel %vm1550_vm2, %v1977_v13, 0.0  ;;  %v1754_v1 = vsel %vm1550_vm2, %v3061_v0, 0.0 }
 0x198   : > { %v1979_v35 = vmul.f32 %v3086_v25, %v3086_v25  ;;  %v497_v23 = vmul.f32 %v3140_v7, %v365_v20  ;;  %v3747_v0 = vpop.f32.mrf.mxu1 }
 0x199   : > { %v1751_v19 = vadd.f32 %v1750_v27, %v1749_v26  ;;  %v2138_v38 = vadd.f32 %v2137_v14, %v2136_v32  ;;  %v2143_v26 = vsel %vm1550_vm2, %v1978_v61, 0.0  ;;  %v1756_v32 = vsel %vm1550_vm2, %v3086_v25, 0.0  ;;  %1612 = vst.msk [vmem:[%s2793_s8 + $0x1e8] sm:$0xff] %vm1550_vm2, %v3747_v0 }
 0x19a   : > { %v1980_v14 = vmul.f32 %v3111_v52, %v3111_v52  ;;  %v629_v27 = vadd.f32 %v3121_v2, %v497_v23  ;;  %v2145_v43 = vsel %vm1550_vm2, %v1979_v35, 0.0  ;;  %v1758_v25 = vsel %vm1550_vm2, %v3111_v52, 0.0 }
 0x19b   : > { %v1753_v59 = vadd.f32 %v1752_v54, %v1751_v19  ;;  %v2140_v39 = vadd.f32 %v2139_v63, %v2138_v38  ;;  %v3753_v7 = vpop.f32.mrf.mxu2  ;;  %v3755_v38 = vpop.f32.mrf.mxu3  ;;  %v1981_v63 = vmul.f32 %v3151_v15, %v3151_v15  ;;  %v1982_v52 = vmul.f32 %v3181_v45, %v3181_v45 }
 0x19c   : > { %1636 = vst.msk [vmem:[%s2793_s8 + $0x2a8] sm:$0xff] %vm1550_vm2, %v3753_v7  ;;  %v757_v61 = vmax.f32 %v629_v27, 0.0  ;;  %v1762_v23 = vsel %vm1550_vm2, %v3181_v45, 0.0  ;;  %v1764_v27 = vsel %vm1550_vm2, %v3209_v10, 0.0  ;;  %v1984_v45 = vmul.f32 %v3236_v34, %v3236_v34 }
 0x19d   : > { %v1755_v36 = vadd.f32 %v1754_v1, %v1753_v59  ;;  %v2142_v30 = vadd.f32 %v2141_v4, %v2140_v39  ;;  %1660 = vst.msk [vmem:[%s2793_s8 + $0x368] sm:$0xff] %vm1550_vm2, %v3755_v38  ;;  %v2147_v59 = vsel %vm1550_vm2, %v1980_v14, 0.0  ;;  %v1760_v39 = vsel %vm1550_vm2, %v3151_v15, 0.0  ;;  %v366_v1 = vld [vmem:[%s2643_s28 + $0x3f8] sm:$0xff]  ;;  %v2576_v15 = vld [vmem:[%s4370_s1] ss:$0 sm:$0xff] }
 0x19e   : > { %v2149_v35 = vsel %vm1550_vm2, %v1981_v63, 0.0  ;;  %2557 = vmatmul.msk.f32.gmra.mxu3 %vm760_vm1, %v757_v61  ;;  %v2151_v14 = vsel %vm1550_vm2, %v1982_v52, 0.0  ;;  %v1766_v61 = vsel %vm1550_vm2, %v3236_v34, 0.0  ;;  %v1986_v34 = vmul.f32 %v3288_v28, %v3288_v28 }
 0x19f   : > { %v1757_v13 = vadd.f32 %v1756_v32, %v1755_v36  ;;  %v2144_v19 = vadd.f32 %v2143_v26, %v2142_v30  ;;  %v1983_v36 = vmul.f32 %v3209_v10, %v3209_v10  ;;  %v498_v30 = vmul.f32 %v2576_v15, %v366_v1 }
 0x1a0   : > { %v1768_v1 = vsel %vm1550_vm2, %v3262_v62, 0.0  ;;  %v1770_v15 = vsel %vm1550_vm2, %v3288_v28, 0.0 }
 0x1a1   : > { %v1759_v2 = vadd.f32 %v1758_v25, %v1757_v13  ;;  %v2146_v54 = vadd.f32 %v2145_v43, %v2144_v19  ;;  %v3788_v13 = vpop.f32.mrf.mxu1  ;;  %v2577_v19 = vld [vmem:[%s4371_s2] ss:$0 sm:$0xff]  ;;  %v2153_v10 = vsel %vm1550_vm2, %v1983_v36, 0.0 }
 0x1a2   : > { %v630_v43 = vadd.f32 %v2577_v19, %v498_v30  ;;  %1613 = vst.msk [vmem:[%s2793_s8 + $0x1f0] sm:$0xff] %vm1550_vm2, %v3788_v13  ;;  %v1987_v30 = vmul.f32 %v3314_v56, %v3314_v56 }
 0x1a3   : > { %v1761_v20 = vadd.f32 %v1760_v39, %v1759_v2  ;;  %v2148_v4 = vadd.f32 %v2147_v59, %v2146_v54  ;;  %v3796_v2 = vpop.f32.mrf.mxu2  ;;  %v3798_v54 = vpop.f32.mrf.mxu3  ;;  %v1985_v59 = vmul.f32 %v3262_v62, %v3262_v62  ;;  %v2159_v62 = vsel %vm1550_vm2, %v1986_v34, 0.0 }
 0x1a4   : > { %1637 = vst.msk [vmem:[%s2793_s8 + $0x2b0] sm:$0xff] %vm1550_vm2, %v3796_v2  ;;  %v1778_v34 = vsel %vm1550_vm2, %v3401_v8, 0.0 }
 0x1a5   : > { %v1763_v26 = vadd.f32 %v1762_v23, %v1761_v20  ;;  %v2150_v32 = vadd.f32 %v2149_v35, %v2148_v4  ;;  %1661 = vst.msk [vmem:[%s2793_s8 + $0x370] sm:$0xff] %vm1550_vm2, %v3798_v54  ;;  %v758_v20 = vmax.f32 %v630_v43, 0.0  ;;  %v2155_v4 = vsel %vm1550_vm2, %v1984_v45, 0.0 }
 0x1a6   : > { %v2157_v36 = vsel %vm1550_vm2, %v1985_v59, 0.0 }
 0x1a7   : > { %v1765_v25 = vadd.f32 %v1764_v27, %v1763_v26  ;;  %v2152_v63 = vadd.f32 %v2151_v14, %v2150_v32  ;;  %2558 = vmatmul.msk.f32.gmra.mxu3 %vm760_vm1, %v758_v20  ;;  %v1772_v14 = vsel %vm1550_vm2, %v3314_v56, 0.0  ;;  %v1988_v27 = vmul.f32 %v3340_v24, %v3340_v24 }
 0x1a8   : > { %v1989_v56 = vmul.f32 %v3373_v50, %v3373_v50  ;;  %v1990_v20 = vmul.f32 %v3401_v8, %v3401_v8 }
 0x1a9   : > { %v2154_v39 = vadd.f32 %v2153_v10, %v2152_v63  ;;  %v1767_v52 = vadd.f32 %v1766_v61, %v1765_v25  ;;  %v3827_v45 = vpop.f32.mrf.mxu1  ;;  %v2161_v63 = vsel %vm1550_vm2, %v1987_v30, 0.0  ;;  %v1774_v10 = vsel %vm1550_vm2, %v3340_v24, 0.0 }
 0x1aa   : > { %1614 = vst.msk [vmem:[%s2793_s8 + $0x1f8] sm:$0xff] %vm1550_vm2, %v3827_v45  ;;  %v1992_v30 = vmul.f32 %v3457_v57, %v3457_v57 }
 0x1ab   : > { %v1769_v35 = vadd.f32 %v1768_v1, %v1767_v52  ;;  %v2156_v23 = vadd.f32 %v2155_v4, %v2154_v39  ;;  %v3832_v43 = vpop.f32.mrf.mxu2  ;;  %v3834_v25 = vpop.f32.mrf.mxu3  ;;  %v2163_v39 = vsel %vm1550_vm2, %v1988_v27, 0.0  ;;  %v1776_v52 = vsel %vm1550_vm2, %v3373_v50, 0.0 }
 0x1ac   : > { %1638 = vst.msk [vmem:[%s2793_s8 + $0x2b8] sm:$0xff] %vm1550_vm2, %v3832_v43  ;;  %v2165_v1 = vsel %vm1550_vm2, %v1989_v56, 0.0  ;;  %v1780_v50 = vsel %vm1550_vm2, %v3429_v29, 0.0  ;;  %v1782_v27 = vsel %vm1550_vm2, %v3457_v57, 0.0  ;;  %v1994_v56 = vmul.f32 %v3513_v16, %v3513_v16 }
 0x1ad   : > { %v1771_v26 = vadd.f32 %v1770_v15, %v1769_v35  ;;  %v2158_v32 = vadd.f32 %v2157_v36, %v2156_v23  ;;  %1662 = vst.msk [vmem:[%s2793_s8 + $0x378] sm:$0xff] %vm1550_vm2, %v3834_v25  ;;  %v1991_v35 = vmul.f32 %v3429_v29, %v3429_v29  ;;  %v2167_v15 = vsel %vm1550_vm2, %v1990_v20, 0.0 }
 0x1af   : > { %v1773_v28 = vadd.f32 %v1772_v14, %v1771_v26  ;;  %v2160_v19 = vadd.f32 %v2159_v62, %v2158_v32  ;;  %v2169_v8 = vsel %vm1550_vm2, %v1991_v35, 0.0 }
 0x1b1   : > { %v1775_v61 = vadd.f32 %v1774_v10, %v1773_v28  ;;  %v2162_v59 = vadd.f32 %v2161_v63, %v2160_v19  ;;  %v1993_v28 = vmul.f32 %v3485_v37, %v3485_v37  ;;  %v2171_v63 = vsel %vm1550_vm2, %v1992_v30, 0.0 }
 0x1b2   : > { %v1784_v10 = vsel %vm1550_vm2, %v3485_v37, 0.0  ;;  %v1788_v37 = vsel %vm1550_vm2, %v3539_v6, 0.0 }
 0x1b3   : > { %v1777_v24 = vadd.f32 %v1776_v52, %v1775_v61  ;;  %v2164_v4 = vadd.f32 %v2163_v39, %v2162_v59  ;;  %v3862_v62 = vpop.f32.mrf.mxu2  ;;  %v3864_v14 = vpop.f32.mrf.mxu3  ;;  %v2173_v59 = vsel %vm1550_vm2, %v1993_v28, 0.0  ;;  %v1786_v39 = vsel %vm1550_vm2, %v3513_v16, 0.0 }
 0x1b4   : > { %1639 = vst.msk [vmem:[%s2793_s8 + $0x2c0] sm:$0xff] %vm1550_vm2, %v3862_v62  ;;  %v1995_v52 = vmul.f32 %v3539_v6, %v3539_v6 }
 0x1b5   : > { %v1779_v23 = vadd.f32 %v1778_v34, %v1777_v24  ;;  %v2166_v36 = vadd.f32 %v2165_v1, %v2164_v4  ;;  %1663 = vst.msk [vmem:[%s2793_s8 + $0x380] sm:$0xff] %vm1550_vm2, %v3864_v14  ;;  %v2175_v4 = vsel %vm1550_vm2, %v1994_v56, 0.0  ;;  %v1996_v1 = vmul.f32 %v3562_v46, %v3562_v46 }
 0x1b6   : > { %v2177_v16 = vsel %vm1550_vm2, %v1995_v52, 0.0 }
 0x1b7   : > { %v1781_v26 = vadd.f32 %v1780_v50, %v1779_v23  ;;  %v2168_v32 = vadd.f32 %v2167_v15, %v2166_v36  ;;  %v1790_v15 = vsel %vm1550_vm2, %v3562_v46, 0.0  ;;  %v1997_v50 = vmul.f32 %v3604_v53, %v3604_v53 }
 0x1b9   : > { %v1783_v29 = vadd.f32 %v1782_v27, %v1781_v26  ;;  %v2170_v19 = vadd.f32 %v2169_v8, %v2168_v32  ;;  %v2179_v26 = vsel %vm1550_vm2, %v1996_v1, 0.0  ;;  %v1792_v32 = vsel %vm1550_vm2, %v3604_v53, 0.0 }
 0x1ba   : > { %v1998_v8 = vmul.f32 %v3640_v47, %v3640_v47  ;;  %v2181_v28 = vsel %vm1550_vm2, %v1997_v50, 0.0  ;;  %v1796_v53 = vsel %vm1550_vm2, %v3669_v11, 0.0  ;;  %v1800_v1 = vsel %vm1550_vm2, %v3747_v0, 0.0 }
 0x1bb   : > { %v1785_v57 = vadd.f32 %v1784_v10, %v1783_v29  ;;  %v2172_v61 = vadd.f32 %v2171_v63, %v2170_v19  ;;  %v3892_v23 = vpop.f32.mrf.mxu2  ;;  %v3894_v36 = vpop.f32.mrf.mxu3  ;;  %v1794_v29 = vsel %vm1550_vm2, %v3640_v47, 0.0  ;;  %v1999_v19 = vmul.f32 %v3669_v11, %v3669_v11 }
 0x1bc   : > { %1640 = vst.msk [vmem:[%s2793_s8 + $0x2c8] sm:$0xff] %vm1550_vm2, %v3892_v23  ;;  %v2183_v56 = vsel %vm1550_vm2, %v1998_v8, 0.0  ;;  %v1802_v50 = vsel %vm1550_vm2, %v3788_v13, 0.0 }
 0x1bd   : > { %v1787_v20 = vadd.f32 %v1786_v39, %v1785_v57  ;;  %v2174_v24 = vadd.f32 %v2173_v59, %v2172_v61  ;;  %1664 = vst.msk [vmem:[%s2793_s8 + $0x388] sm:$0xff] %vm1550_vm2, %v3894_v36  ;;  %v2000_v57 = vmul.f32 %v3708_v60, %v3708_v60  ;;  %v2185_v47 = vsel %vm1550_vm2, %v1999_v19, 0.0 }
 0x1bf   : > { %v1789_v34 = vadd.f32 %v1788_v37, %v1787_v20  ;;  %v2176_v35 = vadd.f32 %v2175_v4, %v2174_v24  ;;  %v1798_v20 = vsel %vm1550_vm2, %v3708_v60, 0.0  ;;  %v2001_v24 = vmul.f32 %v3747_v0, %v3747_v0 }
 0x1c0   : > { %v2187_v37 = vsel %vm1550_vm2, %v2000_v57, 0.0  ;;  %v2003_v60 = vmul.f32 %v3827_v45, %v3827_v45 }
 0x1c1   : > { %v2178_v6 = vadd.f32 %v2177_v16, %v2176_v35  ;;  %v1791_v30 = vadd.f32 %v1790_v15, %v1789_v34  ;;  %v2002_v34 = vmul.f32 %v3788_v13, %v3788_v13  ;;  %v2189_v15 = vsel %vm1550_vm2, %v2001_v24, 0.0 }
 0x1c2   : > { %v2193_v8 = vsel %vm1550_vm2, %v2003_v60, 0.0  ;;  %v2005_v13 = vmul.f32 %v3156_v22, %v3156_v22 }
 0x1c3   : > { %v2180_v46 = vadd.f32 %v2179_v26, %v2178_v6  ;;  %v1793_v27 = vadd.f32 %v1792_v32, %v1791_v30  ;;  %v3922_v39 = vpop.f32.mrf.mxu2  ;;  %v3924_v52 = vpop.f32.mrf.mxu3  ;;  %v1804_v6 = vsel %vm1550_vm2, %v3827_v45, 0.0  ;;  %v2004_v26 = vmul.f32 %v3116_v18, %v3116_v18 }
 0x1c4   : > { %1641 = vst.msk [vmem:[%s2793_s8 + $0x2d0] sm:$0xff] %vm1550_vm2, %v3922_v39  ;;  %v2191_v32 = vsel %vm1550_vm2, %v2002_v34, 0.0  ;;  %v1806_v45 = vsel %vm1550_vm2, %v3116_v18, 0.0  ;;  %v2197_v18 = vsel %vm1550_vm2, %v2005_v13, 0.0 }
 0x1c5   : > { %v2182_v63 = vadd.f32 %v2181_v28, %v2180_v46  ;;  %v1795_v10 = vadd.f32 %v1794_v29, %v1793_v27  ;;  %1665 = vst.msk [vmem:[%s2793_s8 + $0x390] sm:$0xff] %vm1550_vm2, %v3924_v52 }
 0x1c7   : > { %v2184_v61 = vadd.f32 %v2183_v56, %v2182_v63  ;;  %v1797_v59 = vadd.f32 %v1796_v53, %v1795_v10  ;;  %v1808_v10 = vsel %vm1550_vm2, %v3156_v22, 0.0  ;;  %v2006_v56 = vmul.f32 %v3186_v49, %v3186_v49 }
 0x1c8   : > { %v2195_v53 = vsel %vm1550_vm2, %v2004_v26, 0.0 }
 0x1c9   : > { %v2186_v11 = vadd.f32 %v2185_v47, %v2184_v61  ;;  %v1799_v4 = vadd.f32 %v1798_v20, %v1797_v59  ;;  %v1810_v59 = vsel %vm1550_vm2, %v3186_v49, 0.0  ;;  %v2007_v47 = vmul.f32 %v3214_v12, %v3214_v12 }
 0x1ca   : > { %v2199_v22 = vsel %vm1550_vm2, %v2006_v56, 0.0 }
 0x1cb   : > { %v2188_v35 = vadd.f32 %v2187_v37, %v2186_v11  ;;  %v1801_v16 = vadd.f32 %v1800_v1, %v1799_v4  ;;  %v3953_v28 = vpop.f32.mrf.mxu2  ;;  %v3955_v29 = vpop.f32.mrf.mxu3  ;;  %v1812_v11 = vsel %vm1550_vm2, %v3214_v12, 0.0  ;;  %v2008_v4 = vmul.f32 %v3241_v40, %v3241_v40 }
 0x1cc   : > { %1642 = vst.msk [vmem:[%s2793_s8 + $0x2d8] sm:$0xff] %vm1550_vm2, %v3953_v28  ;;  %v2201_v49 = vsel %vm1550_vm2, %v2007_v47, 0.0  ;;  %v2014_v47 = vmul.f32 %v3403_v9, %v3403_v9 }
 0x1cd   : > { %v2190_v30 = vadd.f32 %v2189_v15, %v2188_v35  ;;  %v1803_v0 = vadd.f32 %v1802_v50, %v1801_v16  ;;  %1666 = vst.msk [vmem:[%s2793_s8 + $0x398] sm:$0xff] %vm1550_vm2, %v3955_v29  ;;  %v1814_v35 = vsel %vm1550_vm2, %v3241_v40, 0.0  ;;  %v2009_v16 = vmul.f32 %v3267_v5, %v3267_v5 }
 0x1ce   : > { %v2203_v50 = vsel %vm1550_vm2, %v2008_v4, 0.0 }
 0x1cf   : > { %v2192_v46 = vadd.f32 %v2191_v32, %v2190_v30  ;;  %v1805_v27 = vadd.f32 %v1804_v6, %v1803_v0  ;;  %v1816_v6 = vsel %vm1550_vm2, %v3267_v5, 0.0  ;;  %v2010_v30 = vmul.f32 %v3293_v31, %v3293_v31 }
 0x1d0   : > { %v2205_v26 = vsel %vm1550_vm2, %v2009_v16, 0.0  ;;  %v1818_v32 = vsel %vm1550_vm2, %v3293_v31, 0.0  ;;  %v1820_v5 = vsel %vm1550_vm2, %v3319_v58, 0.0 }
 0x1d1   : > { %v1807_v19 = vadd.f32 %v1806_v45, %v1805_v27  ;;  %v2194_v63 = vadd.f32 %v2193_v8, %v2192_v46  ;;  %v2011_v8 = vmul.f32 %v3319_v58, %v3319_v58  ;;  %v2207_v13 = vsel %vm1550_vm2, %v2010_v30, 0.0  ;;  %v4421_v30 = vld [vmem:[#allocation8_spill] sm:$0xff] }
 0x1d2   : > { %v2012_v45 = vmul.f32 %v3342_v48, %v3342_v48 }
 0x1d3   : > { %v1809_v57 = vadd.f32 %v1808_v10, %v1807_v19  ;;  %v2196_v61 = vadd.f32 %v2195_v53, %v2194_v63  ;;  %v3982_v34 = vpop.f32.mrf.mxu2  ;;  %v3984_v60 = vpop.f32.mrf.mxu3  ;;  %v2209_v31 = vsel %vm1550_vm2, %v2011_v8, 0.0  ;;  %v1822_v53 = vsel %vm1550_vm2, %v3342_v48, 0.0  ;;  %v4422_v8 = vld [vmem:[#allocation10_spill] sm:$0xff] }
 0x1d4   : > { %1643 = vst.msk [vmem:[%s2793_s8 + $0x2e0] sm:$0xff] %vm1550_vm2, %v3982_v34 }
 0x1d5   : > { %v1811_v20 = vadd.f32 %v1810_v59, %v1809_v57  ;;  %v2198_v24 = vadd.f32 %v2197_v18, %v2196_v61  ;;  %1667 = vst.msk [vmem:[%s2793_s8 + $0x3a0] sm:$0xff] %vm1550_vm2, %v3984_v60  ;;  %v2013_v57 = vmul.f32 %v3375_v51, %v3375_v51  ;;  %v2211_v18 = vsel %vm1550_vm2, %v2012_v45, 0.0 }
 0x1d6   : > { %v1824_v59 = vsel %vm1550_vm2, %v3375_v51, 0.0  ;;  %v1828_v51 = vsel %vm1550_vm2, %v3431_v33, 0.0  ;;  %v1834_v45 = vsel %vm1550_vm2, %v4422_v8, 0.0 }
 0x1d7   : > { %v1813_v37 = vadd.f32 %v1812_v11, %v1811_v20  ;;  %v2200_v1 = vadd.f32 %v2199_v22, %v2198_v24  ;;  %v2213_v24 = vsel %vm1550_vm2, %v2013_v57, 0.0  ;;  %v1826_v22 = vsel %vm1550_vm2, %v3403_v9, 0.0 }
 0x1d8   : > { %v2015_v11 = vmul.f32 %v3431_v33, %v3431_v33 }
 0x1d9   : > { %v1815_v12 = vadd.f32 %v1814_v35, %v1813_v37  ;;  %v2202_v15 = vadd.f32 %v2201_v49, %v2200_v1  ;;  %v2215_v1 = vsel %vm1550_vm2, %v2014_v47, 0.0  ;;  %v4420_v49 = vld [vmem:[#allocation6_spill] sm:$0xff] }
 0x1da   : > { %v2016_v35 = vmul.f32 %v4420_v49, %v4420_v49  ;;  %v2217_v9 = vsel %vm1550_vm2, %v2015_v11, 0.0  ;;  %v4425_v11 = vld [vmem:[#allocation16_spill] sm:$0xff] }
 0x1db   : > { %v1817_v40 = vadd.f32 %v1816_v6, %v1815_v12  ;;  %v2204_v0 = vadd.f32 %v2203_v50, %v2202_v15  ;;  %v4012_v10 = vpop.f32.mrf.mxu2  ;;  %v4014_v56 = vpop.f32.mrf.mxu3  ;;  %v1830_v6 = vsel %vm1550_vm2, %v4420_v49, 0.0  ;;  %v1840_v49 = vsel %vm1550_vm2, %v4425_v11, 0.0 }
 0x1dc   : > { %1644 = vst.msk [vmem:[%s2793_s8 + $0x2e8] sm:$0xff] %vm1550_vm2, %v4012_v10 }
 0x1dd   : > { %v1819_v46 = vadd.f32 %v1818_v32, %v1817_v40  ;;  %v2206_v27 = vadd.f32 %v2205_v26, %v2204_v0  ;;  %1668 = vst.msk [vmem:[%s2793_s8 + $0x3a8] sm:$0xff] %vm1550_vm2, %v4014_v56  ;;  %v2017_v40 = vmul.f32 %v4421_v30, %v4421_v30  ;;  %v2219_v26 = vsel %vm1550_vm2, %v2016_v35, 0.0 }
 0x1de   : > { %v1832_v32 = vsel %vm1550_vm2, %v4421_v30, 0.0  ;;  %v2022_v35 = vmul.f32 %v3646_v3, %v3646_v3  ;;  %v2023_v30 = vmul.f32 %v3675_v21, %v3675_v21 }
 0x1df   : > { %v1821_v19 = vadd.f32 %v1820_v5, %v1819_v46  ;;  %v2208_v63 = vadd.f32 %v2207_v13, %v2206_v27  ;;  %v2018_v46 = vmul.f32 %v4422_v8, %v4422_v8  ;;  %v2221_v5 = vsel %vm1550_vm2, %v2017_v40, 0.0 }
 0x1e1   : > { %v1823_v58 = vadd.f32 %v1822_v53, %v1821_v19  ;;  %v2210_v61 = vadd.f32 %v2209_v31, %v2208_v63  ;;  %v4423_v19 = vld [vmem:[#allocation12_spill] sm:$0xff]  ;;  %v2223_v57 = vsel %vm1550_vm2, %v2018_v46, 0.0 }
 0x1e2   : > { %v2019_v63 = vmul.f32 %v4423_v19, %v4423_v19 }
 0x1e3   : > { %v1825_v48 = vadd.f32 %v1824_v59, %v1823_v58  ;;  %v2212_v20 = vadd.f32 %v2211_v18, %v2210_v61  ;;  %v4042_v15 = vpop.f32.mrf.mxu2  ;;  %v4044_v50 = vpop.f32.mrf.mxu3  ;;  %v1836_v58 = vsel %vm1550_vm2, %v4423_v19, 0.0  ;;  %v4424_v61 = vld [vmem:[#allocation14_spill] sm:$0xff] }
 0x1e4   : > { %1645 = vst.msk [vmem:[%s2793_s8 + $0x2f0] sm:$0xff] %vm1550_vm2, %v4042_v15  ;;  %v2020_v18 = vmul.f32 %v4424_v61, %v4424_v61 }
 0x1e5   : > { %v1827_v4 = vadd.f32 %v1826_v22, %v1825_v48  ;;  %v2214_v37 = vadd.f32 %v2213_v24, %v2212_v20  ;;  %1669 = vst.msk [vmem:[%s2793_s8 + $0x3b0] sm:$0xff] %vm1550_vm2, %v4044_v50  ;;  %v2225_v24 = vsel %vm1550_vm2, %v2019_v63, 0.0  ;;  %v1838_v22 = vsel %vm1550_vm2, %v4424_v61, 0.0 }
 0x1e6   : > { %v1848_v63 = vsel %vm1550_vm2, %v3753_v7, 0.0  ;;  %v2027_v61 = vmul.f32 %v3832_v43, %v3832_v43 }
 0x1e7   : > { %v1829_v16 = vadd.f32 %v1828_v51, %v1827_v4  ;;  %v2216_v12 = vadd.f32 %v2215_v1, %v2214_v37  ;;  %v2021_v4 = vmul.f32 %v4425_v11, %v4425_v11  ;;  %v2227_v51 = vsel %vm1550_vm2, %v2020_v18, 0.0 }
 0x1e9   : > { %v2218_v33 = vadd.f32 %v2217_v9, %v2216_v12  ;;  %v1831_v0 = vadd.f32 %v1830_v6, %v1829_v16  ;;  %v2229_v9 = vsel %vm1550_vm2, %v2021_v4, 0.0  ;;  %v1842_v6 = vsel %vm1550_vm2, %v3646_v3, 0.0 }
 0x1ea   : > { %v1846_v3 = vsel %vm1550_vm2, %v3714_v44, 0.0 }
 0x1eb   : > { %v1833_v27 = vadd.f32 %v1832_v32, %v1831_v0  ;;  %v2220_v13 = vadd.f32 %v2219_v26, %v2218_v33  ;;  %v4072_v48 = vpop.f32.mrf.mxu2  ;;  %v4074_v20 = vpop.f32.mrf.mxu3  ;;  %v2231_v0 = vsel %vm1550_vm2, %v2022_v35, 0.0  ;;  %v1844_v26 = vsel %vm1550_vm2, %v3675_v21, 0.0 }
 0x1ec   : > { %1646 = vst.msk [vmem:[%s2793_s8 + $0x2f8] sm:$0xff] %vm1550_vm2, %v4072_v48  ;;  %v2024_v32 = vmul.f32 %v3714_v44, %v3714_v44  ;;  %v1856_v35 = vsel %vm1550_vm2, %v3892_v23, 0.0 }
 0x1ed   : > { %v1835_v31 = vadd.f32 %v1834_v45, %v1833_v27  ;;  %v2222_v53 = vadd.f32 %v2221_v5, %v2220_v13  ;;  %1670 = vst.msk [vmem:[%s2793_s8 + $0x3b8] sm:$0xff] %vm1550_vm2, %v4074_v20  ;;  %v2233_v13 = vsel %vm1550_vm2, %v2023_v30, 0.0  ;;  %v2025_v5 = vmul.f32 %v3753_v7, %v3753_v7 }
 0x1ee   : > { %v2235_v19 = vsel %vm1550_vm2, %v2024_v32, 0.0  ;;  %v1852_v7 = vsel %vm1550_vm2, %v3832_v43, 0.0  ;;  %v2031_v30 = vmul.f32 %v3953_v28, %v3953_v28 }
 0x1ef   : > { %v1837_v59 = vadd.f32 %v1836_v58, %v1835_v31  ;;  %v2224_v47 = vadd.f32 %v2223_v57, %v2222_v53  ;;  %v2026_v31 = vmul.f32 %v3796_v2, %v3796_v2  ;;  %v2237_v44 = vsel %vm1550_vm2, %v2025_v5, 0.0 }
 0x1f0   : > { %v1850_v58 = vsel %vm1550_vm2, %v3796_v2, 0.0  ;;  %v1854_v2 = vsel %vm1550_vm2, %v3862_v62, 0.0 }
 0x1f1   : > { %v1839_v37 = vadd.f32 %v1838_v22, %v1837_v59  ;;  %v2226_v1 = vadd.f32 %v2225_v24, %v2224_v47  ;;  %v2239_v47 = vsel %vm1550_vm2, %v2026_v31, 0.0  ;;  %v2028_v24 = vmul.f32 %v3862_v62, %v3862_v62 }
 0x1f3   : > { %v1841_v16 = vadd.f32 %v1840_v49, %v1839_v37  ;;  %v2228_v12 = vadd.f32 %v2227_v51, %v2226_v1  ;;  %v4102_v27 = vpop.f32.mrf.mxu3  ;;  %v2241_v37 = vsel %vm1550_vm2, %v2027_v61, 0.0  ;;  %v2029_v1 = vmul.f32 %v3892_v23, %v3892_v23 }
 0x1f4   : > { %1671 = vst.msk [vmem:[%s2793_s8 + $0x3c0] sm:$0xff] %vm1550_vm2, %v4102_v27  ;;  %v2243_v49 = vsel %vm1550_vm2, %v2028_v24, 0.0  ;;  %v1860_v23 = vsel %vm1550_vm2, %v3953_v28, 0.0 }
 0x1f5   : > { %v1843_v40 = vadd.f32 %v1842_v6, %v1841_v16  ;;  %v2230_v33 = vadd.f32 %v2229_v9, %v2228_v12  ;;  %v2030_v16 = vmul.f32 %v3922_v39, %v3922_v39  ;;  %v2245_v62 = vsel %vm1550_vm2, %v2029_v1, 0.0 }
 0x1f6   : > { %v1858_v6 = vsel %vm1550_vm2, %v3922_v39, 0.0  ;;  %v1862_v39 = vsel %vm1550_vm2, %v3982_v34, 0.0 }
 0x1f7   : > { %v1845_v8 = vadd.f32 %v1844_v26, %v1843_v40  ;;  %v2232_v46 = vadd.f32 %v2231_v0, %v2230_v33  ;;  %v2247_v0 = vsel %vm1550_vm2, %v2030_v16, 0.0  ;;  %v2032_v26 = vmul.f32 %v3982_v34, %v3982_v34 }
 0x1f9   : > { %v1847_v45 = vadd.f32 %v1846_v3, %v1845_v8  ;;  %v2234_v21 = vadd.f32 %v2233_v13, %v2232_v46  ;;  %v2249_v13 = vsel %vm1550_vm2, %v2031_v30, 0.0  ;;  %v2033_v3 = vmul.f32 %v4012_v10, %v4012_v10 }
 0x1fb   : > { %v1849_v53 = vadd.f32 %v1848_v63, %v1847_v45  ;;  %v2236_v57 = vadd.f32 %v2235_v19, %v2234_v21  ;;  %v4127_v4 = vpop.f32.mrf.mxu3  ;;  %v2251_v45 = vsel %vm1550_vm2, %v2032_v26, 0.0  ;;  %v1864_v21 = vsel %vm1550_vm2, %v4012_v10, 0.0  ;;  %v4426_v10 = vld [vmem:[#allocation2_spill] sm:$0xff] }
 0x1fc   : > { %1672 = vst.msk [vmem:[%s2793_s8 + $0x3c8] sm:$0xff] %vm1550_vm2, %v4127_v4  ;;  %v2034_v19 = vmul.f32 %v4042_v15, %v4042_v15  ;;  %v2035_v63 = vmul.f32 %v4072_v48, %v4072_v48 }
 0x1fd   : > { %v1851_v18 = vadd.f32 %v1850_v58, %v1849_v53  ;;  %v2238_v59 = vadd.f32 %v2237_v44, %v2236_v57  ;;  %v2253_v53 = vsel %vm1550_vm2, %v2033_v3, 0.0  ;;  %v1866_v57 = vsel %vm1550_vm2, %v4042_v15, 0.0 }
 0x1fe   : > { %v1868_v44 = vsel %vm1550_vm2, %v4072_v48, 0.0  ;;  %v1870_v15 = vsel %vm1550_vm2, %v4426_v10, 0.0 }
 0x1ff   : > { %v1853_v22 = vadd.f32 %v1852_v7, %v1851_v18  ;;  %v2240_v11 = vadd.f32 %v2239_v47, %v2238_v59  ;;  %v2036_v18 = vmul.f32 %v4426_v10, %v4426_v10  ;;  %v2255_v59 = vsel %vm1550_vm2, %v2034_v19, 0.0 }
 0x200   : > { %v2257_v47 = vsel %vm1550_vm2, %v2035_v63, 0.0 }
 0x201   : > { %v2242_v51 = vadd.f32 %v2241_v37, %v2240_v11  ;;  %v1855_v43 = vadd.f32 %v1854_v2, %v1853_v22  ;;  %v4427_v11 = vld [vmem:[#allocation3_spill] sm:$0xff] }
 0x202   : > { %v2037_v37 = vmul.f32 %v4427_v11, %v4427_v11  ;;  %v1872_v1 = vsel %vm1550_vm2, %v4427_v11, 0.0 }
 0x203   : > { %v2244_v12 = vadd.f32 %v2243_v49, %v2242_v51  ;;  %v1857_v9 = vadd.f32 %v1856_v35, %v1855_v43  ;;  %v4152_v46 = vpop.f32.mrf.mxu3  ;;  %v4428_v51 = vld [vmem:[#allocation4_spill] sm:$0xff]  ;;  %v2259_v49 = vsel %vm1550_vm2, %v2036_v18, 0.0 }
 0x204   : > { %1673 = vst.msk [vmem:[%s2793_s8 + $0x3d0] sm:$0xff] %vm1550_vm2, %v4152_v46  ;;  %v2038_v43 = vmul.f32 %v4428_v51, %v4428_v51 }
 0x205   : > { %v2246_v40 = vadd.f32 %v2245_v62, %v2244_v12  ;;  %v1859_v33 = vadd.f32 %v1858_v6, %v1857_v9  ;;  %v2261_v12 = vsel %vm1550_vm2, %v2037_v37, 0.0  ;;  %v1874_v9 = vsel %vm1550_vm2, %v4428_v51, 0.0  ;;  %v4429_v62 = vld [vmem:[#allocation5_spill] sm:$0xff] }
 0x206   : > { %v2039_v6 = vmul.f32 %v4429_v62, %v4429_v62  ;;  %v2045_v51 = vmul.f32 %v3612_v55, %v3612_v55 }
 0x207   : > { %v2248_v32 = vadd.f32 %v2247_v0, %v2246_v40  ;;  %v1861_v8 = vadd.f32 %v1860_v23, %v1859_v33  ;;  %v2263_v33 = vsel %vm1550_vm2, %v2038_v43, 0.0  ;;  %v1876_v0 = vsel %vm1550_vm2, %v4429_v62, 0.0  ;;  %v4430_v23 = vld [vmem:[#allocation7_spill] sm:$0xff] }
 0x208   : > { %v2040_v26 = vmul.f32 %v4430_v23, %v4430_v23  ;;  %v1878_v3 = vsel %vm1550_vm2, %v4430_v23, 0.0 }
 0x209   : > { %v2250_v5 = vadd.f32 %v2249_v13, %v2248_v32  ;;  %v1863_v28 = vadd.f32 %v1862_v39, %v1861_v8  ;;  %v2265_v39 = vsel %vm1550_vm2, %v2039_v6, 0.0  ;;  %v2277_v6 = vsel %vm1550_vm2, %v2045_v51, 0.0 }
 0x20a   : > { %v2267_v19 = vsel %vm1550_vm2, %v2040_v26, 0.0  ;;  %v2048_v26 = vmul.f32 %v3716_v17, %v3716_v17  ;;  %v1906_v51 = vsel %vm1550_vm2, %v3924_v52, 0.0 }
 0x20b   : > { %v2252_v34 = vadd.f32 %v2251_v45, %v2250_v5  ;;  %v1865_v31 = vadd.f32 %v1864_v21, %v1863_v28  ;;  %v4178_v22 = vpop.f32.mrf.mxu3  ;;  %v4431_v5 = vld [vmem:[#allocation9_spill] sm:$0xff] }
 0x20c   : > { %1674 = vst.msk [vmem:[%s2793_s8 + $0x3d8] sm:$0xff] %vm1550_vm2, %v4178_v22  ;;  %v2041_v28 = vmul.f32 %v4431_v5, %v4431_v5  ;;  %v1880_v63 = vsel %vm1550_vm2, %v4431_v5, 0.0  ;;  %v2049_v5 = vmul.f32 %v3755_v38, %v3755_v38 }
 0x20d   : > { %v2254_v58 = vadd.f32 %v2253_v53, %v2252_v34  ;;  %v1867_v61 = vadd.f32 %v1866_v57, %v1865_v31  ;;  %v4432_v34 = vld [vmem:[#allocation11_spill] sm:$0xff] }
 0x20e   : > { %v2042_v31 = vmul.f32 %v4432_v34, %v4432_v34 }
 0x20f   : > { %v2256_v7 = vadd.f32 %v2255_v59, %v2254_v58  ;;  %v1869_v24 = vadd.f32 %v1868_v44, %v1867_v61  ;;  %v2269_v44 = vsel %vm1550_vm2, %v2041_v28, 0.0  ;;  %v1882_v58 = vsel %vm1550_vm2, %v4432_v34, 0.0  ;;  %v4433_v61 = vld [vmem:[#allocation13_spill] sm:$0xff] }
 0x210   : > { %v2043_v10 = vmul.f32 %v4433_v61, %v4433_v61 }
 0x211   : > { %v1871_v48 = vadd.f32 %v1870_v15, %v1869_v24  ;;  %v2258_v2 = vadd.f32 %v2257_v47, %v2256_v7  ;;  %v2271_v47 = vsel %vm1550_vm2, %v2042_v31, 0.0  ;;  %v1884_v7 = vsel %vm1550_vm2, %v4433_v61, 0.0  ;;  %v4434_v24 = vld [vmem:[#allocation15_spill] sm:$0xff] }
 0x212   : > { %v2044_v11 = vmul.f32 %v4434_v24, %v4434_v24  ;;  %v1898_v31 = vsel %vm1550_vm2, %v3798_v54, 0.0  ;;  %v2052_v61 = vmul.f32 %v3864_v14, %v3864_v14 }
 0x213   : > { %v1873_v35 = vadd.f32 %v1872_v1, %v1871_v48  ;;  %v2260_v16 = vadd.f32 %v2259_v49, %v2258_v2  ;;  %v4202_v13 = vpop.f32.mrf.mxu3  ;;  %v2273_v2 = vsel %vm1550_vm2, %v2043_v10, 0.0  ;;  %v1886_v1 = vsel %vm1550_vm2, %v4434_v24, 0.0 }
 0x214   : > { %1675 = vst.msk [vmem:[%s2793_s8 + $0x3e0] sm:$0xff] %vm1550_vm2, %v4202_v13 }
 0x215   : > { %v1875_v30 = vadd.f32 %v1874_v9, %v1873_v35  ;;  %v2262_v40 = vadd.f32 %v2261_v12, %v2260_v16  ;;  %v2275_v35 = vsel %vm1550_vm2, %v2044_v11, 0.0  ;;  %v1888_v16 = vsel %vm1550_vm2, %v3612_v55, 0.0 }
 0x216   : > { %v2046_v12 = vmul.f32 %v3648_v41, %v3648_v41  ;;  %v1892_v55 = vsel %vm1550_vm2, %v3677_v42, 0.0  ;;  %v2291_v11 = vsel %vm1550_vm2, %v2052_v61, 0.0 }
 0x217   : > { %v1877_v32 = vadd.f32 %v1876_v0, %v1875_v30  ;;  %v2264_v8 = vadd.f32 %v2263_v33, %v2262_v40  ;;  %v1890_v30 = vsel %vm1550_vm2, %v3648_v41, 0.0  ;;  %v2047_v40 = vmul.f32 %v3677_v42, %v3677_v42 }
 0x218   : > { %v2279_v23 = vsel %vm1550_vm2, %v2046_v12, 0.0  ;;  %v1894_v41 = vsel %vm1550_vm2, %v3716_v17, 0.0  ;;  %v2285_v17 = vsel %vm1550_vm2, %v2049_v5, 0.0  ;;  %v2056_v12 = vmul.f32 %v3984_v60, %v3984_v60 }
 0x219   : > { %v1879_v45 = vadd.f32 %v1878_v3, %v1877_v32  ;;  %v2266_v21 = vadd.f32 %v2265_v39, %v2264_v8  ;;  %v2281_v3 = vsel %vm1550_vm2, %v2047_v40, 0.0 }
 0x21b   : > { %v1881_v53 = vadd.f32 %v1880_v63, %v1879_v45  ;;  %v2268_v57 = vadd.f32 %v2267_v19, %v2266_v21  ;;  %v4227_v48 = vpop.f32.mrf.mxu3  ;;  %v2283_v45 = vsel %vm1550_vm2, %v2048_v26, 0.0  ;;  %v1896_v21 = vsel %vm1550_vm2, %v3755_v38, 0.0 }
 0x21c   : > { %1676 = vst.msk [vmem:[%s2793_s8 + $0x3e8] sm:$0xff] %vm1550_vm2, %v4227_v48  ;;  %v2050_v19 = vmul.f32 %v3798_v54, %v3798_v54  ;;  %v1900_v38 = vsel %vm1550_vm2, %v3834_v25, 0.0  ;;  %v1902_v54 = vsel %vm1550_vm2, %v3864_v14, 0.0 }
 0x21d   : > { %v1883_v18 = vadd.f32 %v1882_v58, %v1881_v53  ;;  %v2270_v59 = vadd.f32 %v2269_v44, %v2268_v57  ;;  %v2051_v53 = vmul.f32 %v3834_v25, %v3834_v25 }
 0x21e   : > { %v2287_v58 = vsel %vm1550_vm2, %v2050_v19, 0.0  ;;  %v2061_v19 = vmul.f32 %v4127_v4, %v4127_v4 }
 0x21f   : > { %v1885_v37 = vadd.f32 %v1884_v7, %v1883_v18  ;;  %v2272_v15 = vadd.f32 %v2271_v47, %v2270_v59  ;;  %v2289_v47 = vsel %vm1550_vm2, %v2051_v53, 0.0  ;;  %v2053_v7 = vmul.f32 %v3894_v36, %v3894_v36 }
 0x221   : > { %v1887_v43 = vadd.f32 %v1886_v1, %v1885_v37  ;;  %v2274_v49 = vadd.f32 %v2273_v2, %v2272_v15  ;;  %v1904_v37 = vsel %vm1550_vm2, %v3894_v36, 0.0  ;;  %v2054_v15 = vmul.f32 %v3924_v52, %v3924_v52 }
 0x222   : > { %v2293_v14 = vsel %vm1550_vm2, %v2053_v7, 0.0  ;;  %v1908_v36 = vsel %vm1550_vm2, %v3955_v29, 0.0  ;;  %v1910_v52 = vsel %vm1550_vm2, %v3984_v60, 0.0  ;;  %v1914_v60 = vsel %vm1550_vm2, %v4044_v50, 0.0 }
 0x223   : > { %v1889_v9 = vadd.f32 %v1888_v16, %v1887_v43  ;;  %v2276_v62 = vadd.f32 %v2275_v35, %v2274_v49  ;;  %v4252_v39 = vpop.f32.mrf.mxu3  ;;  %v2055_v43 = vmul.f32 %v3955_v29, %v3955_v29  ;;  %v2295_v16 = vsel %vm1550_vm2, %v2054_v15, 0.0 }
 0x224   : > { %1677 = vst.msk [vmem:[%s2793_s8 + $0x3f0] sm:$0xff] %vm1550_vm2, %v4252_v39  ;;  %v1912_v29 = vsel %vm1550_vm2, %v4014_v56, 0.0  ;;  %v2066_v15 = vmul.f32 %v4252_v39, %v4252_v39 }
 0x225   : > { %v1891_v33 = vadd.f32 %v1890_v30, %v1889_v9  ;;  %v2278_v0 = vadd.f32 %v2277_v6, %v2276_v62  ;;  %v2297_v6 = vsel %vm1550_vm2, %v2055_v43, 0.0  ;;  %v2057_v30 = vmul.f32 %v4014_v56, %v4014_v56 }
 0x226   : > { %v1916_v56 = vsel %vm1550_vm2, %v4074_v20, 0.0 }
 0x227   : > { %v1893_v32 = vadd.f32 %v1892_v55, %v1891_v33  ;;  %v2280_v8 = vadd.f32 %v2279_v23, %v2278_v0  ;;  %v2299_v0 = vsel %vm1550_vm2, %v2056_v12, 0.0  ;;  %v2058_v23 = vmul.f32 %v4044_v50, %v4044_v50 }
 0x228   : > { %v1918_v50 = vsel %vm1550_vm2, %v4102_v27, 0.0 }
 0x229   : > { %v2282_v28 = vadd.f32 %v2281_v3, %v2280_v8  ;;  %v1895_v42 = vadd.f32 %v1894_v41, %v1893_v32  ;;  %v2301_v32 = vsel %vm1550_vm2, %v2057_v30, 0.0  ;;  %v2059_v8 = vmul.f32 %v4074_v20, %v4074_v20 }
 0x22a   : > { %v2303_v5 = vsel %vm1550_vm2, %v2058_v23, 0.0  ;;  %v1920_v20 = vsel %vm1550_vm2, %v4127_v4, 0.0  ;;  %v1924_v4 = vsel %vm1550_vm2, %v4178_v22, 0.0 }
 0x22b   : > { %v1897_v63 = vadd.f32 %v1896_v21, %v1895_v42  ;;  %v2284_v34 = vadd.f32 %v2283_v45, %v2282_v28  ;;  %v4277_v59 = vpop.f32.mrf.mxu3  ;;  %v2060_v28 = vmul.f32 %v4102_v27, %v4102_v27  ;;  %v2305_v21 = vsel %vm1550_vm2, %v2059_v8, 0.0 }
 0x22c   : > { %1678 = vst.msk [vmem:[%s2793_s8 + $0x3f8] sm:$0xff] %vm1550_vm2, %v4277_v59  ;;  %v1922_v27 = vsel %vm1550_vm2, %v4152_v46, 0.0  ;;  %v1932_v43 = vsel %vm1550_vm2, %v4277_v59, 0.0 }
 0x22d   : > { %v1899_v57 = vadd.f32 %v1898_v31, %v1897_v63  ;;  %v2286_v44 = vadd.f32 %v2285_v17, %v2284_v34  ;;  %v2307_v17 = vsel %vm1550_vm2, %v2060_v28, 0.0  ;;  %v2062_v31 = vmul.f32 %v4152_v46, %v4152_v46 }
 0x22e   : > { %v1926_v46 = vsel %vm1550_vm2, %v4202_v13, 0.0 }
 0x22f   : > { %v1901_v10 = vadd.f32 %v1900_v38, %v1899_v57  ;;  %v2288_v18 = vadd.f32 %v2287_v58, %v2286_v44  ;;  %v2309_v44 = vsel %vm1550_vm2, %v2061_v19, 0.0  ;;  %v2063_v58 = vmul.f32 %v4178_v22, %v4178_v22 }
 0x230   : > { %v1928_v22 = vsel %vm1550_vm2, %v4227_v48, 0.0 }
 0x231   : > { %v1903_v24 = vadd.f32 %v1902_v54, %v1901_v10  ;;  %v2290_v25 = vadd.f32 %v2289_v47, %v2288_v18  ;;  %v2311_v10 = vsel %vm1550_vm2, %v2062_v31, 0.0  ;;  %v2064_v18 = vmul.f32 %v4202_v13, %v4202_v13 }
 0x232   : > { %v2313_v7 = vsel %vm1550_vm2, %v2063_v58, 0.0 }
 0x233   : > { %v1905_v2 = vadd.f32 %v1904_v37, %v1903_v24  ;;  %v2292_v1 = vadd.f32 %v2291_v11, %v2290_v25  ;;  %v2065_v24 = vmul.f32 %v4227_v48, %v4227_v48  ;;  %v2315_v37 = vsel %vm1550_vm2, %v2064_v18, 0.0 }
 0x235   : > { %v1907_v49 = vadd.f32 %v1906_v51, %v1905_v2  ;;  %v2294_v35 = vadd.f32 %v2293_v14, %v2292_v1  ;;  %v2067_v2 = vmul.f32 %v4277_v59, %v4277_v59  ;;  %v2317_v13 = vsel %vm1550_vm2, %v2065_v24, 0.0 }
 0x236   : > { %v1930_v51 = vsel %vm1550_vm2, %v4252_v39, 0.0 }
 0x237   : > { %v1909_v9 = vadd.f32 %v1908_v36, %v1907_v49  ;;  %v2296_v62 = vadd.f32 %v2295_v16, %v2294_v35  ;;  %v2319_v35 = vsel %vm1550_vm2, %v2066_v15, 0.0  ;;  %v2321_v16 = vsel %vm1550_vm2, %v2067_v2, 0.0 }
 0x239   : > { %v1911_v40 = vadd.f32 %v1910_v52, %v1909_v9  ;;  %v2298_v33 = vadd.f32 %v2297_v6, %v2296_v62 }
 0x23b   : > { %v1913_v55 = vadd.f32 %v1912_v29, %v1911_v40  ;;  %v2300_v26 = vadd.f32 %v2299_v0, %v2298_v33 }
 0x23d   : > { %v1915_v3 = vadd.f32 %v1914_v60, %v1913_v55  ;;  %v2302_v41 = vadd.f32 %v2301_v32, %v2300_v26 }
 0x23f   : > { %v1917_v42 = vadd.f32 %v1916_v56, %v1915_v3  ;;  %v2304_v45 = vadd.f32 %v2303_v5, %v2302_v41 }
 0x241   : > { %v2306_v63 = vadd.f32 %v2305_v21, %v2304_v45  ;;  %v1919_v34 = vadd.f32 %v1918_v50, %v1917_v42 }
 0x243   : > { %v2308_v53 = vadd.f32 %v2307_v17, %v2306_v63  ;;  %v1921_v57 = vadd.f32 %v1920_v20, %v1919_v34 }
 0x245   : > { %v2310_v38 = vadd.f32 %v2309_v44, %v2308_v53  ;;  %v1923_v61 = vadd.f32 %v1922_v27, %v1921_v57 }
 0x247   : > { %v2312_v47 = vadd.f32 %v2311_v10, %v2310_v38  ;;  %v1925_v54 = vadd.f32 %v1924_v4, %v1923_v61 }
 0x249   : > { %v2314_v25 = vadd.f32 %v2313_v7, %v2312_v47  ;;  %v1927_v11 = vadd.f32 %v1926_v46, %v1925_v54 }
 0x24b   : > { %v2316_v1 = vadd.f32 %v2315_v37, %v2314_v25  ;;  %v1929_v14 = vadd.f32 %v1928_v22, %v1927_v11 }
 0x24d   : > { %v2318_v49 = vadd.f32 %v2317_v13, %v2316_v1  ;;  %v1931_v48 = vadd.f32 %v1930_v51, %v1929_v14 }
 0x24f   : > { %v2320_v36 = vadd.f32 %v2319_v35, %v2318_v49  ;;  %v1933_v12 = vadd.f32 %v1932_v43, %v1931_v48 }
 0x251   : > { %v1934_v9 = vrot.slane %v1933_v12, 4  ;;  %v2322_v62 = vadd.f32 %v2321_v16, %v2320_v36 }
 0x253   : > { %v1935_v6 = vadd.f32 %v1934_v9, %v1933_v12  ;;  %v2323_v52 = vrot.slane %v2322_v62, 4 }
 0x255   : > { %v1936_v30 = vrot.slane %v1935_v6, 2  ;;  %v2324_v40 = vadd.f32 %v2323_v52, %v2322_v62 }
 0x257   : > { %v1937_v39 = vadd.f32 %v1936_v30, %v1935_v6  ;;  %v2325_v33 = vrot.slane %v2324_v40, 2 }
 0x259   : > { %v1938_v0 = vrot.slane %v1937_v39, 1  ;;  %v2326_v59 = vadd.f32 %v2325_v33, %v2324_v40 }
 0x25b   : > { %v2327_v29 = vrot.slane %v2326_v59, 1  ;;  %v1939_v23 = vadd.f32 %v1938_v0, %v1937_v39 }
 0x25d   : > { %v2328_v55 = vadd.f32 %v2327_v29, %v2326_v59 }
 0x25f   : > { %v2330_v26 = vsel %vm2329_vm3, %v1939_v23, %v2328_v55 }
 0x260   : > { %2332 = vst.msk [vmem:[%s238_s22] sm:$0x3] %vm2331_vm4, %v2330_v26 }
 0x261 PF: > { %s16_s18 = sadd.s32 1, %s2584_s18  }
 0x262   : > { %p13_p5 = scmp.ge.s32.totalorder %s16_s18, 4  }
 0x264   :  { %15 = sbr.rel (!%p13_p5) target bundleno = 1 (0x1), region = 78 }

</bundles_post_ra>
